<compile_context>
chip_gen: v6e
topology: v6e:2x2x1
jax: 0.10.0
libtpu: 0.0.40
codegen_flags: <defaults>
</compile_context>

<pallas_src>
import jax
import jax.numpy as jnp
from jax.experimental import pallas as pl
from jax.experimental.pallas import tpu as pltpu


# ----------------------------------------------------------------------------
# Kernel 1: per-frame features (pointwise conv + SiLU stand-in), global average
#           pool, fused GRU input projection (gi = pooled @ W_ih + b_ih).
# ----------------------------------------------------------------------------
def feature_gi_kernel(x_ref, wft_ref, bft_ref, wih_ref, bih_ref, gi_ref):
    # x_ref:   (TBt, C, HW)  tile of frames, channels-first (C on sublanes)
    # wft_ref: (F, C)        pointwise conv weight, stored transposed
    # bft_ref: (F, 1)        conv bias
    # wih_ref: (F, 3H)       GRU W_ih^T (gate order r, z, n)
    # bih_ref: (1, 3H)       GRU b_ih
    # gi_ref:  (TBt, 3H)     per-frame GRU input-gate pre-activations
    x = x_ref[...]                         # (TBt, C, HW)
    wft = wft_ref[...]                     # (F, C)
    C = x.shape[1]

    # Pointwise conv as C broadcast FMAs on the VPU (avoid K=3 MXU matmul).
    # y[t, f, hw] = sum_c x[t, c, hw] * wft[f, c]
    acc = x[:, 0:1, :] * wft[:, 0:1][None, :, :]          # (TBt, F, HW)
    for c in range(1, C):                                  # static unroll, C tiny
        acc = acc + x[:, c:c + 1, :] * wft[:, c:c + 1][None, :, :]
    acc = acc + bft_ref[...][None, :, :]                   # + bias (1, F, 1)
    acc = acc * jax.nn.sigmoid(acc)                        # SiLU

    # Global average pool: single vectorized reduction over HW for the whole tile.
    pooled = jnp.mean(acc, axis=-1)                        # (TBt, F)

    # Fused GRU input projection (hoisted out of the recurrence) on the MXU.
    gi = jnp.dot(pooled, wih_ref[...],
                 preferred_element_type=jnp.float32) + bih_ref[...]
    gi_ref[...] = gi


def extract_gi_features(frames, w_feat_t, b_feat, w_ih, b_ih):
    # frames: (BT, C, HW) float32, t-major row order  ->  gi: (BT, 3H) float32
    BT, C, HW = frames.shape
    F = w_feat_t.shape[0]
    G3 = w_ih.shape[1]
    # Two parallel tiles (keeps both v7x TensorCores busy) instead of a per-frame grid.
    tile_bt = BT // 2 if (BT % 2 == 0 and BT >= 2) else BT
    grid = (BT // tile_bt,)
    return pl.pallas_call(
        feature_gi_kernel,
        out_shape=jax.ShapeDtypeStruct((BT, G3), jnp.float32),
        grid=grid,
        in_specs=[
            pl.BlockSpec((tile_bt, C, HW), lambda i: (i, 0, 0)),
            pl.BlockSpec((F, C), lambda i: (0, 0)),
            pl.BlockSpec((F, 1), lambda i: (0, 0)),
            pl.BlockSpec((F, G3), lambda i: (0, 0)),
            pl.BlockSpec((1, G3), lambda i: (0, 0)),
        ],
        out_specs=pl.BlockSpec((tile_bt, G3), lambda i: (i, 0)),
        compiler_params=pltpu.CompilerParams(
            dimension_semantics=("parallel",)),
    )(frames, w_feat_t, b_feat, w_ih, b_ih)


# ----------------------------------------------------------------------------
# Kernel 2: GRU recurrence over T (single invocation, fori_loop, hidden state
#           carried in the loop) + final Linear(H, 1) + Sigmoid.
# ----------------------------------------------------------------------------
def gru_fc_kernel(gi_r_ref, gi_z_ref, gi_n_ref, whh_ref, bhh_ref,
                  fcw_ref, fcb_ref, o_ref):
    # gi_*_ref: (T, B, H)   precomputed input-gate pre-activations, one per gate
    # whh_ref:  (H, 3H)     GRU W_hh^T (gate order r, z, n)
    # bhh_ref:  (1, 3H)
    # fcw_ref:  (H, 1), fcb_ref: (1, 1)
    # o_ref:    (B, 1)      final sigmoid output
    T, B, H = gi_r_ref.shape

    # Hoist gate slicing of the recurrent weights/bias out of the time loop.
    whh = whh_ref[...]
    bhh = bhh_ref[...]
    whh_r, whh_z, whh_n = whh[:, 0:H], whh[:, H:2 * H], whh[:, 2 * H:3 * H]
    bhh_r, bhh_z, bhh_n = bhh[:, 0:H], bhh[:, H:2 * H], bhh[:, 2 * H:3 * H]

    def step(t, h):
        gr = gi_r_ref[t]                                    # (B, H)
        gz = gi_z_ref[t]
        gn = gi_n_ref[t]
        hr = jnp.dot(h, whh_r, preferred_element_type=jnp.float32) + bhh_r
        hz = jnp.dot(h, whh_z, preferred_element_type=jnp.float32) + bhh_z
        hn = jnp.dot(h, whh_n, preferred_element_type=jnp.float32) + bhh_n
        r = jax.nn.sigmoid(gr + hr)
        z = jax.nn.sigmoid(gz + hz)
        n = jnp.tanh(gn + r * hn)
        return (1.0 - z) * n + z * h                        # PyTorch GRU update

    h0 = jnp.zeros((B, H), jnp.float32)
    h_last = jax.lax.fori_loop(0, T, step, h0, unroll=True)

    logits = jnp.dot(h_last, fcw_ref[...],
                     preferred_element_type=jnp.float32) + fcb_ref[...]
    # Dropout(0.5) is identity in inference mode.
    o_ref[...] = jax.nn.sigmoid(logits)


def gru_fc_head(gi_r, gi_z, gi_n, w_hh, b_hh, fc_w, fc_b):
    # gi_*: (T, B, H) -> (B, 1)
    T, B, H = gi_r.shape
    return pl.pallas_call(
        gru_fc_kernel,
        out_shape=jax.ShapeDtypeStruct((B, 1), jnp.float32),
        grid=(1,),
        in_specs=[
            pl.BlockSpec((T, B, H), lambda i: (0, 0, 0)),
            pl.BlockSpec((T, B, H), lambda i: (0, 0, 0)),
            pl.BlockSpec((T, B, H), lambda i: (0, 0, 0)),
            pl.BlockSpec((H, 3 * H), lambda i: (0, 0)),
            pl.BlockSpec((1, 3 * H), lambda i: (0, 0)),
            pl.BlockSpec((H, 1), lambda i: (0, 0)),
            pl.BlockSpec((1, 1), lambda i: (0, 0)),
        ],
        out_specs=pl.BlockSpec((B, 1), lambda i: (0, 0)),
        compiler_params=pltpu.CompilerParams(
            dimension_semantics=("arbitrary",)),
    )(gi_r, gi_z, gi_n, w_hh, b_hh, fc_w, fc_b)


# ----------------------------------------------------------------------------
# Full forward (thin JAX glue; hot paths in the two kernels above).
# ----------------------------------------------------------------------------
def combined_model_forward(x, params):
    # x: (B, T, C, H, W) float32 (PyTorch NCHW-per-frame convention)
    B, T, C, Hh, Ww = x.shape
    H = params["w_hh"].shape[0]

    # t-major frame ordering so the recurrent kernel sees contiguous (B, H) rows
    # per timestep; channels stay first (land on the sublane axis in the kernel).
    frames = jnp.transpose(x, (1, 0, 2, 3, 4)).reshape(T * B, C, Hh * Ww)

    # Features + pooled + GRU input projection, all in one parallel kernel.
    gi_flat = extract_gi_features(frames, params["feat_w_t"], params["feat_b"],
                                  params["w_ih"], params["b_ih"])      # (T*B, 3H)

    # Split gates onto a leading dim (tiny XLA reshape) so the sequential kernel
    # never lane-slices gates inside the time loop.
    gi = gi_flat.reshape(T, B, 3, H)
    gi_r, gi_z, gi_n = gi[:, :, 0, :], gi[:, :, 1, :], gi[:, :, 2, :]   # (T, B, H)

    out = gru_fc_head(gi_r, gi_z, gi_n,
                      params["w_hh"], params["b_hh"],
                      params["fc_w"], params["fc_b"])                   # (B, 1)
    return out


def init_params(key, C, F, H):
    ks = jax.random.split(key, 7)

    def u(k, shape, fan_in):
        bound = 1.0 / jnp.sqrt(jnp.float32(fan_in))
        return jax.random.uniform(k, shape, jnp.float32, -bound, bound)

    return {
        "feat_w_t": u(ks[0], (F, C), C),       # pointwise conv weight, stored (F, C)
        "feat_b":   u(ks[1], (F, 1), C),
        "w_ih":     u(ks[2], (F, 3 * H), H),   # W_ih^T, gate order r, z, n
        "b_ih":     u(ks[3], (1, 3 * H), H),
        "w_hh":     u(ks[4], (H, 3 * H), H),   # W_hh^T, gate order r, z, n
        "b_hh":     u(ks[5], (1, 3 * H), H),
        "fc_w":     u(ks[6], (H, 1), H),
        "fc_b":     jnp.zeros((1, 1), jnp.float32),
    }


if __name__ == "__main__":
    # Small shapes consistent with the forward:
    #   batch=2, timesteps=8, C=3, spatial=16x16,
    #   efficientnet_output_size=128, gru_hidden_size=32
    B, T, C, Hh, Ww = 2, 8, 3, 16, 16
    F, GH = 128, 32

    key = jax.random.PRNGKey(0)
    kx, kp = jax.random.split(key)
    x = jax.random.normal(kx, (B, T, C, Hh, Ww), jnp.float32)
    params = init_params(kp, C, F, GH)

    fwd = jax.jit(combined_model_forward)
    out = fwd(x, params)
    out = jax.block_until_ready(out)
    assert out.shape == (B, 1)
    assert bool(jnp.all(jnp.isfinite(out)))
    print("KERNEL_OK")
</pallas_src>

<mosaic_0001>
module attributes {stable_mosaic.version = 11 : i64} {
  func.func @gru_fc_kernel(%arg0: i32, %arg1: memref<8x2x32xf32, #tpu.memory_space<vmem>>, %arg2: memref<8x2x32xf32, #tpu.memory_space<vmem>>, %arg3: memref<8x2x32xf32, #tpu.memory_space<vmem>>, %arg4: memref<32x96xf32, #tpu.memory_space<vmem>>, %arg5: memref<1x96xf32, #tpu.memory_space<vmem>>, %arg6: memref<32x1xf32, #tpu.memory_space<vmem>>, %arg7: memref<1x1xf32, #tpu.memory_space<vmem>>, %arg8: memref<2x1xf32, #tpu.memory_space<vmem>>) attributes {dimension_semantics = [#tpu.dimension_semantics<arbitrary>], iteration_bounds = array<i64: 1>, scalar_prefetch = 0 : i64, scratch_operands = 0 : i64, tpu.core_type = #tpu.core_type<tc>, window_params = [{pipeline_mode = #tpu.pipeline_mode<synchronous>, transform_indices = @transform_0, window_bounds = array<i64: 8, 2, 32>}, {pipeline_mode = #tpu.pipeline_mode<synchronous>, transform_indices = @transform_1, window_bounds = array<i64: 8, 2, 32>}, {pipeline_mode = #tpu.pipeline_mode<synchronous>, transform_indices = @transform_2, window_bounds = array<i64: 8, 2, 32>}, {pipeline_mode = #tpu.pipeline_mode<synchronous>, transform_indices = @transform_3, window_bounds = array<i64: 32, 96>}, {pipeline_mode = #tpu.pipeline_mode<synchronous>, transform_indices = @transform_4, window_bounds = array<i64: 1, 96>}, {pipeline_mode = #tpu.pipeline_mode<synchronous>, transform_indices = @transform_5, window_bounds = array<i64: 32, 1>}, {pipeline_mode = #tpu.pipeline_mode<synchronous>, transform_indices = @transform_6, window_bounds = array<i64: 1, 1>}, {pipeline_mode = #tpu.pipeline_mode<synchronous>, transform_indices = @transform_7, window_bounds = array<i64: 2, 1>}]} {
    %c0 = arith.constant 0 : index
    %c0_0 = arith.constant 0 : index
    %0 = vector.load %arg4[%c0, %c0_0] : memref<32x96xf32, #tpu.memory_space<vmem>>, vector<32x96xf32>
    %c0_1 = arith.constant 0 : index
    %c0_2 = arith.constant 0 : index
    %1 = vector.load %arg5[%c0_1, %c0_2] : memref<1x96xf32, #tpu.memory_space<vmem>>, vector<1x96xf32>
    %2 = vector.extract_strided_slice %0 {offsets = [0, 0], sizes = [32, 32], strides = [1, 1]} : vector<32x96xf32> to vector<32x32xf32>
    %3 = vector.extract_strided_slice %0 {offsets = [0, 32], sizes = [32, 32], strides = [1, 1]} : vector<32x96xf32> to vector<32x32xf32>
    %4 = vector.extract_strided_slice %0 {offsets = [0, 64], sizes = [32, 32], strides = [1, 1]} : vector<32x96xf32> to vector<32x32xf32>
    %5 = vector.extract_strided_slice %1 {offsets = [0, 0], sizes = [1, 32], strides = [1, 1]} : vector<1x96xf32> to vector<1x32xf32>
    %6 = vector.extract_strided_slice %1 {offsets = [0, 32], sizes = [1, 32], strides = [1, 1]} : vector<1x96xf32> to vector<1x32xf32>
    %7 = vector.extract_strided_slice %1 {offsets = [0, 64], sizes = [1, 32], strides = [1, 1]} : vector<1x96xf32> to vector<1x32xf32>
    %cst = arith.constant 0.000000e+00 : f32
    %8 = vector.broadcast %cst : f32 to vector<2x32xf32>
    %c0_i32 = arith.constant 0 : i32
    %9 = arith.index_cast %c0_i32 : i32 to index
    %c0_3 = arith.constant 0 : index
    %c0_4 = arith.constant 0 : index
    %10 = vector.load %arg1[%9, %c0_3, %c0_4] : memref<8x2x32xf32, #tpu.memory_space<vmem>>, vector<1x2x32xf32>
    %11 = vector.shape_cast %10 : vector<1x2x32xf32> to vector<2x32xf32>
    %12 = arith.index_cast %c0_i32 : i32 to index
    %c0_5 = arith.constant 0 : index
    %c0_6 = arith.constant 0 : index
    %13 = vector.load %arg2[%12, %c0_5, %c0_6] : memref<8x2x32xf32, #tpu.memory_space<vmem>>, vector<1x2x32xf32>
    %14 = vector.shape_cast %13 : vector<1x2x32xf32> to vector<2x32xf32>
    %15 = arith.index_cast %c0_i32 : i32 to index
    %c0_7 = arith.constant 0 : index
    %c0_8 = arith.constant 0 : index
    %16 = vector.load %arg3[%15, %c0_7, %c0_8] : memref<8x2x32xf32, #tpu.memory_space<vmem>>, vector<1x2x32xf32>
    %17 = vector.shape_cast %16 : vector<1x2x32xf32> to vector<2x32xf32>
    %cst_9 = arith.constant dense<0.000000e+00> : vector<2x32xf32>
    %18 = tpu.matmul %8, %2, %cst_9 {dimension_numbers = #tpu.dot_dimension_numbers<[1], [0], [0], [1], [0, 0, 1, 1], [], []>} : vector<2x32xf32>, vector<32x32xf32>, vector<2x32xf32> -> vector<2x32xf32>
    %19 = vector.broadcast %5 : vector<1x32xf32> to vector<2x32xf32>
    %20 = arith.addf %18, %19 : vector<2x32xf32>
    %cst_10 = arith.constant dense<0.000000e+00> : vector<2x32xf32>
    %21 = tpu.matmul %8, %3, %cst_10 {dimension_numbers = #tpu.dot_dimension_numbers<[1], [0], [0], [1], [0, 0, 1, 1], [], []>} : vector<2x32xf32>, vector<32x32xf32>, vector<2x32xf32> -> vector<2x32xf32>
    %22 = vector.broadcast %6 : vector<1x32xf32> to vector<2x32xf32>
    %23 = arith.addf %21, %22 : vector<2x32xf32>
    %cst_11 = arith.constant dense<0.000000e+00> : vector<2x32xf32>
    %24 = tpu.matmul %8, %4, %cst_11 {dimension_numbers = #tpu.dot_dimension_numbers<[1], [0], [0], [1], [0, 0, 1, 1], [], []>} : vector<2x32xf32>, vector<32x32xf32>, vector<2x32xf32> -> vector<2x32xf32>
    %25 = vector.broadcast %7 : vector<1x32xf32> to vector<2x32xf32>
    %26 = arith.addf %24, %25 : vector<2x32xf32>
    %27 = arith.addf %11, %20 : vector<2x32xf32>
    %28 = arith.negf %27 : vector<2x32xf32>
    %29 = math.exp %28 : vector<2x32xf32>
    %cst_12 = arith.constant 1.000000e+00 : f32
    %30 = vector.broadcast %cst_12 : f32 to vector<2x32xf32>
    %31 = arith.addf %30, %29 : vector<2x32xf32>
    %32 = arith.divf %30, %31 : vector<2x32xf32>
    %33 = arith.addf %14, %23 : vector<2x32xf32>
    %34 = arith.negf %33 : vector<2x32xf32>
    %35 = math.exp %34 : vector<2x32xf32>
    %cst_13 = arith.constant 1.000000e+00 : f32
    %36 = vector.broadcast %cst_13 : f32 to vector<2x32xf32>
    %37 = arith.addf %36, %35 : vector<2x32xf32>
    %38 = arith.divf %36, %37 : vector<2x32xf32>
    %39 = arith.mulf %32, %26 : vector<2x32xf32>
    %40 = arith.addf %17, %39 : vector<2x32xf32>
    %41 = math.tanh %40 : vector<2x32xf32>
    %cst_14 = arith.constant 1.000000e+00 : f32
    %42 = vector.broadcast %cst_14 : f32 to vector<2x32xf32>
    %43 = arith.subf %42, %38 : vector<2x32xf32>
    %44 = arith.mulf %43, %41 : vector<2x32xf32>
    %45 = arith.mulf %38, %8 : vector<2x32xf32>
    %46 = arith.addf %44, %45 : vector<2x32xf32>
    %c1_i32 = arith.constant 1 : i32
    %47 = arith.index_cast %c1_i32 : i32 to index
    %c0_15 = arith.constant 0 : index
    %c0_16 = arith.constant 0 : index
    %48 = vector.load %arg1[%47, %c0_15, %c0_16] : memref<8x2x32xf32, #tpu.memory_space<vmem>>, vector<1x2x32xf32>
    %49 = vector.shape_cast %48 : vector<1x2x32xf32> to vector<2x32xf32>
    %50 = arith.index_cast %c1_i32 : i32 to index
    %c0_17 = arith.constant 0 : index
    %c0_18 = arith.constant 0 : index
    %51 = vector.load %arg2[%50, %c0_17, %c0_18] : memref<8x2x32xf32, #tpu.memory_space<vmem>>, vector<1x2x32xf32>
    %52 = vector.shape_cast %51 : vector<1x2x32xf32> to vector<2x32xf32>
    %53 = arith.index_cast %c1_i32 : i32 to index
    %c0_19 = arith.constant 0 : index
    %c0_20 = arith.constant 0 : index
    %54 = vector.load %arg3[%53, %c0_19, %c0_20] : memref<8x2x32xf32, #tpu.memory_space<vmem>>, vector<1x2x32xf32>
    %55 = vector.shape_cast %54 : vector<1x2x32xf32> to vector<2x32xf32>
    %cst_21 = arith.constant dense<0.000000e+00> : vector<2x32xf32>
    %56 = tpu.matmul %46, %2, %cst_21 {dimension_numbers = #tpu.dot_dimension_numbers<[1], [0], [0], [1], [0, 0, 1, 1], [], []>} : vector<2x32xf32>, vector<32x32xf32>, vector<2x32xf32> -> vector<2x32xf32>
    %57 = vector.broadcast %5 : vector<1x32xf32> to vector<2x32xf32>
    %58 = arith.addf %56, %57 : vector<2x32xf32>
    %cst_22 = arith.constant dense<0.000000e+00> : vector<2x32xf32>
    %59 = tpu.matmul %46, %3, %cst_22 {dimension_numbers = #tpu.dot_dimension_numbers<[1], [0], [0], [1], [0, 0, 1, 1], [], []>} : vector<2x32xf32>, vector<32x32xf32>, vector<2x32xf32> -> vector<2x32xf32>
    %60 = vector.broadcast %6 : vector<1x32xf32> to vector<2x32xf32>
    %61 = arith.addf %59, %60 : vector<2x32xf32>
    %cst_23 = arith.constant dense<0.000000e+00> : vector<2x32xf32>
    %62 = tpu.matmul %46, %4, %cst_23 {dimension_numbers = #tpu.dot_dimension_numbers<[1], [0], [0], [1], [0, 0, 1, 1], [], []>} : vector<2x32xf32>, vector<32x32xf32>, vector<2x32xf32> -> vector<2x32xf32>
    %63 = vector.broadcast %7 : vector<1x32xf32> to vector<2x32xf32>
    %64 = arith.addf %62, %63 : vector<2x32xf32>
    %65 = arith.addf %49, %58 : vector<2x32xf32>
    %66 = arith.negf %65 : vector<2x32xf32>
    %67 = math.exp %66 : vector<2x32xf32>
    %cst_24 = arith.constant 1.000000e+00 : f32
    %68 = vector.broadcast %cst_24 : f32 to vector<2x32xf32>
    %69 = arith.addf %68, %67 : vector<2x32xf32>
    %70 = arith.divf %68, %69 : vector<2x32xf32>
    %71 = arith.addf %52, %61 : vector<2x32xf32>
    %72 = arith.negf %71 : vector<2x32xf32>
    %73 = math.exp %72 : vector<2x32xf32>
    %cst_25 = arith.constant 1.000000e+00 : f32
    %74 = vector.broadcast %cst_25 : f32 to vector<2x32xf32>
    %75 = arith.addf %74, %73 : vector<2x32xf32>
    %76 = arith.divf %74, %75 : vector<2x32xf32>
    %77 = arith.mulf %70, %64 : vector<2x32xf32>
    %78 = arith.addf %55, %77 : vector<2x32xf32>
    %79 = math.tanh %78 : vector<2x32xf32>
    %cst_26 = arith.constant 1.000000e+00 : f32
    %80 = vector.broadcast %cst_26 : f32 to vector<2x32xf32>
    %81 = arith.subf %80, %76 : vector<2x32xf32>
    %82 = arith.mulf %81, %79 : vector<2x32xf32>
    %83 = arith.mulf %76, %46 : vector<2x32xf32>
    %84 = arith.addf %82, %83 : vector<2x32xf32>
    %c2_i32 = arith.constant 2 : i32
    %85 = arith.index_cast %c2_i32 : i32 to index
    %c0_27 = arith.constant 0 : index
    %c0_28 = arith.constant 0 : index
    %86 = vector.load %arg1[%85, %c0_27, %c0_28] : memref<8x2x32xf32, #tpu.memory_space<vmem>>, vector<1x2x32xf32>
    %87 = vector.shape_cast %86 : vector<1x2x32xf32> to vector<2x32xf32>
    %88 = arith.index_cast %c2_i32 : i32 to index
    %c0_29 = arith.constant 0 : index
    %c0_30 = arith.constant 0 : index
    %89 = vector.load %arg2[%88, %c0_29, %c0_30] : memref<8x2x32xf32, #tpu.memory_space<vmem>>, vector<1x2x32xf32>
    %90 = vector.shape_cast %89 : vector<1x2x32xf32> to vector<2x32xf32>
    %91 = arith.index_cast %c2_i32 : i32 to index
    %c0_31 = arith.constant 0 : index
    %c0_32 = arith.constant 0 : index
    %92 = vector.load %arg3[%91, %c0_31, %c0_32] : memref<8x2x32xf32, #tpu.memory_space<vmem>>, vector<1x2x32xf32>
    %93 = vector.shape_cast %92 : vector<1x2x32xf32> to vector<2x32xf32>
    %cst_33 = arith.constant dense<0.000000e+00> : vector<2x32xf32>
    %94 = tpu.matmul %84, %2, %cst_33 {dimension_numbers = #tpu.dot_dimension_numbers<[1], [0], [0], [1], [0, 0, 1, 1], [], []>} : vector<2x32xf32>, vector<32x32xf32>, vector<2x32xf32> -> vector<2x32xf32>
    %95 = vector.broadcast %5 : vector<1x32xf32> to vector<2x32xf32>
    %96 = arith.addf %94, %95 : vector<2x32xf32>
    %cst_34 = arith.constant dense<0.000000e+00> : vector<2x32xf32>
    %97 = tpu.matmul %84, %3, %cst_34 {dimension_numbers = #tpu.dot_dimension_numbers<[1], [0], [0], [1], [0, 0, 1, 1], [], []>} : vector<2x32xf32>, vector<32x32xf32>, vector<2x32xf32> -> vector<2x32xf32>
    %98 = vector.broadcast %6 : vector<1x32xf32> to vector<2x32xf32>
    %99 = arith.addf %97, %98 : vector<2x32xf32>
    %cst_35 = arith.constant dense<0.000000e+00> : vector<2x32xf32>
    %100 = tpu.matmul %84, %4, %cst_35 {dimension_numbers = #tpu.dot_dimension_numbers<[1], [0], [0], [1], [0, 0, 1, 1], [], []>} : vector<2x32xf32>, vector<32x32xf32>, vector<2x32xf32> -> vector<2x32xf32>
    %101 = vector.broadcast %7 : vector<1x32xf32> to vector<2x32xf32>
    %102 = arith.addf %100, %101 : vector<2x32xf32>
    %103 = arith.addf %87, %96 : vector<2x32xf32>
    %104 = arith.negf %103 : vector<2x32xf32>
    %105 = math.exp %104 : vector<2x32xf32>
    %cst_36 = arith.constant 1.000000e+00 : f32
    %106 = vector.broadcast %cst_36 : f32 to vector<2x32xf32>
    %107 = arith.addf %106, %105 : vector<2x32xf32>
    %108 = arith.divf %106, %107 : vector<2x32xf32>
    %109 = arith.addf %90, %99 : vector<2x32xf32>
    %110 = arith.negf %109 : vector<2x32xf32>
    %111 = math.exp %110 : vector<2x32xf32>
    %cst_37 = arith.constant 1.000000e+00 : f32
    %112 = vector.broadcast %cst_37 : f32 to vector<2x32xf32>
    %113 = arith.addf %112, %111 : vector<2x32xf32>
    %114 = arith.divf %112, %113 : vector<2x32xf32>
    %115 = arith.mulf %108, %102 : vector<2x32xf32>
    %116 = arith.addf %93, %115 : vector<2x32xf32>
    %117 = math.tanh %116 : vector<2x32xf32>
    %cst_38 = arith.constant 1.000000e+00 : f32
    %118 = vector.broadcast %cst_38 : f32 to vector<2x32xf32>
    %119 = arith.subf %118, %114 : vector<2x32xf32>
    %120 = arith.mulf %119, %117 : vector<2x32xf32>
    %121 = arith.mulf %114, %84 : vector<2x32xf32>
    %122 = arith.addf %120, %121 : vector<2x32xf32>
    %c3_i32 = arith.constant 3 : i32
    %123 = arith.index_cast %c3_i32 : i32 to index
    %c0_39 = arith.constant 0 : index
    %c0_40 = arith.constant 0 : index
    %124 = vector.load %arg1[%123, %c0_39, %c0_40] : memref<8x2x32xf32, #tpu.memory_space<vmem>>, vector<1x2x32xf32>
    %125 = vector.shape_cast %124 : vector<1x2x32xf32> to vector<2x32xf32>
    %126 = arith.index_cast %c3_i32 : i32 to index
    %c0_41 = arith.constant 0 : index
    %c0_42 = arith.constant 0 : index
    %127 = vector.load %arg2[%126, %c0_41, %c0_42] : memref<8x2x32xf32, #tpu.memory_space<vmem>>, vector<1x2x32xf32>
    %128 = vector.shape_cast %127 : vector<1x2x32xf32> to vector<2x32xf32>
    %129 = arith.index_cast %c3_i32 : i32 to index
    %c0_43 = arith.constant 0 : index
    %c0_44 = arith.constant 0 : index
    %130 = vector.load %arg3[%129, %c0_43, %c0_44] : memref<8x2x32xf32, #tpu.memory_space<vmem>>, vector<1x2x32xf32>
    %131 = vector.shape_cast %130 : vector<1x2x32xf32> to vector<2x32xf32>
    %cst_45 = arith.constant dense<0.000000e+00> : vector<2x32xf32>
    %132 = tpu.matmul %122, %2, %cst_45 {dimension_numbers = #tpu.dot_dimension_numbers<[1], [0], [0], [1], [0, 0, 1, 1], [], []>} : vector<2x32xf32>, vector<32x32xf32>, vector<2x32xf32> -> vector<2x32xf32>
    %133 = vector.broadcast %5 : vector<1x32xf32> to vector<2x32xf32>
    %134 = arith.addf %132, %133 : vector<2x32xf32>
    %cst_46 = arith.constant dense<0.000000e+00> : vector<2x32xf32>
    %135 = tpu.matmul %122, %3, %cst_46 {dimension_numbers = #tpu.dot_dimension_numbers<[1], [0], [0], [1], [0, 0, 1, 1], [], []>} : vector<2x32xf32>, vector<32x32xf32>, vector<2x32xf32> -> vector<2x32xf32>
    %136 = vector.broadcast %6 : vector<1x32xf32> to vector<2x32xf32>
    %137 = arith.addf %135, %136 : vector<2x32xf32>
    %cst_47 = arith.constant dense<0.000000e+00> : vector<2x32xf32>
    %138 = tpu.matmul %122, %4, %cst_47 {dimension_numbers = #tpu.dot_dimension_numbers<[1], [0], [0], [1], [0, 0, 1, 1], [], []>} : vector<2x32xf32>, vector<32x32xf32>, vector<2x32xf32> -> vector<2x32xf32>
    %139 = vector.broadcast %7 : vector<1x32xf32> to vector<2x32xf32>
    %140 = arith.addf %138, %139 : vector<2x32xf32>
    %141 = arith.addf %125, %134 : vector<2x32xf32>
    %142 = arith.negf %141 : vector<2x32xf32>
    %143 = math.exp %142 : vector<2x32xf32>
    %cst_48 = arith.constant 1.000000e+00 : f32
    %144 = vector.broadcast %cst_48 : f32 to vector<2x32xf32>
    %145 = arith.addf %144, %143 : vector<2x32xf32>
    %146 = arith.divf %144, %145 : vector<2x32xf32>
    %147 = arith.addf %128, %137 : vector<2x32xf32>
    %148 = arith.negf %147 : vector<2x32xf32>
    %149 = math.exp %148 : vector<2x32xf32>
    %cst_49 = arith.constant 1.000000e+00 : f32
    %150 = vector.broadcast %cst_49 : f32 to vector<2x32xf32>
    %151 = arith.addf %150, %149 : vector<2x32xf32>
    %152 = arith.divf %150, %151 : vector<2x32xf32>
    %153 = arith.mulf %146, %140 : vector<2x32xf32>
    %154 = arith.addf %131, %153 : vector<2x32xf32>
    %155 = math.tanh %154 : vector<2x32xf32>
    %cst_50 = arith.constant 1.000000e+00 : f32
    %156 = vector.broadcast %cst_50 : f32 to vector<2x32xf32>
    %157 = arith.subf %156, %152 : vector<2x32xf32>
    %158 = arith.mulf %157, %155 : vector<2x32xf32>
    %159 = arith.mulf %152, %122 : vector<2x32xf32>
    %160 = arith.addf %158, %159 : vector<2x32xf32>
    %c4_i32 = arith.constant 4 : i32
    %161 = arith.index_cast %c4_i32 : i32 to index
    %c0_51 = arith.constant 0 : index
    %c0_52 = arith.constant 0 : index
    %162 = vector.load %arg1[%161, %c0_51, %c0_52] : memref<8x2x32xf32, #tpu.memory_space<vmem>>, vector<1x2x32xf32>
    %163 = vector.shape_cast %162 : vector<1x2x32xf32> to vector<2x32xf32>
    %164 = arith.index_cast %c4_i32 : i32 to index
    %c0_53 = arith.constant 0 : index
    %c0_54 = arith.constant 0 : index
    %165 = vector.load %arg2[%164, %c0_53, %c0_54] : memref<8x2x32xf32, #tpu.memory_space<vmem>>, vector<1x2x32xf32>
    %166 = vector.shape_cast %165 : vector<1x2x32xf32> to vector<2x32xf32>
    %167 = arith.index_cast %c4_i32 : i32 to index
    %c0_55 = arith.constant 0 : index
    %c0_56 = arith.constant 0 : index
    %168 = vector.load %arg3[%167, %c0_55, %c0_56] : memref<8x2x32xf32, #tpu.memory_space<vmem>>, vector<1x2x32xf32>
    %169 = vector.shape_cast %168 : vector<1x2x32xf32> to vector<2x32xf32>
    %cst_57 = arith.constant dense<0.000000e+00> : vector<2x32xf32>
    %170 = tpu.matmul %160, %2, %cst_57 {dimension_numbers = #tpu.dot_dimension_numbers<[1], [0], [0], [1], [0, 0, 1, 1], [], []>} : vector<2x32xf32>, vector<32x32xf32>, vector<2x32xf32> -> vector<2x32xf32>
    %171 = vector.broadcast %5 : vector<1x32xf32> to vector<2x32xf32>
    %172 = arith.addf %170, %171 : vector<2x32xf32>
    %cst_58 = arith.constant dense<0.000000e+00> : vector<2x32xf32>
    %173 = tpu.matmul %160, %3, %cst_58 {dimension_numbers = #tpu.dot_dimension_numbers<[1], [0], [0], [1], [0, 0, 1, 1], [], []>} : vector<2x32xf32>, vector<32x32xf32>, vector<2x32xf32> -> vector<2x32xf32>
    %174 = vector.broadcast %6 : vector<1x32xf32> to vector<2x32xf32>
    %175 = arith.addf %173, %174 : vector<2x32xf32>
    %cst_59 = arith.constant dense<0.000000e+00> : vector<2x32xf32>
    %176 = tpu.matmul %160, %4, %cst_59 {dimension_numbers = #tpu.dot_dimension_numbers<[1], [0], [0], [1], [0, 0, 1, 1], [], []>} : vector<2x32xf32>, vector<32x32xf32>, vector<2x32xf32> -> vector<2x32xf32>
    %177 = vector.broadcast %7 : vector<1x32xf32> to vector<2x32xf32>
    %178 = arith.addf %176, %177 : vector<2x32xf32>
    %179 = arith.addf %163, %172 : vector<2x32xf32>
    %180 = arith.negf %179 : vector<2x32xf32>
    %181 = math.exp %180 : vector<2x32xf32>
    %cst_60 = arith.constant 1.000000e+00 : f32
    %182 = vector.broadcast %cst_60 : f32 to vector<2x32xf32>
    %183 = arith.addf %182, %181 : vector<2x32xf32>
    %184 = arith.divf %182, %183 : vector<2x32xf32>
    %185 = arith.addf %166, %175 : vector<2x32xf32>
    %186 = arith.negf %185 : vector<2x32xf32>
    %187 = math.exp %186 : vector<2x32xf32>
    %cst_61 = arith.constant 1.000000e+00 : f32
    %188 = vector.broadcast %cst_61 : f32 to vector<2x32xf32>
    %189 = arith.addf %188, %187 : vector<2x32xf32>
    %190 = arith.divf %188, %189 : vector<2x32xf32>
    %191 = arith.mulf %184, %178 : vector<2x32xf32>
    %192 = arith.addf %169, %191 : vector<2x32xf32>
    %193 = math.tanh %192 : vector<2x32xf32>
    %cst_62 = arith.constant 1.000000e+00 : f32
    %194 = vector.broadcast %cst_62 : f32 to vector<2x32xf32>
    %195 = arith.subf %194, %190 : vector<2x32xf32>
    %196 = arith.mulf %195, %193 : vector<2x32xf32>
    %197 = arith.mulf %190, %160 : vector<2x32xf32>
    %198 = arith.addf %196, %197 : vector<2x32xf32>
    %c5_i32 = arith.constant 5 : i32
    %199 = arith.index_cast %c5_i32 : i32 to index
    %c0_63 = arith.constant 0 : index
    %c0_64 = arith.constant 0 : index
    %200 = vector.load %arg1[%199, %c0_63, %c0_64] : memref<8x2x32xf32, #tpu.memory_space<vmem>>, vector<1x2x32xf32>
    %201 = vector.shape_cast %200 : vector<1x2x32xf32> to vector<2x32xf32>
    %202 = arith.index_cast %c5_i32 : i32 to index
    %c0_65 = arith.constant 0 : index
    %c0_66 = arith.constant 0 : index
    %203 = vector.load %arg2[%202, %c0_65, %c0_66] : memref<8x2x32xf32, #tpu.memory_space<vmem>>, vector<1x2x32xf32>
    %204 = vector.shape_cast %203 : vector<1x2x32xf32> to vector<2x32xf32>
    %205 = arith.index_cast %c5_i32 : i32 to index
    %c0_67 = arith.constant 0 : index
    %c0_68 = arith.constant 0 : index
    %206 = vector.load %arg3[%205, %c0_67, %c0_68] : memref<8x2x32xf32, #tpu.memory_space<vmem>>, vector<1x2x32xf32>
    %207 = vector.shape_cast %206 : vector<1x2x32xf32> to vector<2x32xf32>
    %cst_69 = arith.constant dense<0.000000e+00> : vector<2x32xf32>
    %208 = tpu.matmul %198, %2, %cst_69 {dimension_numbers = #tpu.dot_dimension_numbers<[1], [0], [0], [1], [0, 0, 1, 1], [], []>} : vector<2x32xf32>, vector<32x32xf32>, vector<2x32xf32> -> vector<2x32xf32>
    %209 = vector.broadcast %5 : vector<1x32xf32> to vector<2x32xf32>
    %210 = arith.addf %208, %209 : vector<2x32xf32>
    %cst_70 = arith.constant dense<0.000000e+00> : vector<2x32xf32>
    %211 = tpu.matmul %198, %3, %cst_70 {dimension_numbers = #tpu.dot_dimension_numbers<[1], [0], [0], [1], [0, 0, 1, 1], [], []>} : vector<2x32xf32>, vector<32x32xf32>, vector<2x32xf32> -> vector<2x32xf32>
    %212 = vector.broadcast %6 : vector<1x32xf32> to vector<2x32xf32>
    %213 = arith.addf %211, %212 : vector<2x32xf32>
    %cst_71 = arith.constant dense<0.000000e+00> : vector<2x32xf32>
    %214 = tpu.matmul %198, %4, %cst_71 {dimension_numbers = #tpu.dot_dimension_numbers<[1], [0], [0], [1], [0, 0, 1, 1], [], []>} : vector<2x32xf32>, vector<32x32xf32>, vector<2x32xf32> -> vector<2x32xf32>
    %215 = vector.broadcast %7 : vector<1x32xf32> to vector<2x32xf32>
    %216 = arith.addf %214, %215 : vector<2x32xf32>
    %217 = arith.addf %201, %210 : vector<2x32xf32>
    %218 = arith.negf %217 : vector<2x32xf32>
    %219 = math.exp %218 : vector<2x32xf32>
    %cst_72 = arith.constant 1.000000e+00 : f32
    %220 = vector.broadcast %cst_72 : f32 to vector<2x32xf32>
    %221 = arith.addf %220, %219 : vector<2x32xf32>
    %222 = arith.divf %220, %221 : vector<2x32xf32>
    %223 = arith.addf %204, %213 : vector<2x32xf32>
    %224 = arith.negf %223 : vector<2x32xf32>
    %225 = math.exp %224 : vector<2x32xf32>
    %cst_73 = arith.constant 1.000000e+00 : f32
    %226 = vector.broadcast %cst_73 : f32 to vector<2x32xf32>
    %227 = arith.addf %226, %225 : vector<2x32xf32>
    %228 = arith.divf %226, %227 : vector<2x32xf32>
    %229 = arith.mulf %222, %216 : vector<2x32xf32>
    %230 = arith.addf %207, %229 : vector<2x32xf32>
    %231 = math.tanh %230 : vector<2x32xf32>
    %cst_74 = arith.constant 1.000000e+00 : f32
    %232 = vector.broadcast %cst_74 : f32 to vector<2x32xf32>
    %233 = arith.subf %232, %228 : vector<2x32xf32>
    %234 = arith.mulf %233, %231 : vector<2x32xf32>
    %235 = arith.mulf %228, %198 : vector<2x32xf32>
    %236 = arith.addf %234, %235 : vector<2x32xf32>
    %c6_i32 = arith.constant 6 : i32
    %237 = arith.index_cast %c6_i32 : i32 to index
    %c0_75 = arith.constant 0 : index
    %c0_76 = arith.constant 0 : index
    %238 = vector.load %arg1[%237, %c0_75, %c0_76] : memref<8x2x32xf32, #tpu.memory_space<vmem>>, vector<1x2x32xf32>
    %239 = vector.shape_cast %238 : vector<1x2x32xf32> to vector<2x32xf32>
    %240 = arith.index_cast %c6_i32 : i32 to index
    %c0_77 = arith.constant 0 : index
    %c0_78 = arith.constant 0 : index
    %241 = vector.load %arg2[%240, %c0_77, %c0_78] : memref<8x2x32xf32, #tpu.memory_space<vmem>>, vector<1x2x32xf32>
    %242 = vector.shape_cast %241 : vector<1x2x32xf32> to vector<2x32xf32>
    %243 = arith.index_cast %c6_i32 : i32 to index
    %c0_79 = arith.constant 0 : index
    %c0_80 = arith.constant 0 : index
    %244 = vector.load %arg3[%243, %c0_79, %c0_80] : memref<8x2x32xf32, #tpu.memory_space<vmem>>, vector<1x2x32xf32>
    %245 = vector.shape_cast %244 : vector<1x2x32xf32> to vector<2x32xf32>
    %cst_81 = arith.constant dense<0.000000e+00> : vector<2x32xf32>
    %246 = tpu.matmul %236, %2, %cst_81 {dimension_numbers = #tpu.dot_dimension_numbers<[1], [0], [0], [1], [0, 0, 1, 1], [], []>} : vector<2x32xf32>, vector<32x32xf32>, vector<2x32xf32> -> vector<2x32xf32>
    %247 = vector.broadcast %5 : vector<1x32xf32> to vector<2x32xf32>
    %248 = arith.addf %246, %247 : vector<2x32xf32>
    %cst_82 = arith.constant dense<0.000000e+00> : vector<2x32xf32>
    %249 = tpu.matmul %236, %3, %cst_82 {dimension_numbers = #tpu.dot_dimension_numbers<[1], [0], [0], [1], [0, 0, 1, 1], [], []>} : vector<2x32xf32>, vector<32x32xf32>, vector<2x32xf32> -> vector<2x32xf32>
    %250 = vector.broadcast %6 : vector<1x32xf32> to vector<2x32xf32>
    %251 = arith.addf %249, %250 : vector<2x32xf32>
    %cst_83 = arith.constant dense<0.000000e+00> : vector<2x32xf32>
    %252 = tpu.matmul %236, %4, %cst_83 {dimension_numbers = #tpu.dot_dimension_numbers<[1], [0], [0], [1], [0, 0, 1, 1], [], []>} : vector<2x32xf32>, vector<32x32xf32>, vector<2x32xf32> -> vector<2x32xf32>
    %253 = vector.broadcast %7 : vector<1x32xf32> to vector<2x32xf32>
    %254 = arith.addf %252, %253 : vector<2x32xf32>
    %255 = arith.addf %239, %248 : vector<2x32xf32>
    %256 = arith.negf %255 : vector<2x32xf32>
    %257 = math.exp %256 : vector<2x32xf32>
    %cst_84 = arith.constant 1.000000e+00 : f32
    %258 = vector.broadcast %cst_84 : f32 to vector<2x32xf32>
    %259 = arith.addf %258, %257 : vector<2x32xf32>
    %260 = arith.divf %258, %259 : vector<2x32xf32>
    %261 = arith.addf %242, %251 : vector<2x32xf32>
    %262 = arith.negf %261 : vector<2x32xf32>
    %263 = math.exp %262 : vector<2x32xf32>
    %cst_85 = arith.constant 1.000000e+00 : f32
    %264 = vector.broadcast %cst_85 : f32 to vector<2x32xf32>
    %265 = arith.addf %264, %263 : vector<2x32xf32>
    %266 = arith.divf %264, %265 : vector<2x32xf32>
    %267 = arith.mulf %260, %254 : vector<2x32xf32>
    %268 = arith.addf %245, %267 : vector<2x32xf32>
    %269 = math.tanh %268 : vector<2x32xf32>
    %cst_86 = arith.constant 1.000000e+00 : f32
    %270 = vector.broadcast %cst_86 : f32 to vector<2x32xf32>
    %271 = arith.subf %270, %266 : vector<2x32xf32>
    %272 = arith.mulf %271, %269 : vector<2x32xf32>
    %273 = arith.mulf %266, %236 : vector<2x32xf32>
    %274 = arith.addf %272, %273 : vector<2x32xf32>
    %c7_i32 = arith.constant 7 : i32
    %275 = arith.index_cast %c7_i32 : i32 to index
    %c0_87 = arith.constant 0 : index
    %c0_88 = arith.constant 0 : index
    %276 = vector.load %arg1[%275, %c0_87, %c0_88] : memref<8x2x32xf32, #tpu.memory_space<vmem>>, vector<1x2x32xf32>
    %277 = vector.shape_cast %276 : vector<1x2x32xf32> to vector<2x32xf32>
    %278 = arith.index_cast %c7_i32 : i32 to index
    %c0_89 = arith.constant 0 : index
    %c0_90 = arith.constant 0 : index
    %279 = vector.load %arg2[%278, %c0_89, %c0_90] : memref<8x2x32xf32, #tpu.memory_space<vmem>>, vector<1x2x32xf32>
    %280 = vector.shape_cast %279 : vector<1x2x32xf32> to vector<2x32xf32>
    %281 = arith.index_cast %c7_i32 : i32 to index
    %c0_91 = arith.constant 0 : index
    %c0_92 = arith.constant 0 : index
    %282 = vector.load %arg3[%281, %c0_91, %c0_92] : memref<8x2x32xf32, #tpu.memory_space<vmem>>, vector<1x2x32xf32>
    %283 = vector.shape_cast %282 : vector<1x2x32xf32> to vector<2x32xf32>
    %cst_93 = arith.constant dense<0.000000e+00> : vector<2x32xf32>
    %284 = tpu.matmul %274, %2, %cst_93 {dimension_numbers = #tpu.dot_dimension_numbers<[1], [0], [0], [1], [0, 0, 1, 1], [], []>} : vector<2x32xf32>, vector<32x32xf32>, vector<2x32xf32> -> vector<2x32xf32>
    %285 = vector.broadcast %5 : vector<1x32xf32> to vector<2x32xf32>
    %286 = arith.addf %284, %285 : vector<2x32xf32>
    %cst_94 = arith.constant dense<0.000000e+00> : vector<2x32xf32>
    %287 = tpu.matmul %274, %3, %cst_94 {dimension_numbers = #tpu.dot_dimension_numbers<[1], [0], [0], [1], [0, 0, 1, 1], [], []>} : vector<2x32xf32>, vector<32x32xf32>, vector<2x32xf32> -> vector<2x32xf32>
    %288 = vector.broadcast %6 : vector<1x32xf32> to vector<2x32xf32>
    %289 = arith.addf %287, %288 : vector<2x32xf32>
    %cst_95 = arith.constant dense<0.000000e+00> : vector<2x32xf32>
    %290 = tpu.matmul %274, %4, %cst_95 {dimension_numbers = #tpu.dot_dimension_numbers<[1], [0], [0], [1], [0, 0, 1, 1], [], []>} : vector<2x32xf32>, vector<32x32xf32>, vector<2x32xf32> -> vector<2x32xf32>
    %291 = vector.broadcast %7 : vector<1x32xf32> to vector<2x32xf32>
    %292 = arith.addf %290, %291 : vector<2x32xf32>
    %293 = arith.addf %277, %286 : vector<2x32xf32>
    %294 = arith.negf %293 : vector<2x32xf32>
    %295 = math.exp %294 : vector<2x32xf32>
    %cst_96 = arith.constant 1.000000e+00 : f32
    %296 = vector.broadcast %cst_96 : f32 to vector<2x32xf32>
    %297 = arith.addf %296, %295 : vector<2x32xf32>
    %298 = arith.divf %296, %297 : vector<2x32xf32>
    %299 = arith.addf %280, %289 : vector<2x32xf32>
    %300 = arith.negf %299 : vector<2x32xf32>
    %301 = math.exp %300 : vector<2x32xf32>
    %cst_97 = arith.constant 1.000000e+00 : f32
    %302 = vector.broadcast %cst_97 : f32 to vector<2x32xf32>
    %303 = arith.addf %302, %301 : vector<2x32xf32>
    %304 = arith.divf %302, %303 : vector<2x32xf32>
    %305 = arith.mulf %298, %292 : vector<2x32xf32>
    %306 = arith.addf %283, %305 : vector<2x32xf32>
    %307 = math.tanh %306 : vector<2x32xf32>
    %cst_98 = arith.constant 1.000000e+00 : f32
    %308 = vector.broadcast %cst_98 : f32 to vector<2x32xf32>
    %309 = arith.subf %308, %304 : vector<2x32xf32>
    %310 = arith.mulf %309, %307 : vector<2x32xf32>
    %311 = arith.mulf %304, %274 : vector<2x32xf32>
    %312 = arith.addf %310, %311 : vector<2x32xf32>
    %c8_i32 = arith.constant 8 : i32
    %c0_99 = arith.constant 0 : index
    %c0_100 = arith.constant 0 : index
    %313 = vector.load %arg6[%c0_99, %c0_100] : memref<32x1xf32, #tpu.memory_space<vmem>>, vector<32x1xf32>
    %cst_101 = arith.constant dense<0.000000e+00> : vector<2x1xf32>
    %314 = tpu.matmul %312, %313, %cst_101 {dimension_numbers = #tpu.dot_dimension_numbers<[1], [0], [0], [1], [0, 0, 1, 1], [], []>} : vector<2x32xf32>, vector<32x1xf32>, vector<2x1xf32> -> vector<2x1xf32>
    %c0_102 = arith.constant 0 : index
    %c0_103 = arith.constant 0 : index
    %315 = vector.load %arg7[%c0_102, %c0_103] : memref<1x1xf32, #tpu.memory_space<vmem>>, vector<1x1xf32>
    %316 = vector.broadcast %315 : vector<1x1xf32> to vector<2x1xf32>
    %317 = arith.addf %314, %316 : vector<2x1xf32>
    %318 = arith.negf %317 : vector<2x1xf32>
    %319 = math.exp %318 : vector<2x1xf32>
    %cst_104 = arith.constant 1.000000e+00 : f32
    %320 = vector.broadcast %cst_104 : f32 to vector<2x1xf32>
    %321 = arith.addf %320, %319 : vector<2x1xf32>
    %322 = arith.divf %320, %321 : vector<2x1xf32>
    %c0_105 = arith.constant 0 : index
    %c0_106 = arith.constant 0 : index
    %323 = vector.load %arg8[%c0_105, %c0_106] : memref<2x1xf32, #tpu.memory_space<vmem>>, vector<2x1xf32>
    tpu.vector_store %arg8[%c0_105, %c0_106], %322 {strides = array<i32>} : memref<2x1xf32, #tpu.memory_space<vmem>>, vector<2x1xf32>,
    return
  }
  func.func @transform_0(%arg0: i32) -> (i32, i32, i32) {
    %c0_i32 = arith.constant 0 : i32
    %c0_i32_0 = arith.constant 0 : i32
    %c0_i32_1 = arith.constant 0 : i32
    %c0_i32_2 = arith.constant 0 : i32
    return %c0_i32, %c0_i32_0, %c0_i32_1 : i32, i32, i32
  }
  func.func @transform_1(%arg0: i32) -> (i32, i32, i32) {
    %c0_i32 = arith.constant 0 : i32
    %c0_i32_0 = arith.constant 0 : i32
    %c0_i32_1 = arith.constant 0 : i32
    %c0_i32_2 = arith.constant 0 : i32
    return %c0_i32, %c0_i32_0, %c0_i32_1 : i32, i32, i32
  }
  func.func @transform_2(%arg0: i32) -> (i32, i32, i32) {
    %c0_i32 = arith.constant 0 : i32
    %c0_i32_0 = arith.constant 0 : i32
    %c0_i32_1 = arith.constant 0 : i32
    %c0_i32_2 = arith.constant 0 : i32
    return %c0_i32, %c0_i32_0, %c0_i32_1 : i32, i32, i32
  }
  func.func @transform_3(%arg0: i32) -> (i32, i32) {
    %c0_i32 = arith.constant 0 : i32
    %c0_i32_0 = arith.constant 0 : i32
    %c0_i32_1 = arith.constant 0 : i32
    return %c0_i32, %c0_i32_0 : i32, i32
  }
  func.func @transform_4(%arg0: i32) -> (i32, i32) {
    %c0_i32 = arith.constant 0 : i32
    %c0_i32_0 = arith.constant 0 : i32
    %c0_i32_1 = arith.constant 0 : i32
    return %c0_i32, %c0_i32_0 : i32, i32
  }
  func.func @transform_5(%arg0: i32) -> (i32, i32) {
    %c0_i32 = arith.constant 0 : i32
    %c0_i32_0 = arith.constant 0 : i32
    %c0_i32_1 = arith.constant 0 : i32
    return %c0_i32, %c0_i32_0 : i32, i32
  }
  func.func @transform_6(%arg0: i32) -> (i32, i32) {
    %c0_i32 = arith.constant 0 : i32
    %c0_i32_0 = arith.constant 0 : i32
    %c0_i32_1 = arith.constant 0 : i32
    return %c0_i32, %c0_i32_0 : i32, i32
  }
  func.func @transform_7(%arg0: i32) -> (i32, i32) {
    %c0_i32 = arith.constant 0 : i32
    %c0_i32_0 = arith.constant 0 : i32
    %c0_i32_1 = arith.constant 0 : i32
    return %c0_i32, %c0_i32_0 : i32, i32
  }
}

module attributes {stable_mosaic.version = 11 : i64} {
  func.func @feature_gi_kernel(%arg0: i32, %arg1: memref<8x3x256xf32, #tpu.memory_space<vmem>>, %arg2: memref<128x3xf32, #tpu.memory_space<vmem>>, %arg3: memref<128x1xf32, #tpu.memory_space<vmem>>, %arg4: memref<128x96xf32, #tpu.memory_space<vmem>>, %arg5: memref<1x96xf32, #tpu.memory_space<vmem>>, %arg6: memref<8x96xf32, #tpu.memory_space<vmem>>) attributes {dimension_semantics = [#tpu.dimension_semantics<parallel>], iteration_bounds = array<i64: 2>, scalar_prefetch = 0 : i64, scratch_operands = 0 : i64, tpu.core_type = #tpu.core_type<tc>, window_params = [{transform_indices = @transform_0, window_bounds = array<i64: 8, 3, 256>}, {pipeline_mode = #tpu.pipeline_mode<synchronous>, transform_indices = @transform_1, window_bounds = array<i64: 128, 3>}, {pipeline_mode = #tpu.pipeline_mode<synchronous>, transform_indices = @transform_2, window_bounds = array<i64: 128, 1>}, {pipeline_mode = #tpu.pipeline_mode<synchronous>, transform_indices = @transform_3, window_bounds = array<i64: 128, 96>}, {pipeline_mode = #tpu.pipeline_mode<synchronous>, transform_indices = @transform_4, window_bounds = array<i64: 1, 96>}, {transform_indices = @transform_5, window_bounds = array<i64: 8, 96>}]} {
    %c0 = arith.constant 0 : index
    %c0_0 = arith.constant 0 : index
    %c0_1 = arith.constant 0 : index
    %0 = vector.load %arg1[%c0, %c0_0, %c0_1] : memref<8x3x256xf32, #tpu.memory_space<vmem>>, vector<8x3x256xf32>
    %c0_2 = arith.constant 0 : index
    %c0_3 = arith.constant 0 : index
    %1 = vector.load %arg2[%c0_2, %c0_3] : memref<128x3xf32, #tpu.memory_space<vmem>>, vector<128x3xf32>
    %2 = vector.extract_strided_slice %0 {offsets = [0, 0, 0], sizes = [8, 1, 256], strides = [1, 1, 1]} : vector<8x3x256xf32> to vector<8x1x256xf32>
    %3 = vector.extract_strided_slice %1 {offsets = [0, 0], sizes = [128, 1], strides = [1, 1]} : vector<128x3xf32> to vector<128x1xf32>
    %4 = vector.shape_cast %3 : vector<128x1xf32> to vector<1x128x1xf32>
    %5 = vector.broadcast %2 : vector<8x1x256xf32> to vector<8x128x256xf32>
    %6 = vector.broadcast %4 : vector<1x128x1xf32> to vector<8x128x256xf32>
    %7 = arith.mulf %5, %6 : vector<8x128x256xf32>
    %8 = vector.extract_strided_slice %0 {offsets = [0, 1, 0], sizes = [8, 1, 256], strides = [1, 1, 1]} : vector<8x3x256xf32> to vector<8x1x256xf32>
    %9 = vector.extract_strided_slice %1 {offsets = [0, 1], sizes = [128, 1], strides = [1, 1]} : vector<128x3xf32> to vector<128x1xf32>
    %10 = vector.shape_cast %9 : vector<128x1xf32> to vector<1x128x1xf32>
    %11 = vector.broadcast %8 : vector<8x1x256xf32> to vector<8x128x256xf32>
    %12 = vector.broadcast %10 : vector<1x128x1xf32> to vector<8x128x256xf32>
    %13 = arith.mulf %11, %12 : vector<8x128x256xf32>
    %14 = arith.addf %7, %13 : vector<8x128x256xf32>
    %15 = vector.extract_strided_slice %0 {offsets = [0, 2, 0], sizes = [8, 1, 256], strides = [1, 1, 1]} : vector<8x3x256xf32> to vector<8x1x256xf32>
    %16 = vector.extract_strided_slice %1 {offsets = [0, 2], sizes = [128, 1], strides = [1, 1]} : vector<128x3xf32> to vector<128x1xf32>
    %17 = vector.shape_cast %16 : vector<128x1xf32> to vector<1x128x1xf32>
    %18 = vector.broadcast %15 : vector<8x1x256xf32> to vector<8x128x256xf32>
    %19 = vector.broadcast %17 : vector<1x128x1xf32> to vector<8x128x256xf32>
    %20 = arith.mulf %18, %19 : vector<8x128x256xf32>
    %21 = arith.addf %14, %20 : vector<8x128x256xf32>
    %c0_4 = arith.constant 0 : index
    %c0_5 = arith.constant 0 : index
    %22 = vector.load %arg3[%c0_4, %c0_5] : memref<128x1xf32, #tpu.memory_space<vmem>>, vector<128x1xf32>
    %23 = vector.shape_cast %22 : vector<128x1xf32> to vector<1x128x1xf32>
    %24 = vector.broadcast %23 : vector<1x128x1xf32> to vector<8x128x256xf32>
    %25 = arith.addf %21, %24 : vector<8x128x256xf32>
    %26 = arith.negf %25 : vector<8x128x256xf32>
    %27 = math.exp %26 : vector<8x128x256xf32>
    %cst = arith.constant 1.000000e+00 : f32
    %28 = vector.broadcast %cst : f32 to vector<8x128x256xf32>
    %29 = arith.addf %28, %27 : vector<8x128x256xf32>
    %30 = arith.divf %28, %29 : vector<8x128x256xf32>
    %31 = arith.mulf %25, %30 : vector<8x128x256xf32>
    %cst_6 = arith.constant dense<0.000000e+00> : vector<8x128xf32>
    %32 = vector.multi_reduction <add>, %31, %cst_6 [2] : vector<8x128x256xf32> to vector<8x128xf32>
    %cst_7 = arith.constant 2.560000e+02 : f32
    %33 = vector.broadcast %cst_7 : f32 to vector<8x128xf32>
    %34 = arith.divf %32, %33 : vector<8x128xf32>
    %c0_8 = arith.constant 0 : index
    %c0_9 = arith.constant 0 : index
    %35 = vector.load %arg4[%c0_8, %c0_9] : memref<128x96xf32, #tpu.memory_space<vmem>>, vector<128x96xf32>
    %cst_10 = arith.constant dense<0.000000e+00> : vector<8x96xf32>
    %36 = tpu.matmul %34, %35, %cst_10 {dimension_numbers = #tpu.dot_dimension_numbers<[1], [0], [0], [1], [0, 0, 1, 1], [], []>} : vector<8x128xf32>, vector<128x96xf32>, vector<8x96xf32> -> vector<8x96xf32>
    %c0_11 = arith.constant 0 : index
    %c0_12 = arith.constant 0 : index
    %37 = vector.load %arg5[%c0_11, %c0_12] : memref<1x96xf32, #tpu.memory_space<vmem>>, vector<1x96xf32>
    %38 = vector.broadcast %37 : vector<1x96xf32> to vector<8x96xf32>
    %39 = arith.addf %36, %38 : vector<8x96xf32>
    %c0_13 = arith.constant 0 : index
    %c0_14 = arith.constant 0 : index
    %40 = vector.load %arg6[%c0_13, %c0_14] : memref<8x96xf32, #tpu.memory_space<vmem>>, vector<8x96xf32>
    tpu.vector_store %arg6[%c0_13, %c0_14], %39 {strides = array<i32>} : memref<8x96xf32, #tpu.memory_space<vmem>>, vector<8x96xf32>,
    return
  }
  func.func @transform_0(%arg0: i32) -> (i32, i32, i32) {
    %c0_i32 = arith.constant 0 : i32
    %c0_i32_0 = arith.constant 0 : i32
    %c0_i32_1 = arith.constant 0 : i32
    return %arg0, %c0_i32, %c0_i32_0 : i32, i32, i32
  }
  func.func @transform_1(%arg0: i32) -> (i32, i32) {
    %c0_i32 = arith.constant 0 : i32
    %c0_i32_0 = arith.constant 0 : i32
    %c0_i32_1 = arith.constant 0 : i32
    return %c0_i32, %c0_i32_0 : i32, i32
  }
  func.func @transform_2(%arg0: i32) -> (i32, i32) {
    %c0_i32 = arith.constant 0 : i32
    %c0_i32_0 = arith.constant 0 : i32
    %c0_i32_1 = arith.constant 0 : i32
    return %c0_i32, %c0_i32_0 : i32, i32
  }
  func.func @transform_3(%arg0: i32) -> (i32, i32) {
    %c0_i32 = arith.constant 0 : i32
    %c0_i32_0 = arith.constant 0 : i32
    %c0_i32_1 = arith.constant 0 : i32
    return %c0_i32, %c0_i32_0 : i32, i32
  }
  func.func @transform_4(%arg0: i32) -> (i32, i32) {
    %c0_i32 = arith.constant 0 : i32
    %c0_i32_0 = arith.constant 0 : i32
    %c0_i32_1 = arith.constant 0 : i32
    return %c0_i32, %c0_i32_0 : i32, i32
  }
  func.func @transform_5(%arg0: i32) -> (i32, i32) {
    %c0_i32 = arith.constant 0 : i32
    %c0_i32_0 = arith.constant 0 : i32
    return %arg0, %c0_i32 : i32, i32
  }
}

</mosaic_0001>

<bundles_post_ra>
// kernel: combined_model_forward.3
= control target key start
LH: loop header
LB: loop body
LE: loop exit
PB: predicated region body
PF: predicated region fallthrough
CT: control target
= control target key end

     0   :  { %v2637_v2 = vmov 0.0   ;;  %vm2638_vm0 = vmmov 0   ;;  %s2639_s28 = smov 96   ;;  %vm42_vm1 = vcmask 261120   ;;  %vm2081_vm2 = vcmask 1024   ;;  %s3157_s3 = inlined_call_operand.vmem [shape: f32[32,96], index: 3, kind: input, shape index: {}]   ;;  %s3158_s4 = inlined_call_operand.vmem [shape: f32[1,96], index: 4, kind: input, shape index: {}]   ;;  %s3159_s0 = inlined_call_operand.vmem [shape: f32[8,2,32], index: 0, kind: input, shape index: {}]   ;;  %s3160_s1 = inlined_call_operand.vmem [shape: f32[8,2,32], index: 1, kind: input, shape index: {}]   ;;  %s3161_s2 = inlined_call_operand.vmem [shape: f32[8,2,32], index: 2, kind: input, shape index: {}]   ;;  %s3162_s5 = inlined_call_operand.vmem [shape: f32[32,1], index: 5, kind: input, shape index: {}]   ;;  %s3163_s6 = inlined_call_operand.<no memory space> [shape: f32[1,1], index: 6, kind: input, shape index: {}]   ;;  %s3164_s7 = inlined_call_operand.vmem [shape: f32[2,1], index: 7, kind: output, shape index: {}]  }
   0x1   :  { %v2684_v0 = vld [vmem:[%s3157_s3 + $0x18] sm:$0xff]  ;;  %v2689_v1 = vld [vmem:[%s3157_s3 + $0x8] sm:$0xff]  ;;  %2274 = vmatprep.subr.mxu0 %v2637_v2  ;;  %2282 = vmatprep.mubr.msk.f32.mxu0 %vm2638_vm0, %v2637_v2  ;;  %v2699_v3 = vld [vmem:[%s3157_s3 + $0x10] sm:$0xff] }
   0x2   :  { %126 = vrot.lane.b32.xlu0 %v2684_v0, %s2639_s28  ;;  %122 = vrot.lane.b32.xlu1 %v2689_v1, %s2639_s28  ;;  %v2704_v4 = vld [vmem:[%s3157_s3] sm:$0xff]  ;;  %s2640_s3 = smov 64  }
   0x3   :  { %2275 = vmatpush3.msra.mxu0 %v2684_v0  ;;  %2285 = vmatprep.subr.mxu1 %v2637_v2  ;;  %v2729_v5 = vld [vmem:[%s3158_s4] ss:$0 sm:$0xff]  ;;  %v2090_v45 = vld [vmem:[%s3159_s0 + $0x2] sm:$0x3] }
   0x4   :  { %2276 = vmatprep.subr.mxu0 %v2637_v2  ;;  %2293 = vmatprep.mubr.msk.f32.mxu1 %vm2638_vm0, %v2637_v2  ;;  %v33_v17 = vld [vmem:[%s3159_s0] sm:$0x3]  ;;  %v2091_v54 = vld [vmem:[%s3160_s1 + $0x2] sm:$0x3] }
   0x5   :  { %2277 = vmatpush3.msra.mxu0 %v2699_v3  ;;  %v34_v23 = vld [vmem:[%s3160_s1] sm:$0x3] }
   0x6   :  { %124 = vrot.lane.b32.xlu0 %v2699_v3, %s2639_s28  ;;  %120 = vrot.lane.b32.xlu1 %v2704_v4, %s2639_s28  ;;  %v35_v35 = vld [vmem:[%s3161_s2] sm:$0x3] }
   0x7   :  { %2278 = vmatprep.subr.mxu0 %v2637_v2 }
   0x8   :  { %2279 = vmatpush3.msra.mxu0 %v2689_v1 }
   0x9   :  { %2280 = vmatprep.subr.mxu0 %v2637_v2 }
   0xa   :  { %211 = vrot.lane.b32.xlu0 %v2684_v0, %s2640_s3  ;;  %209 = vrot.lane.b32.xlu1 %v2699_v3, %s2640_s3 }
   0xb   :  { %2281 = vmatpush3.msra.mxu0 %v2704_v4 }
   0xc   :  { %2283 = vmatmul.mubr.f32.vlgmr.msra.gmra.mxu0 %v2637_v2  ;;  %2296 = vmatprep.subr.mxu0 %v2637_v2 }
   0xd   :  { %2304 = vmatprep.mubr.msk.f32.mxu0 %vm2638_vm0, %v2637_v2 }
   0xe   :  { %207 = vrot.lane.b32.xlu0 %v2689_v1, %s2640_s3  ;;  %205 = vrot.lane.b32.xlu1 %v2704_v4, %s2640_s3 }
  0x12   :  { %132 = vrot.lane.b32.xlu0 %v2729_v5, %s2639_s28  ;;  %217 = vrot.lane.b32.xlu1 %v2729_v5, %s2640_s3 }
  0x74   :  { %v2733_v6 = vpop.permute.xlu0 %126  ;;  %v2735_v7 = vpop.permute.xlu1 %122 }
  0x75   :  { %2286 = vmatpush3.msra.mxu1 %v2733_v6 }
  0x76   :  { %2287 = vmatprep.subr.mxu1 %v2637_v2 }
  0x78   :  { %v2739_v8 = vpop.permute.xlu0 %124  ;;  %v2741_v9 = vpop.permute.xlu1 %120 }
  0x79   :  { %2288 = vmatpush3.msra.mxu1 %v2739_v8 }
  0x7a   :  { %2289 = vmatprep.subr.mxu1 %v2637_v2 }
  0x7b   :  { %2290 = vmatpush3.msra.mxu1 %v2735_v7 }
  0x7c   :  { %v2746_v10 = vpop.permute.xlu0 %211  ;;  %2291 = vmatprep.subr.mxu1 %v2637_v2  ;;  %v2749_v11 = vpop.permute.xlu1 %209 }
  0x7d   :  { %2292 = vmatpush3.msra.mxu1 %v2741_v9  ;;  %2297 = vmatpush3.msra.mxu0 %v2746_v10 }
  0x7e   :  { %2294 = vmatmul.mubr.f32.vlgmr.msra.gmra.mxu1 %v2637_v2  ;;  %2298 = vmatprep.subr.mxu0 %v2637_v2 }
  0x7f   :  { %2299 = vmatpush3.msra.mxu0 %v2749_v11  ;;  %2307 = vmatprep.subr.mxu1 %v2637_v2 }
  0x80   :  { %v2757_v12 = vpop.permute.xlu0 %207  ;;  %2300 = vmatprep.subr.mxu0 %v2637_v2  ;;  %v2760_v13 = vpop.permute.xlu1 %205  ;;  %2308 = vmatpush3.msra.mxu1 %v2684_v0 }
  0x81   :  { %2301 = vmatpush3.msra.mxu0 %v2757_v12  ;;  %2309 = vmatprep.subr.mxu1 %v2637_v2 }
  0x82   :  { %2302 = vmatprep.subr.mxu0 %v2637_v2  ;;  %2310 = vmatpush3.msra.mxu1 %v2699_v3 }
  0x83   :  { %2303 = vmatpush3.msra.mxu0 %v2760_v13  ;;  %2311 = vmatprep.subr.mxu1 %v2637_v2 }
  0x84   :  { %2318 = vmatprep.subr.mxu0 %v2637_v2  ;;  %2305 = vmatmul.mubr.f32.vlgmr.msra.gmra.mxu0 %v2637_v2  ;;  %v2791_v22 = vpop.permute.xlu0 %132  ;;  %v2797_v30 = vpop.permute.xlu1 %217 }
  0x85   :  { %2319 = vmatpush3.msra.mxu0 %v2733_v6  ;;  %2312 = vmatpush3.msra.mxu1 %v2689_v1 }
  0x86   :  { %2320 = vmatprep.subr.mxu0 %v2637_v2  ;;  %2313 = vmatprep.subr.mxu1 %v2637_v2 }
  0x87   :  { %2321 = vmatpush3.msra.mxu0 %v2739_v8  ;;  %2314 = vmatpush3.msra.mxu1 %v2704_v4 }
  0x88   :  { %2322 = vmatprep.subr.mxu0 %v2637_v2  ;;  %2315 = vmatprep.mubr.msk.f32.mxu1 %vm2638_vm0, %v2637_v2 }
  0x89   :  { %2323 = vmatpush3.msra.mxu0 %v2735_v7  ;;  %2326 = vmatprep.mubr.msk.f32.mxu0 %vm2638_vm0, %v2637_v2 }
  0x8a   :  { %2324 = vmatprep.subr.mxu0 %v2637_v2  ;;  %2329 = vmatprep.subr.mxu1 %v2637_v2 }
  0x8b   :  { %2325 = vmatpush3.msra.mxu0 %v2741_v9 }
  0x8c   :  { %2340 = vmatprep.subr.mxu0 %v2637_v2 }
  0xcc   :  { %v112_v14 = vpop.f32.mrf.mxu0 }
  0xcd   :  { %v113_v16 = vadd.f32 %v2729_v5, %v112_v14 }
  0xce   :  { %v2284_v15 = vpop.f32.mrf.mxu0 }
  0xcf   :  { %v290_v18 = vadd.f32 %v113_v16, %v33_v17  ;;  %v2092_v15 = vld [vmem:[%s3161_s2 + $0x2] sm:$0x3] }
  0xd1   :  { %v2088_v19 = vmul.f32 -1.442695, %v290_v18 }
  0xd3   :  { %2553 = vpow2.f32 %v2088_v19 }
  0xe0   :  { %v2554_v20 = vpop.eup %2553 }
  0xe1   :  { %v294_v21 = vadd.f32 1.0, %v2554_v20 }
  0xe3   :  { %2555 = vrcp.f32 %v294_v21 }
  0xf0   :  { %v2556_v33 = vpop.eup %2555 }
 0x13e   :  { %v201_v24 = vpop.f32.mrf.mxu1 }
 0x13f   :  { %v202_v25 = vadd.f32 %v201_v24, %v2791_v22 }
 0x140   :  { %v2295_v26 = vpop.f32.mrf.mxu1 }
 0x141   :  { %v297_v27 = vadd.f32 %v202_v25, %v34_v23  ;;  %v2098_v25 = vld [vmem:[%s3159_s0 + $0x4] sm:$0x3] }
 0x143   :  { %v2089_v28 = vmul.f32 -1.442695, %v297_v27 }
 0x144   :  { %v286_v29 = vpop.f32.mrf.mxu0 }
 0x145   :  { %2557 = vpow2.f32 %v2089_v28  ;;  %v287_v32 = vadd.f32 %v286_v29, %v2797_v30 }
 0x146   :  { %v2306_v31 = vpop.f32.mrf.mxu0 }
 0x147   :  { %v304_v34 = vmul.f32 %v2556_v33, %v287_v32 }
 0x149   :  { %v305_v36 = vadd.f32 %v304_v34, %v35_v35  ;;  %v2099_v35 = vld [vmem:[%s3160_s1 + $0x4] sm:$0x3] }
 0x14b   :  { %2559 = vtanh.f32 %v305_v36 }
 0x152   :  { %v2558_v37 = vpop.eup %2557 }
 0x153   :  { %v301_v38 = vadd.f32 1.0, %v2558_v37 }
 0x155   :  { %2561 = vrcp.f32 %v301_v38 }
 0x158   :  { %v2560_v39 = vpop.eup %2559 }
 0x162   :  { %v2562_v40 = vpop.eup %2561 }
 0x163   :  { %v307_v41 = vsub.f32 1.0, %v2562_v40  ;;  %v309_v43 = vmul.f32 0.0, %v2562_v40 }
 0x165   :  { %v308_v42 = vmul.f32 %v2560_v39, %v307_v41 }
 0x167   :  { %v2803_v44 = vadd.f32 %v309_v43, %v308_v42 }
 0x169   :  { %2316 = vmatmul.mubr.msk.f32.vlgmr.msra.gmra.mxu1 %vm42_vm1, %v2803_v44  ;;  %2327 = vmatmul.mubr.msk.f32.vlgmr.msra.gmra.mxu0 %vm42_vm1, %v2803_v44 }
 0x16a   :  { %2330 = vmatpush3.msra.mxu1 %v2746_v10  ;;  %2337 = vmatprep.mubr.msk.f32.mxu1 %vm2638_vm0, %v2637_v2 }
 0x16b   :  { %2331 = vmatprep.subr.mxu1 %v2637_v2  ;;  %2341 = vmatpush3.msra.mxu0 %v2684_v0 }
 0x16c   :  { %2332 = vmatpush3.msra.mxu1 %v2749_v11  ;;  %2342 = vmatprep.subr.mxu0 %v2637_v2 }
 0x16d   :  { %2333 = vmatprep.subr.mxu1 %v2637_v2  ;;  %2343 = vmatpush3.msra.mxu0 %v2699_v3 }
 0x16e   :  { %2334 = vmatpush3.msra.mxu1 %v2757_v12  ;;  %2344 = vmatprep.subr.mxu0 %v2637_v2 }
 0x16f   :  { %2335 = vmatprep.subr.mxu1 %v2637_v2  ;;  %2345 = vmatpush3.msra.mxu0 %v2689_v1 }
 0x170   :  { %2336 = vmatpush3.msra.mxu1 %v2760_v13  ;;  %2346 = vmatprep.subr.mxu0 %v2637_v2 }
 0x171   :  { %2338 = vmatmul.mubr.msk.f32.vlgmr.msra.gmra.mxu1 %vm42_vm1, %v2803_v44  ;;  %2351 = vmatprep.subr.mxu1 %v2637_v2 }
 0x172   :  { %2352 = vmatpush3.msra.mxu1 %v2733_v6  ;;  %2347 = vmatpush3.msra.mxu0 %v2704_v4 }
 0x173   :  { %2353 = vmatprep.subr.mxu1 %v2637_v2  ;;  %2348 = vmatprep.mubr.msk.f32.mxu0 %vm2638_vm0, %v2637_v2 }
 0x174   :  { %2354 = vmatpush3.msra.mxu1 %v2739_v8  ;;  %2359 = vmatprep.mubr.msk.f32.mxu1 %vm2638_vm0, %v2637_v2 }
 0x175   :  { %2355 = vmatprep.subr.mxu1 %v2637_v2  ;;  %2362 = vmatprep.subr.mxu0 %v2637_v2 }
 0x176   :  { %2356 = vmatpush3.msra.mxu1 %v2735_v7 }
 0x177   :  { %2357 = vmatprep.subr.mxu1 %v2637_v2 }
 0x178   :  { %2358 = vmatpush3.msra.mxu1 %v2741_v9 }
 0x179   :  { %2373 = vmatprep.subr.mxu1 %v2637_v2 }
 0x229   :  { %v386_v46 = vpop.f32.mrf.mxu1  ;;  %v456_v47 = vpop.f32.mrf.mxu0 }
 0x22a   :  { %v387_v48 = vadd.f32 %v2729_v5, %v386_v46  ;;  %v457_v53 = vadd.f32 %v456_v47, %v2791_v22  ;;  %v2100_v46 = vld [vmem:[%s3161_s2 + $0x4] sm:$0x3] }
 0x22b   :  { %v2317_v49 = vpop.f32.mrf.mxu1  ;;  %v2328_v50 = vpop.f32.mrf.mxu0 }
 0x22c   :  { %v530_v51 = vadd.f32 %v2090_v45, %v387_v48  ;;  %v537_v56 = vadd.f32 %v2091_v54, %v457_v53 }
 0x22e   :  { %v2096_v52 = vmul.f32 -1.442695, %v530_v51  ;;  %v2097_v58 = vmul.f32 -1.442695, %v537_v56 }
 0x230   :  { %2563 = vpow2.f32 %v2096_v52 }
 0x231   :  { %v526_v55 = vpop.f32.mrf.mxu1  ;;  %2565 = vpow2.f32 %v2097_v58 }
 0x232   :  { %v527_v63 = vadd.f32 %v526_v55, %v2797_v30  ;;  %v2106_v55 = vld [vmem:[%s3159_s0 + $0x6] sm:$0x3] }
 0x233   :  { %v2339_v57 = vpop.f32.mrf.mxu1 }
 0x23d   :  { %v2564_v59 = vpop.eup %2563 }
 0x23e   :  { %v534_v60 = vadd.f32 1.0, %v2564_v59  ;;  %v2566_v61 = vpop.eup %2565 }
 0x23f   :  { %v541_v62 = vadd.f32 1.0, %v2566_v61 }
 0x240   :  { %2567 = vrcp.f32 %v534_v60 }
 0x241   :  { %2569 = vrcp.f32 %v541_v62 }
 0x24d   :  { %v2568_v14 = vpop.eup %2567 }
 0x24e   :  { %v544_v16 = vmul.f32 %v2568_v14, %v527_v63  ;;  %v2570_v18 = vpop.eup %2569  ;;  %v2107_v14 = vld [vmem:[%s3160_s1 + $0x6] sm:$0x3] }
 0x24f   :  { %v547_v19 = vsub.f32 1.0, %v2570_v18  ;;  %v549_v23 = vmul.f32 %v2570_v18, %v2803_v44 }
 0x250   :  { %v545_v17 = vadd.f32 %v2092_v15, %v544_v16 }
 0x252   :  { %2571 = vtanh.f32 %v545_v17 }
 0x25f   :  { %v2572_v20 = vpop.eup %2571 }
 0x260   :  { %v548_v21 = vmul.f32 %v2572_v20, %v547_v19 }
 0x262   :  { %v2854_v24 = vadd.f32 %v549_v23, %v548_v21 }
 0x264   :  { %2349 = vmatmul.mubr.msk.f32.vlgmr.msra.gmra.mxu0 %vm42_vm1, %v2854_v24  ;;  %2360 = vmatmul.mubr.msk.f32.vlgmr.msra.gmra.mxu1 %vm42_vm1, %v2854_v24 }
 0x265   :  { %2363 = vmatpush3.msra.mxu0 %v2746_v10  ;;  %2370 = vmatprep.mubr.msk.f32.mxu0 %vm2638_vm0, %v2637_v2 }
 0x266   :  { %2364 = vmatprep.subr.mxu0 %v2637_v2  ;;  %2374 = vmatpush3.msra.mxu1 %v2684_v0 }
 0x267   :  { %2365 = vmatpush3.msra.mxu0 %v2749_v11  ;;  %2375 = vmatprep.subr.mxu1 %v2637_v2 }
 0x268   :  { %2366 = vmatprep.subr.mxu0 %v2637_v2  ;;  %2376 = vmatpush3.msra.mxu1 %v2699_v3 }
 0x269   :  { %2367 = vmatpush3.msra.mxu0 %v2757_v12  ;;  %2377 = vmatprep.subr.mxu1 %v2637_v2 }
 0x26a   :  { %2368 = vmatprep.subr.mxu0 %v2637_v2  ;;  %2378 = vmatpush3.msra.mxu1 %v2689_v1 }
 0x26b   :  { %2369 = vmatpush3.msra.mxu0 %v2760_v13  ;;  %2379 = vmatprep.subr.mxu1 %v2637_v2 }
 0x26c   :  { %2371 = vmatmul.mubr.msk.f32.vlgmr.msra.gmra.mxu0 %vm42_vm1, %v2854_v24  ;;  %2384 = vmatprep.subr.mxu0 %v2637_v2 }
 0x26d   :  { %2385 = vmatpush3.msra.mxu0 %v2733_v6  ;;  %2380 = vmatpush3.msra.mxu1 %v2704_v4 }
 0x26e   :  { %2386 = vmatprep.subr.mxu0 %v2637_v2  ;;  %2381 = vmatprep.mubr.msk.f32.mxu1 %vm2638_vm0, %v2637_v2 }
 0x26f   :  { %2387 = vmatpush3.msra.mxu0 %v2739_v8  ;;  %2392 = vmatprep.mubr.msk.f32.mxu0 %vm2638_vm0, %v2637_v2 }
 0x270   :  { %2388 = vmatprep.subr.mxu0 %v2637_v2  ;;  %2395 = vmatprep.subr.mxu1 %v2637_v2 }
 0x271   :  { %2389 = vmatpush3.msra.mxu0 %v2735_v7 }
 0x272   :  { %2390 = vmatprep.subr.mxu0 %v2637_v2 }
 0x273   :  { %2391 = vmatpush3.msra.mxu0 %v2741_v9 }
 0x274   :  { %2406 = vmatprep.subr.mxu0 %v2637_v2 }
 0x324   :  { %v626_v26 = vpop.f32.mrf.mxu0  ;;  %v696_v27 = vpop.f32.mrf.mxu1 }
 0x325   :  { %v627_v28 = vadd.f32 %v2729_v5, %v626_v26  ;;  %v697_v34 = vadd.f32 %v696_v27, %v2791_v22  ;;  %v2108_v26 = vld [vmem:[%s3161_s2 + $0x6] sm:$0x3] }
 0x326   :  { %v2350_v29 = vpop.f32.mrf.mxu0  ;;  %v2361_v31 = vpop.f32.mrf.mxu1 }
 0x327   :  { %v770_v32 = vadd.f32 %v2098_v25, %v627_v28  ;;  %v777_v37 = vadd.f32 %v2099_v35, %v697_v34 }
 0x329   :  { %v2104_v33 = vmul.f32 -1.442695, %v770_v32  ;;  %v2105_v39 = vmul.f32 -1.442695, %v777_v37 }
 0x32b   :  { %2573 = vpow2.f32 %v2104_v33 }
 0x32c   :  { %v766_v36 = vpop.f32.mrf.mxu0  ;;  %2575 = vpow2.f32 %v2105_v39 }
 0x32d   :  { %v767_v44 = vadd.f32 %v766_v36, %v2797_v30  ;;  %v2114_v36 = vld [vmem:[%s3159_s0 + $0x8] sm:$0x3] }
 0x32e   :  { %v2372_v38 = vpop.f32.mrf.mxu0 }
 0x338   :  { %v2574_v40 = vpop.eup %2573 }
 0x339   :  { %v774_v41 = vadd.f32 1.0, %v2574_v40  ;;  %v2576_v42 = vpop.eup %2575 }
 0x33a   :  { %v781_v43 = vadd.f32 1.0, %v2576_v42 }
 0x33b   :  { %2577 = vrcp.f32 %v774_v41 }
 0x33c   :  { %2579 = vrcp.f32 %v781_v43 }
 0x348   :  { %v2578_v45 = vpop.eup %2577 }
 0x349   :  { %v784_v47 = vmul.f32 %v2578_v45, %v767_v44  ;;  %v2580_v49 = vpop.eup %2579  ;;  %v2115_v45 = vld [vmem:[%s3160_s1 + $0x8] sm:$0x3] }
 0x34a   :  { %v787_v50 = vsub.f32 1.0, %v2580_v49  ;;  %v789_v53 = vmul.f32 %v2580_v49, %v2854_v24 }
 0x34b   :  { %v785_v48 = vadd.f32 %v2100_v46, %v784_v47 }
 0x34d   :  { %2581 = vtanh.f32 %v785_v48 }
 0x35a   :  { %v2582_v51 = vpop.eup %2581 }
 0x35b   :  { %v788_v52 = vmul.f32 %v2582_v51, %v787_v50 }
 0x35d   :  { %v2905_v54 = vadd.f32 %v789_v53, %v788_v52 }
 0x35f   :  { %2382 = vmatmul.mubr.msk.f32.vlgmr.msra.gmra.mxu1 %vm42_vm1, %v2905_v54  ;;  %2393 = vmatmul.mubr.msk.f32.vlgmr.msra.gmra.mxu0 %vm42_vm1, %v2905_v54 }
 0x360   :  { %2396 = vmatpush3.msra.mxu1 %v2746_v10  ;;  %2403 = vmatprep.mubr.msk.f32.mxu1 %vm2638_vm0, %v2637_v2 }
 0x361   :  { %2397 = vmatprep.subr.mxu1 %v2637_v2  ;;  %2407 = vmatpush3.msra.mxu0 %v2684_v0 }
 0x362   :  { %2398 = vmatpush3.msra.mxu1 %v2749_v11  ;;  %2408 = vmatprep.subr.mxu0 %v2637_v2 }
 0x363   :  { %2399 = vmatprep.subr.mxu1 %v2637_v2  ;;  %2409 = vmatpush3.msra.mxu0 %v2699_v3 }
 0x364   :  { %2400 = vmatpush3.msra.mxu1 %v2757_v12  ;;  %2410 = vmatprep.subr.mxu0 %v2637_v2 }
 0x365   :  { %2401 = vmatprep.subr.mxu1 %v2637_v2  ;;  %2411 = vmatpush3.msra.mxu0 %v2689_v1 }
 0x366   :  { %2402 = vmatpush3.msra.mxu1 %v2760_v13  ;;  %2412 = vmatprep.subr.mxu0 %v2637_v2 }
 0x367   :  { %2404 = vmatmul.mubr.msk.f32.vlgmr.msra.gmra.mxu1 %vm42_vm1, %v2905_v54  ;;  %2417 = vmatprep.subr.mxu1 %v2637_v2 }
 0x368   :  { %2418 = vmatpush3.msra.mxu1 %v2733_v6  ;;  %2413 = vmatpush3.msra.mxu0 %v2704_v4 }
 0x369   :  { %2419 = vmatprep.subr.mxu1 %v2637_v2  ;;  %2414 = vmatprep.mubr.msk.f32.mxu0 %vm2638_vm0, %v2637_v2 }
 0x36a   :  { %2420 = vmatpush3.msra.mxu1 %v2739_v8  ;;  %2425 = vmatprep.mubr.msk.f32.mxu1 %vm2638_vm0, %v2637_v2 }
 0x36b   :  { %2421 = vmatprep.subr.mxu1 %v2637_v2  ;;  %2428 = vmatprep.subr.mxu0 %v2637_v2 }
 0x36c   :  { %2422 = vmatpush3.msra.mxu1 %v2735_v7 }
 0x36d   :  { %2423 = vmatprep.subr.mxu1 %v2637_v2 }
 0x36e   :  { %2424 = vmatpush3.msra.mxu1 %v2741_v9 }
 0x36f   :  { %2439 = vmatprep.subr.mxu1 %v2637_v2 }
 0x41f   :  { %v866_v56 = vpop.f32.mrf.mxu1  ;;  %v936_v57 = vpop.f32.mrf.mxu0 }
 0x420   :  { %v867_v58 = vadd.f32 %v2729_v5, %v866_v56  ;;  %v937_v63 = vadd.f32 %v936_v57, %v2791_v22  ;;  %v2116_v56 = vld [vmem:[%s3161_s2 + $0x8] sm:$0x3] }
 0x421   :  { %v2383_v59 = vpop.f32.mrf.mxu1  ;;  %v2394_v60 = vpop.f32.mrf.mxu0 }
 0x422   :  { %v1010_v61 = vadd.f32 %v2106_v55, %v867_v58  ;;  %v1017_v16 = vadd.f32 %v2107_v14, %v937_v63 }
 0x424   :  { %v2112_v62 = vmul.f32 -1.442695, %v1010_v61  ;;  %v2113_v18 = vmul.f32 -1.442695, %v1017_v16 }
 0x426   :  { %2583 = vpow2.f32 %v2112_v62 }
 0x427   :  { %v1006_v15 = vpop.f32.mrf.mxu1  ;;  %2585 = vpow2.f32 %v2113_v18 }
 0x428   :  { %v1007_v24 = vadd.f32 %v1006_v15, %v2797_v30  ;;  %v2122_v15 = vld [vmem:[%s3159_s0 + $0xa] sm:$0x3] }
 0x429   :  { %v2405_v17 = vpop.f32.mrf.mxu1 }
 0x433   :  { %v2584_v19 = vpop.eup %2583 }
 0x434   :  { %v1014_v20 = vadd.f32 1.0, %v2584_v19  ;;  %v2586_v21 = vpop.eup %2585 }
 0x435   :  { %v1021_v23 = vadd.f32 1.0, %v2586_v21 }
 0x436   :  { %2587 = vrcp.f32 %v1014_v20 }
 0x437   :  { %2589 = vrcp.f32 %v1021_v23 }
 0x443   :  { %v2588_v25 = vpop.eup %2587 }
 0x444   :  { %v1024_v27 = vmul.f32 %v2588_v25, %v1007_v24  ;;  %v2590_v29 = vpop.eup %2589  ;;  %v2123_v25 = vld [vmem:[%s3160_s1 + $0xa] sm:$0x3] }
 0x445   :  { %v1027_v31 = vsub.f32 1.0, %v2590_v29  ;;  %v1029_v34 = vmul.f32 %v2590_v29, %v2905_v54 }
 0x446   :  { %v1025_v28 = vadd.f32 %v2108_v26, %v1024_v27 }
 0x448   :  { %2591 = vtanh.f32 %v1025_v28 }
 0x455   :  { %v2592_v32 = vpop.eup %2591 }
 0x456   :  { %v1028_v33 = vmul.f32 %v2592_v32, %v1027_v31 }
 0x458   :  { %v2956_v35 = vadd.f32 %v1029_v34, %v1028_v33 }
 0x45a   :  { %2415 = vmatmul.mubr.msk.f32.vlgmr.msra.gmra.mxu0 %vm42_vm1, %v2956_v35  ;;  %2426 = vmatmul.mubr.msk.f32.vlgmr.msra.gmra.mxu1 %vm42_vm1, %v2956_v35 }
 0x45b   :  { %2429 = vmatpush3.msra.mxu0 %v2746_v10  ;;  %2436 = vmatprep.mubr.msk.f32.mxu0 %vm2638_vm0, %v2637_v2 }
 0x45c   :  { %2430 = vmatprep.subr.mxu0 %v2637_v2  ;;  %2440 = vmatpush3.msra.mxu1 %v2684_v0 }
 0x45d   :  { %2431 = vmatpush3.msra.mxu0 %v2749_v11  ;;  %2441 = vmatprep.subr.mxu1 %v2637_v2 }
 0x45e   :  { %2432 = vmatprep.subr.mxu0 %v2637_v2  ;;  %2442 = vmatpush3.msra.mxu1 %v2699_v3 }
 0x45f   :  { %2433 = vmatpush3.msra.mxu0 %v2757_v12  ;;  %2443 = vmatprep.subr.mxu1 %v2637_v2 }
 0x460   :  { %2434 = vmatprep.subr.mxu0 %v2637_v2  ;;  %2444 = vmatpush3.msra.mxu1 %v2689_v1 }
 0x461   :  { %2435 = vmatpush3.msra.mxu0 %v2760_v13  ;;  %2445 = vmatprep.subr.mxu1 %v2637_v2 }
 0x462   :  { %2437 = vmatmul.mubr.msk.f32.vlgmr.msra.gmra.mxu0 %vm42_vm1, %v2956_v35  ;;  %2450 = vmatprep.subr.mxu0 %v2637_v2 }
 0x463   :  { %2451 = vmatpush3.msra.mxu0 %v2733_v6  ;;  %2446 = vmatpush3.msra.mxu1 %v2704_v4 }
 0x464   :  { %2452 = vmatprep.subr.mxu0 %v2637_v2  ;;  %2447 = vmatprep.mubr.msk.f32.mxu1 %vm2638_vm0, %v2637_v2 }
 0x465   :  { %2453 = vmatpush3.msra.mxu0 %v2739_v8  ;;  %2458 = vmatprep.mubr.msk.f32.mxu0 %vm2638_vm0, %v2637_v2 }
 0x466   :  { %2454 = vmatprep.subr.mxu0 %v2637_v2  ;;  %2461 = vmatprep.subr.mxu1 %v2637_v2 }
 0x467   :  { %2455 = vmatpush3.msra.mxu0 %v2735_v7 }
 0x468   :  { %2456 = vmatprep.subr.mxu0 %v2637_v2 }
 0x469   :  { %2457 = vmatpush3.msra.mxu0 %v2741_v9 }
 0x46a   :  { %2472 = vmatprep.subr.mxu0 %v2637_v2 }
 0x51a   :  { %v1106_v37 = vpop.f32.mrf.mxu0  ;;  %v1176_v38 = vpop.f32.mrf.mxu1 }
 0x51b   :  { %v1107_v39 = vadd.f32 %v2729_v5, %v1106_v37  ;;  %v1177_v44 = vadd.f32 %v1176_v38, %v2791_v22  ;;  %v2124_v37 = vld [vmem:[%s3161_s2 + $0xa] sm:$0x3] }
 0x51c   :  { %v2416_v40 = vpop.f32.mrf.mxu0  ;;  %v2427_v41 = vpop.f32.mrf.mxu1 }
 0x51d   :  { %v1250_v42 = vadd.f32 %v2114_v36, %v1107_v39  ;;  %v1257_v47 = vadd.f32 %v2115_v45, %v1177_v44 }
 0x51f   :  { %v2120_v43 = vmul.f32 -1.442695, %v1250_v42  ;;  %v2121_v49 = vmul.f32 -1.442695, %v1257_v47 }
 0x521   :  { %2593 = vpow2.f32 %v2120_v43 }
 0x522   :  { %v1246_v46 = vpop.f32.mrf.mxu0  ;;  %2595 = vpow2.f32 %v2121_v49 }
 0x523   :  { %v1247_v54 = vadd.f32 %v1246_v46, %v2797_v30 }
 0x524   :  { %v2438_v48 = vpop.f32.mrf.mxu0 }
 0x52e   :  { %v2594_v50 = vpop.eup %2593 }
 0x52f   :  { %v1254_v51 = vadd.f32 1.0, %v2594_v50  ;;  %v2596_v52 = vpop.eup %2595 }
 0x530   :  { %v1261_v53 = vadd.f32 1.0, %v2596_v52 }
 0x531   :  { %2597 = vrcp.f32 %v1254_v51 }
 0x532   :  { %2599 = vrcp.f32 %v1261_v53 }
 0x53e   :  { %v2598_v55 = vpop.eup %2597 }
 0x53f   :  { %v1264_v57 = vmul.f32 %v2598_v55, %v1247_v54  ;;  %v2600_v59 = vpop.eup %2599 }
 0x540   :  { %v1267_v60 = vsub.f32 1.0, %v2600_v59  ;;  %v1269_v63 = vmul.f32 %v2600_v59, %v2956_v35 }
 0x541   :  { %v1265_v58 = vadd.f32 %v2116_v56, %v1264_v57 }
 0x543   :  { %2601 = vtanh.f32 %v1265_v58  ;;  %v2132_v58 = vld [vmem:[%s3161_s2 + $0xc] sm:$0x3] }
 0x550   :  { %v2602_v61 = vpop.eup %2601 }
 0x551   :  { %v1268_v62 = vmul.f32 %v2602_v61, %v1267_v60 }
 0x553   :  { %v3007_v14 = vadd.f32 %v1269_v63, %v1268_v62 }
 0x555   :  { %2448 = vmatmul.mubr.msk.f32.vlgmr.msra.gmra.mxu1 %vm42_vm1, %v3007_v14  ;;  %2459 = vmatmul.mubr.msk.f32.vlgmr.msra.gmra.mxu0 %vm42_vm1, %v3007_v14 }
 0x556   :  { %2462 = vmatpush3.msra.mxu1 %v2746_v10  ;;  %2469 = vmatprep.mubr.msk.f32.mxu1 %vm2638_vm0, %v2637_v2 }
 0x557   :  { %2463 = vmatprep.subr.mxu1 %v2637_v2  ;;  %2473 = vmatpush3.msra.mxu0 %v2684_v0 }
 0x558   :  { %2464 = vmatpush3.msra.mxu1 %v2749_v11  ;;  %2474 = vmatprep.subr.mxu0 %v2637_v2 }
 0x559   :  { %2465 = vmatprep.subr.mxu1 %v2637_v2  ;;  %2475 = vmatpush3.msra.mxu0 %v2699_v3 }
 0x55a   :  { %2466 = vmatpush3.msra.mxu1 %v2757_v12  ;;  %2476 = vmatprep.subr.mxu0 %v2637_v2 }
 0x55b   :  { %2467 = vmatprep.subr.mxu1 %v2637_v2  ;;  %2477 = vmatpush3.msra.mxu0 %v2689_v1 }
 0x55c   :  { %2468 = vmatpush3.msra.mxu1 %v2760_v13  ;;  %2478 = vmatprep.subr.mxu0 %v2637_v2 }
 0x55d   :  { %2470 = vmatmul.mubr.msk.f32.vlgmr.msra.gmra.mxu1 %vm42_vm1, %v3007_v14  ;;  %2483 = vmatprep.subr.mxu1 %v2637_v2 }
 0x55e   :  { %2484 = vmatpush3.msra.mxu1 %v2733_v6  ;;  %2479 = vmatpush3.msra.mxu0 %v2704_v4 }
 0x55f   :  { %2485 = vmatprep.subr.mxu1 %v2637_v2  ;;  %2480 = vmatprep.mubr.msk.f32.mxu0 %vm2638_vm0, %v2637_v2 }
 0x560   :  { %2486 = vmatpush3.msra.mxu1 %v2739_v8  ;;  %2491 = vmatprep.mubr.msk.f32.mxu1 %vm2638_vm0, %v2637_v2 }
 0x561   :  { %2487 = vmatprep.subr.mxu1 %v2637_v2  ;;  %2494 = vmatprep.subr.mxu0 %v2637_v2 }
 0x562   :  { %2488 = vmatpush3.msra.mxu1 %v2735_v7 }
 0x563   :  { %2489 = vmatprep.subr.mxu1 %v2637_v2 }
 0x564   :  { %2490 = vmatpush3.msra.mxu1 %v2741_v9 }
 0x565   :  { %2505 = vmatprep.subr.mxu1 %v2637_v2 }
 0x615   :  { %v1346_v16 = vpop.f32.mrf.mxu1  ;;  %v1416_v17 = vpop.f32.mrf.mxu0 }
 0x616   :  { %v1347_v18 = vadd.f32 %v2729_v5, %v1346_v16  ;;  %v1417_v24 = vadd.f32 %v1416_v17, %v2791_v22  ;;  %v1993_v17 = vld [vmem:[%s3162_s5 + $0x10] sm:$0xff] }
 0x617   :  { %v2449_v19 = vpop.f32.mrf.mxu1  ;;  %v2460_v20 = vpop.f32.mrf.mxu0 }
 0x618   :  { %v1490_v21 = vadd.f32 %v2122_v15, %v1347_v18  ;;  %v1497_v27 = vadd.f32 %v2123_v25, %v1417_v24  ;;  %v2138_v18 = vld [vmem:[%s3159_s0 + $0xe] sm:$0x3] }
 0x61a   :  { %v2128_v23 = vmul.f32 -1.442695, %v1490_v21  ;;  %v2129_v29 = vmul.f32 -1.442695, %v1497_v27  ;;  %v2139_v27 = vld [vmem:[%s3160_s1 + $0xe] sm:$0x3] }
 0x61c   :  { %2603 = vpow2.f32 %v2128_v23 }
 0x61d   :  { %v1486_v26 = vpop.f32.mrf.mxu1  ;;  %2605 = vpow2.f32 %v2129_v29 }
 0x61e   :  { %v1487_v35 = vadd.f32 %v1486_v26, %v2797_v30 }
 0x61f   :  { %v2471_v28 = vpop.f32.mrf.mxu1 }
 0x629   :  { %v2604_v31 = vpop.eup %2603 }
 0x62a   :  { %v1494_v32 = vadd.f32 1.0, %v2604_v31  ;;  %v2606_v33 = vpop.eup %2605 }
 0x62b   :  { %v1501_v34 = vadd.f32 1.0, %v2606_v33 }
 0x62c   :  { %2607 = vrcp.f32 %v1494_v32 }
 0x62d   :  { %2609 = vrcp.f32 %v1501_v34 }
 0x639   :  { %v2608_v36 = vpop.eup %2607 }
 0x63a   :  { %v1504_v38 = vmul.f32 %v2608_v36, %v1487_v35  ;;  %v2610_v40 = vpop.eup %2609 }
 0x63b   :  { %v1507_v41 = vsub.f32 1.0, %v2610_v40  ;;  %v1509_v44 = vmul.f32 %v2610_v40, %v3007_v14 }
 0x63c   :  { %v1505_v39 = vadd.f32 %v2124_v37, %v1504_v38 }
 0x63e   :  { %2611 = vtanh.f32 %v1505_v39 }
 0x64b   :  { %v2612_v42 = vpop.eup %2611 }
 0x64c   :  { %v1508_v43 = vmul.f32 %v2612_v42, %v1507_v41 }
 0x64e   :  { %v3058_v45 = vadd.f32 %v1509_v44, %v1508_v43 }
 0x650   :  { %2481 = vmatmul.mubr.msk.f32.vlgmr.msra.gmra.mxu0 %vm42_vm1, %v3058_v45  ;;  %2492 = vmatmul.mubr.msk.f32.vlgmr.msra.gmra.mxu1 %vm42_vm1, %v3058_v45 }
 0x651   :  { %2495 = vmatpush3.msra.mxu0 %v2746_v10  ;;  %2502 = vmatprep.mubr.msk.f32.mxu0 %vm2638_vm0, %v2637_v2 }
 0x652   :  { %2496 = vmatprep.subr.mxu0 %v2637_v2  ;;  %2506 = vmatpush3.msra.mxu1 %v2684_v0  ;;  %v2130_v0 = vld [vmem:[%s3159_s0 + $0xc] sm:$0x3] }
 0x653   :  { %2497 = vmatpush3.msra.mxu0 %v2749_v11  ;;  %2507 = vmatprep.subr.mxu1 %v2637_v2 }
 0x654   :  { %2498 = vmatprep.subr.mxu0 %v2637_v2  ;;  %2508 = vmatpush3.msra.mxu1 %v2699_v3 }
 0x655   :  { %2499 = vmatpush3.msra.mxu0 %v2757_v12  ;;  %2509 = vmatprep.subr.mxu1 %v2637_v2 }
 0x656   :  { %2500 = vmatprep.subr.mxu0 %v2637_v2  ;;  %2510 = vmatpush3.msra.mxu1 %v2689_v1 }
 0x657   :  { %2501 = vmatpush3.msra.mxu0 %v2760_v13  ;;  %2511 = vmatprep.subr.mxu1 %v2637_v2 }
 0x658   :  { %2503 = vmatmul.mubr.msk.f32.vlgmr.msra.gmra.mxu0 %vm42_vm1, %v3058_v45  ;;  %2516 = vmatprep.subr.mxu0 %v2637_v2 }
 0x659   :  { %2517 = vmatpush3.msra.mxu0 %v2733_v6  ;;  %2512 = vmatpush3.msra.mxu1 %v2704_v4 }
 0x65a   :  { %2518 = vmatprep.subr.mxu0 %v2637_v2  ;;  %2513 = vmatprep.mubr.msk.f32.mxu1 %vm2638_vm0, %v2637_v2 }
 0x65b   :  { %2519 = vmatpush3.msra.mxu0 %v2739_v8  ;;  %2524 = vmatprep.mubr.msk.f32.mxu0 %vm2638_vm0, %v2637_v2 }
 0x65c   :  { %2520 = vmatprep.subr.mxu0 %v2637_v2  ;;  %2527 = vmatprep.subr.mxu1 %v2637_v2 }
 0x65d   :  { %2521 = vmatpush3.msra.mxu0 %v2735_v7 }
 0x65e   :  { %2522 = vmatprep.subr.mxu0 %v2637_v2 }
 0x65f   :  { %2523 = vmatpush3.msra.mxu0 %v2741_v9  ;;  %v2131_v9 = vld [vmem:[%s3160_s1 + $0xc] sm:$0x3] }
 0x660   :  { %2538 = vmatprep.subr.mxu0 %v2637_v2 }
 0x710   :  { %v1586_v1 = vpop.f32.mrf.mxu0  ;;  %v1656_v3 = vpop.f32.mrf.mxu1 }
 0x711   :  { %v1587_v4 = vadd.f32 %v2729_v5, %v1586_v1  ;;  %v1657_v7 = vadd.f32 %v1656_v3, %v2791_v22 }
 0x712   :  { %v2482_v6 = vpop.f32.mrf.mxu0  ;;  %v2493_v8 = vpop.f32.mrf.mxu1 }
 0x713   :  { %v1730_v46 = vadd.f32 %v2130_v0, %v1587_v4  ;;  %v1737_v49 = vadd.f32 %v2131_v9, %v1657_v7 }
 0x715   :  { %v2136_v47 = vmul.f32 -1.442695, %v1730_v46  ;;  %v2137_v51 = vmul.f32 -1.442695, %v1737_v49 }
 0x717   :  { %2613 = vpow2.f32 %v2136_v47 }
 0x718   :  { %v1726_v48 = vpop.f32.mrf.mxu0  ;;  %2615 = vpow2.f32 %v2137_v51 }
 0x719   :  { %v1727_v56 = vadd.f32 %v1726_v48, %v2797_v30 }
 0x71a   :  { %v2504_v50 = vpop.f32.mrf.mxu0 }
 0x724   :  { %v2614_v52 = vpop.eup %2613 }
 0x725   :  { %v1734_v53 = vadd.f32 1.0, %v2614_v52  ;;  %v2616_v54 = vpop.eup %2615 }
 0x726   :  { %v1741_v55 = vadd.f32 1.0, %v2616_v54 }
 0x727   :  { %2617 = vrcp.f32 %v1734_v53 }
 0x728   :  { %2619 = vrcp.f32 %v1741_v55 }
 0x734   :  { %v2618_v57 = vpop.eup %2617 }
 0x735   :  { %v1744_v59 = vmul.f32 %v2618_v57, %v1727_v56  ;;  %v2620_v61 = vpop.eup %2619 }
 0x736   :  { %v1747_v62 = vsub.f32 1.0, %v2620_v61  ;;  %v1749_v15 = vmul.f32 %v2620_v61, %v3058_v45 }
 0x737   :  { %v1745_v60 = vadd.f32 %v2132_v58, %v1744_v59 }
 0x739   :  { %2621 = vtanh.f32 %v1745_v60 }
 0x746   :  { %v2622_v63 = vpop.eup %2621 }
 0x747   :  { %v1748_v14 = vmul.f32 %v2622_v63, %v1747_v62 }
 0x749   :  { %v1750_v16 = vadd.f32 %v1749_v15, %v1748_v14 }
 0x74b   :  { %2514 = vmatmul.mubr.msk.f32.vlgmr.msra.gmra.mxu1 %vm42_vm1, %v1750_v16  ;;  %2525 = vmatmul.mubr.msk.f32.vlgmr.msra.gmra.mxu0 %vm42_vm1, %v1750_v16 }
 0x74c   :  { %2528 = vmatpush3.msra.mxu1 %v2746_v10  ;;  %2535 = vmatprep.mubr.msk.f32.mxu1 %vm2638_vm0, %v2637_v2  ;;  %v1994_v10 = vld [vmem:[%s3162_s5 + $0x18] sm:$0xff] }
 0x74d   :  { %2529 = vmatprep.subr.mxu1 %v2637_v2  ;;  %2546 = vmatprep.mubr.msk.f32.mxu0 %vm2638_vm0, %v2637_v2 }
 0x74e   :  { %2530 = vmatpush3.msra.mxu1 %v2749_v11  ;;  %2539 = vmatpush3.msra.mxu0 %v1994_v10  ;;  %v1992_v11 = vld [vmem:[%s3162_s5 + $0x8] sm:$0xff] }
 0x74f   :  { %2531 = vmatprep.subr.mxu1 %v2637_v2  ;;  %2540 = vmatprep.subr.mxu0 %v2637_v2 }
 0x750   :  { %2532 = vmatpush3.msra.mxu1 %v2757_v12  ;;  %2541 = vmatpush3.msra.mxu0 %v1993_v17  ;;  %v1991_v12 = vld [vmem:[%s3162_s5] sm:$0xff] }
 0x751   :  { %2533 = vmatprep.subr.mxu1 %v2637_v2  ;;  %2542 = vmatprep.subr.mxu0 %v2637_v2 }
 0x752   :  { %2534 = vmatpush3.msra.mxu1 %v2760_v13  ;;  %2543 = vmatpush3.msra.mxu0 %v1992_v11  ;;  %v12_v13 = vstv %s3163_s6 }
 0x753   :  { %2536 = vmatmul.mubr.msk.f32.vlgmr.msra.gmra.mxu1 %vm42_vm1, %v1750_v16  ;;  %2544 = vmatprep.subr.mxu0 %v2637_v2  ;;  %13 = vst [vmem:[#allocation2] sm:$0x1] %v12_v13 }
 0x754   :  { %2545 = vmatpush3.msra.mxu0 %v1991_v12 }
 0x75a   :  { %v2146_v0 = vld [vmem:[#allocation2] ss:$0 sm:$0xff] }
 0x80b   :  { %v1826_v19 = vpop.f32.mrf.mxu1  ;;  %v1896_v20 = vpop.f32.mrf.mxu0 }
 0x80c   :  { %v1827_v21 = vadd.f32 %v2729_v5, %v1826_v19  ;;  %v1897_v2 = vadd.f32 %v1896_v20, %v2791_v22  ;;  %v2140_v22 = vld [vmem:[%s3161_s2 + $0xe] sm:$0x3] }
 0x80d   :  { %v2515_v23 = vpop.f32.mrf.mxu1  ;;  %v2526_v24 = vpop.f32.mrf.mxu0 }
 0x80e   :  { %v1970_v25 = vadd.f32 %v2138_v18, %v1827_v21  ;;  %v1977_v29 = vadd.f32 %v2139_v27, %v1897_v2 }
 0x810   :  { %v2144_v26 = vmul.f32 -1.442695, %v1970_v25  ;;  %v2145_v32 = vmul.f32 -1.442695, %v1977_v29 }
 0x812   :  { %2623 = vpow2.f32 %v2144_v26 }
 0x813   :  { %v1966_v28 = vpop.f32.mrf.mxu1  ;;  %2625 = vpow2.f32 %v2145_v32 }
 0x814   :  { %v1967_v36 = vadd.f32 %v1966_v28, %v2797_v30 }
 0x815   :  { %v2537_v31 = vpop.f32.mrf.mxu1 }
 0x81f   :  { %v2624_v33 = vpop.eup %2623 }
 0x820   :  { %v1974_v34 = vadd.f32 1.0, %v2624_v33  ;;  %v2626_v5 = vpop.eup %2625 }
 0x821   :  { %v1981_v35 = vadd.f32 1.0, %v2626_v5 }
 0x822   :  { %2627 = vrcp.f32 %v1974_v34 }
 0x823   :  { %2629 = vrcp.f32 %v1981_v35 }
 0x82f   :  { %v2628_v37 = vpop.eup %2627 }
 0x830   :  { %v1984_v38 = vmul.f32 %v2628_v37, %v1967_v36  ;;  %v2630_v40 = vpop.eup %2629 }
 0x831   :  { %v1987_v41 = vsub.f32 1.0, %v2630_v40  ;;  %v1989_v44 = vmul.f32 %v2630_v40, %v1750_v16 }
 0x832   :  { %v1985_v39 = vadd.f32 %v2140_v22, %v1984_v38 }
 0x834   :  { %2631 = vtanh.f32 %v1985_v39 }
 0x841   :  { %v2632_v42 = vpop.eup %2631 }
 0x842   :  { %v1988_v43 = vmul.f32 %v2632_v42, %v1987_v41 }
 0x844   :  { %v1990_v45 = vadd.f32 %v1989_v44, %v1988_v43 }
 0x846   :  { %2547 = vmatmul.mubr.msk.f32.vlgmr.msra.gmra.mxu0 %vm42_vm1, %v1990_v45 }
 0x906   :  { %v2071_v1 = vpop.f32.mrf.mxu0 }
 0x907   :  { %v2072_v30 = vadd.f32 %v2146_v0, %v2071_v1 }
 0x908   :  { %v2548_v3 = vpop.f32.mrf.mxu0 }
 0x909   :  { %v2148_v4 = vmul.f32 -1.442695, %v2072_v30 }
 0x90b   :  { %2633 = vpow2.f32 %v2148_v4 }
 0x918   :  { %v2634_v6 = vpop.eup %2633 }
 0x919   :  { %v2078_v8 = vadd.f32 1.0, %v2634_v6 }
 0x91b   :  { %2635 = vrcp.f32 %v2078_v8 }
 0x928   :  { %v2636_v46 = vpop.eup %2635 }
 0x929   :  { %2082 = vst.msk [vmem:[%s3164_s7] sm:$0x3] %vm2081_vm2, %v2636_v46 }

// kernel: combined_model_forward.2
= control target key start
LH: loop header
LB: loop body
LE: loop exit
PB: predicated region body
PF: predicated region fallthrough
CT: control target
= control target key end

     0   :  { %s7203_s18 = smov 0   ;;  %s11960_s0 = inlined_call_operand.vmem [shape: f32[16,3,256], index: 0, kind: input, shape index: {}]   ;;  %s11961_s1 = inlined_call_operand.vmem [shape: f32[128,3], index: 1, kind: input, shape index: {}]   ;;  %s11962_s2 = inlined_call_operand.vmem [shape: f32[128,1], index: 2, kind: input, shape index: {}]   ;;  %s11963_s3 = inlined_call_operand.vmem [shape: f32[128,96], index: 3, kind: input, shape index: {}]   ;;  %s11964_s4 = inlined_call_operand.vmem [shape: f32[1,96], index: 4, kind: input, shape index: {}]   ;;  %s11965_s5 = inlined_call_operand.vmem [shape: f32[16,96], index: 5, kind: output, shape index: {}]  }
   0x1 LB: > { %s7209_s19 = sadd.s32 4294967295, %s7166_s18   ;;  %p5796_p0 = scmp.ge.s32.totalorder %s7166_s18, 1  ;;  %s7166_s18 = sphi %s7203_s18, %s15_s18  }
   0x2   : > { %p189_p1 = scmp.lt.s32.totalorder %s7166_s18, 3 }
   0x4   : > { %p190_p2 = pnand %p5796_p0, %p189_p1 }
   0x6   : > { %193 = sbr.rel (%p190_p2) target bundleno = 1309 (0x51d), region = 40 }
   0xb   : > { %v238_v0 = vld [vmem:[%s11961_s1 + $0x10] sm:$0xff]  ;;  %v236_v1 = vld [vmem:[%s11961_s1] sm:$0xff]  ;;  %v7168_v2 = vmov 1   ;;  %v7169_v3 = vmov 0   ;;  %v239_v4 = vld [vmem:[%s11961_s1 + $0x18] sm:$0xff]  ;;  %v7170_v12 = vmov 2   ;;  %v11966_v28 = vlaneseq }
   0xc   : > { %6127 = vset.pattern.permute.xlu0 %v7168_v2  ;;  %6126 = vset.pattern.permute.xlu1 %v7169_v3  ;;  %v241_v5 = vld [vmem:[%s11961_s1 + $0x28] sm:$0xff]  ;;  %v7229_v6 = vld [vmem:[%s11961_s1 + $0x38] sm:$0xff]  ;;  %v240_v13 = vld [vmem:[%s11961_s1 + $0x20] sm:$0xff]  ;;  %s5797_s20 = sshll.u32 %s7209_s19, 3  ;;  %vm4999_vm0 = vcmask 130112   ;;  %vm5006_vm1 = vcmask 195712  }
   0xd   : > { %416 = vperm.xlu1 %6126, %v238_v0   ;;  %885 = vperm.xlu0 %6127, %v236_v1   ;;  %v7236_v7 = vld [vmem:[%s11961_s1 + $0x48] sm:$0xff]  ;;  %v7243_v8 = vld [vmem:[%s11961_s1 + $0x58] sm:$0xff]  ;;  %v242_v14 = vld [vmem:[%s11961_s1 + $0x30] sm:$0xff]  ;;  %p218_p3 = scmp.lt.s32.totalorder %s5797_s20, 15  ;;  %v7322_v30 = vshrl.u32 %v11966_v28, 7  ;;  %vm5013_vm2 = vcmask 261312  }
   0xe   : > { %v7250_v9 = vld [vmem:[%s11961_s1 + $0x68] sm:$0xff]  ;;  %v7257_v10 = vld [vmem:[%s11961_s1 + $0x78] sm:$0xff]  ;;  %v244_v15 = vld [vmem:[%s11961_s1 + $0x40] sm:$0xff]  ;;  %vm5020_vm3 = vcmask 326912   ;;  %vm5027_vm4 = vcmask 392512   ;;  %vm5034_vm5 = vcmask 458112  }
   0xf   : > { %v237_v11 = vld [vmem:[%s11961_s1 + $0x8] sm:$0xff]  ;;  %v246_v16 = vld [vmem:[%s11961_s1 + $0x50] sm:$0xff]  ;;  %v248_v17 = vld [vmem:[%s11961_s1 + $0x60] sm:$0xff]  ;;  %s13547_s20 = smov (!%p218_p3, %s5797_s20), 15  ;;  %12445 = vst [vmem:[#allocation2_spill] sm:$0xff] %v7322_v30  ;;  %v7333_v32 = vsub.s32 0, %v7322_v30 }
  0x10   : > { %v7283_v18 = vld [vmem:[%s11961_s1 + $0x70] sm:$0xff]  ;;  %v2180_v19 = vld [vmem:[%s11962_s2] sm:$0xff]  ;;  %v2183_v21 = vld [vmem:[%s11962_s2 + $0x18] sm:$0xff]  ;;  %s6060_s25 = sshll.u32 %s13547_s20, 3  ;;  %v7336_v33 = vsub.s32 4, %v7322_v30  ;;  %v7343_v35 = vsub.s32 1, %v7322_v30 }
  0x11   : > { %421 = vperm.xlu1 %6126, %v239_v4   ;;  %897 = vperm.xlu0 %6127, %v239_v4   ;;  %v2182_v20 = vld [vmem:[%s11962_s2 + $0x10] sm:$0xff]  ;;  %v2181_v22 = vld [vmem:[%s11962_s2 + $0x8] sm:$0xff]  ;;  %v2184_v23 = vld [vmem:[%s11962_s2 + $0x20] sm:$0xff]  ;;  %s7327_s30 = scalar_lea.vmem %s11960_s0, %s6060_s25  ;;  %12446 = vst [vmem:[#allocation3_spill] sm:$0xff] %v7333_v32  ;;  %v7346_v36 = vsub.s32 5, %v7322_v30  ;;  %v7393_v54 = vsub.s32 2, %v7322_v30 }
  0x12   : > { %v2185_v24 = vld [vmem:[%s11962_s2 + $0x28] sm:$0xff]  ;;  %v2186_v25 = vld [vmem:[%s11962_s2 + $0x30] sm:$0xff]  ;;  %v2187_v26 = vld [vmem:[%s11962_s2 + $0x38] sm:$0xff]  ;;  %12447 = vst [vmem:[#allocation4_spill] sm:$0xff] %v7336_v33  ;;  %v7396_v55 = vsub.s32 6, %v7322_v30  ;;  %vm5041_vm6 = vcmask 523712  }
  0x13   : > { %v2188_v27 = vld [vmem:[%s11962_s2 + $0x40] sm:$0xff]  ;;  %v2189_v29 = vld [vmem:[%s11962_s2 + $0x48] sm:$0xff]  ;;  %v2190_v31 = vld [vmem:[%s11962_s2 + $0x50] sm:$0xff]  ;;  %12448 = vst [vmem:[#allocation5_spill] sm:$0xff] %v7343_v35  ;;  %vm5048_vm7 = vcmask 589312   ;;  %vm5055_vm8 = vcmask 654912  }
  0x14   : > { %v7340_v34 = vld [vmem:[%s7327_s30] sm:$0x77]  ;;  %12449 = vst [vmem:[#allocation6_spill] sm:$0xff] %v7346_v36  ;;  %v7349_v37 = vld [vmem:[%s7327_s30 + $0x8] sm:$0x77]  ;;  %v2191_v38 = vld [vmem:[%s11962_s2 + $0x58] sm:$0xff] }
  0x15   : > { %431 = vperm.xlu1 %6126, %v241_v5   ;;  %905 = vperm.xlu0 %6127, %v241_v5   ;;  %v263_v39 = vrot.slane %v7340_v34, %v7333_v32  ;;  %v267_v40 = vrot.slane %v7340_v34, %v7336_v33  ;;  %v743_v41 = vrot.slane %v7340_v34, %v7343_v35  ;;  %v7367_v45 = vld [vmem:[%s7327_s30 + $0x10] sm:$0x77]  ;;  %v2193_v46 = vld [vmem:[%s11962_s2 + $0x68] sm:$0xff]  ;;  %v7383_v51 = vld [vmem:[%s7327_s30 + $0x18] sm:$0x77]  ;;  %vm12444_vm9 = vcmask 720512  }
  0x16   : > { %v747_v42 = vrot.slane %v7340_v34, %v7346_v36  ;;  %v271_v43 = vrot.slane %v7349_v37, %v7333_v32  ;;  %v275_v44 = vrot.slane %v7349_v37, %v7336_v33  ;;  %v751_v49 = vrot.slane %v7349_v37, %v7343_v35  ;;  %12454 = vst [vmem:[#allocation11_spill] sm:$0xff] %v7393_v54  ;;  %v7399_v56 = vld [vmem:[%s7327_s30 + $0x20] sm:$0x77]  ;;  %p224_p4 = scmp.lt.s32.totalorder %s7209_s19, 1 }
  0x17   : > { %v7373_v47 = vrot.slane %v263_v39, %v7333_v32  ;;  %v7376_v48 = vrot.slane %v267_v40, %v7333_v32  ;;  %v755_v50 = vrot.slane %v7349_v37, %v7346_v36  ;;  %v7387_v52 = vrot.slane %v743_v41, %v7343_v35  ;;  %12455 = vst [vmem:[#allocation12_spill] sm:$0xff] %v7396_v55  ;;  %v7502_v40 = vld [vmem:[%s7327_s30 + $0x30] sm:$0x77]  ;;  %v2192_v41 = vld [vmem:[%s11962_s2 + $0x60] sm:$0xff] }
  0x18   : > { %v7390_v53 = vrot.slane %v747_v42, %v7343_v35  ;;  %v7402_v57 = vrot.slane %v271_v43, %v7333_v32  ;;  %v7405_v58 = vrot.slane %v275_v44, %v7333_v32  ;;  %v279_v59 = vrot.slane %v7367_v45, %v7333_v32  ;;  %s13549_s19 = smov (!%p224_p4, %s7209_s19), 1 }
  0x19   : > { %441 = vperm.xlu1 %6126, %v7229_v6   ;;  %913 = vperm.xlu0 %6127, %v7229_v6   ;;  %12450 = vst [vmem:[#allocation7_spill] sm:$0xff] %v7373_v47  ;;  %12451 = vst [vmem:[#allocation8_spill] sm:$0xff] %v7376_v48  ;;  %v283_v60 = vrot.slane %v7367_v45, %v7336_v33  ;;  %v759_v61 = vrot.slane %v7367_v45, %v7343_v35  ;;  %vm5069_vm10 = vcmask 786112   ;;  %vm5076_vm11 = vcmask 851712   ;;  %s5800_s29 = sshll.u32 %s13549_s19, 3 }
  0x1a   : > { %12452 = vst [vmem:[#allocation9_spill] sm:$0xff] %v7387_v52  ;;  %12453 = vst [vmem:[#allocation10_spill] sm:$0xff] %v7390_v53  ;;  %v763_v62 = vrot.slane %v7367_v45, %v7346_v36  ;;  %v287_v63 = vrot.slane %v7383_v51, %v7333_v32  ;;  %v779_v39 = vrot.slane %v7399_v56, %v7346_v36  ;;  %vm5083_vm12 = vcmask 917312   ;;  %s227_s9 = scalar_lea.vmem %s11965_s5, %s5800_s29 }
  0x1b   : > { %12456 = vst [vmem:[#allocation13_spill] sm:$0xff] %v7402_v57  ;;  %12457 = vst [vmem:[#allocation14_spill] sm:$0xff] %v7405_v58  ;;  %v1487_v42 = vrot.slane %v7383_v51, %v7393_v54  ;;  %v1491_v43 = vrot.slane %v7383_v51, %v7396_v55  ;;  %vm5090_vm13 = vcmask 982912   ;;  %vm5097_vm14 = vcmask 1048512  }
  0x1c   : > { %vm5652_vm15 = vcmask 1041409  }
  0x1d   : > { %451 = vperm.xlu1 %6126, %v7236_v7   ;;  %921 = vperm.xlu0 %6127, %v7236_v7  }
  0x21   : > { %461 = vperm.xlu1 %6126, %v7243_v8   ;;  %929 = vperm.xlu0 %6127, %v7243_v8  }
  0x25   : > { %471 = vperm.xlu1 %6126, %v7250_v9   ;;  %937 = vperm.xlu0 %6127, %v7250_v9  }
  0x29   : > { %481 = vperm.xlu1 %6126, %v7257_v10   ;;  %945 = vperm.xlu0 %6127, %v7257_v10  }
  0x2d   : > { %6128 = vset.pattern.permute.xlu1 %v7168_v2  ;;  %6130 = vset.pattern.permute.xlu0 %v7170_v12  ;;  %v767_v2 = vrot.slane %v7383_v51, %v7343_v35 }
  0x2e   : > { %889 = vperm.xlu1 %6128, %v237_v11   ;;  %1609 = vperm.xlu0 %6130, %v237_v11  }
  0x32   : > { %893 = vperm.xlu1 %6128, %v238_v0   ;;  %1621 = vperm.xlu0 %6130, %v240_v13  }
  0x36   : > { %901 = vperm.xlu1 %6128, %v240_v13   ;;  %6131 = vset.pattern.permute.xlu0 %v7169_v3 }
  0x37   : > { %406 = vperm.xlu0 %6131, %v236_v1  }
  0x3a   : > { %909 = vperm.xlu1 %6128, %v242_v14  }
  0x3b   : > { %411 = vperm.xlu0 %6131, %v237_v11   ;;  %v1471_v11 = vrot.slane %v7349_v37, %v7393_v54 }
  0x3e   : > { %917 = vperm.xlu1 %6128, %v244_v15  }
  0x3f   : > { %426 = vperm.xlu0 %6131, %v240_v13   ;;  %v1475_v13 = vrot.slane %v7349_v37, %v7396_v55 }
  0x41   : > { %v7493_v37 = vrot.slane %v1475_v13, %v7393_v54 }
  0x42   : > { %925 = vperm.xlu1 %6128, %v246_v16  }
  0x43   : > { %436 = vperm.xlu0 %6131, %v242_v14   ;;  %12475 = vst [vmem:[#allocation32_spill] sm:$0xff] %v7493_v37 }
  0x46   : > { %933 = vperm.xlu1 %6128, %v248_v17  }
  0x47   : > { %446 = vperm.xlu0 %6131, %v244_v15  }
  0x4a   : > { %941 = vperm.xlu1 %6128, %v7283_v18  }
  0x4b   : > { %456 = vperm.xlu0 %6131, %v246_v16  }
  0x4e   : > { %6129 = vset.pattern.permute.xlu1 %v7170_v12 }
  0x4f   : > { %1605 = vperm.xlu1 %6129, %v236_v1   ;;  %466 = vperm.xlu0 %6131, %v248_v17   ;;  %v2195_v1 = vld [vmem:[%s11962_s2 + $0x78] sm:$0xff] }
  0x53   : > { %1613 = vperm.xlu1 %6129, %v238_v0   ;;  %476 = vperm.xlu0 %6131, %v7283_v18   ;;  %v291_v0 = vrot.slane %v7383_v51, %v7336_v33 }
  0x57   : > { %1617 = vperm.xlu1 %6129, %v239_v4   ;;  %2198 = vperm.xlu0 %6131, %v2180_v19   ;;  %v771_v4 = vrot.slane %v7383_v51, %v7346_v36  ;;  %v7461_v19 = vrot.slane %v291_v0, %v7333_v32  ;;  %v315_v0 = vrot.slane %v7502_v40, %v7336_v33 }
  0x59   : > { %12465 = vst [vmem:[#allocation22_spill] sm:$0xff] %v7461_v19 }
  0x5b   : > { %1625 = vperm.xlu1 %6129, %v241_v5   ;;  %2208 = vperm.xlu0 %6131, %v2182_v20   ;;  %v295_v5 = vrot.slane %v7399_v56, %v7333_v32 }
  0x5f   : > { %6132 = vset.pattern.permute.xlu1 %v7169_v3  ;;  %2213 = vperm.xlu0 %6131, %v2183_v21  }
  0x60   : > { %2203 = vperm.xlu1 %6132, %v2181_v22   ;;  %v7468_v22 = vrot.slane %v767_v2, %v7343_v35 }
  0x62   : > { %12468 = vst [vmem:[#allocation25_spill] sm:$0xff] %v7468_v22 }
  0x63   : > { %2218 = vperm.xlu0 %6131, %v2184_v23   ;;  %v7471_v23 = vrot.slane %v771_v4, %v7343_v35  ;;  %v2194_v4 = vld [vmem:[%s11962_s2 + $0x70] sm:$0xff] }
  0x64   : > { %6133 = vset.pattern.permute.xlu1 %v7170_v12  ;;  %v7441_v12 = vrot.slane %v755_v50, %v7343_v35  ;;  %v1495_v50 = vrot.slane %v7399_v56, %v7393_v54 }
  0x65   : > { %1629 = vperm.xlu1 %6133, %v242_v14   ;;  %v7446_v14 = vrot.slane %v279_v59, %v7333_v32  ;;  %12469 = vst [vmem:[#allocation26_spill] sm:$0xff] %v7471_v23  ;;  %v1499_v59 = vrot.slane %v7399_v56, %v7396_v55 }
  0x66   : > { %12459 = vst [vmem:[#allocation16_spill] sm:$0xff] %v7441_v12 }
  0x67   : > { %2223 = vperm.xlu0 %6131, %v2185_v24   ;;  %12460 = vst [vmem:[#allocation17_spill] sm:$0xff] %v7446_v14  ;;  %v7474_v24 = vrot.slane %v295_v5, %v7333_v32  ;;  %v7546_v5 = vrot.slane %v1487_v42, %v7393_v54 }
  0x69   : > { %1633 = vperm.xlu1 %6133, %v7229_v6   ;;  %v299_v6 = vrot.slane %v7399_v56, %v7336_v33  ;;  %12470 = vst [vmem:[#allocation27_spill] sm:$0xff] %v7474_v24  ;;  %12482 = vst [vmem:[#allocation39_spill] sm:$0xff] %v7546_v5 }
  0x6b   : > { %2228 = vperm.xlu0 %6131, %v2186_v25   ;;  %v7477_v25 = vrot.slane %v299_v6, %v7333_v32  ;;  %v7549_v6 = vrot.slane %v1491_v43, %v7393_v54  ;;  %v7583_v43 = vrot.slane %v315_v0, %v7333_v32 }
  0x6d   : > { %1637 = vperm.xlu1 %6133, %v244_v15   ;;  %v7449_v15 = vrot.slane %v283_v60, %v7333_v32  ;;  %12471 = vst [vmem:[#allocation28_spill] sm:$0xff] %v7477_v25  ;;  %12483 = vst [vmem:[#allocation40_spill] sm:$0xff] %v7549_v6 }
  0x6e   : > { %12495 = vst [vmem:[#allocation52_spill] sm:$0xff] %v7583_v43 }
  0x6f   : > { %2233 = vperm.xlu0 %6131, %v2187_v26   ;;  %12461 = vst [vmem:[#allocation18_spill] sm:$0xff] %v7449_v15  ;;  %v233_v26 = vld [vmem:[%s7327_s30 + $0x28] sm:$0x77] }
  0x70   : > { %v303_v44 = vrot.slane %v233_v26, %v7333_v32  ;;  %v783_v60 = vrot.slane %v233_v26, %v7343_v35  ;;  %v1503_v51 = vrot.slane %v233_v26, %v7393_v54 }
  0x71   : > { %1641 = vperm.xlu1 %6133, %v7236_v7   ;;  %v1463_v7 = vrot.slane %v7340_v34, %v7393_v54 }
  0x73   : > { %2238 = vperm.xlu0 %6131, %v2188_v27   ;;  %v7482_v27 = vrot.slane %v1463_v7, %v7393_v54  ;;  %v7552_v7 = vrot.slane %v303_v44, %v7333_v32 }
  0x75   : > { %1645 = vperm.xlu1 %6133, %v246_v16   ;;  %v7452_v16 = vrot.slane %v759_v61, %v7343_v35  ;;  %12472 = vst [vmem:[#allocation29_spill] sm:$0xff] %v7482_v27  ;;  %v787_v61 = vrot.slane %v233_v26, %v7346_v36  ;;  %12484 = vst [vmem:[#allocation41_spill] sm:$0xff] %v7552_v7 }
  0x77   : > { %2243 = vperm.xlu0 %6131, %v2189_v29   ;;  %12462 = vst [vmem:[#allocation19_spill] sm:$0xff] %v7452_v16 }
  0x79   : > { %1649 = vperm.xlu1 %6133, %v7243_v8   ;;  %v1467_v8 = vrot.slane %v7340_v34, %v7396_v55  ;;  %v775_v34 = vrot.slane %v7399_v56, %v7343_v35 }
  0x7b   : > { %2248 = vperm.xlu0 %6131, %v2190_v31   ;;  %v7485_v29 = vrot.slane %v1467_v8, %v7393_v54  ;;  %v7488_v31 = vrot.slane %v1471_v11, %v7393_v54  ;;  %v7537_v2 = vrot.slane %v775_v34, %v7343_v35  ;;  %v7565_v34 = vrot.slane %v1499_v59, %v7393_v54 }
  0x7d   : > { %1653 = vperm.xlu1 %6133, %v248_v17   ;;  %v7455_v17 = vrot.slane %v763_v62, %v7343_v35  ;;  %12473 = vst [vmem:[#allocation30_spill] sm:$0xff] %v7485_v29  ;;  %12474 = vst [vmem:[#allocation31_spill] sm:$0xff] %v7488_v31  ;;  %v1507_v62 = vrot.slane %v233_v26, %v7396_v55 }
  0x7e   : > { %12480 = vst [vmem:[#allocation37_spill] sm:$0xff] %v7537_v2  ;;  %12489 = vst [vmem:[#allocation46_spill] sm:$0xff] %v7565_v34 }
  0x7f   : > { %2253 = vperm.xlu0 %6131, %v2191_v38   ;;  %12463 = vst [vmem:[#allocation20_spill] sm:$0xff] %v7455_v17  ;;  %v1479_v38 = vrot.slane %v7367_v45, %v7393_v54 }
  0x81   : > { %1657 = vperm.xlu1 %6133, %v7250_v9   ;;  %v7436_v9 = vrot.slane %v751_v49, %v7343_v35 }
  0x83   : > { %2263 = vperm.xlu0 %6131, %v2193_v46   ;;  %12458 = vst [vmem:[#allocation15_spill] sm:$0xff] %v7436_v9  ;;  %v307_v46 = vrot.slane %v233_v26, %v7336_v33  ;;  %v7562_v26 = vrot.slane %v1495_v50, %v7393_v54 }
  0x85   : > { %1661 = vperm.xlu1 %6133, %v7283_v18   ;;  %v7458_v18 = vrot.slane %v287_v63, %v7333_v32  ;;  %v311_v63 = vrot.slane %v7502_v40, %v7333_v32  ;;  %v7555_v8 = vrot.slane %v307_v46, %v7333_v32  ;;  %12488 = vst [vmem:[#allocation45_spill] sm:$0xff] %v7562_v26 }
  0x87   : > { %2273 = vperm.xlu0 %6131, %v2195_v1   ;;  %12464 = vst [vmem:[#allocation21_spill] sm:$0xff] %v7458_v18  ;;  %v7531_v1 = vrot.slane %v1479_v38, %v7393_v54  ;;  %12485 = vst [vmem:[#allocation42_spill] sm:$0xff] %v7555_v8  ;;  %v7568_v38 = vrot.slane %v783_v60, %v7343_v35  ;;  %v7580_v42 = vrot.slane %v311_v63, %v7333_v32 }
  0x88   : > { %v7463_v20 = vpop.permute.xlu1 %416  ;;  %v7465_v21 = vpop.permute.xlu0 %885 }
  0x89   : > { %12466 = vst [vmem:[#allocation23_spill] sm:$0xff] %v7463_v20  ;;  %12467 = vst [vmem:[#allocation24_spill] sm:$0xff] %v7465_v21  ;;  %1665 = vperm.xlu1 %6133, %v7257_v10   ;;  %v1483_v10 = vrot.slane %v7367_v45, %v7396_v55  ;;  %v7587_v44 = vmul.f32 %v7465_v21, %v7387_v52  ;;  %v7591_v46 = vmul.f32 %v7465_v21, %v7390_v53 }
  0x8a   : > { %12478 = vst [vmem:[#allocation35_spill] sm:$0xff] %v7531_v1  ;;  %12490 = vst [vmem:[#allocation47_spill] sm:$0xff] %v7568_v38  ;;  %v7595_v50 = vmul.f32 %v7465_v21, %v7436_v9  ;;  %v7599_v59 = vmul.f32 %v7465_v21, %v7441_v12  ;;  %v7603_v60 = vmul.f32 %v7463_v20, %v7402_v57 }
  0x8b   : > { %v7534_v56 = vrot.slane %v1483_v10, %v7393_v54  ;;  %v7571_v10 = vrot.slane %v787_v61, %v7343_v35  ;;  %12494 = vst [vmem:[#allocation51_spill] sm:$0xff] %v7580_v42  ;;  %12496 = vst [vmem:[#allocation53_spill] sm:$0xff] %v7587_v44  ;;  %v7607_v61 = vmul.f32 %v7463_v20, %v7405_v58 }
  0x8c   : > { %v7513_v45 = vpop.permute.xlu1 %421  ;;  %v7515_v49 = vpop.permute.xlu0 %897  ;;  %12497 = vst [vmem:[#allocation54_spill] sm:$0xff] %v7591_v46  ;;  %12498 = vst [vmem:[#allocation55_spill] sm:$0xff] %v7595_v50  ;;  %v7627_v28 = vmul.f32 %v7465_v21, %v7455_v17  ;;  %v7631_v30 = vmul.f32 %v7465_v21, %v7468_v22  ;;  %v7635_v33 = vmul.f32 %v7465_v21, %v7471_v23 }
  0x8d   : > { %12476 = vst [vmem:[#allocation33_spill] sm:$0xff] %v7513_v45  ;;  %12477 = vst [vmem:[#allocation34_spill] sm:$0xff] %v7515_v49  ;;  %6134 = vset.pattern.permute.xlu1 %v7169_v3  ;;  %v7540_v3 = vrot.slane %v779_v39, %v7343_v35  ;;  %v7574_v39 = vrot.slane %v1503_v51, %v7393_v54  ;;  %v7611_v51 = vmul.f32 %v7463_v20, %v7373_v47 }
  0x8e   : > { %2258 = vperm.xlu1 %6134, %v2192_v41   ;;  %12479 = vst [vmem:[#allocation36_spill] sm:$0xff] %v7534_v56  ;;  %12491 = vst [vmem:[#allocation48_spill] sm:$0xff] %v7571_v10  ;;  %v7577_v41 = vrot.slane %v1507_v62, %v7393_v54  ;;  %v7615_v62 = vmul.f32 %v7463_v20, %v7376_v48  ;;  %v522_v32 = vmul.f32 %v7513_v45, %v7402_v57 }
  0x8f   : > { %12481 = vst [vmem:[#allocation38_spill] sm:$0xff] %v7540_v3  ;;  %12492 = vst [vmem:[#allocation49_spill] sm:$0xff] %v7574_v39  ;;  %v523_v55 = vmul.f32 %v7513_v45, %v7405_v58  ;;  %v986_v54 = vmul.f32 %v7515_v49, %v7436_v9  ;;  %v987_v43 = vmul.f32 %v7515_v49, %v7441_v12 }
  0x90   : > { %v7557_v11 = vpop.permute.xlu1 %431  ;;  %v7559_v13 = vpop.permute.xlu0 %905  ;;  %12493 = vst [vmem:[#allocation50_spill] sm:$0xff] %v7577_v41  ;;  %12499 = vst [vmem:[#allocation56_spill] sm:$0xff] %v7599_v59  ;;  %v490_v42 = vmul.f32 %v7513_v45, %v7373_v47  ;;  %v491_v41 = vmul.f32 %v7513_v45, %v7376_v48  ;;  %v954_v39 = vmul.f32 %v7515_v49, %v7387_v52 }
  0x91   : > { %12486 = vst [vmem:[#allocation43_spill] sm:$0xff] %v7557_v11  ;;  %12487 = vst [vmem:[#allocation44_spill] sm:$0xff] %v7559_v13  ;;  %v955_v34 = vmul.f32 %v7515_v49, %v7390_v53  ;;  %v554_v26 = vmul.f32 %v7513_v45, %v7446_v14  ;;  %v7667_v50 = vmul.f32 %v7463_v20, %v7446_v14 }
  0x92   : > { %2268 = vperm.xlu1 %6134, %v2194_v4   ;;  %12500 = vst [vmem:[#allocation57_spill] sm:$0xff] %v7603_v60  ;;  %12501 = vst [vmem:[#allocation58_spill] sm:$0xff] %v7607_v61  ;;  %v7623_v4 = vmul.f32 %v7465_v21, %v7452_v16  ;;  %v7671_v46 = vmul.f32 %v7463_v20, %v7449_v15  ;;  %v7675_v44 = vmul.f32 %v7465_v21, %v7537_v2 }
  0x93   : > { %12502 = vst [vmem:[#allocation59_spill] sm:$0xff] %v7611_v51  ;;  %12503 = vst [vmem:[#allocation60_spill] sm:$0xff] %v7615_v62  ;;  %v7679_v62 = vmul.f32 %v7465_v21, %v7540_v3  ;;  %v7689_v51 = vadd.f32 %v986_v54, %v522_v32  ;;  %v7691_v61 = vadd.f32 %v987_v43, %v523_v55 }
  0x94   : > { %v7617_v63 = vpop.permute.xlu1 %441  ;;  %v7619_v0 = vpop.permute.xlu0 %913  ;;  %12506 = vst [vmem:[#allocation63_spill] sm:$0xff] %v7623_v4  ;;  %12507 = vst [vmem:[#allocation64_spill] sm:$0xff] %v7627_v28  ;;  %v1019_v28 = vmul.f32 %v7515_v49, %v7455_v17  ;;  %v7695_v60 = vadd.f32 %v955_v34, %v491_v41  ;;  %v7703_v5 = vmul.f32 %v7463_v20, %v7458_v18 }
  0x95   : > { %12504 = vst [vmem:[#allocation61_spill] sm:$0xff] %v7617_v63  ;;  %12505 = vst [vmem:[#allocation62_spill] sm:$0xff] %v7619_v0  ;;  %v7707_v56 = vmul.f32 %v7463_v20, %v7461_v19  ;;  %v526_v55 = vmul.f32 %v7557_v11, %v7402_v57  ;;  %v7731_v41 = vmul.f32 %v7463_v20, %v7477_v25 }
  0x96   : > { %12508 = vst [vmem:[#allocation65_spill] sm:$0xff] %v7631_v30  ;;  %12509 = vst [vmem:[#allocation66_spill] sm:$0xff] %v7635_v33  ;;  %v555_v33 = vmul.f32 %v7513_v45, %v7449_v15  ;;  %v1018_v30 = vmul.f32 %v7515_v49, %v7452_v16  ;;  %v587_v43 = vmul.f32 %v7513_v45, %v7461_v19 }
  0x97   : > { %12512 = vst [vmem:[#allocation69_spill] sm:$0xff] %v7667_v50  ;;  %12513 = vst [vmem:[#allocation70_spill] sm:$0xff] %v7671_v46  ;;  %v958_v50 = vmul.f32 %v7559_v13, %v7387_v52  ;;  %v959_v46 = vmul.f32 %v7559_v13, %v7390_v53 }
  0x98   : > { %v7661_v4 = vpop.permute.xlu1 %451  ;;  %v7663_v59 = vpop.permute.xlu0 %921  ;;  %12514 = vst [vmem:[#allocation71_spill] sm:$0xff] %v7675_v44  ;;  %12515 = vst [vmem:[#allocation72_spill] sm:$0xff] %v7679_v62  ;;  %v7693_v44 = vadd.f32 %v954_v39, %v490_v42  ;;  %v7697_v62 = vadd.f32 %v1018_v30, %v554_v26  ;;  %v7699_v6 = vadd.f32 %v1019_v28, %v555_v33 }
  0x99   : > { %12510 = vst [vmem:[#allocation67_spill] sm:$0xff] %v7661_v4  ;;  %12511 = vst [vmem:[#allocation68_spill] sm:$0xff] %v7663_v59  ;;  %v494_v4 = vmul.f32 %v7557_v11, %v7373_v47  ;;  %v495_v59 = vmul.f32 %v7557_v11, %v7376_v48  ;;  %v527_v30 = vmul.f32 %v7557_v11, %v7405_v58 }
  0x9a   : > { %12516 = vst [vmem:[#allocation73_spill] sm:$0xff] %v7689_v51  ;;  %12517 = vst [vmem:[#allocation74_spill] sm:$0xff] %v7691_v61  ;;  %v990_v28 = vmul.f32 %v7559_v13, %v7436_v9  ;;  %v991_v33 = vmul.f32 %v7559_v13, %v7441_v12  ;;  %v7727_v39 = vmul.f32 %v7463_v20, %v7474_v24 }
  0x9b   : > { %12518 = vst [vmem:[#allocation75_spill] sm:$0xff] %v7693_v44  ;;  %12519 = vst [vmem:[#allocation76_spill] sm:$0xff] %v7695_v60  ;;  %v7721_v26 = vadd.f32 %v958_v50, %v494_v4  ;;  %v7723_v34 = vadd.f32 %v959_v46, %v495_v59  ;;  %v586_v42 = vmul.f32 %v7513_v45, %v7458_v18 }
  0x9c   : > { %12520 = vst [vmem:[#allocation77_spill] sm:$0xff] %v7697_v62  ;;  %12521 = vst [vmem:[#allocation78_spill] sm:$0xff] %v7699_v6  ;;  %v7709_v32 = vpop.permute.xlu1 %461  ;;  %v7711_v54 = vpop.permute.xlu0 %929  ;;  %v1050_v50 = vmul.f32 %v7515_v49, %v7468_v22  ;;  %v1051_v46 = vmul.f32 %v7515_v49, %v7471_v23  ;;  %v558_v59 = vmul.f32 %v7557_v11, %v7446_v14 }
  0x9d   : > { %12522 = vst [vmem:[#allocation79_spill] sm:$0xff] %v7709_v32  ;;  %12523 = vst [vmem:[#allocation80_spill] sm:$0xff] %v7711_v54  ;;  %v559_v4 = vmul.f32 %v7557_v11, %v7449_v15  ;;  %v1022_v54 = vmul.f32 %v7559_v13, %v7452_v16  ;;  %v1023_v32 = vmul.f32 %v7559_v13, %v7455_v17 }
  0x9e   : > { %12524 = vst [vmem:[#allocation81_spill] sm:$0xff] %v7721_v26  ;;  %12525 = vst [vmem:[#allocation82_spill] sm:$0xff] %v7723_v34  ;;  %v7753_v6 = vadd.f32 %v990_v28, %v526_v55  ;;  %v7755_v62 = vadd.f32 %v991_v33, %v527_v30  ;;  %v618_v60 = vmul.f32 %v7513_v45, %v7474_v24 }
  0x9f   : > { %12526 = vst [vmem:[#allocation83_spill] sm:$0xff] %v7727_v39  ;;  %12527 = vst [vmem:[#allocation84_spill] sm:$0xff] %v7731_v41  ;;  %v619_v44 = vmul.f32 %v7513_v45, %v7477_v25  ;;  %v1082_v61 = vmul.f32 %v7515_v49, %v7537_v2  ;;  %v1083_v51 = vmul.f32 %v7515_v49, %v7540_v3  ;;  %v12567_v41 = vld [vmem:[#allocation60_spill] sm:$0xff] }
  0xa0   : > { %v7749_v34 = vpop.permute.xlu1 %471  ;;  %v7751_v26 = vpop.permute.xlu0 %937  ;;  %12530 = vst [vmem:[#allocation87_spill] sm:$0xff] %v7753_v6  ;;  %12531 = vst [vmem:[#allocation88_spill] sm:$0xff] %v7755_v62  ;;  %v795_v55 = vrot.slane %v7502_v40, %v7346_v36  ;;  %v7769_v30 = vadd.f32 %v1050_v50, %v586_v42  ;;  %v7771_v28 = vadd.f32 %v1051_v46, %v587_v43 }
  0xa1   : > { %12528 = vst [vmem:[#allocation85_spill] sm:$0xff] %v7749_v34  ;;  %12529 = vst [vmem:[#allocation86_spill] sm:$0xff] %v7751_v26  ;;  %v791_v34 = vrot.slane %v7502_v40, %v7343_v35  ;;  %v7775_v33 = vmul.f32 %v7465_v21, %v7568_v38  ;;  %v7779_v26 = vmul.f32 %v7465_v21, %v7571_v10  ;;  %v12563_v10 = vld [vmem:[#allocation58_spill] sm:$0xff] }
  0xa2   : > { %12532 = vst [vmem:[#allocation89_spill] sm:$0xff] %v7769_v30  ;;  %12533 = vst [vmem:[#allocation90_spill] sm:$0xff] %v7771_v28  ;;  %v7781_v45 = vadd.f32 %v1022_v54, %v558_v59  ;;  %v7783_v49 = vadd.f32 %v1023_v32, %v559_v4  ;;  %v7787_v62 = vmul.f32 %v7463_v20, %v7552_v7 }
  0xa3   : > { %12534 = vst [vmem:[#allocation91_spill] sm:$0xff] %v7775_v33  ;;  %12535 = vst [vmem:[#allocation92_spill] sm:$0xff] %v7779_v26  ;;  %v7791_v40 = vmul.f32 %v7463_v20, %v7555_v8  ;;  %v590_v43 = vmul.f32 %v7557_v11, %v7458_v18  ;;  %v591_v50 = vmul.f32 %v7557_v11, %v7461_v19  ;;  %v12565_v8 = vld [vmem:[#allocation59_spill] sm:$0xff] }
  0xa4   : > { %12536 = vst [vmem:[#allocation93_spill] sm:$0xff] %v7781_v45  ;;  %12537 = vst [vmem:[#allocation94_spill] sm:$0xff] %v7783_v49  ;;  %v7793_v42 = vpop.permute.xlu1 %481  ;;  %v1054_v32 = vmul.f32 %v7559_v13, %v7468_v22  ;;  %v1055_v54 = vmul.f32 %v7559_v13, %v7471_v23  ;;  %v7803_v46 = vpop.permute.xlu0 %945  ;;  %v7805_v59 = vadd.f32 %v1082_v61, %v618_v60 }
  0xa5   : > { %12538 = vst [vmem:[#allocation95_spill] sm:$0xff] %v7787_v62  ;;  %12539 = vst [vmem:[#allocation96_spill] sm:$0xff] %v7791_v40  ;;  %v7807_v4 = vadd.f32 %v1083_v51, %v619_v44  ;;  %v7813_v20 = vrot.slane %v795_v55, %v7343_v35  ;;  %v530_v11 = vmul.f32 %v7617_v63, %v7402_v57 }
  0xa6   : > { %12540 = vst [vmem:[#allocation97_spill] sm:$0xff] %v7793_v42  ;;  %12541 = vst [vmem:[#allocation98_spill] sm:$0xff] %v7803_v46  ;;  %v7810_v42 = vrot.slane %v791_v34, %v7343_v35  ;;  %v531_v36 = vmul.f32 %v7617_v63, %v7405_v58  ;;  %v994_v13 = vmul.f32 %v7619_v0, %v7436_v9 }
  0xa7   : > { %12542 = vst [vmem:[#allocation99_spill] sm:$0xff] %v7805_v59  ;;  %12543 = vst [vmem:[#allocation100_spill] sm:$0xff] %v7807_v4  ;;  %v995_v60 = vmul.f32 %v7619_v0, %v7441_v12  ;;  %v498_v44 = vmul.f32 %v7617_v63, %v7373_v47  ;;  %v499_v61 = vmul.f32 %v7617_v63, %v7376_v48 }
  0xa8   : > { %12544 = vst [vmem:[#allocation101_spill] sm:$0xff] %v7810_v42  ;;  %12545 = vst [vmem:[#allocation102_spill] sm:$0xff] %v7813_v20  ;;  %v962_v51 = vmul.f32 %v7619_v0, %v7387_v52  ;;  %v963_v34 = vmul.f32 %v7619_v0, %v7390_v53  ;;  %v7833_v55 = vmul.f32 %v7465_v21, %v7810_v42 }
  0xa9   : > { %v7837_v46 = vmul.f32 %v7465_v21, %v7813_v20  ;;  %v7839_v35 = vadd.f32 %v1054_v32, %v590_v43  ;;  %v7841_v4 = vadd.f32 %v1055_v54, %v591_v50  ;;  %v7843_v59 = vpop.permute.xlu1 %889  ;;  %v7845_v63 = vpop.permute.xlu0 %1609  ;;  %v7847_v40 = vadd.f32 %v994_v13, %v530_v11 }
  0xaa   : > { %12546 = vst [vmem:[#allocation103_spill] sm:$0xff] %v7833_v55  ;;  %12550 = vst [vmem:[#allocation107_spill] sm:$0xff] %v7843_v59  ;;  %v7849_v62 = vadd.f32 %v995_v60, %v531_v36  ;;  %v7851_v0 = vadd.f32 %v962_v51, %v498_v44  ;;  %v7853_v42 = vadd.f32 %v963_v34, %v499_v61  ;;  %v12556_v51 = vld [vmem:[#allocation36_spill] sm:$0xff] }
  0xab   : > { %12547 = vst [vmem:[#allocation104_spill] sm:$0xff] %v7837_v46  ;;  %12548 = vst [vmem:[#allocation105_spill] sm:$0xff] %v7839_v35  ;;  %v7857_v21 = vmul.f32 %v7843_v59, %v7387_v52  ;;  %v7861_v43 = vmul.f32 %v7843_v59, %v7390_v53  ;;  %v7865_v50 = vmul.f32 %v7845_v63, %v7482_v27  ;;  %v12560_v46 = vld [vmem:[#allocation40_spill] sm:$0xff] }
  0xac   : > { %12549 = vst [vmem:[#allocation106_spill] sm:$0xff] %v7841_v4  ;;  %12551 = vst [vmem:[#allocation108_spill] sm:$0xff] %v7845_v63  ;;  %v7869_v36 = vmul.f32 %v7845_v63, %v7485_v29  ;;  %v7873_v11 = vmul.f32 %v7843_v59, %v7436_v9  ;;  %v7877_v13 = vmul.f32 %v7843_v59, %v7441_v12 }
  0xad   : > { %12552 = vst [vmem:[#allocation109_spill] sm:$0xff] %v7847_v40  ;;  %12553 = vst [vmem:[#allocation110_spill] sm:$0xff] %v7849_v62  ;;  %v7881_v32 = vmul.f32 %v7845_v63, %v7488_v31  ;;  %v7885_v54 = vmul.f32 %v7845_v63, %v7493_v37  ;;  %v7889_v60 = vmul.f32 %v7843_v59, %v7452_v16  ;;  %v7903_v4 = vpop.permute.xlu1 %893  ;;  %v7905_v35 = vpop.permute.xlu0 %1621  ;;  %v12559_v62 = vld [vmem:[#allocation39_spill] sm:$0xff] }
  0xae   : > { %12554 = vst [vmem:[#allocation111_spill] sm:$0xff] %v7851_v0  ;;  %12555 = vst [vmem:[#allocation112_spill] sm:$0xff] %v7853_v42  ;;  %v7893_v44 = vmul.f32 %v7843_v59, %v7455_v17  ;;  %v7897_v61 = vmul.f32 %v7845_v63, %v7531_v1  ;;  %v7901_v34 = vmul.f32 %v7845_v63, %v12556_v51 }
  0xaf   : > { %12557 = vst [vmem:[#allocation113_spill] sm:$0xff] %v7903_v4  ;;  %12558 = vst [vmem:[#allocation114_spill] sm:$0xff] %v7905_v35  ;;  %v1046_v42 = vmul.f32 %v7843_v59, %v7468_v22  ;;  %v1047_v0 = vmul.f32 %v7843_v59, %v7471_v23  ;;  %v7913_v40 = vmul.f32 %v7845_v63, %v12559_v62 }
  0xb0   : > { %v7917_v55 = vmul.f32 %v7845_v63, %v12560_v46  ;;  %v984_v20 = vmul.f32 %v7903_v4, %v7436_v9  ;;  %v985_v49 = vmul.f32 %v7903_v4, %v7441_v12  ;;  %v952_v45 = vmul.f32 %v7903_v4, %v7387_v52  ;;  %v12561_v46 = vld [vmem:[#allocation57_spill] sm:$0xff]  ;;  %v12583_v63 = vld [vmem:[#allocation64_spill] sm:$0xff] }
  0xb1   : > { %v953_v26 = vmul.f32 %v7903_v4, %v7390_v53  ;;  %v1016_v33 = vmul.f32 %v7903_v4, %v7452_v16  ;;  %v1017_v28 = vmul.f32 %v7903_v4, %v7455_v17  ;;  %v7933_v30 = vmul.f32 %v7905_v35, %v7482_v27  ;;  %v7951_v51 = vpop.permute.xlu1 %901  ;;  %v12570_v27 = vld [vmem:[#allocation69_spill] sm:$0xff]  ;;  %v12572_v17 = vld [vmem:[#allocation70_spill] sm:$0xff] }
  0xb2   : > { %v7937_v6 = vmul.f32 %v7905_v35, %v7485_v29  ;;  %v7940_v62 = vadd.f32 %v984_v20, %v12561_v46  ;;  %v7943_v38 = vadd.f32 %v985_v49, %v12563_v10  ;;  %v7946_v7 = vadd.f32 %v952_v45, %v12565_v8  ;;  %12569 = vst [vmem:[#allocation115_spill] sm:$0xff] %v7951_v51  ;;  %v7967_v45 = vpop.permute.xlu0 %406 }
  0xb3   : > { %v7949_v39 = vadd.f32 %v953_v26, %v12567_v41  ;;  %v7954_v1 = vadd.f32 %v1016_v33, %v12570_v27  ;;  %v7957_v29 = vadd.f32 %v1017_v28, %v12572_v17  ;;  %v7961_v20 = vmul.f32 %v7905_v35, %v7488_v31  ;;  %12574 = vst [vmem:[#allocation116_spill] sm:$0xff] %v7967_v45 }
  0xb4   : > { %12562 = vst [vmem:[#allocation57_spill] sm:$0xff] %v7940_v62  ;;  %12564 = vst [vmem:[#allocation58_spill] sm:$0xff] %v7943_v38  ;;  %v7965_v49 = vmul.f32 %v7905_v35, %v7493_v37  ;;  %v956_v8 = vmul.f32 %v7951_v51, %v7387_v52  ;;  %v957_v27 = vmul.f32 %v7951_v51, %v7390_v53  ;;  %v12578_v38 = vld [vmem:[#allocation55_spill] sm:$0xff]  ;;  %v12579_v37 = vld [vmem:[#allocation56_spill] sm:$0xff] }
  0xb5   : > { %12566 = vst [vmem:[#allocation59_spill] sm:$0xff] %v7946_v7  ;;  %12568 = vst [vmem:[#allocation60_spill] sm:$0xff] %v7949_v39  ;;  %v988_v17 = vmul.f32 %v7951_v51, %v7436_v9  ;;  %v989_v10 = vmul.f32 %v7951_v51, %v7441_v12  ;;  %v484_v26 = vmul.f32 %v7967_v45, %v7373_v47  ;;  %v7993_v9 = vpop.permute.xlu1 %909  ;;  %v12577_v39 = vld [vmem:[#allocation54_spill] sm:$0xff]  ;;  %v12581_v51 = vld [vmem:[#allocation63_spill] sm:$0xff] }
  0xb6   : > { %12571 = vst [vmem:[#allocation69_spill] sm:$0xff] %v7954_v1  ;;  %12573 = vst [vmem:[#allocation70_spill] sm:$0xff] %v7957_v29  ;;  %v485_v41 = vmul.f32 %v7967_v45, %v7376_v48  ;;  %v516_v28 = vmul.f32 %v7967_v45, %v7402_v57  ;;  %v517_v33 = vmul.f32 %v7967_v45, %v7405_v58  ;;  %v12576_v29 = vld [vmem:[#allocation53_spill] sm:$0xff]  ;;  %v8007_v35 = vpop.permute.xlu0 %411 }
  0xb7   : > { %v548_v46 = vmul.f32 %v7967_v45, %v7446_v14  ;;  %v549_v53 = vmul.f32 %v7967_v45, %v7449_v15  ;;  %v580_v52 = vmul.f32 %v7967_v45, %v7458_v18  ;;  %v581_v12 = vmul.f32 %v7967_v45, %v7461_v19  ;;  %12575 = vst [vmem:[#allocation117_spill] sm:$0xff] %v7993_v9  ;;  %v12585_v9 = vld [vmem:[#allocation65_spill] sm:$0xff] }
  0xb8   : > { %v7996_v1 = vadd.f32 %v12576_v29, %v484_v26  ;;  %v7999_v7 = vadd.f32 %v12577_v39, %v485_v41  ;;  %v8002_v62 = vadd.f32 %v12578_v38, %v516_v28  ;;  %v8005_v31 = vadd.f32 %v12579_v37, %v517_v33  ;;  %12580 = vst [vmem:[#allocation53_spill] sm:$0xff] %v8007_v35  ;;  %v12587_v26 = vld [vmem:[#allocation66_spill] sm:$0xff] }
  0xb9   : > { %v8010_v16 = vadd.f32 %v12581_v51, %v548_v46  ;;  %v8013_v3 = vadd.f32 %v12583_v63, %v549_v53  ;;  %v8016_v29 = vadd.f32 %v12585_v9, %v580_v52  ;;  %v8019_v39 = vadd.f32 %v12587_v26, %v581_v12  ;;  %v8037_v63 = vpop.permute.xlu1 %917 }
  0xba   : > { %v486_v38 = vmul.f32 %v8007_v35, %v7373_v47  ;;  %v487_v37 = vmul.f32 %v8007_v35, %v7376_v48  ;;  %v518_v41 = vmul.f32 %v8007_v35, %v7402_v57  ;;  %v519_v51 = vmul.f32 %v8007_v35, %v7405_v58  ;;  %12589 = vst [vmem:[#allocation64_spill] sm:$0xff] %v8037_v63 }
  0xbb   : > { %12582 = vst [vmem:[#allocation54_spill] sm:$0xff] %v8010_v16  ;;  %12584 = vst [vmem:[#allocation55_spill] sm:$0xff] %v8013_v3  ;;  %v550_v53 = vmul.f32 %v8007_v35, %v7446_v14  ;;  %v551_v52 = vmul.f32 %v8007_v35, %v7449_v15  ;;  %v582_v9 = vmul.f32 %v8007_v35, %v7458_v18 }
  0xbc   : > { %12586 = vst [vmem:[#allocation56_spill] sm:$0xff] %v8016_v29  ;;  %12588 = vst [vmem:[#allocation63_spill] sm:$0xff] %v8019_v39  ;;  %v583_v12 = vmul.f32 %v8007_v35, %v7461_v19  ;;  %v1206_v28 = vadd.f32 %v7857_v21, %v486_v38  ;;  %v1207_v33 = vadd.f32 %v7861_v43, %v487_v37  ;;  %v8043_v39 = vpop.permute.xlu0 %426 }
  0xbd   : > { %v1238_v46 = vadd.f32 %v7873_v11, %v518_v41  ;;  %v1239_v26 = vadd.f32 %v7877_v13, %v519_v51  ;;  %12590 = vst [vmem:[#allocation65_spill] sm:$0xff] %v8043_v39  ;;  %v1270_v29 = vadd.f32 %v7889_v60, %v550_v53  ;;  %v1271_v3 = vadd.f32 %v7893_v44, %v551_v52  ;;  %v12594_v41 = vld [vmem:[#allocation72_spill] sm:$0xff] }
  0xbe   : > { %v1302_v18 = vadd.f32 %v1046_v42, %v582_v9  ;;  %v1303_v16 = vadd.f32 %v1047_v0, %v583_v12  ;;  %v8048_v19 = vadd.f32 %v7865_v50, %v1206_v28  ;;  %v8051_v63 = vadd.f32 %v7869_v36, %v1207_v33  ;;  %v8069_v50 = vpop.permute.xlu1 %925  ;;  %v12597_v28 = vld [vmem:[#allocation38_spill] sm:$0xff]  ;;  %v12598_v33 = vld [vmem:[#allocation45_spill] sm:$0xff] }
  0xbf   : > { %v8054_v21 = vadd.f32 %v7881_v32, %v1238_v46  ;;  %v8057_v43 = vadd.f32 %v7885_v54, %v1239_v26  ;;  %v8060_v11 = vadd.f32 %v7897_v61, %v1270_v29  ;;  %v8063_v13 = vadd.f32 %v7901_v34, %v1271_v3  ;;  %12591 = vst [vmem:[#allocation66_spill] sm:$0xff] %v8069_v50  ;;  %v12600_v26 = vld [vmem:[#allocation46_spill] sm:$0xff] }
  0xc0   : > { %v492_v0 = vmul.f32 %v8043_v39, %v7373_v47  ;;  %v493_v42 = vmul.f32 %v8043_v39, %v7376_v48  ;;  %v8072_v36 = vadd.f32 %v7913_v40, %v1302_v18  ;;  %v8075_v32 = vadd.f32 %v7917_v55, %v1303_v16  ;;  %v8081_v60 = vpop.permute.xlu0 %436 }
  0xc1   : > { %v524_v54 = vmul.f32 %v8043_v39, %v7402_v57  ;;  %v525_v3 = vmul.f32 %v8043_v39, %v7405_v58  ;;  %12592 = vst [vmem:[#allocation118_spill] sm:$0xff] %v8081_v60  ;;  %v612_v34 = vmul.f32 %v7967_v45, %v7474_v24  ;;  %v613_v18 = vmul.f32 %v7967_v45, %v7477_v25 }
  0xc2   : > { %v1212_v44 = vadd.f32 %v956_v8, %v492_v0  ;;  %v1213_v61 = vadd.f32 %v957_v27, %v493_v42  ;;  %v1048_v16 = vmul.f32 %v7903_v4, %v7468_v22  ;;  %v1049_v55 = vmul.f32 %v7903_v4, %v7471_v23  ;;  %v12593_v27 = vld [vmem:[#allocation71_spill] sm:$0xff]  ;;  %v12637_v48 = vld [vmem:[#allocation54_spill] sm:$0xff] }
  0xc3   : > { %v1244_v40 = vadd.f32 %v988_v17, %v524_v54  ;;  %v1245_v29 = vadd.f32 %v989_v10, %v525_v3  ;;  %v8098_v37 = vadd.f32 %v12593_v27, %v612_v34  ;;  %v8101_v51 = vadd.f32 %v12594_v41, %v613_v18  ;;  %v8103_v17 = vpop.permute.xlu1 %933  ;;  %v12603_v18 = vld [vmem:[#allocation20_spill] sm:$0xff]  ;;  %v12638_v47 = vld [vmem:[#allocation55_spill] sm:$0xff] }
  0xc4   : > { %v8092_v38 = vadd.f32 %v7933_v30, %v1212_v44  ;;  %v8095_v8 = vadd.f32 %v7937_v6, %v1213_v61  ;;  %12595 = vst [vmem:[#allocation71_spill] sm:$0xff] %v8103_v17  ;;  %v8112_v30 = vadd.f32 %v1048_v16, %v7703_v5  ;;  %v8115_v6 = vadd.f32 %v1049_v55, %v7707_v56  ;;  %v8117_v52 = vpop.permute.xlu0 %446  ;;  %v12599_v5 = vld [vmem:[#allocation108_spill] sm:$0xff]  ;;  %v12601_v44 = vld [vmem:[#allocation19_spill] sm:$0xff]  ;;  %v12606_v55 = vld [vmem:[#allocation114_spill] sm:$0xff] }
  0xc5   : > { %v8106_v10 = vadd.f32 %v7961_v20, %v1244_v40  ;;  %v8109_v53 = vadd.f32 %v7965_v49, %v1245_v29  ;;  %12596 = vst [vmem:[#allocation72_spill] sm:$0xff] %v8117_v52  ;;  %v614_v9 = vmul.f32 %v8007_v35, %v7474_v24  ;;  %v615_v12 = vmul.f32 %v8007_v35, %v7477_v25  ;;  %v12602_v61 = vld [vmem:[#allocation115_spill] sm:$0xff]  ;;  %v12607_v41 = vld [vmem:[#allocation36_spill] sm:$0xff] }
  0xc6   : > { %v1078_v20 = vmul.f32 %v7843_v59, %v7537_v2  ;;  %v1079_v49 = vmul.f32 %v7843_v59, %v12597_v28  ;;  %v1798_v46 = vmul.f32 %v12599_v5, %v12598_v33  ;;  %v1799_v56 = vmul.f32 %v12599_v5, %v12600_v26  ;;  %v12605_v16 = vld [vmem:[#allocation35_spill] sm:$0xff] }
  0xc7   : > { %v556_v0 = vmul.f32 %v8043_v39, %v7446_v14  ;;  %v557_v42 = vmul.f32 %v8043_v39, %v7449_v15  ;;  %v1020_v34 = vmul.f32 %v12602_v61, %v12601_v44  ;;  %v1021_v40 = vmul.f32 %v12602_v61, %v12603_v18  ;;  %v8139_v29 = vpop.permute.xlu1 %941  ;;  %v12609_v25 = vld [vmem:[#allocation83_spill] sm:$0xff]  ;;  %v12611_v18 = vld [vmem:[#allocation84_spill] sm:$0xff]  ;;  %v12613_v15 = vld [vmem:[#allocation41_spill] sm:$0xff] }
  0xc8   : > { %v1334_v54 = vadd.f32 %v1078_v20, %v614_v9  ;;  %v1335_v3 = vadd.f32 %v1079_v49, %v615_v12  ;;  %12604 = vst [vmem:[#allocation119_spill] sm:$0xff] %v8139_v29  ;;  %v1740_v27 = vmul.f32 %v12606_v55, %v12605_v16  ;;  %v1741_v17 = vmul.f32 %v12606_v55, %v12607_v41  ;;  %v8149_v12 = vpop.permute.xlu0 %456  ;;  %v12614_v14 = vld [vmem:[#allocation42_spill] sm:$0xff] }
  0xc9   : > { %v1080_v50 = vmul.f32 %v7903_v4, %v7537_v2  ;;  %v1081_v9 = vmul.f32 %v7903_v4, %v12597_v28  ;;  %12608 = vst [vmem:[#allocation120_spill] sm:$0xff] %v8149_v12  ;;  %v1276_v52 = vadd.f32 %v1020_v34, %v556_v0  ;;  %v1277_v29 = vadd.f32 %v1021_v40, %v557_v42  ;;  %v12616_v42 = vld [vmem:[#allocation48_spill] sm:$0xff] }
  0xca   : > { %v8151_v20 = vadd.f32 %v1798_v46, %v1334_v54  ;;  %v8153_v49 = vadd.f32 %v1799_v56, %v1335_v3  ;;  %v646_v2 = vmul.f32 %v8007_v35, %v12613_v15  ;;  %v647_v28 = vmul.f32 %v8007_v35, %v12614_v14  ;;  %v12615_v56 = vld [vmem:[#allocation47_spill] sm:$0xff]  ;;  %v12619_v3 = vld [vmem:[#allocation50_spill] sm:$0xff]  ;;  %v12634_v35 = vld [vmem:[#allocation40_spill] sm:$0xff] }
  0xcb   : > { %v8156_v24 = vadd.f32 %v1080_v50, %v12609_v25  ;;  %v8159_v44 = vadd.f32 %v1081_v9, %v12611_v18  ;;  %v8165_v4 = vadd.f32 %v1740_v27, %v1276_v52  ;;  %v8167_v46 = vadd.f32 %v1741_v17, %v1277_v29  ;;  %v12617_v50 = vld [vmem:[#allocation49_spill] sm:$0xff]  ;;  %v8189_v18 = vpop.permute.xlu1 %1605 }
  0xcc   : > { %v1110_v0 = vmul.f32 %v7843_v59, %v12615_v56  ;;  %v1111_v25 = vmul.f32 %v7843_v59, %v12616_v42  ;;  %v8175_v54 = vmul.f32 %v12599_v5, %v12617_v50  ;;  %v8179_v34 = vmul.f32 %v12599_v5, %v12619_v3  ;;  %12623 = vst [vmem:[#allocation125_spill] sm:$0xff] %v8189_v18  ;;  %v8191_v40 = vpop.permute.xlu0 %466  ;;  %v12631_v59 = vld [vmem:[#allocation31_spill] sm:$0xff] }
  0xcd   : > { %12610 = vst [vmem:[#allocation83_spill] sm:$0xff] %v8156_v24  ;;  %12612 = vst [vmem:[#allocation84_spill] sm:$0xff] %v8159_v44  ;;  %v8183_v52 = vmul.f32 %v7967_v45, %v12613_v15  ;;  %v8187_v17 = vmul.f32 %v7967_v45, %v12614_v14  ;;  %v8199_v9 = vmul.f32 %v8081_v60, %v7402_v57  ;;  %v12629_v15 = vld [vmem:[#allocation29_spill] sm:$0xff]  ;;  %v12630_v45 = vld [vmem:[#allocation30_spill] sm:$0xff] }
  0xce   : > { %12618 = vst [vmem:[#allocation121_spill] sm:$0xff] %v8175_v54  ;;  %12620 = vst [vmem:[#allocation122_spill] sm:$0xff] %v8179_v34  ;;  %v8193_v29 = vadd.f32 %v1110_v0, %v646_v2  ;;  %v8195_v27 = vadd.f32 %v1111_v25, %v647_v28  ;;  %v8203_v12 = vmul.f32 %v8081_v60, %v7405_v58  ;;  %v12632_v0 = vld [vmem:[#allocation32_spill] sm:$0xff]  ;;  %v12633_v58 = vld [vmem:[#allocation39_spill] sm:$0xff] }
  0xcf   : > { %12621 = vst [vmem:[#allocation123_spill] sm:$0xff] %v8183_v52  ;;  %12622 = vst [vmem:[#allocation124_spill] sm:$0xff] %v8187_v17  ;;  %v1668_v14 = vmul.f32 %v8189_v18, %v12629_v15  ;;  %v1669_v5 = vmul.f32 %v8189_v18, %v12630_v45  ;;  %v1700_v2 = vmul.f32 %v8189_v18, %v12631_v59  ;;  %v8225_v22 = vpop.permute.xlu1 %1613  ;;  %v12640_v50 = vld [vmem:[#allocation63_spill] sm:$0xff]  ;;  %v12647_v34 = vld [vmem:[#allocation69_spill] sm:$0xff] }
  0xd0   : > { %12624 = vst [vmem:[#allocation126_spill] sm:$0xff] %v8191_v40  ;;  %12625 = vst [vmem:[#allocation127_spill] sm:$0xff] %v8193_v29  ;;  %v1701_v28 = vmul.f32 %v8189_v18, %v12632_v0  ;;  %v1732_v25 = vmul.f32 %v8189_v18, %v12605_v16  ;;  %v1733_v40 = vmul.f32 %v8189_v18, %v12607_v41  ;;  %v8227_v39 = vpop.permute.xlu0 %476  ;;  %v12648_v54 = vld [vmem:[#allocation70_spill] sm:$0xff] }
  0xd1   : > { %12626 = vst [vmem:[#allocation128_spill] sm:$0xff] %v8195_v27  ;;  %12627 = vst [vmem:[#allocation129_spill] sm:$0xff] %v8199_v9  ;;  %v1764_v57 = vmul.f32 %v8189_v18, %v12633_v58  ;;  %v1765_v42 = vmul.f32 %v8189_v18, %v12634_v35  ;;  %v1924_v56 = vadd.f32 %v1668_v14, %v7996_v1  ;;  %v12639_v9 = vld [vmem:[#allocation56_spill] sm:$0xff] }
  0xd2   : > { %12628 = vst [vmem:[#allocation130_spill] sm:$0xff] %v8203_v12  ;;  %v1925_v55 = vadd.f32 %v1669_v5, %v7999_v7  ;;  %v1956_v23 = vadd.f32 %v1700_v2, %v8002_v62  ;;  %v1957_v61 = vadd.f32 %v1701_v28, %v8005_v31  ;;  %12635 = vst [vmem:[#allocation131_spill] sm:$0xff] %v8225_v22  ;;  %v12641_v5 = vld [vmem:[#allocation57_spill] sm:$0xff]  ;;  %v12644_v28 = vld [vmem:[#allocation60_spill] sm:$0xff] }
  0xd3   : > { %12636 = vst [vmem:[#allocation132_spill] sm:$0xff] %v8227_v39  ;;  %v1988_v60 = vadd.f32 %v1732_v25, %v12637_v48  ;;  %v1989_v12 = vadd.f32 %v1733_v40, %v12638_v47  ;;  %v2020_v3 = vadd.f32 %v1764_v57, %v12639_v9  ;;  %v8233_v17 = vadd.f32 %v1765_v42, %v12640_v50  ;;  %v12642_v50 = vld [vmem:[#allocation58_spill] sm:$0xff]  ;;  %v12643_v9 = vld [vmem:[#allocation59_spill] sm:$0xff]  ;;  %v8255_v39 = vpop.permute.xlu1 %1617 }
  0xd4   : > { %v1704_v14 = vmul.f32 %v8225_v22, %v12631_v59  ;;  %v1705_v1 = vmul.f32 %v8225_v22, %v12632_v0  ;;  %v1672_v31 = vmul.f32 %v8225_v22, %v12629_v15  ;;  %v1673_v7 = vmul.f32 %v8225_v22, %v12630_v45  ;;  %12645 = vst [vmem:[#allocation54_spill] sm:$0xff] %v8255_v39  ;;  %v8257_v52 = vpop.permute.xlu0 %2198 }
  0xd5   : > { %v1736_v47 = vmul.f32 %v8225_v22, %v12605_v16  ;;  %v1737_v48 = vmul.f32 %v8225_v22, %v12607_v41  ;;  %v1796_v57 = vmul.f32 %v8189_v18, %v12598_v33  ;;  %v1797_v62 = vmul.f32 %v8189_v18, %v12600_v26  ;;  %12646 = vst [vmem:[#allocation55_spill] sm:$0xff] %v8257_v52 }
  0xd6   : > { %v1960_v42 = vadd.f32 %v1704_v14, %v12641_v5  ;;  %v1961_v40 = vadd.f32 %v1705_v1, %v12642_v50  ;;  %v1928_v2 = vadd.f32 %v1672_v31, %v12643_v9  ;;  %v1929_v25 = vadd.f32 %v1673_v7, %v12644_v28  ;;  %v12653_v5 = vld [vmem:[#allocation73_spill] sm:$0xff] }
  0xd7   : > { %v8260_v27 = vadd.f32 %v1736_v47, %v12647_v34  ;;  %v8263_v29 = vadd.f32 %v1737_v48, %v12648_v54  ;;  %v8266_v18 = vadd.f32 %v1796_v57, %v8098_v37  ;;  %v8269_v14 = vadd.f32 %v1797_v62, %v8101_v51 }
  0xd8   : > { %v8272_v1 = vadd.f32 %v8257_v52, %v1924_v56  ;;  %v8275_v31 = vadd.f32 %v8257_v52, %v1925_v55  ;;  %v8278_v7 = vadd.f32 %v8257_v52, %v1956_v23  ;;  %v8281_v34 = vadd.f32 %v8257_v52, %v1957_v61  ;;  %v8300_v48 = vpop.permute.xlu0 %2208 }
  0xd9   : > { %v8284_v54 = vadd.f32 %v8257_v52, %v1988_v60  ;;  %v8287_v37 = vadd.f32 %v8257_v52, %v1989_v12  ;;  %v1706_v51 = vmul.f32 %v8255_v39, %v12631_v59  ;;  %v1707_v56 = vmul.f32 %v8255_v39, %v12632_v0  ;;  %v8298_v60 = vpop.permute.xlu1 %1625  ;;  %12652 = vst [vmem:[#allocation58_spill] sm:$0xff] %v8300_v48 }
  0xda   : > { %v5801_v55 = vmul.f32 -1.442695, %v8272_v1  ;;  %v5802_v23 = vmul.f32 -1.442695, %v8275_v31  ;;  %v5833_v47 = vmul.f32 -1.442695, %v8278_v7  ;;  %v1674_v61 = vmul.f32 %v8255_v39, %v12629_v15 }
  0xdb   : > { %12649 = vst [vmem:[#allocation56_spill] sm:$0xff] %v8284_v54  ;;  %12650 = vst [vmem:[#allocation63_spill] sm:$0xff] %v8287_v37  ;;  %v5834_v12 = vmul.f32 -1.442695, %v8281_v34  ;;  %v8304_v57 = vmul.f32 -1.442695, %v8284_v54  ;;  %v1962_v50 = vadd.f32 %v1706_v51, %v12653_v5  ;;  %v8311_v9 = vadd.f32 %v8300_v48, %v1960_v42 }
  0xdc   : > { %12651 = vst [vmem:[#allocation57_spill] sm:$0xff] %v8298_v60  ;;  %v8307_v62 = vmul.f32 -1.442695, %v8287_v37  ;;  %6135 = vpow2.f32 %v5801_v55  ;;  %v8314_v28 = vadd.f32 %v8300_v48, %v1961_v40  ;;  %v8317_v44 = vadd.f32 %v8300_v48, %v1928_v2  ;;  %v12654_v54 = vld [vmem:[#allocation74_spill] sm:$0xff]  ;;  %v8328_v55 = vpop.permute.xlu0 %2213  ;;  %v12657_v5 = vld [vmem:[#allocation76_spill] sm:$0xff] }
  0xdd   : > { %6137 = vpow2.f32 %v5802_v23  ;;  %v8320_v24 = vadd.f32 %v8300_v48, %v1929_v25  ;;  %v1963_v26 = vadd.f32 %v1707_v56, %v12654_v54  ;;  %v1675_v37 = vmul.f32 %v8255_v39, %v12630_v45  ;;  %12655 = vst [vmem:[#allocation59_spill] sm:$0xff] %v8328_v55  ;;  %v12656_v23 = vld [vmem:[#allocation75_spill] sm:$0xff]  ;;  %v8333_v54 = vpop.permute.xlu1 %2203 }
  0xde   : > { %6139 = vpow2.f32 %v5833_v47  ;;  %v5837_v51 = vmul.f32 -1.442695, %v8311_v9  ;;  %v5838_v42 = vmul.f32 -1.442695, %v8314_v28  ;;  %v5805_v40 = vmul.f32 -1.442695, %v8317_v44 }
  0xdf   : > { %6141 = vpow2.f32 %v5834_v12  ;;  %v5806_v2 = vmul.f32 -1.442695, %v8320_v24  ;;  %v1930_v25 = vadd.f32 %v1674_v61, %v12656_v23  ;;  %v1931_v33 = vadd.f32 %v1675_v37, %v12657_v5  ;;  %12658 = vst [vmem:[#allocation60_spill] sm:$0xff] %v8333_v54 }
  0xe0   : > { %6143 = vpow2.f32 %v5837_v51  ;;  %v8336_v56 = vadd.f32 %v8328_v55, %v1962_v50  ;;  %v8339_v47 = vadd.f32 %v8328_v55, %v1963_v26  ;;  %v8342_v0 = vadd.f32 %v8257_v52, %v2020_v3  ;;  %v8377_v23 = vpop.permute.xlu0 %2218 }
  0xe1   : > { %v8346_v12 = vadd.f32 %v8333_v54, %v8048_v19  ;;  %v8350_v61 = vadd.f32 %v8333_v54, %v8051_v63  ;;  %v8354_v37 = vadd.f32 %v8333_v54, %v8054_v21  ;;  %v8358_v50 = vadd.f32 %v8333_v54, %v8057_v43  ;;  %12662 = vst [vmem:[#allocation74_spill] sm:$0xff] %v8377_v23 }
  0xe2   : > { %12659 = vst [vmem:[#allocation69_spill] sm:$0xff] %v8336_v56  ;;  %12660 = vst [vmem:[#allocation70_spill] sm:$0xff] %v8339_v47  ;;  %6145 = vpow2.f32 %v5838_v42  ;;  %v8362_v26 = vadd.f32 %v8333_v54, %v8060_v11  ;;  %v8366_v19 = vadd.f32 %v8333_v54, %v8063_v13  ;;  %v8369_v63 = vmul.f32 -1.442695, %v8336_v56 }
  0xe3   : > { %12661 = vst [vmem:[#allocation73_spill] sm:$0xff] %v8342_v0  ;;  %v5803_v3 = vmul.f32 -1.442695, %v8346_v12  ;;  %v5804_v21 = vmul.f32 -1.442695, %v8350_v61  ;;  %6147 = vpow2.f32 %v5805_v40  ;;  %v8383_v5 = vadd.f32 %v8328_v55, %v1930_v25 }
  0xe4   : > { %v5835_v51 = vmul.f32 -1.442695, %v8354_v37  ;;  %v5836_v43 = vmul.f32 -1.442695, %v8358_v50  ;;  %6149 = vpow2.f32 %v5806_v2  ;;  %v5867_v11 = vmul.f32 -1.442695, %v8362_v26 }
  0xe5   : > { %v5868_v42 = vmul.f32 -1.442695, %v8366_v19  ;;  %6151 = vpow2.f32 %v5803_v3  ;;  %v8380_v13 = vmul.f32 -1.442695, %v8339_v47  ;;  %12663 = vst [vmem:[#allocation75_spill] sm:$0xff] %v8383_v5  ;;  %v8386_v56 = vadd.f32 %v8328_v55, %v1931_v33 }
  0xe6   : > { %6153 = vpow2.f32 %v5804_v21  ;;  %v8390_v40 = vadd.f32 %v8257_v52, %v8233_v17  ;;  %v8393_v2 = vmul.f32 -1.442695, %v8342_v0  ;;  %v8397_v3 = vadd.f32 %v8300_v48, %v8260_v27 }
  0xe7   : > { %12664 = vst [vmem:[#allocation76_spill] sm:$0xff] %v8386_v56  ;;  %6155 = vpow2.f32 %v5835_v51  ;;  %v8400_v47 = vmul.f32 -1.442695, %v8383_v5  ;;  %v8403_v25 = vmul.f32 -1.442695, %v8386_v56  ;;  %v8407_v33 = vadd.f32 %v8300_v48, %v8263_v29 }
  0xe8   : > { %12665 = vst [vmem:[#allocation133_spill] sm:$0xff] %v8390_v40  ;;  %12666 = vst [vmem:[#allocation134_spill] sm:$0xff] %v8397_v3  ;;  %6157 = vpow2.f32 %v5836_v43  ;;  %v8410_v17 = vmul.f32 -1.442695, %v8390_v40  ;;  %v8413_v21 = vmul.f32 -1.442695, %v8397_v3  ;;  %v8417_v27 = vadd.f32 %v8377_v23, %v8092_v38 }
  0xe9   : > { %12667 = vst [vmem:[#allocation135_spill] sm:$0xff] %v8407_v33  ;;  %v6136_v51 = vpop.eup %6135  ;;  %6159 = vpow2.f32 %v5867_v11  ;;  %v8420_v0 = vmul.f32 -1.442695, %v8407_v33  ;;  %v8424_v29 = vadd.f32 %v8377_v23, %v8095_v8  ;;  %v8428_v43 = vadd.f32 %v8333_v54, %v8072_v36 }
  0xea   : > { %12668 = vst [vmem:[#allocation136_spill] sm:$0xff] %v8417_v27  ;;  %v6138_v40 = vpop.eup %6137  ;;  %v3300_v3 = vadd.f32 1.0, %v6136_v51  ;;  %6161 = vpow2.f32 %v5868_v42  ;;  %v8431_v56 = vmul.f32 -1.442695, %v8417_v27  ;;  %v8435_v38 = vadd.f32 %v8333_v54, %v8075_v32 }
  0xeb   : > { %12669 = vst [vmem:[#allocation137_spill] sm:$0xff] %v8424_v29  ;;  %12670 = vst [vmem:[#allocation138_spill] sm:$0xff] %v8428_v43  ;;  %v6140_v11 = vpop.eup %6139  ;;  %v3301_v33 = vadd.f32 1.0, %v6138_v40  ;;  %6163 = vpow2.f32 %v8304_v57  ;;  %v8439_v8 = vmul.f32 -1.442695, %v8424_v29  ;;  %v1738_v32 = vmul.f32 %v8255_v39, %v12605_v16  ;;  %v12676_v16 = vld [vmem:[#allocation78_spill] sm:$0xff] }
  0xec   : > { %12671 = vst [vmem:[#allocation139_spill] sm:$0xff] %v8435_v38  ;;  %v8442_v36 = vmul.f32 -1.442695, %v8428_v43  ;;  %v6142_v5 = vpop.eup %6141  ;;  %6165 = vrcp.f32 %v3300_v3  ;;  %v3332_v42 = vadd.f32 1.0, %v6140_v11  ;;  %v8445_v51 = vmul.f32 -1.442695, %v8435_v38 }
  0xed   : > { %v6144_v27 = vpop.eup %6143  ;;  %6167 = vrcp.f32 %v3301_v33  ;;  %v3333_v40 = vadd.f32 1.0, %v6142_v5  ;;  %v1739_v57 = vmul.f32 %v8255_v39, %v12607_v41  ;;  %v8453_v29 = vadd.f32 %v8377_v23, %v8106_v10  ;;  %v12674_v3 = vld [vmem:[#allocation77_spill] sm:$0xff] }
  0xee   : > { %12672 = vst [vmem:[#allocation140_spill] sm:$0xff] %v8445_v51  ;;  %6169 = vrcp.f32 %v3332_v42  ;;  %v3336_v43 = vadd.f32 1.0, %v6144_v27  ;;  %v1994_v11 = vadd.f32 %v1738_v32, %v12674_v3  ;;  %v8458_v38 = vadd.f32 %v8377_v23, %v8109_v53 }
  0xef   : > { %12673 = vst [vmem:[#allocation141_spill] sm:$0xff] %v8453_v29  ;;  %v6146_v51 = vpop.eup %6145  ;;  %6171 = vrcp.f32 %v3333_v40  ;;  %v1995_v33 = vadd.f32 %v1739_v57, %v12676_v16  ;;  %v8462_v5 = vmul.f32 -1.442695, %v8453_v29  ;;  %v8466_v41 = vadd.f32 %v8257_v52, %v8266_v18 }
  0xf0   : > { %12675 = vst [vmem:[#allocation77_spill] sm:$0xff] %v8458_v38  ;;  %v6148_v10 = vpop.eup %6147  ;;  %v3337_v42 = vadd.f32 1.0, %v6146_v51  ;;  %6173 = vrcp.f32 %v3336_v43  ;;  %v8469_v27 = vadd.f32 %v8328_v55, %v1994_v11  ;;  %v8472_v53 = vmul.f32 -1.442695, %v8458_v38 }
  0xf1   : > { %12677 = vst [vmem:[#allocation78_spill] sm:$0xff] %v8466_v41  ;;  %v6150_v32 = vpop.eup %6149  ;;  %v3304_v40 = vadd.f32 1.0, %v6148_v10  ;;  %6175 = vpow2.f32 %v8307_v62  ;;  %v8476_v16 = vadd.f32 %v8328_v55, %v1995_v33  ;;  %v8480_v18 = vadd.f32 %v8257_v52, %v8269_v14  ;;  %v12686_v52 = vld [vmem:[#allocation82_spill] sm:$0xff] }
  0xf2   : > { %12678 = vst [vmem:[#allocation142_spill] sm:$0xff] %v8469_v27  ;;  %12679 = vst [vmem:[#allocation143_spill] sm:$0xff] %v8472_v53  ;;  %v6152_v57 = vpop.eup %6151  ;;  %6177 = vrcp.f32 %v3337_v42  ;;  %v3305_v43 = vadd.f32 1.0, %v6150_v32  ;;  %v8483_v51 = vmul.f32 -1.442695, %v8469_v27  ;;  %v1768_v42 = vmul.f32 %v8225_v22, %v12633_v58 }
  0xf3   : > { %12680 = vst [vmem:[#allocation144_spill] sm:$0xff] %v8476_v16  ;;  %12681 = vst [vmem:[#allocation145_spill] sm:$0xff] %v8480_v18  ;;  %v8486_v3 = vmul.f32 -1.442695, %v8466_v41  ;;  %v6154_v11 = vpop.eup %6153  ;;  %v3302_v10 = vadd.f32 1.0, %v6152_v57  ;;  %6179 = vrcp.f32 %v3304_v40  ;;  %v1769_v32 = vmul.f32 %v8225_v22, %v12634_v35 }
  0xf4   : > { %v8489_v62 = vmul.f32 -1.442695, %v8476_v16  ;;  %v8492_v33 = vmul.f32 -1.442695, %v8480_v18  ;;  %v6156_v14 = vpop.eup %6155  ;;  %v3303_v38 = vadd.f32 1.0, %v6154_v11  ;;  %6181 = vrcp.f32 %v3305_v43  ;;  %v8502_v16 = vpop.permute.xlu0 %2223 }
  0xf5   : > { %12682 = vst [vmem:[#allocation146_spill] sm:$0xff] %v8486_v3  ;;  %v6158_v41 = vpop.eup %6157  ;;  %6183 = vrcp.f32 %v3302_v10  ;;  %v3334_v29 = vadd.f32 1.0, %v6156_v14  ;;  %v1678_v40 = vmul.f32 %v8298_v60, %v12629_v15  ;;  %v1679_v57 = vmul.f32 %v8298_v60, %v12630_v45  ;;  %12684 = vst [vmem:[#allocation148_spill] sm:$0xff] %v8502_v16  ;;  %v12685_v10 = vld [vmem:[#allocation81_spill] sm:$0xff] }
  0xf6   : > { %12683 = vst [vmem:[#allocation147_spill] sm:$0xff] %v8492_v33  ;;  %v6160_v18 = vpop.eup %6159  ;;  %6185 = vrcp.f32 %v3303_v38  ;;  %v3335_v43 = vadd.f32 1.0, %v6158_v41  ;;  %v2024_v11 = vadd.f32 %v1768_v42, %v8112_v30  ;;  %v2025_v27 = vadd.f32 %v1769_v32, %v8115_v6 }
  0xf7   : > { %v6162_v33 = vpop.eup %6161  ;;  %6187 = vrcp.f32 %v3334_v29  ;;  %v3366_v3 = vadd.f32 1.0, %v6160_v18  ;;  %v1934_v14 = vadd.f32 %v1678_v40, %v12685_v10  ;;  %v1935_v53 = vadd.f32 %v1679_v57, %v12686_v52 }
  0xf8   : > { %v6164_v15 = vpop.eup %6163  ;;  %6189 = vrcp.f32 %v3335_v43  ;;  %v3367_v55 = vadd.f32 1.0, %v6162_v33  ;;  %v8509_v45 = vadd.f32 %v8300_v48, %v2024_v11  ;;  %v8512_v38 = vadd.f32 %v8300_v48, %v2025_v27 }
  0xf9   : > { %v6166_v41 = vpop.eup %6165  ;;  %6191 = vrcp.f32 %v3366_v3  ;;  %v3364_v30 = vadd.f32 1.0, %v6164_v15  ;;  %v8515_v6 = vadd.f32 %v8502_v16, %v1934_v14  ;;  %v8518_v29 = vadd.f32 %v8502_v16, %v1935_v53 }
  0xfa   : > { %v6168_v18 = vpop.eup %6167  ;;  %v4068_v52 = vmul.f32 %v6166_v41, %v8272_v1  ;;  %6193 = vrcp.f32 %v3367_v55  ;;  %v8522_v33 = vmul.f32 -1.442695, %v8509_v45  ;;  %v8525_v42 = vmul.f32 -1.442695, %v8512_v38 }
  0xfb   : > { %v6170_v27 = vpop.eup %6169  ;;  %v4069_v3 = vmul.f32 %v6168_v18, %v8275_v31  ;;  %6195 = vrcp.f32 %v3364_v30  ;;  %v8529_v15 = vmul.f32 -1.442695, %v8515_v6  ;;  %v8532_v53 = vmul.f32 -1.442695, %v8518_v29 }
  0xfc   : > { %v6172_v32 = vpop.eup %6171  ;;  %v4100_v1 = vmul.f32 %v6170_v27, %v8278_v7  ;;  %6197 = vpow2.f32 %v8369_v63  ;;  %v8538_v55 = vadd.f32 %v8333_v54, %v8151_v20  ;;  %v8542_v40 = vadd.f32 %v8333_v54, %v8153_v49 }
  0xfd   : > { %v6174_v31 = vpop.eup %6173  ;;  %v4324_v57 = vadd.f32 %v4069_v3, %v4068_v52  ;;  %v4101_v43 = vmul.f32 %v6172_v32, %v8281_v34  ;;  %6199 = vpow2.f32 %v8380_v13  ;;  %v8548_v11 = vadd.f32 %v8377_v23, %v8165_v4  ;;  %v12692_v3 = vld [vmem:[#allocation87_spill] sm:$0xff] }
  0xfe   : > { %12687 = vst [vmem:[#allocation81_spill] sm:$0xff] %v8538_v55  ;;  %12688 = vst [vmem:[#allocation82_spill] sm:$0xff] %v8542_v40  ;;  %v6176_v7 = vpop.eup %6175  ;;  %v4104_v63 = vmul.f32 %v6174_v31, %v8311_v9  ;;  %6201 = vpow2.f32 %v8400_v47  ;;  %v8553_v20 = vmul.f32 -1.442695, %v8538_v55  ;;  %v8556_v49 = vmul.f32 -1.442695, %v8542_v40 }
  0xff   : > { %12689 = vst [vmem:[#allocation149_spill] sm:$0xff] %v8548_v11  ;;  %v6178_v10 = vpop.eup %6177  ;;  %4325 = vadd.xlane.f32.xlu1 %v4324_v57  ;;  %v8558_v34 = vadd.f32 %v4101_v43, %v4100_v1  ;;  %v3365_v13 = vadd.f32 1.0, %v6176_v7  ;;  %6203 = vpow2.f32 %v8403_v25  ;;  %v8563_v4 = vadd.f32 %v8377_v23, %v8167_v46  ;;  %v12691_v46 = vld [vmem:[#allocation32_spill] sm:$0xff]  ;;  %v12694_v43 = vld [vmem:[#allocation45_spill] sm:$0xff]  ;;  %v12742_v55 = vld [vmem:[#allocation147_spill] sm:$0xff] }
 0x100   : > { %v6180_v9 = vpop.eup %6179  ;;  %v4105_v47 = vmul.f32 %v6178_v10, %v8314_v28  ;;  %6205 = vpow2.f32 %v8393_v2  ;;  %v8568_v14 = vmul.f32 -1.442695, %v8548_v11  ;;  %v1710_v41 = vmul.f32 %v8298_v60, %v12631_v59  ;;  %v12741_v11 = vld [vmem:[#allocation76_spill] sm:$0xff] }
 0x101   : > { %12690 = vst [vmem:[#allocation150_spill] sm:$0xff] %v8563_v4  ;;  %v6182_v30 = vpop.eup %6181  ;;  %v4072_v18 = vmul.f32 %v6180_v9, %v8317_v44  ;;  %6207 = vrcp.f32 %v3365_v13  ;;  %v8574_v25 = vmul.f32 -1.442695, %v8563_v4  ;;  %v1711_v52 = vmul.f32 %v8298_v60, %v12691_v46  ;;  %v12693_v44 = vld [vmem:[#allocation88_spill] sm:$0xff] }
 0x102   : > { %v6184_v27 = vpop.eup %6183  ;;  %v4378_v28 = vadd.f32 %v4105_v47, %v4104_v63  ;;  %v4073_v2 = vmul.f32 %v6182_v30, %v8320_v24  ;;  %6209 = vpow2.f32 %v8410_v17  ;;  %v1966_v32 = vadd.f32 %v1710_v41, %v12692_v3 }
 0x103   : > { %v6186_v1 = vpop.eup %6185  ;;  %v4070_v31 = vmul.f32 %v6184_v27, %v8346_v12  ;;  %6211 = vpow2.f32 %v8413_v21  ;;  %v1967_v57 = vadd.f32 %v1711_v52, %v12693_v44  ;;  %v1800_v7 = vmul.f32 %v8225_v22, %v12694_v43  ;;  %v12697_v21 = vld [vmem:[#allocation46_spill] sm:$0xff]  ;;  %v12698_v52 = vld [vmem:[#allocation83_spill] sm:$0xff]  ;;  %v12701_v44 = vld [vmem:[#allocation56_spill] sm:$0xff] }
 0x104   : > { %v6188_v10 = vpop.eup %6187  ;;  %v4071_v13 = vmul.f32 %v6186_v1, %v8350_v61  ;;  %v4330_v63 = vadd.f32 %v4073_v2, %v4072_v18  ;;  %6213 = vpow2.f32 %v8420_v0  ;;  %v8589_v24 = vadd.f32 %v8502_v16, %v1966_v32  ;;  %v12699_v32 = vld [vmem:[#allocation140_spill] sm:$0xff] }
 0x105   : > { %v6190_v17 = vpop.eup %6189  ;;  %v4102_v9 = vmul.f32 %v6188_v10, %v8354_v37  ;;  %6215 = vpow2.f32 %v8431_v56  ;;  %v8594_v12 = vadd.f32 %v8502_v16, %v1967_v57  ;;  %v1801_v47 = vmul.f32 %v8225_v22, %v12697_v21 }
 0x106   : > { %12695 = vst [vmem:[#allocation87_spill] sm:$0xff] %v8589_v24  ;;  %v6192_v41 = vpop.eup %6191  ;;  %v4327_v30 = vadd.f32 %v4071_v13, %v4070_v31  ;;  %v4103_v61 = vmul.f32 %v6190_v17, %v8358_v50  ;;  %6217 = vpow2.f32 %v8439_v8  ;;  %v8601_v0 = vmul.f32 -1.442695, %v8589_v24  ;;  %v12700_v8 = vld [vmem:[#allocation84_spill] sm:$0xff]  ;;  %v12730_v24 = vld [vmem:[#allocation55_spill] sm:$0xff] }
 0x107   : > { %12696 = vst [vmem:[#allocation88_spill] sm:$0xff] %v8594_v12  ;;  %v6194_v18 = vpop.eup %6193  ;;  %v4134_v37 = vmul.f32 %v6192_v41, %v8362_v26  ;;  %6219 = vpow2.f32 %v8442_v36  ;;  %v8606_v56 = vmul.f32 -1.442695, %v8594_v12  ;;  %v2056_v27 = vadd.f32 %v1800_v7, %v12698_v52 }
 0x108   : > { %v6196_v2 = vpop.eup %6195  ;;  %4328 = vadd.xlane.f32.xlu0 %v4327_v30  ;;  %v4375_v3 = vadd.f32 %v4103_v61, %v4102_v9  ;;  %v4135_v50 = vmul.f32 %v6194_v18, %v8366_v19  ;;  %6221 = vpow2.f32 %v12699_v32  ;;  %v2057_v1 = vadd.f32 %v1801_v47, %v12700_v8  ;;  %v12704_v61 = vld [vmem:[#allocation89_spill] sm:$0xff] }
 0x109   : > { %v6198_v31 = vpop.eup %6197  ;;  %v4132_v57 = vmul.f32 %v6196_v2, %v12701_v44  ;;  %6223 = vpow2.f32 %v8483_v51  ;;  %v8615_v26 = vadd.f32 %v8300_v48, %v2056_v27  ;;  %v1770_v36 = vmul.f32 %v8255_v39, %v12633_v58  ;;  %v12706_v2 = vld [vmem:[#allocation127_spill] sm:$0xff]  ;;  %v12711_v44 = vld [vmem:[#allocation122_spill] sm:$0xff] }
 0x10a   : > { %v6200_v7 = vpop.eup %6199  ;;  %4376 = vadd.xlane.f32.xlu1 %v4375_v3  ;;  %v4423_v10 = vadd.f32 %v4135_v50, %v4134_v37  ;;  %v3338_v13 = vadd.f32 1.0, %v6198_v31  ;;  %6225 = vpow2.f32 %v8489_v62  ;;  %v8621_v19 = vadd.f32 %v8300_v48, %v2057_v1  ;;  %v12707_v3 = vld [vmem:[#allocation121_spill] sm:$0xff]  ;;  %v12710_v31 = vld [vmem:[#allocation128_spill] sm:$0xff] }
 0x10b   : > { %12702 = vst [vmem:[#allocation83_spill] sm:$0xff] %v8615_v26  ;;  %v6202_v17 = vpop.eup %6201  ;;  %v3339_v9 = vadd.f32 1.0, %v6200_v7  ;;  %6227 = vpow2.f32 %v8462_v5  ;;  %v8625_v51 = vmul.f32 -1.442695, %v8615_v26  ;;  %v1771_v47 = vmul.f32 %v8255_v39, %v12634_v35  ;;  %v12705_v5 = vld [vmem:[#allocation90_spill] sm:$0xff] }
 0x10c   : > { %12703 = vst [vmem:[#allocation140_spill] sm:$0xff] %v8621_v19  ;;  %v6204_v41 = vpop.eup %6203  ;;  %4373 = vadd.xlane.f32.xlu0 %v8558_v34  ;;  %6229 = vrcp.f32 %v3338_v13  ;;  %v3306_v30 = vadd.f32 1.0, %v6202_v17  ;;  %v8631_v62 = vmul.f32 -1.442695, %v8621_v19  ;;  %v2026_v18 = vadd.f32 %v1770_v36, %v12704_v61  ;;  %v12708_v34 = vld [vmem:[#allocation59_spill] sm:$0xff] }
 0x10d   : > { %v6206_v37 = vpop.eup %6205  ;;  %6231 = vrcp.f32 %v3339_v9  ;;  %v3307_v52 = vadd.f32 1.0, %v6204_v41  ;;  %v2027_v27 = vadd.f32 %v1771_v47, %v12705_v5  ;;  %v2086_v50 = vadd.f32 %v12707_v3, %v12706_v2  ;;  %v12712_v36 = vld [vmem:[#allocation63_spill] sm:$0xff] }
 0x10e   : > { %v6208_v32 = vpop.eup %6207  ;;  %4379 = vadd.xlane.f32.xlu1 %v4378_v28  ;;  %6233 = vrcp.f32 %v3306_v30  ;;  %v3396_v8 = vadd.f32 1.0, %v6206_v37  ;;  %v8638_v1 = vadd.f32 %v12708_v34, %v2026_v18  ;;  %v2087_v7 = vadd.f32 %v12711_v44, %v12710_v31  ;;  %v12718_v31 = vld [vmem:[#allocation91_spill] sm:$0xff] }
 0x10f   : > { %v6210_v13 = vpop.eup %6209  ;;  %v4133_v17 = vmul.f32 %v6208_v32, %v12712_v36  ;;  %6235 = vrcp.f32 %v3307_v52  ;;  %v8644_v9 = vadd.f32 %v12708_v34, %v2027_v27  ;;  %v8647_v47 = vadd.f32 %v8333_v54, %v2086_v50  ;;  %v12716_v52 = vld [vmem:[#allocation143_spill] sm:$0xff] }
 0x110   : > { %12709 = vst [vmem:[#allocation84_spill] sm:$0xff] %v8638_v1  ;;  %v6212_v41 = vpop.eup %6211  ;;  %4331 = vadd.xlane.f32.xlu0 %v4330_v63  ;;  %v3397_v28 = vadd.f32 1.0, %v6210_v13  ;;  %6237 = vrcp.f32 %v3396_v8  ;;  %v8650_v30 = vmul.f32 -1.442695, %v8638_v1  ;;  %v8653_v61 = vadd.f32 %v8333_v54, %v2087_v7  ;;  %v12719_v7 = vld [vmem:[#allocation124_spill] sm:$0xff] }
 0x111   : > { %12713 = vst [vmem:[#allocation56_spill] sm:$0xff] %v8644_v9  ;;  %12714 = vst [vmem:[#allocation89_spill] sm:$0xff] %v8647_v47  ;;  %v6214_v18 = vpop.eup %6213  ;;  %v4420_v37 = vadd.f32 %v4133_v17, %v4132_v57  ;;  %v3368_v5 = vadd.f32 1.0, %v6212_v41  ;;  %6239 = vpow2.f32 %v12716_v52  ;;  %v8657_v27 = vmul.f32 -1.442695, %v8644_v9  ;;  %v12717_v57 = vld [vmem:[#allocation123_spill] sm:$0xff] }
 0x112   : > { %12715 = vst [vmem:[#allocation90_spill] sm:$0xff] %v8653_v61  ;;  %v6216_v2 = vpop.eup %6215  ;;  %4424 = vadd.xlane.f32.xlu1 %v4423_v10  ;;  %6241 = vrcp.f32 %v3397_v28  ;;  %v3369_v63 = vadd.f32 1.0, %v6214_v18  ;;  %v8660_v3 = vmul.f32 -1.442695, %v8647_v47  ;;  %v8663_v50 = vmul.f32 -1.442695, %v8653_v61 }
 0x113   : > { %v6218_v32 = vpop.eup %6217  ;;  %6243 = vrcp.f32 %v3368_v5  ;;  %v3308_v8 = vadd.f32 1.0, %v6216_v2  ;;  %v1364_v44 = vadd.f32 %v12718_v31, %v12717_v57  ;;  %v12720_v13 = vld [vmem:[#allocation92_spill] sm:$0xff]  ;;  %v12721_v41 = vld [vmem:[#allocation49_spill] sm:$0xff]  ;;  %v12723_v52 = vld [vmem:[#allocation50_spill] sm:$0xff] }
 0x114   : > { %v1365_v36 = vadd.f32 %v12720_v13, %v12719_v7  ;;  %v6220_v17 = vpop.eup %6219  ;;  %4421 = vadd.xlane.f32.xlu0 %v4420_v37  ;;  %6245 = vrcp.f32 %v3369_v63  ;;  %v3309_v10 = vadd.f32 1.0, %v6218_v32  ;;  %v12722_v28 = vld [vmem:[#allocation125_spill] sm:$0xff]  ;;  %v12724_v2 = vld [vmem:[#allocation15_spill] sm:$0xff]  ;;  %v12726_v57 = vld [vmem:[#allocation16_spill] sm:$0xff]  ;;  %v8677_v13 = vpop.permute.xlu1 %1629 }
 0x115   : > { %v1828_v18 = vmul.f32 %v12722_v28, %v12721_v41  ;;  %v1829_v61 = vmul.f32 %v12722_v28, %v12723_v52  ;;  %v6222_v47 = vpop.eup %6221  ;;  %6247 = vrcp.f32 %v3308_v8  ;;  %v3398_v5 = vadd.f32 1.0, %v6220_v17  ;;  %v12725_v9 = vld [vmem:[#allocation117_spill] sm:$0xff]  ;;  %12727 = vst [vmem:[#allocation127_spill] sm:$0xff] %v8677_v13  ;;  %v12729_v8 = vld [vmem:[#allocation130_spill] sm:$0xff] }
 0x116   : > { %v992_v54 = vmul.f32 %v12725_v9, %v12724_v2  ;;  %v993_v31 = vmul.f32 %v12725_v9, %v12726_v57  ;;  %v6224_v7 = vpop.eup %6223  ;;  %6249 = vrcp.f32 %v3309_v10  ;;  %v3399_v37 = vadd.f32 1.0, %v6222_v47  ;;  %v12728_v28 = vld [vmem:[#allocation129_spill] sm:$0xff] }
 0x117   : > { %v2084_v63 = vadd.f32 %v1828_v18, %v1364_v44  ;;  %v2085_v32 = vadd.f32 %v1829_v61, %v1365_v36  ;;  %v6226_v1 = vpop.eup %6225  ;;  %6251 = vrcp.f32 %v3398_v5  ;;  %v3370_v19 = vadd.f32 1.0, %v6224_v7  ;;  %v8691_v36 = vpop.permute.xlu0 %2228 }
 0x118   : > { %v1248_v26 = vadd.f32 %v992_v54, %v12728_v28  ;;  %v1249_v17 = vadd.f32 %v993_v31, %v12729_v8  ;;  %v6228_v12 = vpop.eup %6227  ;;  %6253 = vrcp.f32 %v3399_v37  ;;  %v3371_v2 = vadd.f32 1.0, %v6226_v1  ;;  %12733 = vst [vmem:[#allocation122_spill] sm:$0xff] %v8691_v36  ;;  %v12734_v28 = vld [vmem:[#allocation69_spill] sm:$0xff] }
 0x119   : > { %v8682_v4 = vadd.f32 %v12730_v24, %v2084_v63  ;;  %v8685_v57 = vadd.f32 %v12730_v24, %v2085_v32  ;;  %v6230_v10 = vpop.eup %6229  ;;  %6255 = vrcp.f32 %v3370_v19  ;;  %v3340_v47 = vadd.f32 1.0, %v6228_v12  ;;  %v12735_v12 = vld [vmem:[#allocation70_spill] sm:$0xff]  ;;  %v12736_v32 = vld [vmem:[#allocation75_spill] sm:$0xff] }
 0x11a   : > { %v1712_v61 = vmul.f32 %v8677_v13, %v12631_v59  ;;  %v1713_v54 = vmul.f32 %v8677_v13, %v12691_v46  ;;  %v6232_v44 = vpop.eup %6231  ;;  %v4106_v1 = vmul.f32 %v6230_v10, %v12734_v28  ;;  %6257 = vrcp.f32 %v3371_v2  ;;  %v12737_v24 = vld [vmem:[#allocation146_spill] sm:$0xff]  ;;  %v12738_v46 = vld [vmem:[#allocation7_spill] sm:$0xff]  ;;  %v12740_v28 = vld [vmem:[#allocation8_spill] sm:$0xff] }
 0x11b   : > { %12731 = vst [vmem:[#allocation121_spill] sm:$0xff] %v8682_v4  ;;  %12732 = vst [vmem:[#allocation128_spill] sm:$0xff] %v8685_v57  ;;  %v8695_v18 = vmul.f32 -1.442695, %v8682_v4  ;;  %v8698_v5 = vmul.f32 -1.442695, %v8685_v57  ;;  %v6234_v19 = vpop.eup %6233  ;;  %v4107_v31 = vmul.f32 %v6232_v44, %v12735_v12  ;;  %6259 = vrcp.f32 %v3340_v47 }
 0x11c   : > { %v1968_v7 = vadd.f32 %v1712_v61, %v1248_v26  ;;  %v1969_v37 = vadd.f32 %v1713_v54, %v1249_v17  ;;  %v6236_v63 = vpop.eup %6235  ;;  %v4074_v8 = vmul.f32 %v6234_v19, %v12736_v32  ;;  %6261 = vpow2.f32 %v12737_v24  ;;  %v12739_v10 = vld [vmem:[#allocation118_spill] sm:$0xff]  ;;  %v12743_v47 = vld [vmem:[#allocation73_spill] sm:$0xff] }
 0x11d   : > { %v496_v2 = vmul.f32 %v12739_v10, %v12738_v46  ;;  %v497_v4 = vmul.f32 %v12739_v10, %v12740_v28  ;;  %v6238_v59 = vpop.eup %6237  ;;  %v4381_v57 = vadd.f32 %v4107_v31, %v4106_v1  ;;  %v4075_v40 = vmul.f32 %v6236_v63, %v12741_v11  ;;  %v12744_v54 = vld [vmem:[#allocation9_spill] sm:$0xff]  ;;  %v12750_v28 = vld [vmem:[#allocation136_spill] sm:$0xff] }
 0x11e   : > { %6263 = vpow2.f32 %v12742_v55  ;;  %v8710_v26 = vadd.f32 %v8691_v36, %v1968_v7  ;;  %v6240_v17 = vpop.eup %6239  ;;  %v4164_v61 = vmul.f32 %v6238_v59, %v12743_v47  ;;  %v8715_v24 = vadd.f32 %v8691_v36, %v1969_v37  ;;  %v12745_v31 = vld [vmem:[#allocation133_spill] sm:$0xff]  ;;  %v12746_v7 = vld [vmem:[#allocation10_spill] sm:$0xff] }
 0x11f   : > { %6265 = vpow2.f32 %v8522_v33  ;;  %v960_v44 = vmul.f32 %v12725_v9, %v12744_v54  ;;  %v6242_v19 = vpop.eup %6241  ;;  %4382 = vadd.xlane.f32.xlu1 %v4381_v57  ;;  %v4333_v1 = vadd.f32 %v4075_v40, %v4074_v8  ;;  %v3341_v11 = vadd.f32 1.0, %v6240_v17  ;;  %v12747_v40 = vld [vmem:[#allocation134_spill] sm:$0xff]  ;;  %v12748_v32 = vld [vmem:[#allocation29_spill] sm:$0xff] }
 0x120   : > { %6267 = vpow2.f32 %v8525_v42  ;;  %v8721_v55 = vmul.f32 -1.442695, %v8710_v26  ;;  %v6244_v12 = vpop.eup %6243  ;;  %v4165_v59 = vmul.f32 %v6242_v19, %v12745_v31  ;;  %v8726_v33 = vmul.f32 -1.442695, %v8715_v24  ;;  %v12749_v19 = vld [vmem:[#allocation135_spill] sm:$0xff] }
 0x121   : > { %6269 = vpow2.f32 %v8529_v15  ;;  %v961_v37 = vmul.f32 %v12725_v9, %v12746_v7  ;;  %v6246_v63 = vpop.eup %6245  ;;  %4334 = vadd.xlane.f32.xlu0 %v4333_v1  ;;  %v4136_v57 = vmul.f32 %v6244_v12, %v12747_v40  ;;  %v1216_v42 = vadd.f32 %v960_v44, %v496_v2  ;;  %v12751_v1 = vld [vmem:[#allocation30_spill] sm:$0xff]  ;;  %v12752_v40 = vld [vmem:[#allocation137_spill] sm:$0xff] }
 0x122   : > { %6271 = vrcp.f32 %v3341_v11  ;;  %v1680_v8 = vmul.f32 %v8677_v13, %v12748_v32  ;;  %v6248_v17 = vpop.eup %6247  ;;  %v4468_v47 = vadd.f32 %v4165_v59, %v4164_v61  ;;  %v4137_v31 = vmul.f32 %v6246_v63, %v12749_v19  ;;  %v12753_v61 = vld [vmem:[#allocation21_spill] sm:$0xff]  ;;  %v12758_v19 = vld [vmem:[#allocation142_spill] sm:$0xff] }
 0x123   : > { %6273 = vpow2.f32 %v8532_v53  ;;  %v1217_v15 = vadd.f32 %v961_v37, %v497_v4  ;;  %v6250_v54 = vpop.eup %6249  ;;  %v4076_v46 = vmul.f32 %v6248_v17, %v12750_v28  ;;  %v1681_v12 = vmul.f32 %v8677_v13, %v12751_v1  ;;  %v12754_v59 = vld [vmem:[#allocation65_spill] sm:$0xff]  ;;  %v12755_v37 = vld [vmem:[#allocation138_spill] sm:$0xff] }
 0x124   : > { %6275 = vpow2.f32 %v8553_v20  ;;  %v1936_v11 = vadd.f32 %v1680_v8, %v1216_v42  ;;  %v6252_v2 = vpop.eup %6251  ;;  %4469 = vadd.xlane.f32.xlu1 %v4468_v47  ;;  %v4426_v44 = vadd.f32 %v4137_v31, %v4136_v57  ;;  %v4077_v7 = vmul.f32 %v6250_v54, %v12752_v40  ;;  %v12756_v57 = vld [vmem:[#allocation139_spill] sm:$0xff] }
 0x125   : > { %6277 = vpow2.f32 %v8556_v49  ;;  %v588_v53 = vmul.f32 %v12754_v59, %v12753_v61  ;;  %v6254_v4 = vpop.eup %6253  ;;  %v4166_v63 = vmul.f32 %v6252_v2, %v12755_v37  ;;  %v1937_v20 = vadd.f32 %v1681_v12, %v1217_v15  ;;  %v12757_v49 = vld [vmem:[#allocation22_spill] sm:$0xff]  ;;  %v12761_v2 = vld [vmem:[#allocation115_spill] sm:$0xff] }
 0x126   : > { %6279 = vpow2.f32 %v8568_v14  ;;  %v8746_v28 = vadd.f32 %v8691_v36, %v1936_v11  ;;  %v6256_v42 = vpop.eup %6255  ;;  %4427 = vadd.xlane.f32.xlu0 %v4426_v44  ;;  %v4336_v8 = vadd.f32 %v4077_v7, %v4076_v46  ;;  %v4167_v17 = vmul.f32 %v6254_v4, %v12756_v57  ;;  %v12759_v7 = vld [vmem:[#allocation144_spill] sm:$0xff]  ;;  %v12762_v4 = vld [vmem:[#allocation141_spill] sm:$0xff]  ;;  %v12769_v61 = vld [vmem:[#allocation94_spill] sm:$0xff] }
 0x127   : > { %6281 = vpow2.f32 %v8574_v25  ;;  %v589_v54 = vmul.f32 %v12754_v59, %v12757_v49  ;;  %v6258_v47 = vpop.eup %6257  ;;  %v4138_v31 = vmul.f32 %v6256_v42, %v12758_v19  ;;  %v8755_v14 = vadd.f32 %v8691_v36, %v1937_v20  ;;  %v12760_v25 = vld [vmem:[#allocation25_spill] sm:$0xff]  ;;  %v12763_v20 = vld [vmem:[#allocation26_spill] sm:$0xff] }
 0x128   : > { %6283 = vpow2.f32 %v8601_v0  ;;  %v8758_v15 = vmul.f32 -1.442695, %v8746_v28  ;;  %v6260_v12 = vpop.eup %6259  ;;  %4337 = vadd.xlane.f32.xlu1 %v4336_v8  ;;  %v4471_v46 = vadd.f32 %v4167_v17, %v4166_v63  ;;  %v4139_v11 = vmul.f32 %v6258_v47, %v12759_v7 }
 0x129   : > { %6285 = vpow2.f32 %v8606_v56  ;;  %v1052_v44 = vmul.f32 %v12761_v2, %v12760_v25  ;;  %v6262_v40 = vpop.eup %6261  ;;  %v4108_v37 = vmul.f32 %v6260_v12, %v12762_v4  ;;  %v8767_v0 = vmul.f32 -1.442695, %v8755_v14 }
 0x12a   : > { %6287 = vpow2.f32 %v8625_v51  ;;  %v1053_v42 = vmul.f32 %v12761_v2, %v12763_v20  ;;  %4472 = vadd.xlane.f32.xlu0 %v4471_v46  ;;  %v4429_v63 = vadd.f32 %v4139_v11, %v4138_v31  ;;  %v3428_v57 = vadd.f32 1.0, %v6262_v40  ;;  %v12764_v51 = vld [vmem:[#allocation114_spill] sm:$0xff]  ;;  %v12765_v31 = vld [vmem:[#allocation35_spill] sm:$0xff]  ;;  %v12766_v40 = vld [vmem:[#allocation36_spill] sm:$0xff] }
 0x12b   : > { %v6264_v8 = vpop.eup %6263  ;;  %6289 = vpow2.f32 %v8631_v62  ;;  %v1308_v56 = vadd.f32 %v1052_v44, %v588_v53  ;;  %v1772_v12 = vmul.f32 %v12764_v51, %v12633_v58  ;;  %v1773_v46 = vmul.f32 %v12764_v51, %v12634_v35  ;;  %v12768_v20 = vld [vmem:[#allocation77_spill] sm:$0xff]  ;;  %v12774_v51 = vld [vmem:[#allocation96_spill] sm:$0xff] }
 0x12c   : > { %v6266_v17 = vpop.eup %6265  ;;  %v3429_v47 = vadd.f32 1.0, %v6264_v8  ;;  %6291 = vpow2.f32 %v8650_v30  ;;  %v1309_v19 = vadd.f32 %v1053_v42, %v589_v54  ;;  %4430 = vadd.xlane.f32.xlu1 %v4429_v63  ;;  %v1742_v11 = vmul.f32 %v8298_v60, %v12765_v31  ;;  %v12767_v63 = vld [vmem:[#allocation93_spill] sm:$0xff] }
 0x12d   : > { %v6268_v7 = vpop.eup %6267  ;;  %6293 = vrcp.f32 %v3428_v57  ;;  %v3400_v4 = vadd.f32 1.0, %v6266_v17  ;;  %v2028_v44 = vadd.f32 %v1772_v12, %v1308_v56  ;;  %v1743_v30 = vmul.f32 %v8298_v60, %v12766_v40 }
 0x12e   : > { %v6270_v62 = vpop.eup %6269  ;;  %6295 = vrcp.f32 %v3429_v47  ;;  %v3401_v53 = vadd.f32 1.0, %v6268_v7  ;;  %v2029_v8 = vadd.f32 %v1773_v46, %v1309_v19  ;;  %v1998_v57 = vadd.f32 %v1742_v11, %v12767_v63 }
 0x12f   : > { %v6272_v54 = vpop.eup %6271  ;;  %6297 = vrcp.f32 %v3400_v4  ;;  %v3310_v42 = vadd.f32 1.0, %v6270_v62  ;;  %v8784_v49 = vadd.f32 %v8377_v23, %v2028_v44  ;;  %v1999_v47 = vadd.f32 %v1743_v30, %v12769_v61 }
 0x130   : > { %v6274_v17 = vpop.eup %6273  ;;  %v4109_v25 = vmul.f32 %v6272_v54, %v12768_v20  ;;  %6299 = vrcp.f32 %v3401_v53  ;;  %v8788_v12 = vadd.f32 %v8377_v23, %v2029_v8  ;;  %v8791_v4 = vadd.f32 %v8502_v16, %v1998_v57 }
 0x131   : > { %v6276_v7 = vpop.eup %6275  ;;  %v3311_v56 = vadd.f32 1.0, %v6274_v17  ;;  %6301 = vrcp.f32 %v3310_v42  ;;  %v8795_v20 = vmul.f32 -1.442695, %v8784_v49  ;;  %v8801_v44 = vadd.f32 %v8502_v16, %v1999_v47  ;;  %v12772_v17 = vld [vmem:[#allocation48_spill] sm:$0xff] }
 0x132   : > { %v6278_v19 = vpop.eup %6277  ;;  %v4384_v46 = vadd.f32 %v4109_v25, %v4108_v37  ;;  %v3430_v11 = vadd.f32 1.0, %v6276_v7  ;;  %6303 = vpow2.f32 %v8657_v27  ;;  %v8798_v53 = vmul.f32 -1.442695, %v8788_v12  ;;  %v12770_v27 = vld [vmem:[#allocation47_spill] sm:$0xff]  ;;  %v12771_v37 = vld [vmem:[#allocation113_spill] sm:$0xff] }
 0x133   : > { %v6280_v62 = vpop.eup %6279  ;;  %6305 = vrcp.f32 %v3311_v56  ;;  %v3431_v61 = vadd.f32 1.0, %v6278_v19  ;;  %v8804_v25 = vmul.f32 -1.442695, %v8791_v4  ;;  %v1112_v42 = vmul.f32 %v12771_v37, %v12770_v27  ;;  %v12773_v19 = vld [vmem:[#allocation95_spill] sm:$0xff] }
 0x134   : > { %v6282_v30 = vpop.eup %6281  ;;  %4385 = vadd.xlane.f32.xlu0 %v4384_v46  ;;  %6307 = vrcp.f32 %v3430_v11  ;;  %v3372_v54 = vadd.f32 1.0, %v6280_v62  ;;  %v8809_v57 = vmul.f32 -1.442695, %v8801_v44  ;;  %v1113_v47 = vmul.f32 %v12771_v37, %v12772_v17 }
 0x135   : > { %v6284_v8 = vpop.eup %6283  ;;  %6309 = vrcp.f32 %v3431_v61  ;;  %v3373_v63 = vadd.f32 1.0, %v6282_v30  ;;  %v1368_v46 = vadd.f32 %v1112_v42, %v12773_v19  ;;  %v1832_v11 = vmul.f32 %v8225_v22, %v12721_v41 }
 0x136   : > { %v6286_v7 = vpop.eup %6285  ;;  %6311 = vrcp.f32 %v3372_v54  ;;  %v3342_v56 = vadd.f32 1.0, %v6284_v8  ;;  %v1369_v61 = vadd.f32 %v1113_v47, %v12774_v51  ;;  %v1833_v30 = vmul.f32 %v8225_v22, %v12723_v52  ;;  %v12775_v22 = vld [vmem:[#allocation99_spill] sm:$0xff] }
 0x137   : > { %v6288_v62 = vpop.eup %6287  ;;  %6313 = vrcp.f32 %v3373_v63  ;;  %v3343_v23 = vadd.f32 1.0, %v6286_v7  ;;  %v2088_v37 = vadd.f32 %v1832_v11, %v1368_v46  ;;  %v1802_v54 = vmul.f32 %v8255_v39, %v12694_v43  ;;  %v12776_v46 = vld [vmem:[#allocation78_spill] sm:$0xff] }
 0x138   : > { %v6290_v2 = vpop.eup %6289  ;;  %6315 = vrcp.f32 %v3342_v56  ;;  %v3432_v59 = vadd.f32 1.0, %v6288_v62  ;;  %v2089_v19 = vadd.f32 %v1833_v30, %v1369_v61  ;;  %v1803_v63 = vmul.f32 %v8255_v39, %v12697_v21  ;;  %v12778_v30 = vld [vmem:[#allocation145_spill] sm:$0xff] }
 0x139   : > { %v6292_v8 = vpop.eup %6291  ;;  %6317 = vrcp.f32 %v3343_v23  ;;  %v3433_v42 = vadd.f32 1.0, %v6290_v2  ;;  %v8824_v47 = vadd.f32 %v8300_v48, %v2088_v37  ;;  %v2058_v56 = vadd.f32 %v1802_v54, %v12775_v22  ;;  %v12777_v23 = vld [vmem:[#allocation100_spill] sm:$0xff]  ;;  %v12791_v39 = vld [vmem:[#allocation149_spill] sm:$0xff] }
 0x13a   : > { %v6294_v7 = vpop.eup %6293  ;;  %6319 = vrcp.f32 %v3432_v59  ;;  %v3402_v51 = vadd.f32 1.0, %v6292_v8  ;;  %v8829_v43 = vadd.f32 %v8300_v48, %v2089_v19  ;;  %v2059_v2 = vadd.f32 %v1803_v63, %v12777_v23 }
 0x13b   : > { %v6296_v62 = vpop.eup %6295  ;;  %v4196_v11 = vmul.f32 %v6294_v7, %v12776_v46  ;;  %6321 = vrcp.f32 %v3433_v42  ;;  %v8834_v59 = vmul.f32 -1.442695, %v8824_v47  ;;  %v8837_v37 = vadd.f32 %v12708_v34, %v2058_v56  ;;  %v12782_v46 = vld [vmem:[#allocation53_spill] sm:$0xff] }
 0x13c   : > { %v6298_v61 = vpop.eup %6297  ;;  %v4197_v21 = vmul.f32 %v6296_v62, %v12778_v30  ;;  %6323 = vrcp.f32 %v3402_v51  ;;  %v8842_v8 = vmul.f32 -1.442695, %v8829_v43  ;;  %v8845_v42 = vadd.f32 %v12708_v34, %v2059_v2  ;;  %v12781_v62 = vld [vmem:[#allocation51_spill] sm:$0xff] }
 0x13d   : > { %12779 = vst [vmem:[#allocation63_spill] sm:$0xff] %v8837_v37  ;;  %v6300_v22 = vpop.eup %6299  ;;  %v4168_v54 = vmul.f32 %v6298_v61, %v8509_v45  ;;  %6325 = vpow2.f32 %v8660_v3  ;;  %v8850_v51 = vmul.f32 -1.442695, %v8837_v37  ;;  %v678_v23 = vmul.f32 %v12782_v46, %v12781_v62  ;;  %v12785_v30 = vld [vmem:[#allocation107_spill] sm:$0xff] }
 0x13e   : > { %12780 = vst [vmem:[#allocation143_spill] sm:$0xff] %v8845_v42  ;;  %v6302_v19 = vpop.eup %6301  ;;  %v4516_v63 = vadd.f32 %v4197_v21, %v4196_v11  ;;  %v4169_v7 = vmul.f32 %v6300_v22, %v8512_v38  ;;  %6327 = vpow2.f32 %v8663_v50  ;;  %v8855_v3 = vmul.f32 -1.442695, %v8845_v42  ;;  %v12783_v50 = vld [vmem:[#allocation52_spill] sm:$0xff] }
 0x13f   : > { %v6304_v56 = vpop.eup %6303  ;;  %v4078_v45 = vmul.f32 %v6302_v19, %v8515_v6  ;;  %6329 = vpow2.f32 %v8695_v18  ;;  %v679_v2 = vmul.f32 %v12782_v46, %v12783_v50  ;;  %v12784_v18 = vld [vmem:[#allocation101_spill] sm:$0xff]  ;;  %v12786_v19 = vld [vmem:[#allocation102_spill] sm:$0xff]  ;;  %v12789_v46 = vld [vmem:[#allocation12_spill] sm:$0xff] }
 0x140   : > { %v6306_v21 = vpop.eup %6305  ;;  %4517 = vadd.xlane.f32.xlu1 %v4516_v63  ;;  %v4474_v38 = vadd.f32 %v4169_v7, %v4168_v54  ;;  %v3403_v11 = vadd.f32 1.0, %v6304_v56  ;;  %6331 = vpow2.f32 %v8698_v5  ;;  %v1142_v22 = vmul.f32 %v12785_v30, %v12784_v18  ;;  %v12787_v54 = vld [vmem:[#allocation81_spill] sm:$0xff]  ;;  %v7159_v5 = vld [vmem:[%s7327_s30 + $0x30] sm:$0x77]  ;;  %v12788_v7 = vld [vmem:[#allocation11_spill] sm:$0xff] }
 0x141   : > { %v6308_v61 = vpop.eup %6307  ;;  %v4079_v6 = vmul.f32 %v6306_v21, %v8518_v29  ;;  %6333 = vpow2.f32 %v8721_v55  ;;  %v1143_v48 = vmul.f32 %v12785_v30, %v12786_v19  ;;  %v1511_v56 = vrot.slane %v7159_v5, %v12788_v7  ;;  %v12790_v21 = vld [vmem:[#allocation82_spill] sm:$0xff] }
 0x142   : > { %v6310_v42 = vpop.eup %6309  ;;  %4475 = vadd.xlane.f32.xlu0 %v4474_v38  ;;  %v4198_v63 = vmul.f32 %v6308_v61, %v12787_v54  ;;  %6335 = vrcp.f32 %v3403_v11  ;;  %v1515_v34 = vrot.slane %v7159_v5, %v12789_v46  ;;  %v1398_v18 = vadd.f32 %v1142_v22, %v678_v23  ;;  %v12793_v5 = vld [vmem:[#allocation150_spill] sm:$0xff] }
 0x143   : > { %v6312_v52 = vpop.eup %6311  ;;  %v4339_v29 = vadd.f32 %v4079_v6, %v4078_v45  ;;  %v4199_v55 = vmul.f32 %v6310_v42, %v12790_v21  ;;  %6337 = vpow2.f32 %v8726_v33  ;;  %v1399_v38 = vadd.f32 %v1143_v48, %v679_v2  ;;  %v12795_v45 = vld [vmem:[#allocation87_spill] sm:$0xff] }
 0x144   : > { %v6314_v37 = vpop.eup %6313  ;;  %v4140_v30 = vmul.f32 %v6312_v52, %v12791_v39  ;;  %6339 = vpow2.f32 %v8758_v15  ;;  %v8877_v11 = vrot.slane %v1511_v56, %v12788_v7  ;;  %v8882_v42 = vrot.slane %v1515_v34, %v12788_v7  ;;  %v12796_v39 = vld [vmem:[#allocation108_spill] sm:$0xff] }
 0x145   : > { %v6316_v61 = vpop.eup %6315  ;;  %4340 = vadd.xlane.f32.xlu1 %v4339_v29  ;;  %v4519_v54 = vadd.f32 %v4199_v55, %v4198_v63  ;;  %v4141_v19 = vmul.f32 %v6314_v37, %v12793_v5  ;;  %6341 = vpow2.f32 %v8767_v0  ;;  %v12797_v52 = vld [vmem:[#allocation116_spill] sm:$0xff]  ;;  %v12799_v63 = vld [vmem:[#allocation83_spill] sm:$0xff] }
 0x146   : > { %12792 = vst [vmem:[#allocation123_spill] sm:$0xff] %v8877_v11  ;;  %12794 = vst [vmem:[#allocation91_spill] sm:$0xff] %v8882_v42  ;;  %v6318_v33 = vpop.eup %6317  ;;  %v4110_v23 = vmul.f32 %v6316_v61, %v12795_v45  ;;  %6343 = vpow2.f32 %v8795_v20  ;;  %v1862_v48 = vmul.f32 %v12796_v39, %v8877_v11  ;;  %v676_v15 = vmul.f32 %v12797_v52, %v12781_v62  ;;  %v12798_v37 = vld [vmem:[#allocation88_spill] sm:$0xff] }
 0x147   : > { %v6320_v2 = vpop.eup %6319  ;;  %4520 = vadd.xlane.f32.xlu0 %v4519_v54  ;;  %v4432_v6 = vadd.f32 %v4141_v19, %v4140_v30  ;;  %v4111_v22 = vmul.f32 %v6318_v33, %v12798_v37  ;;  %6345 = vpow2.f32 %v8798_v53  ;;  %v1863_v34 = vmul.f32 %v12796_v39, %v8882_v42  ;;  %v12800_v30 = vld [vmem:[#allocation140_spill] sm:$0xff] }
 0x148   : > { %v6322_v0 = vpop.eup %6321  ;;  %v4200_v56 = vmul.f32 %v6320_v2, %v12799_v63  ;;  %6347 = vpow2.f32 %v8804_v25  ;;  %v2118_v20 = vadd.f32 %v1862_v48, %v1398_v18  ;;  %v677_v29 = vmul.f32 %v12797_v52, %v12783_v50  ;;  %v12801_v54 = vld [vmem:[#allocation84_spill] sm:$0xff]  ;;  %v12803_v25 = vld [vmem:[#allocation103_spill] sm:$0xff]  ;;  %v8906_v2 = vpop.permute.xlu1 %1633 }
 0x149   : > { %v6324_v21 = vpop.eup %6323  ;;  %4433 = vadd.xlane.f32.xlu1 %v4432_v6  ;;  %v4387_v55 = vadd.f32 %v4111_v22, %v4110_v23  ;;  %v4201_v19 = vmul.f32 %v6322_v0, %v12800_v30  ;;  %6349 = vpow2.f32 %v8809_v57  ;;  %v2119_v53 = vadd.f32 %v1863_v34, %v1399_v38  ;;  %v12802_v33 = vld [vmem:[#allocation60_spill] sm:$0xff]  ;;  %12804 = vst [vmem:[#allocation124_spill] sm:$0xff] %v8906_v2 }
 0x14a   : > { %v6326_v61 = vpop.eup %6325  ;;  %v4170_v5 = vmul.f32 %v6324_v21, %v12801_v54  ;;  %6351 = vpow2.f32 %v8834_v59  ;;  %v8903_v45 = vadd.f32 %v12802_v33, %v2118_v20  ;;  %v1396_v18 = vadd.f32 %v12803_v25, %v676_v15  ;;  %v12805_v22 = vld [vmem:[#allocation104_spill] sm:$0xff] }
 0x14b   : > { %v6328_v48 = vpop.eup %6327  ;;  %4388 = vadd.xlane.f32.xlu0 %v4387_v55  ;;  %v4522_v23 = vadd.f32 %v4201_v19, %v4200_v56  ;;  %v3462_v6 = vadd.f32 1.0, %v6326_v61  ;;  %6353 = vpow2.f32 %v8842_v8  ;;  %v8910_v57 = vadd.f32 %v12802_v33, %v2119_v53  ;;  %v12806_v8 = vld [vmem:[#allocation125_spill] sm:$0xff]  ;;  %v12807_v55 = vld [vmem:[#allocation31_spill] sm:$0xff]  ;;  %v12808_v61 = vld [vmem:[#allocation32_spill] sm:$0xff] }
 0x14c   : > { %v6330_v38 = vpop.eup %6329  ;;  %v3463_v37 = vadd.f32 1.0, %v6328_v48  ;;  %6355 = vpow2.f32 %v8850_v51  ;;  %v8914_v59 = vmul.f32 -1.442695, %v8903_v45  ;;  %v1397_v15 = vadd.f32 %v12805_v22, %v677_v29  ;;  %v8928_v48 = vpop.permute.xlu0 %2233 }
 0x14d   : > { %v6332_v34 = vpop.eup %6331  ;;  %4523 = vadd.xlane.f32.xlu1 %v4522_v23  ;;  %6357 = vrcp.f32 %v3462_v6  ;;  %v3460_v0 = vadd.f32 1.0, %v6330_v38  ;;  %v8918_v63 = vmul.f32 -1.442695, %v8910_v57  ;;  %v1860_v56 = vmul.f32 %v12806_v8, %v8877_v11  ;;  %12809 = vst [vmem:[#allocation92_spill] sm:$0xff] %v8928_v48  ;;  %v12810_v23 = vld [vmem:[#allocation56_spill] sm:$0xff] }
 0x14e   : > { %v6334_v20 = vpop.eup %6333  ;;  %6359 = vrcp.f32 %v3463_v37  ;;  %v3461_v21 = vadd.f32 1.0, %v6332_v34  ;;  %v1861_v51 = vmul.f32 %v12806_v8, %v8882_v42  ;;  %v1714_v30 = vmul.f32 %v8906_v2, %v12807_v55  ;;  %v12811_v37 = vld [vmem:[#allocation109_spill] sm:$0xff]  ;;  %v12812_v55 = vld [vmem:[#allocation55_spill] sm:$0xff] }
 0x14f   : > { %v6336_v29 = vpop.eup %6335  ;;  %6361 = vrcp.f32 %v3460_v0  ;;  %v3344_v19 = vadd.f32 1.0, %v6334_v20  ;;  %v2116_v53 = vadd.f32 %v1860_v56, %v1396_v18  ;;  %v1715_v54 = vmul.f32 %v8906_v2, %v12808_v61  ;;  %v12813_v0 = vld [vmem:[#allocation110_spill] sm:$0xff] }
 0x150   : > { %v6338_v25 = vpop.eup %6337  ;;  %v4171_v6 = vmul.f32 %v6336_v29, %v12810_v23  ;;  %6363 = vrcp.f32 %v3461_v21  ;;  %v2117_v38 = vadd.f32 %v1861_v51, %v1397_v15  ;;  %v1970_v22 = vadd.f32 %v1714_v30, %v12811_v37 }
 0x151   : > { %v6340_v34 = vpop.eup %6339  ;;  %v3345_v33 = vadd.f32 1.0, %v6338_v25  ;;  %6365 = vrcp.f32 %v3344_v19  ;;  %v8933_v39 = vadd.f32 %v12812_v55, %v2116_v53  ;;  %v1971_v18 = vadd.f32 %v1715_v54, %v12813_v0 }
 0x152   : > { %v6342_v56 = vpop.eup %6341  ;;  %v4477_v20 = vadd.f32 %v4171_v6, %v4170_v5  ;;  %v3312_v61 = vadd.f32 1.0, %v6340_v34  ;;  %6367 = vpow2.f32 %v8855_v3  ;;  %v8938_v42 = vadd.f32 %v12812_v55, %v2117_v38  ;;  %v12814_v34 = vld [vmem:[#allocation111_spill] sm:$0xff] }
 0x153   : > { %v6344_v21 = vpop.eup %6343  ;;  %6369 = vrcp.f32 %v3345_v33  ;;  %v3313_v15 = vadd.f32 1.0, %v6342_v56  ;;  %v5993_v51 = vmul.f32 -1.442695, %v8933_v39  ;;  %v8942_v30 = vadd.f32 %v8928_v48, %v1970_v22 }
 0x154   : > { %v6346_v29 = vpop.eup %6345  ;;  %4478 = vadd.xlane.f32.xlu0 %v4477_v20  ;;  %6371 = vrcp.f32 %v3312_v61  ;;  %v3404_v19 = vadd.f32 1.0, %v6344_v21  ;;  %v5994_v5 = vmul.f32 -1.442695, %v8938_v42  ;;  %v8946_v53 = vadd.f32 %v8928_v48, %v1971_v18  ;;  %v12815_v21 = vld [vmem:[#allocation112_spill] sm:$0xff] }
 0x155   : > { %v6348_v3 = vpop.eup %6347  ;;  %6373 = vrcp.f32 %v3313_v15  ;;  %v3405_v54 = vadd.f32 1.0, %v6346_v29  ;;  %v5847_v33 = vmul.f32 -1.442695, %v8942_v30  ;;  %v1682_v25 = vmul.f32 %v8906_v2, %v12748_v32 }
 0x156   : > { %v6350_v23 = vpop.eup %6349  ;;  %6375 = vrcp.f32 %v3404_v19  ;;  %v3374_v6 = vadd.f32 1.0, %v6348_v3  ;;  %v8952_v38 = vmul.f32 -1.442695, %v8946_v53  ;;  %v1683_v61 = vmul.f32 %v8906_v2, %v12751_v1 }
 0x157   : > { %v6352_v37 = vpop.eup %6351  ;;  %6377 = vrcp.f32 %v3405_v54  ;;  %v3375_v22 = vadd.f32 1.0, %v6350_v23  ;;  %v1938_v0 = vadd.f32 %v1682_v25, %v12814_v34  ;;  %v1774_v18 = vmul.f32 %v8298_v60, %v12633_v58  ;;  %v12816_v54 = vld [vmem:[#allocation105_spill] sm:$0xff] }
 0x158   : > { %v6354_v56 = vpop.eup %6353  ;;  %6379 = vrcp.f32 %v3374_v6  ;;  %v3464_v20 = vadd.f32 1.0, %v6352_v37  ;;  %v1939_v15 = vadd.f32 %v1683_v61, %v12815_v21  ;;  %v1775_v29 = vmul.f32 %v8298_v60, %v12634_v35  ;;  %v12817_v6 = vld [vmem:[#allocation106_spill] sm:$0xff]  ;;  %v12818_v21 = vld [vmem:[#allocation89_spill] sm:$0xff]  ;;  %v12822_v60 = vld [vmem:[#allocation128_spill] sm:$0xff] }
 0x159   : > { %v6356_v19 = vpop.eup %6355  ;;  %6381 = vrcp.f32 %v3375_v22  ;;  %v3465_v3 = vadd.f32 1.0, %v6354_v56  ;;  %v8963_v2 = vadd.f32 %v8928_v48, %v1938_v0  ;;  %v2030_v23 = vadd.f32 %v1774_v18, %v12816_v54  ;;  %v12819_v35 = vld [vmem:[#allocation90_spill] sm:$0xff] }
 0x15a   : > { %v6358_v25 = vpop.eup %6357  ;;  %6383 = vrcp.f32 %v3464_v20  ;;  %v3434_v34 = vadd.f32 1.0, %v6356_v19  ;;  %v8967_v58 = vadd.f32 %v8928_v48, %v1939_v15  ;;  %v2031_v37 = vadd.f32 %v1775_v29, %v12817_v6  ;;  %v12820_v29 = vld [vmem:[#allocation121_spill] sm:$0xff] }
 0x15b   : > { %v6360_v61 = vpop.eup %6359  ;;  %v4230_v1 = vmul.f32 %v6358_v25, %v12818_v21  ;;  %6385 = vrcp.f32 %v3465_v3  ;;  %v5815_v22 = vmul.f32 -1.442695, %v8963_v2  ;;  %v8973_v56 = vadd.f32 %v8502_v16, %v2030_v23  ;;  %v12821_v25 = vld [vmem:[#allocation17_spill] sm:$0xff] }
 0x15c   : > { %v6362_v0 = vpop.eup %6361  ;;  %v4231_v18 = vmul.f32 %v6360_v61, %v12819_v35  ;;  %6387 = vrcp.f32 %v3434_v34  ;;  %v5816_v20 = vmul.f32 -1.442695, %v8967_v58  ;;  %v8978_v15 = vadd.f32 %v8502_v16, %v2031_v37 }
 0x15d   : > { %v6364_v19 = vpop.eup %6363  ;;  %v4228_v54 = vmul.f32 %v6362_v0, %v12820_v29  ;;  %6389 = vpow2.f32 %v8914_v59  ;;  %v5907_v3 = vmul.f32 -1.442695, %v8973_v56  ;;  %v560_v23 = vmul.f32 %v12739_v10, %v12821_v25  ;;  %v12823_v0 = vld [vmem:[#allocation18_spill] sm:$0xff]  ;;  %v12824_v29 = vld [vmem:[#allocation19_spill] sm:$0xff] }
 0x15e   : > { %v6366_v6 = vpop.eup %6365  ;;  %v4567_v21 = vadd.f32 %v4231_v18, %v4230_v1  ;;  %v4229_v35 = vmul.f32 %v6364_v19, %v12822_v60  ;;  %6391 = vpow2.f32 %v8918_v63  ;;  %v5908_v34 = vmul.f32 -1.442695, %v8978_v15  ;;  %v12825_v60 = vld [vmem:[#allocation20_spill] sm:$0xff] }
 0x15f   : > { %v6368_v37 = vpop.eup %6367  ;;  %v4112_v61 = vmul.f32 %v6366_v6, %v8710_v26  ;;  %6393 = vpow2.f32 %v5993_v51  ;;  %v561_v59 = vmul.f32 %v12739_v10, %v12823_v0  ;;  %v1024_v16 = vmul.f32 %v12725_v9, %v12824_v29 }
 0x160   : > { %v6370_v48 = vpop.eup %6369  ;;  %4568 = vadd.xlane.f32.xlu1 %v4567_v21  ;;  %v4564_v25 = vadd.f32 %v4229_v35, %v4228_v54  ;;  %v3435_v1 = vadd.f32 1.0, %v6368_v37  ;;  %6395 = vpow2.f32 %v5994_v5  ;;  %v1025_v63 = vmul.f32 %v12725_v9, %v12825_v60 }
 0x161   : > { %v6372_v18 = vpop.eup %6371  ;;  %v4113_v19 = vmul.f32 %v6370_v48, %v8715_v24  ;;  %6397 = vpow2.f32 %v5847_v33  ;;  %v1280_v26 = vadd.f32 %v1024_v16, %v560_v23  ;;  %v1744_v51 = vmul.f32 %v8677_v13, %v12765_v31  ;;  %v12827_v23 = vld [vmem:[#allocation33_spill] sm:$0xff] }
 0x162   : > { %v6374_v6 = vpop.eup %6373  ;;  %4565 = vadd.xlane.f32.xlu0 %v4564_v25  ;;  %v4080_v10 = vmul.f32 %v6372_v18, %v8746_v28  ;;  %6399 = vrcp.f32 %v3435_v1  ;;  %v1281_v21 = vadd.f32 %v1025_v63, %v561_v59  ;;  %v1745_v5 = vmul.f32 %v8677_v13, %v12766_v40  ;;  %v12826_v25 = vld [vmem:[#allocation41_spill] sm:$0xff] }
 0x163   : > { %v6376_v54 = vpop.eup %6375  ;;  %v4390_v35 = vadd.f32 %v4113_v19, %v4112_v61  ;;  %v4081_v37 = vmul.f32 %v6374_v6, %v8755_v14  ;;  %6401 = vpow2.f32 %v8952_v38  ;;  %v2000_v24 = vadd.f32 %v1744_v51, %v1280_v26 }
 0x164   : > { %v6378_v16 = vpop.eup %6377  ;;  %v4172_v48 = vmul.f32 %v6376_v54, %v8784_v49  ;;  %6403 = vpow2.f32 %v5815_v22  ;;  %v2001_v33 = vadd.f32 %v1745_v5, %v1281_v21  ;;  %v650_v28 = vmul.f32 %v12827_v23, %v12826_v25  ;;  %v12828_v22 = vld [vmem:[#allocation42_spill] sm:$0xff] }
 0x165   : > { %v6380_v1 = vpop.eup %6379  ;;  %4391 = vadd.xlane.f32.xlu1 %v4390_v35  ;;  %v4342_v59 = vadd.f32 %v4081_v37, %v4080_v10  ;;  %v4173_v63 = vmul.f32 %v6378_v16, %v8788_v12  ;;  %6405 = vpow2.f32 %v5816_v20  ;;  %v9008_v61 = vadd.f32 %v8691_v36, %v2000_v24  ;;  %v12831_v24 = vld [vmem:[#allocation63_spill] sm:$0xff] }
 0x166   : > { %v6382_v14 = vpop.eup %6381  ;;  %v4142_v38 = vmul.f32 %v6380_v1, %v8791_v4  ;;  %6407 = vpow2.f32 %v5907_v3  ;;  %v9012_v49 = vadd.f32 %v8691_v36, %v2001_v33  ;;  %v651_v18 = vmul.f32 %v12827_v23, %v12828_v22  ;;  %v12829_v3 = vld [vmem:[#allocation34_spill] sm:$0xff] }
 0x167   : > { %v6384_v19 = vpop.eup %6383  ;;  %4343 = vadd.xlane.f32.xlu0 %v4342_v59  ;;  %v4480_v26 = vadd.f32 %v4173_v63, %v4172_v48  ;;  %v4143_v10 = vmul.f32 %v6382_v14, %v8801_v44  ;;  %6409 = vpow2.f32 %v5908_v34  ;;  %v5877_v12 = vmul.f32 -1.442695, %v9008_v61  ;;  %v12830_v44 = vld [vmem:[#allocation54_spill] sm:$0xff] }
 0x168   : > { %v6386_v20 = vpop.eup %6385  ;;  %v4232_v51 = vmul.f32 %v6384_v19, %v8824_v47  ;;  %v5878_v4 = vmul.f32 -1.442695, %v9012_v49  ;;  %v1114_v6 = vmul.f32 %v12829_v3, %v12770_v27  ;;  %v1115_v21 = vmul.f32 %v12829_v3, %v12772_v17  ;;  %v12832_v63 = vld [vmem:[#allocation50_spill] sm:$0xff]  ;;  %v12834_v19 = vld [vmem:[#allocation65_spill] sm:$0xff]  ;;  %v12846_v3 = vld [vmem:[#allocation4_spill] sm:$0xff] }
 0x169   : > { %v6388_v5 = vpop.eup %6387  ;;  %4481 = vadd.xlane.f32.xlu1 %v4480_v26  ;;  %v4435_v54 = vadd.f32 %v4143_v10, %v4142_v38  ;;  %v4233_v35 = vmul.f32 %v6386_v20, %v8829_v43  ;;  %6411 = vpow2.f32 %v5877_v12  ;;  %v1834_v34 = vmul.f32 %v12830_v44, %v12721_v41  ;;  %v12833_v38 = vld [vmem:[#allocation27_spill] sm:$0xff]  ;;  %v12835_v20 = vld [vmem:[#allocation28_spill] sm:$0xff]  ;;  %v235_v27 = vld [vmem:[%s7327_s30 + $0x38] sm:$0x77] }
 0x16a   : > { %v6390_v37 = vpop.eup %6389  ;;  %v4202_v47 = vmul.f32 %v6388_v5, %v12831_v24  ;;  %6413 = vpow2.f32 %v5878_v4  ;;  %v1370_v16 = vadd.f32 %v1114_v6, %v650_v28  ;;  %v1371_v48 = vadd.f32 %v1115_v21, %v651_v18  ;;  %v12836_v5 = vld [vmem:[#allocation37_spill] sm:$0xff]  ;;  %v12837_v4 = vld [vmem:[#allocation115_spill] sm:$0xff]  ;;  %v12838_v21 = vld [vmem:[#allocation38_spill] sm:$0xff] }
 0x16b   : > { %v6392_v33 = vpop.eup %6391  ;;  %4436 = vadd.xlane.f32.xlu0 %v4435_v54  ;;  %v4570_v1 = vadd.f32 %v4233_v35, %v4232_v51  ;;  %v3494_v59 = vadd.f32 1.0, %v6390_v37  ;;  %v1835_v14 = vmul.f32 %v12830_v44, %v12832_v63  ;;  %v620_v43 = vmul.f32 %v12834_v19, %v12833_v38  ;;  %v12839_v24 = vld [vmem:[#allocation59_spill] sm:$0xff] }
 0x16c   : > { %v6394_v26 = vpop.eup %6393  ;;  %v3495_v10 = vadd.f32 1.0, %v6392_v33  ;;  %v2090_v12 = vadd.f32 %v1834_v34, %v1370_v16  ;;  %v621_v41 = vmul.f32 %v12834_v19, %v12835_v20  ;;  %v1084_v28 = vmul.f32 %v12837_v4, %v12836_v5 }
 0x16d   : > { %v6396_v18 = vpop.eup %6395  ;;  %4571 = vadd.xlane.f32.xlu1 %v4570_v1  ;;  %6415 = vrcp.f32 %v3494_v59  ;;  %v3492_v51 = vadd.f32 1.0, %v6394_v26  ;;  %v2091_v6 = vadd.f32 %v1835_v14, %v1371_v48  ;;  %v1085_v54 = vmul.f32 %v12837_v4, %v12838_v21  ;;  %v12840_v48 = vld [vmem:[#allocation143_spill] sm:$0xff]  ;;  %v12841_v4 = vld [vmem:[#allocation45_spill] sm:$0xff] }
 0x16e   : > { %v6398_v35 = vpop.eup %6397  ;;  %6417 = vrcp.f32 %v3495_v10  ;;  %v3493_v37 = vadd.f32 1.0, %v6396_v18  ;;  %v9039_v34 = vadd.f32 %v12839_v24, %v2090_v12  ;;  %v1340_v16 = vadd.f32 %v1084_v28, %v620_v43  ;;  %v12842_v10 = vld [vmem:[#allocation114_spill] sm:$0xff] }
 0x16f   : > { %v6400_v33 = vpop.eup %6399  ;;  %6419 = vrcp.f32 %v3492_v51  ;;  %v3346_v63 = vadd.f32 1.0, %v6398_v35  ;;  %v9042_v17 = vadd.f32 %v12839_v24, %v2091_v6  ;;  %v1341_v1 = vadd.f32 %v1085_v54, %v621_v41  ;;  %v12843_v28 = vld [vmem:[#allocation46_spill] sm:$0xff]  ;;  %v12844_v24 = vld [vmem:[#allocation3_spill] sm:$0xff] }
 0x170   : > { %v6402_v59 = vpop.eup %6401  ;;  %v4203_v14 = vmul.f32 %v6400_v33, %v12840_v48  ;;  %6421 = vrcp.f32 %v3493_v37  ;;  %v5967_v26 = vmul.f32 -1.442695, %v9039_v34  ;;  %v1804_v18 = vmul.f32 %v12842_v10, %v12841_v4 }
 0x171   : > { %v6404_v12 = vpop.eup %6403  ;;  %v3347_v22 = vadd.f32 1.0, %v6402_v59  ;;  %6423 = vrcp.f32 %v3346_v63  ;;  %v5968_v43 = vmul.f32 -1.442695, %v9042_v17  ;;  %v1805_v51 = vmul.f32 %v12842_v10, %v12843_v28  ;;  %v12845_v59 = vld [vmem:[#allocation74_spill] sm:$0xff] }
 0x172   : > { %v6406_v6 = vpop.eup %6405  ;;  %v4525_v41 = vadd.f32 %v4203_v14, %v4202_v47  ;;  %v3314_v54 = vadd.f32 1.0, %v6404_v12  ;;  %6425 = vpow2.f32 %v5967_v26  ;;  %v2060_v35 = vadd.f32 %v1804_v18, %v1340_v16  ;;  %v12849_v18 = vld [vmem:[#allocation5_spill] sm:$0xff] }
 0x173   : > { %v6408_v37 = vpop.eup %6407  ;;  %6427 = vrcp.f32 %v3347_v22  ;;  %v3315_v33 = vadd.f32 1.0, %v6406_v6  ;;  %v2061_v48 = vadd.f32 %v1805_v51, %v1341_v1  ;;  %v319_v19 = vrot.slane %v235_v27, %v12844_v24 }
 0x174   : > { %v6410_v25 = vpop.eup %6409  ;;  %4526 = vadd.xlane.f32.xlu0 %v4525_v41  ;;  %6429 = vrcp.f32 %v3314_v54  ;;  %v3406_v63 = vadd.f32 1.0, %v6408_v37  ;;  %v9054_v44 = vadd.f32 %v12845_v59, %v2060_v35  ;;  %v323_v10 = vrot.slane %v235_v27, %v12846_v3  ;;  %v12850_v54 = vld [vmem:[#allocation6_spill] sm:$0xff] }
 0x175   : > { %6431 = vrcp.f32 %v3315_v33  ;;  %v3407_v47 = vadd.f32 1.0, %v6410_v25  ;;  %v9058_v14 = vadd.f32 %v12845_v59, %v2061_v48  ;;  %v9061_v22 = vrot.slane %v319_v19, %v12844_v24 }
 0x176   : > { %v6412_v16 = vpop.eup %6411  ;;  %6433 = vrcp.f32 %v3406_v63  ;;  %v5937_v1 = vmul.f32 -1.442695, %v9054_v44  ;;  %v9065_v26 = vrot.slane %v323_v10, %v12844_v24  ;;  %v799_v12 = vrot.slane %v235_v27, %v12849_v18 }
 0x177   : > { %12847 = vst [vmem:[#allocation129_spill] sm:$0xff] %v9061_v22  ;;  %v6414_v51 = vpop.eup %6413  ;;  %6435 = vrcp.f32 %v3407_v47  ;;  %v3376_v3 = vadd.f32 1.0, %v6412_v16  ;;  %v5938_v25 = vmul.f32 -1.442695, %v9058_v14  ;;  %v708_v6 = vmul.f32 %v12797_v52, %v9061_v22 }
 0x178   : > { %12848 = vst [vmem:[#allocation130_spill] sm:$0xff] %v9065_v26  ;;  %v3377_v41 = vadd.f32 1.0, %v6414_v51  ;;  %6437 = vpow2.f32 %v5968_v43  ;;  %v709_v19 = vmul.f32 %v12797_v52, %v9065_v26  ;;  %v803_v35 = vrot.slane %v235_v27, %v12850_v54  ;;  %v12853_v43 = vld [vmem:[#allocation23_spill] sm:$0xff] }
 0x179   : > { %6439 = vrcp.f32 %v3376_v3  ;;  %v9075_v24 = vrot.slane %v799_v12, %v12849_v18  ;;  %v1519_v10 = vrot.slane %v235_v27, %v12788_v7  ;;  %v1523_v37 = vrot.slane %v235_v27, %v12789_v46  ;;  %v12854_v12 = vld [vmem:[#allocation24_spill] sm:$0xff] }
 0x17a   : > { %v6416_v33 = vpop.eup %6415  ;;  %6441 = vrcp.f32 %v3377_v41  ;;  %v9080_v48 = vrot.slane %v803_v35, %v12849_v18  ;;  %v680_v63 = vmul.f32 %v12853_v43, %v12781_v62  ;;  %v681_v52 = vmul.f32 %v12853_v43, %v12783_v50 }
 0x17b   : > { %12851 = vst [vmem:[#allocation69_spill] sm:$0xff] %v9075_v24  ;;  %v6418_v47 = vpop.eup %6417  ;;  %v4262_v16 = vmul.f32 %v6416_v33, %v8903_v45  ;;  %6443 = vpow2.f32 %v5937_v1  ;;  %v1172_v51 = vmul.f32 %v12854_v12, %v9075_v24  ;;  %v9090_v27 = vrot.slane %v1519_v10, %v12788_v7  ;;  %v12857_v33 = vld [vmem:[#allocation101_spill] sm:$0xff] }
 0x17c   : > { %12852 = vst [vmem:[#allocation70_spill] sm:$0xff] %v9080_v48  ;;  %v6420_v46 = vpop.eup %6419  ;;  %v4263_v18 = vmul.f32 %v6418_v47, %v8910_v57  ;;  %6445 = vpow2.f32 %v5938_v25  ;;  %v1173_v3 = vmul.f32 %v12854_v12, %v9080_v48  ;;  %v9096_v41 = vrot.slane %v1523_v37, %v12788_v7  ;;  %v12858_v10 = vld [vmem:[#allocation113_spill] sm:$0xff] }
 0x17d   : > { %12855 = vst [vmem:[#allocation75_spill] sm:$0xff] %v9090_v27  ;;  %v6422_v54 = vpop.eup %6421  ;;  %v4260_v45 = vmul.f32 %v6420_v46, %v8933_v39  ;;  %v1428_v1 = vadd.f32 %v1172_v51, %v708_v6  ;;  %v1892_v35 = vmul.f32 %v12806_v8, %v9090_v27  ;;  %v1144_v43 = vmul.f32 %v12858_v10, %v12857_v33  ;;  %v12859_v39 = vld [vmem:[#allocation102_spill] sm:$0xff] }
 0x17e   : > { %12856 = vst [vmem:[#allocation146_spill] sm:$0xff] %v9096_v41  ;;  %v6424_v59 = vpop.eup %6423  ;;  %v4615_v36 = vadd.f32 %v4263_v18, %v4262_v16  ;;  %v4261_v57 = vmul.f32 %v6422_v54, %v8938_v42  ;;  %v1429_v25 = vadd.f32 %v1173_v3, %v709_v19  ;;  %v1893_v47 = vmul.f32 %v12806_v8, %v9096_v41  ;;  %v12860_v16 = vld [vmem:[#allocation131_spill] sm:$0xff] }
 0x17f   : > { %v6426_v7 = vpop.eup %6425  ;;  %v4114_v37 = vmul.f32 %v6424_v59, %v8942_v30  ;;  %v2148_v12 = vadd.f32 %v1892_v35, %v1428_v1  ;;  %v1145_v6 = vmul.f32 %v12858_v10, %v12859_v39  ;;  %v1400_v51 = vadd.f32 %v1144_v43, %v680_v63  ;;  %v12861_v59 = vld [vmem:[#allocation91_spill] sm:$0xff] }
 0x180   : > { %v6428_v46 = vpop.eup %6427  ;;  %4616 = vadd.xlane.f32.xlu1 %v4615_v36  ;;  %v4612_v50 = vadd.f32 %v4261_v57, %v4260_v45  ;;  %v3466_v33 = vadd.f32 1.0, %v6426_v7  ;;  %v2149_v23 = vadd.f32 %v1893_v47, %v1429_v25  ;;  %v1864_v42 = vmul.f32 %v12860_v16, %v8877_v11 }
 0x181   : > { %v6430_v19 = vpop.eup %6429  ;;  %v4115_v18 = vmul.f32 %v6428_v46, %v8946_v53  ;;  %v9113_v8 = vadd.f32 %v12812_v55, %v2148_v12  ;;  %v1401_v30 = vadd.f32 %v1145_v6, %v681_v52  ;;  %v1865_v3 = vmul.f32 %v12860_v16, %v12861_v59  ;;  %v9130_v12 = vpop.permute.xlu1 %1637 }
 0x182   : > { %v6432_v54 = vpop.eup %6431  ;;  %4613 = vadd.xlane.f32.xlu0 %v4612_v50  ;;  %v4082_v36 = vmul.f32 %v6430_v19, %v8963_v2  ;;  %6447 = vrcp.f32 %v3466_v33  ;;  %v9119_v43 = vadd.f32 %v12812_v55, %v2149_v23  ;;  %v2120_v63 = vadd.f32 %v1864_v42, %v1400_v51  ;;  %v12862_v50 = vld [vmem:[#allocation58_spill] sm:$0xff]  ;;  %v12863_v2 = vld [vmem:[#allocation7_spill] sm:$0xff]  ;;  %v12864_v33 = vld [vmem:[#allocation72_spill] sm:$0xff]  ;;  %12865 = vst [vmem:[#allocation76_spill] sm:$0xff] %v9130_v12 }
 0x183   : > { %v6434_v45 = vpop.eup %6433  ;;  %v4393_v1 = vadd.f32 %v4115_v18, %v4114_v37  ;;  %v4083_v53 = vmul.f32 %v6432_v54, %v8967_v58  ;;  %v6025_v35 = vmul.f32 -1.442695, %v9113_v8  ;;  %v2121_v57 = vadd.f32 %v1865_v3, %v1401_v30  ;;  %v12866_v42 = vld [vmem:[#allocation8_spill] sm:$0xff] }
 0x184   : > { %v6436_v52 = vpop.eup %6435  ;;  %v4174_v25 = vmul.f32 %v6434_v45, %v8973_v56  ;;  %v6026_v47 = vmul.f32 -1.442695, %v9119_v43  ;;  %v9126_v7 = vadd.f32 %v12862_v50, %v2120_v63  ;;  %v500_v55 = vmul.f32 %v12864_v33, %v12863_v2 }
 0x185   : > { %v6438_v23 = vpop.eup %6437  ;;  %4394 = vadd.xlane.f32.xlu1 %v4393_v1  ;;  %v4345_v37 = vadd.f32 %v4083_v53, %v4082_v36  ;;  %v4175_v58 = vmul.f32 %v6436_v52, %v8978_v15  ;;  %6449 = vpow2.f32 %v6025_v35  ;;  %v9134_v6 = vadd.f32 %v12862_v50, %v2121_v57  ;;  %v12867_v15 = vld [vmem:[#allocation9_spill] sm:$0xff]  ;;  %v12868_v36 = vld [vmem:[#allocation64_spill] sm:$0xff]  ;;  %v12869_v53 = vld [vmem:[#allocation10_spill] sm:$0xff] }
 0x186   : > { %v6440_v56 = vpop.eup %6439  ;;  %v3467_v51 = vadd.f32 1.0, %v6438_v23  ;;  %6451 = vpow2.f32 %v6026_v47  ;;  %v5997_v46 = vmul.f32 -1.442695, %v9126_v7  ;;  %v501_v19 = vmul.f32 %v12864_v33, %v12866_v42  ;;  %v12870_v47 = vld [vmem:[#allocation30_spill] sm:$0xff] }
 0x187   : > { %v6442_v18 = vpop.eup %6441  ;;  %4346 = vadd.xlane.f32.xlu0 %v4345_v37  ;;  %v4483_v30 = vadd.f32 %v4175_v58, %v4174_v25  ;;  %v4144_v3 = vmul.f32 %v6440_v56, %v9008_v61  ;;  %v5998_v54 = vmul.f32 -1.442695, %v9134_v6  ;;  %v964_v63 = vmul.f32 %v12868_v36, %v12867_v15  ;;  %v9150_v37 = vpop.permute.xlu0 %2238 }
 0x188   : > { %v6444_v45 = vpop.eup %6443  ;;  %v4145_v1 = vmul.f32 %v6442_v18, %v9012_v49  ;;  %6453 = vrcp.f32 %v3467_v51  ;;  %v965_v35 = vmul.f32 %v12868_v36, %v12869_v53  ;;  %v1684_v57 = vmul.f32 %v9130_v12, %v12748_v32  ;;  %12871 = vst [vmem:[#allocation147_spill] sm:$0xff] %v9150_v37  ;;  %v12872_v18 = vld [vmem:[#allocation53_spill] sm:$0xff] }
 0x189   : > { %v6446_v52 = vpop.eup %6445  ;;  %4484 = vadd.xlane.f32.xlu1 %v4483_v30  ;;  %v3436_v25 = vadd.f32 1.0, %v6444_v45  ;;  %6455 = vpow2.f32 %v5997_v46  ;;  %v1220_v61 = vadd.f32 %v964_v63, %v500_v55  ;;  %v1685_v23 = vmul.f32 %v9130_v12, %v12870_v47  ;;  %v12873_v46 = vld [vmem:[#allocation107_spill] sm:$0xff] }
 0x18a   : > { %v4438_v58 = vadd.f32 %v4145_v1, %v4144_v3  ;;  %v3437_v56 = vadd.f32 1.0, %v6446_v52  ;;  %6457 = vpow2.f32 %v5998_v54  ;;  %v1221_v49 = vadd.f32 %v965_v35, %v501_v19  ;;  %v12874_v19 = vld [vmem:[#allocation108_spill] sm:$0xff]  ;;  %v12875_v35 = vld [vmem:[#allocation17_spill] sm:$0xff] }
 0x18b   : > { %6459 = vrcp.f32 %v3436_v25  ;;  %v1940_v51 = vadd.f32 %v1684_v57, %v1220_v61  ;;  %v710_v50 = vmul.f32 %v12872_v18, %v9061_v22  ;;  %v711_v30 = vmul.f32 %v12872_v18, %v9065_v26  ;;  %v12876_v57 = vld [vmem:[#allocation61_spill] sm:$0xff] }
 0x18c   : > { %4439 = vadd.xlane.f32.xlu0 %v4438_v58  ;;  %6461 = vrcp.f32 %v3437_v56  ;;  %v1941_v55 = vadd.f32 %v1685_v23, %v1221_v49  ;;  %v1174_v63 = vmul.f32 %v12873_v46, %v9075_v24  ;;  %v1175_v3 = vmul.f32 %v12873_v46, %v9080_v48 }
 0x18d   : > { %v9161_v54 = vadd.f32 %v9150_v37, %v1940_v51  ;;  %v1894_v45 = vmul.f32 %v12874_v19, %v9090_v27  ;;  %v1895_v1 = vmul.f32 %v12874_v19, %v9096_v41  ;;  %v562_v52 = vmul.f32 %v12876_v57, %v12875_v35  ;;  %v12877_v51 = vld [vmem:[#allocation62_spill] sm:$0xff]  ;;  %v12878_v19 = vld [vmem:[#allocation124_spill] sm:$0xff] }
 0x18e   : > { %v9170_v25 = vadd.f32 %v9150_v37, %v1941_v55  ;;  %v1430_v61 = vadd.f32 %v1174_v63, %v710_v50  ;;  %v1431_v23 = vadd.f32 %v1175_v3, %v711_v30  ;;  %v563_v58 = vmul.f32 %v12876_v57, %v12823_v0 }
 0x18f   : > { %v6448_v56 = vpop.eup %6447  ;;  %v5817_v49 = vmul.f32 -1.442695, %v9161_v54  ;;  %v1026_v18 = vmul.f32 %v12877_v51, %v12824_v29  ;;  %v1027_v46 = vmul.f32 %v12877_v51, %v12825_v60  ;;  %v1746_v35 = vmul.f32 %v12878_v19, %v12765_v31  ;;  %v12879_v29 = vld [vmem:[#allocation60_spill] sm:$0xff]  ;;  %v12880_v31 = vld [vmem:[#allocation13_spill] sm:$0xff] }
 0x190   : > { %v4234_v55 = vmul.f32 %v6448_v56, %v9039_v34  ;;  %v5818_v50 = vmul.f32 -1.442695, %v9170_v25  ;;  %v2150_v30 = vadd.f32 %v1894_v45, %v1430_v61  ;;  %v2151_v63 = vadd.f32 %v1895_v1, %v1431_v23 }
 0x191   : > { %6463 = vpow2.f32 %v5817_v49  ;;  %v1282_v3 = vadd.f32 %v1026_v18, %v562_v52  ;;  %v1283_v57 = vadd.f32 %v1027_v46, %v563_v58  ;;  %v1747_v0 = vmul.f32 %v12878_v19, %v12766_v40  ;;  %v12881_v52 = vld [vmem:[#allocation14_spill] sm:$0xff]  ;;  %v12882_v46 = vld [vmem:[#allocation15_spill] sm:$0xff] }
 0x192   : > { %v6450_v41 = vpop.eup %6449  ;;  %6465 = vpow2.f32 %v5818_v50  ;;  %v9186_v16 = vadd.f32 %v12879_v29, %v2150_v30  ;;  %v9189_v51 = vadd.f32 %v12879_v29, %v2151_v63  ;;  %v532_v34 = vmul.f32 %v12864_v33, %v12880_v31  ;;  %v12883_v30 = vld [vmem:[#allocation92_spill] sm:$0xff]  ;;  %v12885_v19 = vld [vmem:[#allocation31_spill] sm:$0xff] }
 0x193   : > { %v6452_v56 = vpop.eup %6451  ;;  %v3524_v45 = vadd.f32 1.0, %v6450_v41  ;;  %v2002_v1 = vadd.f32 %v1746_v35, %v1282_v3  ;;  %v2003_v61 = vadd.f32 %v1747_v0, %v1283_v57  ;;  %v533_v23 = vmul.f32 %v12864_v33, %v12881_v52  ;;  %v12884_v0 = vld [vmem:[#allocation16_spill] sm:$0xff] }
 0x194   : > { %v3525_v58 = vadd.f32 1.0, %v6452_v56  ;;  %v6027_v49 = vmul.f32 -1.442695, %v9186_v16  ;;  %v6028_v18 = vmul.f32 -1.442695, %v9189_v51  ;;  %v996_v50 = vmul.f32 %v12868_v36, %v12882_v46 }
 0x195   : > { %v6454_v29 = vpop.eup %6453  ;;  %6467 = vrcp.f32 %v3524_v45  ;;  %v9200_v63 = vadd.f32 %v12883_v30, %v2002_v1  ;;  %v9203_v41 = vadd.f32 %v12883_v30, %v2003_v61  ;;  %v997_v35 = vmul.f32 %v12868_v36, %v12884_v0 }
 0x196   : > { %v6456_v57 = vpop.eup %6455  ;;  %v4235_v3 = vmul.f32 %v6454_v29, %v9042_v17  ;;  %6469 = vrcp.f32 %v3525_v58  ;;  %v1252_v56 = vadd.f32 %v996_v50, %v532_v34  ;;  %v1716_v52 = vmul.f32 %v9130_v12, %v12885_v19  ;;  %v12886_v34 = vld [vmem:[#allocation32_spill] sm:$0xff]  ;;  %v12887_v29 = vld [vmem:[#allocation43_spill] sm:$0xff] }
 0x197   : > { %v6458_v46 = vpop.eup %6457  ;;  %v3496_v31 = vadd.f32 1.0, %v6456_v57  ;;  %6471 = vpow2.f32 %v6027_v49  ;;  %v5879_v45 = vmul.f32 -1.442695, %v9200_v63  ;;  %v5880_v1 = vmul.f32 -1.442695, %v9203_v41 }
 0x198   : > { %v6460_v61 = vpop.eup %6459  ;;  %v4573_v30 = vadd.f32 %v4235_v3, %v4234_v55  ;;  %v3497_v40 = vadd.f32 1.0, %v6458_v46  ;;  %6473 = vpow2.f32 %v6028_v18  ;;  %v1253_v0 = vadd.f32 %v997_v35, %v533_v23 }
 0x199   : > { %v6462_v60 = vpop.eup %6461  ;;  %v4204_v17 = vmul.f32 %v6460_v61, %v9054_v44  ;;  %6475 = vrcp.f32 %v3496_v31  ;;  %v1717_v58 = vmul.f32 %v9130_v12, %v12886_v34  ;;  %v1972_v50 = vadd.f32 %v1716_v52, %v1252_v56  ;;  %v12888_v31 = vld [vmem:[#allocation44_spill] sm:$0xff] }
 0x19a   : > { %4574 = vadd.xlane.f32.xlu1 %v4573_v30  ;;  %v4205_v49 = vmul.f32 %v6462_v60, %v9058_v14  ;;  %6477 = vrcp.f32 %v3497_v40  ;;  %v622_v57 = vmul.f32 %v12887_v29, %v12833_v38  ;;  %v623_v55 = vmul.f32 %v12887_v29, %v12835_v20  ;;  %v12889_v40 = vld [vmem:[#allocation57_spill] sm:$0xff] }
 0x19b   : > { %6479 = vpow2.f32 %v5879_v45  ;;  %v1973_v23 = vadd.f32 %v1717_v58, %v1253_v0  ;;  %v9221_v18 = vadd.f32 %v9150_v37, %v1972_v50  ;;  %v1086_v44 = vmul.f32 %v12888_v31, %v12836_v5  ;;  %v12890_v45 = vld [vmem:[#allocation21_spill] sm:$0xff] }
 0x19c   : > { %v4528_v46 = vadd.f32 %v4205_v49, %v4204_v17  ;;  %6481 = vpow2.f32 %v5880_v1  ;;  %v1087_v60 = vmul.f32 %v12888_v31, %v12838_v21  ;;  %v1806_v14 = vmul.f32 %v12889_v40, %v12841_v4  ;;  %v12891_v1 = vld [vmem:[#allocation118_spill] sm:$0xff]  ;;  %v12893_v50 = vld [vmem:[#allocation25_spill] sm:$0xff] }
 0x19d   : > { %v9230_v52 = vadd.f32 %v9150_v37, %v1973_v23  ;;  %v5849_v30 = vmul.f32 -1.442695, %v9221_v18  ;;  %v1342_v0 = vadd.f32 %v1086_v44, %v622_v57  ;;  %v1807_v35 = vmul.f32 %v12889_v40, %v12843_v28  ;;  %v12892_v17 = vld [vmem:[#allocation22_spill] sm:$0xff] }
 0x19e   : > { %v6464_v3 = vpop.eup %6463  ;;  %4529 = vadd.xlane.f32.xlu0 %v4528_v46  ;;  %v1343_v56 = vadd.f32 %v1087_v60, %v623_v55  ;;  %v592_v61 = vmul.f32 %v12891_v1, %v12890_v45  ;;  %v593_v58 = vmul.f32 %v12891_v1, %v12892_v17  ;;  %v1056_v49 = vmul.f32 %v12725_v9, %v12893_v50  ;;  %v12894_v28 = vld [vmem:[#allocation26_spill] sm:$0xff]  ;;  %v12895_v60 = vld [vmem:[#allocation148_spill] sm:$0xff]  ;;  %v12896_v17 = vld [vmem:[#allocation39_spill] sm:$0xff] }
 0x19f   : > { %v6466_v23 = vpop.eup %6465  ;;  %v3316_v31 = vadd.f32 1.0, %v6464_v3  ;;  %6483 = vpow2.f32 %v5849_v30  ;;  %v5850_v57 = vmul.f32 -1.442695, %v9230_v52  ;;  %v2062_v44 = vadd.f32 %v1806_v14, %v1342_v0  ;;  %v12897_v50 = vld [vmem:[#allocation40_spill] sm:$0xff] }
 0x1a0   : > { %v3317_v29 = vadd.f32 1.0, %v6466_v23  ;;  %v2063_v40 = vadd.f32 %v1807_v35, %v1343_v56  ;;  %v1057_v55 = vmul.f32 %v12725_v9, %v12894_v28  ;;  %v1312_v46 = vadd.f32 %v1056_v49, %v592_v61  ;;  %v12898_v35 = vld [vmem:[#allocation33_spill] sm:$0xff]  ;;  %v12899_v28 = vld [vmem:[#allocation52_spill] sm:$0xff] }
 0x1a1   : > { %6485 = vrcp.f32 %v3316_v31  ;;  %v9245_v45 = vadd.f32 %v12895_v60, %v2062_v44  ;;  %v1776_v4 = vmul.f32 %v8677_v13, %v12896_v17  ;;  %v1777_v3 = vmul.f32 %v8677_v13, %v12897_v50 }
 0x1a2   : > { %v6468_v30 = vpop.eup %6467  ;;  %6487 = vrcp.f32 %v3317_v29  ;;  %v9252_v14 = vadd.f32 %v12895_v60, %v2063_v40  ;;  %v1313_v0 = vadd.f32 %v1057_v55, %v593_v58  ;;  %v682_v56 = vmul.f32 %v12898_v35, %v12781_v62  ;;  %v12900_v60 = vld [vmem:[#allocation122_spill] sm:$0xff] }
 0x1a3   : > { %v6470_v61 = vpop.eup %6469  ;;  %v4292_v31 = vmul.f32 %v6468_v30, %v9113_v8  ;;  %6489 = vpow2.f32 %v5850_v57  ;;  %v5939_v49 = vmul.f32 -1.442695, %v9245_v45  ;;  %v2032_v23 = vadd.f32 %v1776_v4, %v1312_v46  ;;  %v12901_v8 = vld [vmem:[#allocation101_spill] sm:$0xff]  ;;  %v12902_v57 = vld [vmem:[#allocation34_spill] sm:$0xff] }
 0x1a4   : > { %v6472_v44 = vpop.eup %6471  ;;  %v4293_v17 = vmul.f32 %v6470_v61, %v9119_v43  ;;  %v5940_v50 = vmul.f32 -1.442695, %v9252_v14  ;;  %v2033_v29 = vadd.f32 %v1777_v3, %v1313_v0  ;;  %v683_v40 = vmul.f32 %v12898_v35, %v12899_v28 }
 0x1a5   : > { %v6474_v58 = vpop.eup %6473  ;;  %v3526_v55 = vadd.f32 1.0, %v6472_v44  ;;  %6491 = vpow2.f32 %v5939_v49  ;;  %v9263_v62 = vadd.f32 %v12900_v60, %v2032_v23  ;;  %v1146_v30 = vmul.f32 %v12902_v57, %v12901_v8 }
 0x1a6   : > { %v6476_v13 = vpop.eup %6475  ;;  %v4660_v4 = vadd.f32 %v4293_v17, %v4292_v31  ;;  %v3527_v46 = vadd.f32 1.0, %v6474_v58  ;;  %6493 = vpow2.f32 %v5940_v50  ;;  %v9268_v43 = vadd.f32 %v12900_v60, %v2033_v29 }
 0x1a7   : > { %v6478_v3 = vpop.eup %6477  ;;  %v4264_v0 = vmul.f32 %v6476_v13, %v9126_v7  ;;  %6495 = vrcp.f32 %v3526_v55  ;;  %v5909_v61 = vmul.f32 -1.442695, %v9263_v62  ;;  %v1147_v49 = vmul.f32 %v12902_v57, %v12859_v39  ;;  %v12903_v13 = vld [vmem:[#allocation54_spill] sm:$0xff] }
 0x1a8   : > { %v6480_v23 = vpop.eup %6479  ;;  %4661 = vadd.xlane.f32.xlu1 %v4660_v4  ;;  %v4265_v44 = vmul.f32 %v6478_v3, %v9134_v6  ;;  %6497 = vrcp.f32 %v3527_v46  ;;  %v5910_v17 = vmul.f32 -1.442695, %v9268_v43  ;;  %v1402_v50 = vadd.f32 %v1146_v30, %v682_v56  ;;  %v12904_v6 = vld [vmem:[#allocation41_spill] sm:$0xff]  ;;  %v12906_v39 = vld [vmem:[#allocation42_spill] sm:$0xff] }
 0x1a9   : > { %v6482_v31 = vpop.eup %6481  ;;  %v3378_v29 = vadd.f32 1.0, %v6480_v23  ;;  %6499 = vpow2.f32 %v5909_v61  ;;  %v1403_v58 = vadd.f32 %v1147_v49, %v683_v40  ;;  %v1866_v7 = vmul.f32 %v12903_v13, %v8877_v11  ;;  %v12905_v46 = vld [vmem:[#allocation65_spill] sm:$0xff]  ;;  %v12907_v61 = vld [vmem:[#allocation47_spill] sm:$0xff]  ;;  %v12909_v23 = vld [vmem:[#allocation48_spill] sm:$0xff] }
 0x1aa   : > { %v4618_v55 = vadd.f32 %v4265_v44, %v4264_v0  ;;  %v3379_v35 = vadd.f32 1.0, %v6482_v31  ;;  %6501 = vpow2.f32 %v5910_v17  ;;  %v1867_v57 = vmul.f32 %v12903_v13, %v12861_v59  ;;  %v12908_v49 = vld [vmem:[#allocation115_spill] sm:$0xff] }
 0x1ab   : > { %6503 = vrcp.f32 %v3378_v29  ;;  %v2122_v4 = vadd.f32 %v1866_v7, %v1402_v50  ;;  %v652_v3 = vmul.f32 %v12905_v46, %v12904_v6  ;;  %v653_v56 = vmul.f32 %v12905_v46, %v12906_v39  ;;  %v12910_v31 = vld [vmem:[#allocation59_spill] sm:$0xff]  ;;  %v12911_v50 = vld [vmem:[#allocation49_spill] sm:$0xff]  ;;  %v12912_v7 = vld [vmem:[#allocation114_spill] sm:$0xff] }
 0x1ac   : > { %v6484_v30 = vpop.eup %6483  ;;  %4619 = vadd.xlane.f32.xlu0 %v4618_v55  ;;  %6505 = vrcp.f32 %v3379_v35  ;;  %v2123_v40 = vadd.f32 %v1867_v57, %v1403_v58  ;;  %v1116_v0 = vmul.f32 %v12908_v49, %v12907_v61  ;;  %v1117_v44 = vmul.f32 %v12908_v49, %v12909_v23  ;;  %v12913_v6 = vld [vmem:[#allocation50_spill] sm:$0xff]  ;;  %v12914_v55 = vld [vmem:[#allocation67_spill] sm:$0xff] }
 0x1ad   : > { %v3348_v17 = vadd.f32 1.0, %v6484_v30  ;;  %v9289_v29 = vadd.f32 %v12910_v31, %v2122_v4  ;;  %v1836_v13 = vmul.f32 %v12912_v7, %v12911_v50  ;;  %v1837_v39 = vmul.f32 %v12912_v7, %v12913_v6 }
 0x1ae   : > { %v6486_v59 = vpop.eup %6485  ;;  %v9296_v35 = vadd.f32 %v12910_v31, %v2123_v40  ;;  %v1372_v57 = vadd.f32 %v1116_v0, %v652_v3  ;;  %v1373_v58 = vadd.f32 %v1117_v44, %v653_v56  ;;  %v502_v61 = vmul.f32 %v12914_v55, %v12863_v2  ;;  %v9306_v56 = vpop.permute.xlu1 %1641  ;;  %v12916_v44 = vld [vmem:[#allocation68_spill] sm:$0xff] }
 0x1af   : > { %v6488_v23 = vpop.eup %6487  ;;  %v4084_v30 = vmul.f32 %v6486_v59, %v9161_v54  ;;  %6507 = vrcp.f32 %v3348_v17  ;;  %v5999_v4 = vmul.f32 -1.442695, %v9289_v29  ;;  %v503_v50 = vmul.f32 %v12914_v55, %v12866_v42  ;;  %12915 = vst [vmem:[#allocation73_spill] sm:$0xff] %v9306_v56  ;;  %v12917_v42 = vld [vmem:[#allocation74_spill] sm:$0xff] }
 0x1b0   : > { %v6490_v11 = vpop.eup %6489  ;;  %v4085_v6 = vmul.f32 %v6488_v23, %v9170_v25  ;;  %v6000_v40 = vmul.f32 -1.442695, %v9296_v35  ;;  %v2092_v31 = vadd.f32 %v1836_v13, %v1372_v57  ;;  %v2093_v3 = vadd.f32 %v1837_v39, %v1373_v58 }
 0x1b1   : > { %v3349_v0 = vadd.f32 1.0, %v6490_v11  ;;  %6509 = vpow2.f32 %v5999_v4  ;;  %v966_v59 = vmul.f32 %v12916_v44, %v12867_v15  ;;  %v967_v54 = vmul.f32 %v12916_v44, %v12869_v53 }
 0x1b2   : > { %v6492_v17 = vpop.eup %6491  ;;  %v4348_v2 = vadd.f32 %v4085_v6, %v4084_v30  ;;  %6511 = vpow2.f32 %v6000_v40  ;;  %v9313_v7 = vadd.f32 %v12917_v42, %v2092_v31  ;;  %v9316_v25 = vadd.f32 %v12917_v42, %v2093_v3  ;;  %v9322_v30 = vpop.permute.xlu0 %2243 }
 0x1b3   : > { %v6494_v39 = vpop.eup %6493  ;;  %6513 = vrcp.f32 %v3349_v0  ;;  %v3438_v13 = vadd.f32 1.0, %v6492_v17  ;;  %v1222_v11 = vadd.f32 %v966_v59, %v502_v61  ;;  %v1223_v23 = vadd.f32 %v967_v54, %v503_v50  ;;  %12918 = vst [vmem:[#allocation133_spill] sm:$0xff] %v9322_v30  ;;  %v12919_v50 = vld [vmem:[#allocation23_spill] sm:$0xff] }
 0x1b4   : > { %v6496_v57 = vpop.eup %6495  ;;  %4349 = vadd.xlane.f32.xlu1 %v4348_v2  ;;  %v3439_v58 = vadd.f32 1.0, %v6494_v39  ;;  %v5969_v4 = vmul.f32 -1.442695, %v9313_v7  ;;  %v5970_v53 = vmul.f32 -1.442695, %v9316_v25  ;;  %v1686_v6 = vmul.f32 %v9306_v56, %v12748_v32 }
 0x1b5   : > { %v6498_v31 = vpop.eup %6497  ;;  %v4294_v40 = vmul.f32 %v6496_v57, %v9186_v16  ;;  %6515 = vrcp.f32 %v3438_v13  ;;  %v1687_v61 = vmul.f32 %v9306_v56, %v12870_v47  ;;  %v712_v2 = vmul.f32 %v12919_v50, %v9061_v22 }
 0x1b6   : > { %v6500_v3 = vpop.eup %6499  ;;  %v4295_v0 = vmul.f32 %v6498_v31, %v9189_v51  ;;  %6517 = vrcp.f32 %v3439_v58  ;;  %v1942_v59 = vadd.f32 %v1686_v6, %v1222_v11  ;;  %v713_v54 = vmul.f32 %v12919_v50, %v9065_v26  ;;  %v12921_v50 = vld [vmem:[#allocation146_spill] sm:$0xff] }
 0x1b7   : > { %v6502_v17 = vpop.eup %6501  ;;  %v3408_v39 = vadd.f32 1.0, %v6500_v3  ;;  %6519 = vpow2.f32 %v5969_v4  ;;  %v1943_v32 = vadd.f32 %v1687_v61, %v1223_v23  ;;  %v1176_v16 = vmul.f32 %v12858_v10, %v9075_v24  ;;  %v12920_v61 = vld [vmem:[#allocation131_spill] sm:$0xff] }
 0x1b8   : > { %v6504_v13 = vpop.eup %6503  ;;  %v4663_v57 = vadd.f32 %v4295_v0, %v4294_v40  ;;  %v3409_v47 = vadd.f32 1.0, %v6502_v17  ;;  %6521 = vpow2.f32 %v5970_v53  ;;  %v9335_v22 = vadd.f32 %v9322_v30, %v1942_v59 }
 0x1b9   : > { %v6506_v51 = vpop.eup %6505  ;;  %v4146_v11 = vmul.f32 %v6504_v13, %v9200_v63  ;;  %6523 = vrcp.f32 %v3408_v39  ;;  %v9339_v58 = vadd.f32 %v9322_v30, %v1943_v32  ;;  %v1177_v23 = vmul.f32 %v12858_v10, %v9080_v48  ;;  %v12922_v10 = vld [vmem:[#allocation17_spill] sm:$0xff] }
 0x1ba   : > { %4664 = vadd.xlane.f32.xlu0 %v4663_v57  ;;  %v4147_v4 = vmul.f32 %v6506_v51, %v9203_v41  ;;  %6525 = vrcp.f32 %v3409_v47  ;;  %v5819_v6 = vmul.f32 -1.442695, %v9335_v22  ;;  %v1432_v53 = vadd.f32 %v1176_v16, %v712_v2  ;;  %v12923_v41 = vld [vmem:[#allocation18_spill] sm:$0xff]  ;;  %v12924_v16 = vld [vmem:[#allocation19_spill] sm:$0xff]  ;;  %v12925_v57 = vld [vmem:[#allocation20_spill] sm:$0xff] }
 0x1bb   : > { %v5820_v31 = vmul.f32 -1.442695, %v9339_v58  ;;  %v1433_v40 = vadd.f32 %v1177_v23, %v713_v54  ;;  %v1896_v63 = vmul.f32 %v12920_v61, %v9090_v27  ;;  %v1897_v32 = vmul.f32 %v12920_v61, %v12921_v50 }
 0x1bc   : > { %v6508_v3 = vpop.eup %6507  ;;  %v4441_v0 = vadd.f32 %v4147_v4, %v4146_v11  ;;  %6527 = vpow2.f32 %v5819_v6  ;;  %v564_v59 = vmul.f32 %v12864_v33, %v12922_v10  ;;  %v565_v47 = vmul.f32 %v12864_v33, %v12923_v41  ;;  %v12926_v11 = vld [vmem:[#allocation35_spill] sm:$0xff]  ;;  %v12927_v4 = vld [vmem:[#allocation36_spill] sm:$0xff] }
 0x1bd   : > { %v4116_v2 = vmul.f32 %v6508_v3, %v9221_v18  ;;  %6529 = vpow2.f32 %v5820_v31  ;;  %v2152_v17 = vadd.f32 %v1896_v63, %v1432_v53  ;;  %v2153_v54 = vadd.f32 %v1897_v32, %v1433_v40  ;;  %v12928_v18 = vld [vmem:[#allocation58_spill] sm:$0xff]  ;;  %v12929_v40 = vld [vmem:[#allocation13_spill] sm:$0xff] }
 0x1be   : > { %v6510_v39 = vpop.eup %6509  ;;  %4442 = vadd.xlane.f32.xlu1 %v4441_v0  ;;  %v1028_v13 = vmul.f32 %v12868_v36, %v12924_v16  ;;  %v1029_v51 = vmul.f32 %v12868_v36, %v12925_v57  ;;  %v1748_v23 = vmul.f32 %v9130_v12, %v12926_v11  ;;  %v1749_v6 = vmul.f32 %v9130_v12, %v12927_v4  ;;  %v12930_v57 = vld [vmem:[#allocation14_spill] sm:$0xff]  ;;  %v12931_v16 = vld [vmem:[#allocation15_spill] sm:$0xff] }
 0x1bf   : > { %v6512_v61 = vpop.eup %6511  ;;  %v3498_v33 = vadd.f32 1.0, %v6510_v39  ;;  %v9364_v31 = vadd.f32 %v12928_v18, %v2152_v17  ;;  %v9367_v53 = vadd.f32 %v12928_v18, %v2153_v54  ;;  %v534_v63 = vmul.f32 %v12914_v55, %v12929_v40 }
 0x1c0   : > { %v6514_v32 = vpop.eup %6513  ;;  %v3499_v3 = vadd.f32 1.0, %v6512_v61  ;;  %v1284_v0 = vadd.f32 %v1028_v13, %v564_v59  ;;  %v1285_v36 = vadd.f32 %v1029_v51, %v565_v47  ;;  %v535_v11 = vmul.f32 %v12914_v55, %v12930_v57  ;;  %v12932_v13 = vld [vmem:[#allocation16_spill] sm:$0xff] }
 0x1c1   : > { %v4117_v12 = vmul.f32 %v6514_v32, %v9230_v52  ;;  %6531 = vrcp.f32 %v3498_v33  ;;  %v6029_v39 = vmul.f32 -1.442695, %v9364_v31  ;;  %v6030_v17 = vmul.f32 -1.442695, %v9367_v53 }
 0x1c2   : > { %v6516_v4 = vpop.eup %6515  ;;  %6533 = vrcp.f32 %v3499_v3  ;;  %v2004_v54 = vadd.f32 %v1748_v23, %v1284_v0  ;;  %v2005_v18 = vadd.f32 %v1749_v6, %v1285_v36  ;;  %v998_v40 = vmul.f32 %v12916_v44, %v12931_v16 }
 0x1c3   : > { %v6518_v61 = vpop.eup %6517  ;;  %v4396_v59 = vadd.f32 %v4117_v12, %v4116_v2  ;;  %v4206_v47 = vmul.f32 %v6516_v4, %v9245_v45  ;;  %6535 = vpow2.f32 %v6029_v39  ;;  %v999_v52 = vmul.f32 %v12916_v44, %v12932_v13 }
 0x1c4   : > { %v6520_v33 = vpop.eup %6519  ;;  %v4207_v51 = vmul.f32 %v6518_v61, %v9252_v14  ;;  %6537 = vpow2.f32 %v6030_v17  ;;  %v9383_v32 = vadd.f32 %v9150_v37, %v2004_v54  ;;  %v9386_v36 = vadd.f32 %v9150_v37, %v2005_v18  ;;  %v12943_v37 = vld [vmem:[#allocation124_spill] sm:$0xff] }
 0x1c5   : > { %v6522_v23 = vpop.eup %6521  ;;  %4397 = vadd.xlane.f32.xlu0 %v4396_v59  ;;  %v3468_v6 = vadd.f32 1.0, %v6520_v33  ;;  %v1254_v12 = vadd.f32 %v998_v40, %v534_v63  ;;  %v1255_v2 = vadd.f32 %v999_v52, %v535_v11  ;;  %v1718_v45 = vmul.f32 %v9306_v56, %v12885_v19 }
 0x1c6   : > { %v6524_v4 = vpop.eup %6523  ;;  %v4531_v3 = vadd.f32 %v4207_v51, %v4206_v47  ;;  %v3469_v0 = vadd.f32 1.0, %v6522_v23  ;;  %v5881_v14 = vmul.f32 -1.442695, %v9383_v32  ;;  %v5882_v39 = vmul.f32 -1.442695, %v9386_v36 }
 0x1c7   : > { %v6526_v17 = vpop.eup %6525  ;;  %v4176_v54 = vmul.f32 %v6524_v4, %v9263_v62  ;;  %6539 = vrcp.f32 %v3468_v6  ;;  %v1719_v18 = vmul.f32 %v9306_v56, %v12886_v34  ;;  %v1974_v61 = vadd.f32 %v1718_v45, %v1254_v12 }
 0x1c8   : > { %4532 = vadd.xlane.f32.xlu1 %v4531_v3  ;;  %v4177_v11 = vmul.f32 %v6526_v17, %v9268_v43  ;;  %6541 = vrcp.f32 %v3469_v0  ;;  %v624_v40 = vmul.f32 %v12891_v1, %v12833_v38  ;;  %v625_v63 = vmul.f32 %v12891_v1, %v12835_v20  ;;  %v12933_v3 = vld [vmem:[#allocation45_spill] sm:$0xff]  ;;  %v12934_v0 = vld [vmem:[#allocation127_spill] sm:$0xff]  ;;  %v12935_v17 = vld [vmem:[#allocation46_spill] sm:$0xff] }
 0x1c9   : > { %v6528_v59 = vpop.eup %6527  ;;  %6543 = vpow2.f32 %v5881_v14  ;;  %v1975_v47 = vadd.f32 %v1719_v18, %v1255_v2  ;;  %v9401_v62 = vadd.f32 %v9322_v30, %v1974_v61  ;;  %v1088_v52 = vmul.f32 %v12725_v9, %v12836_v5  ;;  %v12936_v18 = vld [vmem:[#allocation21_spill] sm:$0xff]  ;;  %v12942_v1 = vld [vmem:[#allocation39_spill] sm:$0xff] }
 0x1ca   : > { %v6530_v33 = vpop.eup %6529  ;;  %v4486_v51 = vadd.f32 %v4177_v11, %v4176_v54  ;;  %v3318_v23 = vadd.f32 1.0, %v6528_v59  ;;  %6545 = vpow2.f32 %v5882_v39  ;;  %v1089_v43 = vmul.f32 %v12725_v9, %v12838_v21  ;;  %v12937_v61 = vld [vmem:[#allocation61_spill] sm:$0xff]  ;;  %v12938_v59 = vld [vmem:[#allocation22_spill] sm:$0xff] }
 0x1cb   : > { %v3319_v6 = vadd.f32 1.0, %v6530_v33  ;;  %v9408_v12 = vadd.f32 %v9322_v30, %v1975_v47  ;;  %v5851_v45 = vmul.f32 -1.442695, %v9401_v62  ;;  %v1344_v2 = vadd.f32 %v1088_v52, %v624_v40 }
 0x1cc   : > { %4487 = vadd.xlane.f32.xlu0 %v4486_v51  ;;  %6547 = vrcp.f32 %v3318_v23  ;;  %v1345_v4 = vadd.f32 %v1089_v43, %v625_v63  ;;  %v1808_v14 = vmul.f32 %v12934_v0, %v12933_v3  ;;  %v1809_v54 = vmul.f32 %v12934_v0, %v12935_v17  ;;  %v12939_v63 = vld [vmem:[#allocation25_spill] sm:$0xff]  ;;  %v12940_v51 = vld [vmem:[#allocation62_spill] sm:$0xff] }
 0x1cd   : > { %6549 = vrcp.f32 %v3319_v6  ;;  %v5852_v39 = vmul.f32 -1.442695, %v9408_v12  ;;  %v594_v11 = vmul.f32 %v12937_v61, %v12936_v18  ;;  %v595_v47 = vmul.f32 %v12937_v61, %v12938_v59  ;;  %v12941_v6 = vld [vmem:[#allocation26_spill] sm:$0xff] }
 0x1ce   : > { %v6532_v33 = vpop.eup %6531  ;;  %6551 = vpow2.f32 %v5851_v45  ;;  %v2064_v40 = vadd.f32 %v1808_v14, %v1344_v2  ;;  %v2065_v52 = vadd.f32 %v1809_v54, %v1345_v4  ;;  %v1058_v23 = vmul.f32 %v12940_v51, %v12939_v63 }
 0x1cf   : > { %v6534_v43 = vpop.eup %6533  ;;  %v4266_v9 = vmul.f32 %v6532_v33, %v9289_v29  ;;  %6553 = vpow2.f32 %v5852_v39  ;;  %v1059_v0 = vmul.f32 %v12940_v51, %v12941_v6  ;;  %v1778_v18 = vmul.f32 %v12943_v37, %v12942_v1  ;;  %v12944_v39 = vld [vmem:[#allocation40_spill] sm:$0xff]  ;;  %v12945_v6 = vld [vmem:[#allocation51_spill] sm:$0xff] }
 0x1d0   : > { %v6536_v17 = vpop.eup %6535  ;;  %v4267_v59 = vmul.f32 %v6534_v43, %v9296_v35  ;;  %v9429_v45 = vadd.f32 %v12900_v60, %v2064_v40  ;;  %v9432_v2 = vadd.f32 %v12900_v60, %v2065_v52  ;;  %v1314_v4 = vadd.f32 %v1058_v23, %v594_v11  ;;  %v12948_v23 = vld [vmem:[#allocation114_spill] sm:$0xff] }
 0x1d1   : > { %v6538_v14 = vpop.eup %6537  ;;  %v3528_v54 = vadd.f32 1.0, %v6536_v17  ;;  %v1315_v29 = vadd.f32 %v1059_v0, %v595_v47  ;;  %v1779_v33 = vmul.f32 %v12943_v37, %v12944_v39  ;;  %v684_v63 = vmul.f32 %v12905_v46, %v12945_v6  ;;  %v12946_v47 = vld [vmem:[#allocation102_spill] sm:$0xff]  ;;  %v12952_v6 = vld [vmem:[#allocation43_spill] sm:$0xff] }
 0x1d2   : > { %v4621_v1 = vadd.f32 %v4267_v59, %v4266_v9  ;;  %v3529_v3 = vadd.f32 1.0, %v6538_v14  ;;  %v5941_v35 = vmul.f32 -1.442695, %v9429_v45  ;;  %v5942_v40 = vmul.f32 -1.442695, %v9432_v2  ;;  %v12947_v59 = vld [vmem:[#allocation123_spill] sm:$0xff] }
 0x1d3   : > { %6555 = vrcp.f32 %v3528_v54  ;;  %v2034_v43 = vadd.f32 %v1778_v18, %v1314_v4  ;;  %v2035_v52 = vadd.f32 %v1779_v33, %v1315_v29  ;;  %v685_v11 = vmul.f32 %v12905_v46, %v12899_v28  ;;  %v12949_v18 = vld [vmem:[#allocation92_spill] sm:$0xff] }
 0x1d4   : > { %v6540_v17 = vpop.eup %6539  ;;  %4622 = vadd.xlane.f32.xlu1 %v4621_v1  ;;  %6557 = vrcp.f32 %v3529_v3  ;;  %v1148_v0 = vmul.f32 %v12908_v49, %v12901_v8  ;;  %v1149_v9 = vmul.f32 %v12908_v49, %v12946_v47  ;;  %v1868_v14 = vmul.f32 %v12948_v23, %v12947_v59 }
 0x1d5   : > { %v6542_v60 = vpop.eup %6541  ;;  %v4236_v54 = vmul.f32 %v6540_v17, %v9313_v7  ;;  %6559 = vpow2.f32 %v5941_v35  ;;  %v9450_v4 = vadd.f32 %v12949_v18, %v2034_v43  ;;  %v9453_v29 = vadd.f32 %v12949_v18, %v2035_v52  ;;  %v12950_v7 = vld [vmem:[#allocation91_spill] sm:$0xff]  ;;  %v12951_v52 = vld [vmem:[#allocation41_spill] sm:$0xff] }
 0x1d6   : > { %v6544_v1 = vpop.eup %6543  ;;  %v4237_v3 = vmul.f32 %v6542_v60, %v9316_v25  ;;  %6561 = vpow2.f32 %v5942_v40  ;;  %v1404_v33 = vadd.f32 %v1148_v0, %v684_v63  ;;  %v1405_v46 = vadd.f32 %v1149_v9, %v685_v11  ;;  %v12953_v25 = vld [vmem:[#allocation42_spill] sm:$0xff]  ;;  %v12954_v40 = vld [vmem:[#allocation47_spill] sm:$0xff]  ;;  %v12955_v11 = vld [vmem:[#allocation44_spill] sm:$0xff] }
 0x1d7   : > { %v6546_v49 = vpop.eup %6545  ;;  %v3380_v47 = vadd.f32 1.0, %v6544_v1  ;;  %v5911_v59 = vmul.f32 -1.442695, %v9450_v4  ;;  %v5912_v8 = vmul.f32 -1.442695, %v9453_v29  ;;  %v1869_v35 = vmul.f32 %v12948_v23, %v12950_v7 }
 0x1d8   : > { %v4576_v43 = vadd.f32 %v4237_v3, %v4236_v54  ;;  %v3381_v17 = vadd.f32 1.0, %v6546_v49  ;;  %v2124_v28 = vadd.f32 %v1868_v14, %v1404_v33  ;;  %v654_v39 = vmul.f32 %v12952_v6, %v12951_v52  ;;  %v12956_v14 = vld [vmem:[#allocation48_spill] sm:$0xff]  ;;  %v12967_v52 = vld [vmem:[#allocation30_spill] sm:$0xff] }
 0x1d9   : > { %v6548_v18 = vpop.eup %6547  ;;  %6563 = vrcp.f32 %v3380_v47  ;;  %v2125_v60 = vadd.f32 %v1869_v35, %v1405_v46  ;;  %v655_v63 = vmul.f32 %v12952_v6, %v12953_v25  ;;  %v1118_v0 = vmul.f32 %v12955_v11, %v12954_v40  ;;  %v12958_v40 = vld [vmem:[#allocation49_spill] sm:$0xff] }
 0x1da   : > { %v6550_v9 = vpop.eup %6549  ;;  %4577 = vadd.xlane.f32.xlu0 %v4576_v43  ;;  %v4086_v1 = vmul.f32 %v6548_v18, %v9335_v22  ;;  %6565 = vrcp.f32 %v3381_v17  ;;  %v9468_v49 = vadd.f32 %v12917_v42, %v2124_v28  ;;  %v1119_v54 = vmul.f32 %v12955_v11, %v12956_v14  ;;  %v9477_v43 = vpop.permute.xlu1 %1645  ;;  %v12959_v25 = vld [vmem:[#allocation57_spill] sm:$0xff] }
 0x1db   : > { %v6552_v3 = vpop.eup %6551  ;;  %v4087_v46 = vmul.f32 %v6550_v9, %v9339_v58  ;;  %6567 = vpow2.f32 %v5911_v59  ;;  %v9474_v47 = vadd.f32 %v12917_v42, %v2125_v60  ;;  %v1374_v33 = vadd.f32 %v1118_v0, %v654_v39  ;;  %12957 = vst [vmem:[#allocation134_spill] sm:$0xff] %v9477_v43  ;;  %v12960_v59 = vld [vmem:[#allocation50_spill] sm:$0xff]  ;;  %v12961_v39 = vld [vmem:[#allocation7_spill] sm:$0xff]  ;;  %v12962_v0 = vld [vmem:[#allocation120_spill] sm:$0xff] }
 0x1dc   : > { %v6554_v35 = vpop.eup %6553  ;;  %v3350_v23 = vadd.f32 1.0, %v6552_v3  ;;  %6569 = vpow2.f32 %v5912_v8  ;;  %v6001_v22 = vmul.f32 -1.442695, %v9468_v49  ;;  %v1375_v18 = vadd.f32 %v1119_v54, %v655_v63  ;;  %v12963_v8 = vld [vmem:[#allocation8_spill] sm:$0xff] }
 0x1dd   : > { %v4351_v28 = vadd.f32 %v4087_v46, %v4086_v1  ;;  %v3351_v17 = vadd.f32 1.0, %v6554_v35  ;;  %v6002_v14 = vmul.f32 -1.442695, %v9474_v47  ;;  %v1838_v58 = vmul.f32 %v12959_v25, %v12958_v40  ;;  %v12964_v1 = vld [vmem:[#allocation66_spill] sm:$0xff]  ;;  %v12966_v40 = vld [vmem:[#allocation29_spill] sm:$0xff] }
 0x1de   : > { %6571 = vrcp.f32 %v3350_v23  ;;  %v1839_v60 = vmul.f32 %v12959_v25, %v12960_v59  ;;  %v504_v9 = vmul.f32 %v12962_v0, %v12961_v39  ;;  %v505_v3 = vmul.f32 %v12962_v0, %v12963_v8  ;;  %v12965_v46 = vld [vmem:[#allocation10_spill] sm:$0xff]  ;;  %v9500_v8 = vpop.permute.xlu0 %2248 }
 0x1df   : > { %4352 = vadd.xlane.f32.xlu1 %v4351_v28  ;;  %6573 = vrcp.f32 %v3351_v17  ;;  %v2094_v63 = vadd.f32 %v1838_v58, %v1374_v33  ;;  %v968_v54 = vmul.f32 %v12964_v1, %v12867_v15  ;;  %v969_v35 = vmul.f32 %v12964_v1, %v12965_v46  ;;  %v12968_v33 = vld [vmem:[#allocation148_spill] sm:$0xff]  ;;  %12969 = vst [vmem:[#allocation135_spill] sm:$0xff] %v9500_v8  ;;  %v12971_v46 = vld [vmem:[#allocation33_spill] sm:$0xff] }
 0x1e0   : > { %v6556_v42 = vpop.eup %6555  ;;  %6575 = vpow2.f32 %v6001_v22  ;;  %v2095_v23 = vadd.f32 %v1839_v60, %v1375_v18  ;;  %v1688_v59 = vmul.f32 %v9477_v43, %v12966_v40  ;;  %v1689_v39 = vmul.f32 %v9477_v43, %v12967_v52  ;;  %v12970_v40 = vld [vmem:[#allocation129_spill] sm:$0xff] }
 0x1e1   : > { %v6558_v7 = vpop.eup %6557  ;;  %v4296_v28 = vmul.f32 %v6556_v42, %v9364_v31  ;;  %6577 = vpow2.f32 %v6002_v14  ;;  %v9498_v17 = vadd.f32 %v12968_v33, %v2094_v63  ;;  %v1224_v58 = vadd.f32 %v968_v54, %v504_v9 }
 0x1e2   : > { %v6560_v15 = vpop.eup %6559  ;;  %v4297_v22 = vmul.f32 %v6558_v7, %v9367_v53  ;;  %v9504_v18 = vadd.f32 %v12968_v33, %v2095_v23  ;;  %v1225_v60 = vadd.f32 %v969_v35, %v505_v3  ;;  %v714_v52 = vmul.f32 %v12971_v46, %v12970_v40  ;;  %v12972_v3 = vld [vmem:[#allocation34_spill] sm:$0xff] }
 0x1e3   : > { %v6562_v25 = vpop.eup %6561  ;;  %v3440_v11 = vadd.f32 1.0, %v6560_v15  ;;  %v5971_v42 = vmul.f32 -1.442695, %v9498_v17  ;;  %v1944_v31 = vadd.f32 %v1688_v59, %v1224_v58  ;;  %v715_v14 = vmul.f32 %v12971_v46, %v9065_v26 }
 0x1e4   : > { %v4666_v9 = vadd.f32 %v4297_v22, %v4296_v28  ;;  %v3441_v63 = vadd.f32 1.0, %v6562_v25  ;;  %v5972_v54 = vmul.f32 -1.442695, %v9504_v18  ;;  %v1945_v53 = vadd.f32 %v1689_v39, %v1225_v60  ;;  %v12973_v25 = vld [vmem:[#allocation54_spill] sm:$0xff] }
 0x1e5   : > { %6579 = vrcp.f32 %v3440_v11  ;;  %v9513_v7 = vadd.f32 %v9500_v8, %v1944_v31  ;;  %v1178_v35 = vmul.f32 %v12972_v3, %v9075_v24  ;;  %v1179_v15 = vmul.f32 %v12972_v3, %v9080_v48 }
 0x1e6   : > { %v6564_v23 = vpop.eup %6563  ;;  %4667 = vadd.xlane.f32.xlu0 %v4666_v9  ;;  %6581 = vrcp.f32 %v3441_v63  ;;  %v9520_v59 = vadd.f32 %v9500_v8, %v1945_v53  ;;  %v1898_v46 = vmul.f32 %v12973_v25, %v9090_v27  ;;  %v1899_v11 = vmul.f32 %v12973_v25, %v12921_v50 }
 0x1e7   : > { %v6566_v39 = vpop.eup %6565  ;;  %v4148_v28 = vmul.f32 %v6564_v23, %v9383_v32  ;;  %6583 = vpow2.f32 %v5971_v42  ;;  %v5821_v58 = vmul.f32 -1.442695, %v9513_v7  ;;  %v1434_v22 = vadd.f32 %v1178_v35, %v714_v52  ;;  %v12974_v52 = vld [vmem:[#allocation59_spill] sm:$0xff] }
 0x1e8   : > { %v6568_v60 = vpop.eup %6567  ;;  %v4149_v31 = vmul.f32 %v6566_v39, %v9386_v36  ;;  %6585 = vpow2.f32 %v5972_v54  ;;  %v5822_v9 = vmul.f32 -1.442695, %v9520_v59  ;;  %v1435_v63 = vadd.f32 %v1179_v15, %v715_v14  ;;  %v12975_v14 = vld [vmem:[#allocation19_spill] sm:$0xff] }
 0x1e9   : > { %v6570_v53 = vpop.eup %6569  ;;  %v3410_v3 = vadd.f32 1.0, %v6568_v60  ;;  %6587 = vpow2.f32 %v5821_v58  ;;  %v2154_v27 = vadd.f32 %v1898_v46, %v1434_v22  ;;  %v566_v25 = vmul.f32 %v12914_v55, %v12922_v10 }
 0x1ea   : > { %v4444_v50 = vadd.f32 %v4149_v31, %v4148_v28  ;;  %v3411_v32 = vadd.f32 1.0, %v6570_v53  ;;  %6589 = vpow2.f32 %v5822_v9  ;;  %v2155_v42 = vadd.f32 %v1899_v11, %v1435_v63  ;;  %v12976_v11 = vld [vmem:[#allocation20_spill] sm:$0xff]  ;;  %v12977_v31 = vld [vmem:[#allocation35_spill] sm:$0xff] }
 0x1eb   : > { %v6572_v23 = vpop.eup %6571  ;;  %6591 = vrcp.f32 %v3410_v3  ;;  %v9533_v35 = vadd.f32 %v12974_v52, %v2154_v27  ;;  %v567_v36 = vmul.f32 %v12914_v55, %v12923_v41  ;;  %v1030_v54 = vmul.f32 %v12916_v44, %v12975_v14  ;;  %v12978_v3 = vld [vmem:[#allocation36_spill] sm:$0xff] }
 0x1ec   : > { %v6574_v15 = vpop.eup %6573  ;;  %4445 = vadd.xlane.f32.xlu1 %v4444_v50  ;;  %v4118_v46 = vmul.f32 %v6572_v23, %v9401_v62  ;;  %6593 = vrcp.f32 %v3411_v32  ;;  %v9541_v39 = vadd.f32 %v12974_v52, %v2155_v42  ;;  %v1031_v28 = vmul.f32 %v12916_v44, %v12976_v11 }
 0x1ed   : > { %v6576_v58 = vpop.eup %6575  ;;  %v4119_v27 = vmul.f32 %v6574_v15, %v9408_v12  ;;  %v6031_v22 = vmul.f32 -1.442695, %v9533_v35  ;;  %v1286_v60 = vadd.f32 %v1030_v54, %v566_v25  ;;  %v1750_v9 = vmul.f32 %v9306_v56, %v12977_v31  ;;  %v12979_v15 = vld [vmem:[#allocation13_spill] sm:$0xff] }
 0x1ee   : > { %v6578_v63 = vpop.eup %6577  ;;  %v3500_v50 = vadd.f32 1.0, %v6576_v58  ;;  %v6032_v62 = vmul.f32 -1.442695, %v9541_v39  ;;  %v1287_v53 = vadd.f32 %v1031_v28, %v567_v36  ;;  %v1751_v32 = vmul.f32 %v9306_v56, %v12978_v3 }
 0x1ef   : > { %v4399_v42 = vadd.f32 %v4119_v27, %v4118_v46  ;;  %v3501_v23 = vadd.f32 1.0, %v6578_v63  ;;  %6595 = vpow2.f32 %v6031_v22  ;;  %v2006_v52 = vadd.f32 %v1750_v9, %v1286_v60 }
 0x1f0   : > { %6597 = vrcp.f32 %v3500_v50  ;;  %v2007_v12 = vadd.f32 %v1751_v32, %v1287_v53  ;;  %v536_v25 = vmul.f32 %v12962_v0, %v12979_v15  ;;  %v537_v54 = vmul.f32 %v12962_v0, %v12930_v57 }
 0x1f1   : > { %4400 = vadd.xlane.f32.xlu0 %v4399_v42  ;;  %6599 = vrcp.f32 %v3501_v23  ;;  %v9557_v58 = vadd.f32 %v9322_v30, %v2006_v52  ;;  %v1000_v36 = vmul.f32 %v12964_v1, %v12931_v16  ;;  %v1001_v46 = vmul.f32 %v12964_v1, %v12932_v13 }
 0x1f2   : > { %v6580_v28 = vpop.eup %6579  ;;  %6601 = vpow2.f32 %v6032_v62  ;;  %v9564_v27 = vadd.f32 %v9322_v30, %v2007_v12  ;;  %v1720_v22 = vmul.f32 %v9477_v43, %v12885_v19  ;;  %v1721_v60 = vmul.f32 %v9477_v43, %v12886_v34 }
 0x1f3   : > { %v6582_v9 = vpop.eup %6581  ;;  %v4208_v63 = vmul.f32 %v6580_v28, %v9429_v45  ;;  %v5883_v50 = vmul.f32 -1.442695, %v9557_v58  ;;  %v1256_v53 = vadd.f32 %v1000_v36, %v536_v25  ;;  %v1257_v32 = vadd.f32 %v1001_v46, %v537_v54 }
 0x1f4   : > { %v6584_v42 = vpop.eup %6583  ;;  %v4209_v23 = vmul.f32 %v6582_v9, %v9432_v2  ;;  %v5884_v62 = vmul.f32 -1.442695, %v9564_v27  ;;  %v626_v52 = vmul.f32 %v12937_v61, %v12833_v38  ;;  %v627_v12 = vmul.f32 %v12937_v61, %v12835_v20 }
 0x1f5   : > { %v6586_v30 = vpop.eup %6585  ;;  %v3470_v56 = vadd.f32 1.0, %v6584_v42  ;;  %6603 = vpow2.f32 %v5883_v50  ;;  %v1976_v44 = vadd.f32 %v1720_v22, %v1256_v53  ;;  %v1977_v45 = vadd.f32 %v1721_v60, %v1257_v32 }
 0x1f6   : > { %v6588_v28 = vpop.eup %6587  ;;  %v4534_v55 = vadd.f32 %v4209_v23, %v4208_v63  ;;  %v3471_v25 = vadd.f32 1.0, %v6586_v30  ;;  %6605 = vpow2.f32 %v5884_v62  ;;  %v1090_v2 = vmul.f32 %v12940_v51, %v12836_v5  ;;  %v12980_v23 = vld [vmem:[#allocation45_spill] sm:$0xff]  ;;  %v12981_v62 = vld [vmem:[#allocation46_spill] sm:$0xff] }
 0x1f7   : > { %v6590_v54 = vpop.eup %6589  ;;  %6607 = vrcp.f32 %v3470_v56  ;;  %v3320_v36 = vadd.f32 1.0, %v6588_v28  ;;  %v9581_v46 = vadd.f32 %v9500_v8, %v1976_v44  ;;  %v9584_v9 = vadd.f32 %v9500_v8, %v1977_v45  ;;  %v12983_v28 = vld [vmem:[#allocation72_spill] sm:$0xff] }
 0x1f8   : > { %v6592_v42 = vpop.eup %6591  ;;  %4535 = vadd.xlane.f32.xlu1 %v4534_v55  ;;  %6609 = vrcp.f32 %v3471_v25  ;;  %v3321_v22 = vadd.f32 1.0, %v6590_v54  ;;  %v1091_v30 = vmul.f32 %v12940_v51, %v12838_v21  ;;  %v1346_v60 = vadd.f32 %v1090_v2, %v626_v52  ;;  %v12982_v52 = vld [vmem:[#allocation21_spill] sm:$0xff]  ;;  %v12990_v21 = vld [vmem:[#allocation92_spill] sm:$0xff] }
 0x1f9   : > { %v6594_v63 = vpop.eup %6593  ;;  %v4178_v50 = vmul.f32 %v6592_v42, %v9450_v4  ;;  %6611 = vrcp.f32 %v3320_v36  ;;  %v5853_v56 = vmul.f32 -1.442695, %v9581_v46  ;;  %v5854_v44 = vmul.f32 -1.442695, %v9584_v9  ;;  %v12984_v4 = vld [vmem:[#allocation22_spill] sm:$0xff] }
 0x1fa   : > { %v4179_v53 = vmul.f32 %v6594_v63, %v9453_v29  ;;  %6613 = vrcp.f32 %v3321_v22  ;;  %v1347_v32 = vadd.f32 %v1091_v30, %v627_v12  ;;  %v1810_v55 = vmul.f32 %v12943_v37, %v12980_v23  ;;  %v12985_v29 = vld [vmem:[#allocation25_spill] sm:$0xff]  ;;  %v12986_v22 = vld [vmem:[#allocation64_spill] sm:$0xff] }
 0x1fb   : > { %6615 = vpow2.f32 %v5853_v56  ;;  %v1811_v45 = vmul.f32 %v12943_v37, %v12981_v62  ;;  %v596_v25 = vmul.f32 %v12983_v28, %v12982_v52  ;;  %v597_v2 = vmul.f32 %v12983_v28, %v12984_v4  ;;  %v12987_v56 = vld [vmem:[#allocation26_spill] sm:$0xff]  ;;  %v12988_v37 = vld [vmem:[#allocation39_spill] sm:$0xff]  ;;  %v12989_v62 = vld [vmem:[#allocation76_spill] sm:$0xff] }
 0x1fc   : > { %v6596_v54 = vpop.eup %6595  ;;  %v4489_v36 = vadd.f32 %v4179_v53, %v4178_v50  ;;  %6617 = vpow2.f32 %v5854_v44  ;;  %v2066_v42 = vadd.f32 %v1810_v55, %v1346_v60  ;;  %v1060_v12 = vmul.f32 %v12986_v22, %v12985_v29  ;;  %v12991_v44 = vld [vmem:[#allocation40_spill] sm:$0xff] }
 0x1fd   : > { %v6598_v30 = vpop.eup %6597  ;;  %v3530_v63 = vadd.f32 1.0, %v6596_v54  ;;  %v2067_v51 = vadd.f32 %v1811_v45, %v1347_v32  ;;  %v1061_v61 = vmul.f32 %v12986_v22, %v12987_v56  ;;  %v1780_v23 = vmul.f32 %v12989_v62, %v12988_v37 }
 0x1fe   : > { %v6600_v52 = vpop.eup %6599  ;;  %4490 = vadd.xlane.f32.xlu0 %v4489_v36  ;;  %v4268_v4 = vmul.f32 %v6598_v30, %v9468_v49  ;;  %v9608_v50 = vadd.f32 %v12990_v21, %v2066_v42  ;;  %v1316_v60 = vadd.f32 %v1060_v12, %v596_v25  ;;  %v1781_v53 = vmul.f32 %v12989_v62, %v12991_v44  ;;  %v12992_v49 = vld [vmem:[#allocation51_spill] sm:$0xff]  ;;  %v12993_v44 = vld [vmem:[#allocation52_spill] sm:$0xff] }
 0x1ff   : > { %v6602_v55 = vpop.eup %6601  ;;  %v4269_v32 = vmul.f32 %v6600_v52, %v9474_v47  ;;  %6619 = vrcp.f32 %v3530_v63  ;;  %v9614_v45 = vadd.f32 %v12990_v21, %v2067_v51  ;;  %v1317_v54 = vadd.f32 %v1061_v61, %v597_v2  ;;  %v12994_v52 = vld [vmem:[#allocation147_spill] sm:$0xff]  ;;  %v12995_v61 = vld [vmem:[#allocation101_spill] sm:$0xff]  ;;  %v12996_v2 = vld [vmem:[#allocation44_spill] sm:$0xff] }
 0x200   : > { %v3531_v37 = vadd.f32 1.0, %v6602_v55  ;;  %v5943_v36 = vmul.f32 -1.442695, %v9608_v50  ;;  %v2036_v56 = vadd.f32 %v1780_v23, %v1316_v60  ;;  %v686_v42 = vmul.f32 %v12952_v6, %v12992_v49  ;;  %v12997_v55 = vld [vmem:[#allocation102_spill] sm:$0xff] }
 0x201   : > { %v4624_v30 = vadd.f32 %v4269_v32, %v4268_v4  ;;  %v5944_v25 = vmul.f32 -1.442695, %v9614_v45  ;;  %v2037_v12 = vadd.f32 %v1781_v53, %v1317_v54  ;;  %v687_v29 = vmul.f32 %v12952_v6, %v12993_v44  ;;  %v12998_v32 = vld [vmem:[#allocation123_spill] sm:$0xff]  ;;  %v12999_v54 = vld [vmem:[#allocation57_spill] sm:$0xff] }
 0x202   : > { %v6604_v47 = vpop.eup %6603  ;;  %6621 = vrcp.f32 %v3531_v37  ;;  %v9623_v51 = vadd.f32 %v12994_v52, %v2036_v56  ;;  %v1150_v63 = vmul.f32 %v12996_v2, %v12995_v61  ;;  %v1151_v23 = vmul.f32 %v12996_v2, %v12997_v55  ;;  %v13000_v2 = vld [vmem:[#allocation91_spill] sm:$0xff] }
 0x203   : > { %v6606_v60 = vpop.eup %6605  ;;  %4625 = vadd.xlane.f32.xlu1 %v4624_v30  ;;  %v3382_v4 = vadd.f32 1.0, %v6604_v47  ;;  %6623 = vpow2.f32 %v5943_v36  ;;  %v9630_v53 = vadd.f32 %v12994_v52, %v2037_v12  ;;  %v1870_v6 = vmul.f32 %v12999_v54, %v12998_v32 }
 0x204   : > { %v6608_v37 = vpop.eup %6607  ;;  %v3383_v21 = vadd.f32 1.0, %v6606_v60  ;;  %6625 = vpow2.f32 %v5944_v25  ;;  %v5913_v56 = vmul.f32 -1.442695, %v9623_v51  ;;  %v1406_v44 = vadd.f32 %v1150_v63, %v686_v42  ;;  %v13001_v42 = vld [vmem:[#allocation41_spill] sm:$0xff]  ;;  %v13002_v63 = vld [vmem:[#allocation118_spill] sm:$0xff] }
 0x205   : > { %v6610_v61 = vpop.eup %6609  ;;  %v4238_v49 = vmul.f32 %v6608_v37, %v9498_v17  ;;  %6627 = vrcp.f32 %v3382_v4  ;;  %v5914_v30 = vmul.f32 -1.442695, %v9630_v53  ;;  %v1407_v47 = vadd.f32 %v1151_v23, %v687_v29  ;;  %v13003_v17 = vld [vmem:[#allocation42_spill] sm:$0xff] }
 0x206   : > { %v6612_v36 = vpop.eup %6611  ;;  %v4239_v12 = vmul.f32 %v6610_v61, %v9504_v18  ;;  %6629 = vrcp.f32 %v3383_v21  ;;  %v1871_v32 = vmul.f32 %v12999_v54, %v13000_v2  ;;  %v2126_v55 = vadd.f32 %v1870_v6, %v1406_v44  ;;  %v13005_v44 = vld [vmem:[#allocation47_spill] sm:$0xff] }
 0x207   : > { %v6614_v60 = vpop.eup %6613  ;;  %v4088_v25 = vmul.f32 %v6612_v36, %v9513_v7  ;;  %6631 = vpow2.f32 %v5913_v56  ;;  %v656_v52 = vmul.f32 %v13002_v63, %v13001_v42  ;;  %v657_v4 = vmul.f32 %v13002_v63, %v13003_v17  ;;  %v13006_v7 = vld [vmem:[#allocation117_spill] sm:$0xff]  ;;  %v13007_v36 = vld [vmem:[#allocation48_spill] sm:$0xff] }
 0x208   : > { %v6616_v37 = vpop.eup %6615  ;;  %v4579_v29 = vadd.f32 %v4239_v12, %v4238_v49  ;;  %v4089_v23 = vmul.f32 %v6614_v60, %v9520_v59  ;;  %6633 = vpow2.f32 %v5914_v30  ;;  %v2127_v21 = vadd.f32 %v1871_v32, %v1407_v47  ;;  %v13009_v59 = vld [vmem:[#allocation49_spill] sm:$0xff]  ;;  %v13010_v30 = vld [vmem:[#allocation127_spill] sm:$0xff] }
 0x209   : > { %v6618_v18 = vpop.eup %6617  ;;  %v3352_v61 = vadd.f32 1.0, %v6616_v37  ;;  %v9647_v6 = vadd.f32 %v12968_v33, %v2126_v55  ;;  %v1120_v56 = vmul.f32 %v13006_v7, %v13005_v44  ;;  %v1121_v54 = vmul.f32 %v13006_v7, %v13007_v36  ;;  %v9659_v37 = vpop.permute.xlu1 %1649  ;;  %v13015_v36 = vld [vmem:[#allocation8_spill] sm:$0xff] }
 0x20a   : > { %4580 = vadd.xlane.f32.xlu0 %v4579_v29  ;;  %v4354_v42 = vadd.f32 %v4089_v23, %v4088_v25  ;;  %v3353_v17 = vadd.f32 1.0, %v6618_v18  ;;  %v9654_v49 = vadd.f32 %v12968_v33, %v2127_v21  ;;  %v1840_v32 = vmul.f32 %v13010_v30, %v13009_v59  ;;  %13011 = vst [vmem:[#allocation138_spill] sm:$0xff] %v9659_v37  ;;  %v13012_v25 = vld [vmem:[#allocation50_spill] sm:$0xff]  ;;  %v13013_v21 = vld [vmem:[#allocation7_spill] sm:$0xff] }
 0x20b   : > { %13004 = vst [vmem:[#allocation136_spill] sm:$0xff] %v9647_v6  ;;  %6635 = vrcp.f32 %v3352_v61  ;;  %v6003_v47 = vmul.f32 -1.442695, %v9647_v6  ;;  %v1376_v55 = vadd.f32 %v1120_v56, %v656_v52  ;;  %v1377_v12 = vadd.f32 %v1121_v54, %v657_v4  ;;  %v13014_v18 = vld [vmem:[#allocation79_spill] sm:$0xff]  ;;  %v13016_v4 = vld [vmem:[#allocation9_spill] sm:$0xff]  ;;  %v13018_v56 = vld [vmem:[#allocation10_spill] sm:$0xff] }
 0x20c   : > { %13008 = vst [vmem:[#allocation137_spill] sm:$0xff] %v9654_v49  ;;  %v6620_v60 = vpop.eup %6619  ;;  %4355 = vadd.xlane.f32.xlu1 %v4354_v42  ;;  %6637 = vrcp.f32 %v3353_v17  ;;  %v6004_v29 = vmul.f32 -1.442695, %v9654_v49  ;;  %v1841_v23 = vmul.f32 %v13010_v30, %v13012_v25  ;;  %v506_v33 = vmul.f32 %v13014_v18, %v13013_v21  ;;  %v13017_v42 = vld [vmem:[#allocation80_spill] sm:$0xff]  ;;  %v13019_v25 = vld [vmem:[#allocation122_spill] sm:$0xff]  ;;  %v13020_v21 = vld [vmem:[#allocation29_spill] sm:$0xff] }
 0x20d   : > { %v4298_v59 = vmul.f32 %v6620_v60, %v9533_v35  ;;  %6639 = vpow2.f32 %v6003_v47  ;;  %v2096_v61 = vadd.f32 %v1840_v32, %v1376_v55  ;;  %v507_v52 = vmul.f32 %v13014_v18, %v13015_v36  ;;  %v13021_v47 = vld [vmem:[#allocation30_spill] sm:$0xff] }
 0x20e   : > { %6641 = vpow2.f32 %v6004_v29  ;;  %v2097_v54 = vadd.f32 %v1841_v23, %v1377_v12  ;;  %v970_v17 = vmul.f32 %v13017_v42, %v13016_v4  ;;  %v971_v44 = vmul.f32 %v13017_v42, %v13018_v56  ;;  %v9684_v4 = vpop.permute.xlu0 %2253 }
 0x20f   : > { %v6622_v2 = vpop.eup %6621  ;;  %v9674_v30 = vadd.f32 %v13019_v25, %v2096_v61  ;;  %v1690_v35 = vmul.f32 %v9659_v37, %v13020_v21  ;;  %v1691_v32 = vmul.f32 %v9659_v37, %v13021_v47  ;;  %13022 = vst [vmem:[#allocation139_spill] sm:$0xff] %v9684_v4 }
 0x210   : > { %v6624_v55 = vpop.eup %6623  ;;  %v4299_v60 = vmul.f32 %v6622_v2, %v9541_v39  ;;  %v9682_v12 = vadd.f32 %v13019_v25, %v2097_v54  ;;  %v1226_v29 = vadd.f32 %v970_v17, %v506_v33  ;;  %v1227_v36 = vadd.f32 %v971_v44, %v507_v52  ;;  %v13023_v44 = vld [vmem:[#allocation65_spill] sm:$0xff] }
 0x211   : > { %v6626_v23 = vpop.eup %6625  ;;  %v3442_v56 = vadd.f32 1.0, %v6624_v55  ;;  %v5973_v61 = vmul.f32 -1.442695, %v9674_v30 }
 0x212   : > { %v6628_v7 = vpop.eup %6627  ;;  %v4669_v63 = vadd.f32 %v4299_v60, %v4298_v59  ;;  %v3443_v21 = vadd.f32 1.0, %v6626_v23  ;;  %v5974_v49 = vmul.f32 -1.442695, %v9682_v12  ;;  %v1946_v47 = vadd.f32 %v1690_v35, %v1226_v29  ;;  %v13026_v60 = vld [vmem:[#allocation114_spill] sm:$0xff] }
 0x213   : > { %v6630_v6 = vpop.eup %6629  ;;  %v4150_v39 = vmul.f32 %v6628_v7, %v9557_v58  ;;  %6643 = vrcp.f32 %v3442_v56  ;;  %v1947_v2 = vadd.f32 %v1691_v32, %v1227_v36  ;;  %v716_v59 = vmul.f32 %v13023_v44, %v12970_v40  ;;  %v13024_v36 = vld [vmem:[#allocation115_spill] sm:$0xff]  ;;  %v13027_v23 = vld [vmem:[#allocation146_spill] sm:$0xff] }
 0x214   : > { %v6632_v54 = vpop.eup %6631  ;;  %4670 = vadd.xlane.f32.xlu0 %v4669_v63  ;;  %v4151_v33 = vmul.f32 %v6630_v6, %v9564_v27  ;;  %6645 = vrcp.f32 %v3443_v21  ;;  %v9691_v17 = vadd.f32 %v9684_v4, %v1946_v47  ;;  %v717_v58 = vmul.f32 %v13023_v44, %v9065_v26  ;;  %v13025_v32 = vld [vmem:[#allocation75_spill] sm:$0xff] }
 0x215   : > { %v6634_v52 = vpop.eup %6633  ;;  %v3412_v55 = vadd.f32 1.0, %v6632_v54  ;;  %6647 = vpow2.f32 %v5973_v61  ;;  %v9696_v35 = vadd.f32 %v9684_v4, %v1947_v2  ;;  %v1180_v21 = vmul.f32 %v13024_v36, %v9075_v24 }
 0x216   : > { %v4447_v7 = vadd.f32 %v4151_v33, %v4150_v39  ;;  %v3413_v63 = vadd.f32 1.0, %v6634_v52  ;;  %6649 = vpow2.f32 %v5974_v49  ;;  %v5823_v27 = vmul.f32 -1.442695, %v9691_v17 }
 0x217   : > { %6651 = vrcp.f32 %v3412_v55  ;;  %v5824_v6 = vmul.f32 -1.442695, %v9696_v35  ;;  %v1181_v56 = vmul.f32 %v13024_v36, %v9080_v48  ;;  %v1900_v29 = vmul.f32 %v13026_v60, %v13025_v32 }
 0x218   : > { %v6636_v47 = vpop.eup %6635  ;;  %4448 = vadd.xlane.f32.xlu1 %v4447_v7  ;;  %6653 = vrcp.f32 %v3413_v63  ;;  %v1901_v49 = vmul.f32 %v13026_v60, %v13027_v23  ;;  %v568_v61 = vmul.f32 %v12962_v0, %v12922_v10  ;;  %v1436_v54 = vadd.f32 %v1180_v21, %v716_v59 }
 0x219   : > { %v6638_v39 = vpop.eup %6637  ;;  %v4120_v2 = vmul.f32 %v6636_v47, %v9581_v46  ;;  %6655 = vpow2.f32 %v5823_v27  ;;  %v1437_v33 = vadd.f32 %v1181_v56, %v717_v58  ;;  %v569_v55 = vmul.f32 %v12962_v0, %v12923_v41  ;;  %v13044_v0 = vld [vmem:[#allocation40_spill] sm:$0xff] }
 0x21a   : > { %v6640_v44 = vpop.eup %6639  ;;  %v4121_v52 = vmul.f32 %v6638_v39, %v9584_v9  ;;  %6657 = vpow2.f32 %v5824_v6  ;;  %v1032_v7 = vmul.f32 %v12964_v1, %v12975_v14  ;;  %v2156_v60 = vadd.f32 %v1900_v29, %v1436_v54  ;;  %v13028_v6 = vld [vmem:[#allocation74_spill] sm:$0xff] }
 0x21b   : > { %v6642_v63 = vpop.eup %6641  ;;  %v3502_v36 = vadd.f32 1.0, %v6640_v44  ;;  %v2157_v10 = vadd.f32 %v1901_v49, %v1437_v33  ;;  %v1033_v46 = vmul.f32 %v12964_v1, %v12976_v11  ;;  %v1752_v9 = vmul.f32 %v9477_v43, %v12977_v31 }
 0x21c   : > { %v4402_v27 = vadd.f32 %v4121_v52, %v4120_v2  ;;  %v3503_v59 = vadd.f32 1.0, %v6642_v63  ;;  %v1288_v58 = vadd.f32 %v1032_v7, %v568_v61  ;;  %v9723_v21 = vadd.f32 %v13028_v6, %v2156_v60 }
 0x21d   : > { %6659 = vrcp.f32 %v3502_v36  ;;  %v9726_v56 = vadd.f32 %v13028_v6, %v2157_v10  ;;  %v1289_v47 = vadd.f32 %v1033_v46, %v569_v55  ;;  %v1753_v29 = vmul.f32 %v9477_v43, %v12978_v3 }
 0x21e   : > { %4403 = vadd.xlane.f32.xlu0 %v4402_v27  ;;  %6661 = vrcp.f32 %v3503_v59  ;;  %v2008_v49 = vadd.f32 %v1752_v9, %v1288_v58  ;;  %v538_v61 = vmul.f32 %v13014_v18, %v12979_v15  ;;  %v6033_v39 = vmul.f32 -1.442695, %v9723_v21 }
 0x21f   : > { %v6034_v2 = vmul.f32 -1.442695, %v9726_v56  ;;  %v539_v54 = vmul.f32 %v13014_v18, %v12930_v57  ;;  %v1002_v10 = vmul.f32 %v13017_v42, %v12931_v16  ;;  %v2009_v44 = vadd.f32 %v1753_v29, %v1289_v47 }
 0x220   : > { %v6644_v33 = vpop.eup %6643  ;;  %v9739_v52 = vadd.f32 %v9500_v8, %v2008_v49  ;;  %v1003_v55 = vmul.f32 %v13017_v42, %v12932_v13  ;;  %v1722_v7 = vmul.f32 %v9659_v37, %v12885_v19  ;;  %6663 = vpow2.f32 %v6033_v39 }
 0x221   : > { %v6646_v63 = vpop.eup %6645  ;;  %v4210_v36 = vmul.f32 %v6644_v33, %v9608_v50  ;;  %v1258_v60 = vadd.f32 %v1002_v10, %v538_v61  ;;  %v1723_v46 = vmul.f32 %v9659_v37, %v12886_v34  ;;  %6665 = vpow2.f32 %v6034_v2 }
 0x222   : > { %v6648_v27 = vpop.eup %6647  ;;  %v4211_v59 = vmul.f32 %v6646_v63, %v9614_v45  ;;  %v9750_v58 = vadd.f32 %v9500_v8, %v2009_v44  ;;  %v5885_v9 = vmul.f32 -1.442695, %v9739_v52  ;;  %v1259_v29 = vadd.f32 %v1003_v55, %v539_v54  ;;  %v13036_v8 = vld [vmem:[#allocation21_spill] sm:$0xff] }
 0x223   : > { %v6650_v6 = vpop.eup %6649  ;;  %v3472_v47 = vadd.f32 1.0, %v6648_v27  ;;  %v1978_v49 = vadd.f32 %v1722_v7, %v1258_v60  ;;  %v628_v50 = vmul.f32 %v12983_v28, %v12833_v38  ;;  %v629_v55 = vmul.f32 %v12983_v28, %v12835_v20 }
 0x224   : > { %v6652_v61 = vpop.eup %6651  ;;  %v4537_v39 = vadd.f32 %v4211_v59, %v4210_v36  ;;  %v3473_v10 = vadd.f32 1.0, %v6650_v6  ;;  %6667 = vpow2.f32 %v5885_v9  ;;  %v5886_v33 = vmul.f32 -1.442695, %v9750_v58  ;;  %v13029_v6 = vld [vmem:[#allocation38_spill] sm:$0xff] }
 0x225   : > { %v6654_v45 = vpop.eup %6653  ;;  %v4180_v2 = vmul.f32 %v6652_v61, %v9623_v51  ;;  %6669 = vrcp.f32 %v3472_v47  ;;  %v1979_v44 = vadd.f32 %v1723_v46, %v1259_v29  ;;  %v9758_v63 = vadd.f32 %v9684_v4, %v1978_v49  ;;  %v13030_v49 = vld [vmem:[#allocation45_spill] sm:$0xff] }
 0x226   : > { %v6656_v27 = vpop.eup %6655  ;;  %4538 = vadd.xlane.f32.xlu1 %v4537_v39  ;;  %v4181_v54 = vmul.f32 %v6654_v45, %v9630_v53  ;;  %6671 = vrcp.f32 %v3473_v10  ;;  %v1092_v7 = vmul.f32 %v12986_v22, %v12836_v5  ;;  %v1093_v53 = vmul.f32 %v12986_v22, %v13029_v6  ;;  %v13031_v39 = vld [vmem:[#allocation46_spill] sm:$0xff]  ;;  %v13035_v22 = vld [vmem:[#allocation147_spill] sm:$0xff] }
 0x227   : > { %v6658_v36 = vpop.eup %6657  ;;  %v3322_v60 = vadd.f32 1.0, %v6656_v27  ;;  %6673 = vpow2.f32 %v5886_v33  ;;  %v9766_v51 = vadd.f32 %v9684_v4, %v1979_v44  ;;  %v5855_v46 = vmul.f32 -1.442695, %v9758_v63 }
 0x228   : > { %v4492_v59 = vadd.f32 %v4181_v54, %v4180_v2  ;;  %v3323_v9 = vadd.f32 1.0, %v6658_v36  ;;  %v1348_v47 = vadd.f32 %v1092_v7, %v628_v50  ;;  %v1812_v61 = vmul.f32 %v12989_v62, %v13030_v49  ;;  %v13032_v2 = vld [vmem:[#allocation136_spill] sm:$0xff]  ;;  %v13033_v36 = vld [vmem:[#allocation137_spill] sm:$0xff]  ;;  %v13046_v49 = vld [vmem:[#allocation118_spill] sm:$0xff] }
 0x229   : > { %6675 = vrcp.f32 %v3322_v60  ;;  %v5856_v29 = vmul.f32 -1.442695, %v9766_v51  ;;  %v1813_v10 = vmul.f32 %v12989_v62, %v13031_v39  ;;  %v1349_v45 = vadd.f32 %v1093_v53, %v629_v55  ;;  %v9778_v60 = vpop.permute.xlu1 %1653  ;;  %v13037_v62 = vld [vmem:[#allocation67_spill] sm:$0xff] }
 0x22a   : > { %v6660_v33 = vpop.eup %6659  ;;  %4493 = vadd.xlane.f32.xlu0 %v4492_v59  ;;  %6677 = vrcp.f32 %v3323_v9  ;;  %v2068_v54 = vadd.f32 %v1812_v61, %v1348_v47  ;;  %13034 = vst [vmem:[#allocation142_spill] sm:$0xff] %v9778_v60  ;;  %v598_v43 = vmul.f32 %v13037_v62, %v13036_v8  ;;  %v13038_v59 = vld [vmem:[#allocation22_spill] sm:$0xff]  ;;  %v13039_v47 = vld [vmem:[#allocation25_spill] sm:$0xff]  ;;  %v13040_v61 = vld [vmem:[#allocation68_spill] sm:$0xff] }
 0x22b   : > { %v6662_v44 = vpop.eup %6661  ;;  %v4270_v27 = vmul.f32 %v6660_v33, %v13032_v2  ;;  %6679 = vpow2.f32 %v5855_v46  ;;  %v2069_v7 = vadd.f32 %v1813_v10, %v1349_v45  ;;  %v599_v55 = vmul.f32 %v13037_v62, %v13038_v59  ;;  %v13045_v39 = vld [vmem:[#allocation51_spill] sm:$0xff] }
 0x22c   : > { %v4271_v50 = vmul.f32 %v6662_v44, %v13033_v36  ;;  %6681 = vpow2.f32 %v5856_v29  ;;  %v9781_v28 = vadd.f32 %v13035_v22, %v2068_v54  ;;  %v1062_v29 = vmul.f32 %v13040_v61, %v13039_v47  ;;  %v13041_v44 = vld [vmem:[#allocation26_spill] sm:$0xff] }
 0x22d   : > { %v6664_v9 = vpop.eup %6663  ;;  %v9788_v46 = vadd.f32 %v13035_v22, %v2069_v7  ;;  %v1063_v2 = vmul.f32 %v13040_v61, %v13041_v44  ;;  %v13043_v7 = vld [vmem:[#allocation73_spill] sm:$0xff]  ;;  %v688_v44 = vmul.f32 %v13046_v49, %v13045_v39 }
 0x22e   : > { %v4627_v53 = vadd.f32 %v4271_v50, %v4270_v27  ;;  %v6666_v10 = vpop.eup %6665  ;;  %v3532_v33 = vadd.f32 1.0, %v6664_v9  ;;  %v5945_v45 = vmul.f32 -1.442695, %v9781_v28  ;;  %v1318_v1 = vadd.f32 %v1062_v29, %v598_v43  ;;  %v13042_v50 = vld [vmem:[#allocation39_spill] sm:$0xff]  ;;  %v13051_v39 = vld [vmem:[#allocation133_spill] sm:$0xff] }
 0x22f   : > { %v3533_v54 = vadd.f32 1.0, %v6666_v10  ;;  %v5946_v36 = vmul.f32 -1.442695, %v9788_v46  ;;  %v1319_v27 = vadd.f32 %v1063_v2, %v599_v55  ;;  %v1782_v22 = vmul.f32 %v13043_v7, %v13042_v50  ;;  %v9802_v10 = vpop.permute.xlu1 %1657  ;;  %v13048_v50 = vld [vmem:[#allocation52_spill] sm:$0xff] }
 0x230   : > { %4628 = vadd.xlane.f32.xlu1 %v4627_v53  ;;  %6683 = vrcp.f32 %v3532_v33  ;;  %v1783_v47 = vmul.f32 %v13043_v7, %v13044_v0  ;;  %13047 = vst [vmem:[#allocation144_spill] sm:$0xff] %v9802_v10  ;;  %v689_v0 = vmul.f32 %v13046_v49, %v13048_v50 }
 0x231   : > { %v6668_v59 = vpop.eup %6667  ;;  %6685 = vrcp.f32 %v3533_v54  ;;  %v2038_v29 = vadd.f32 %v1782_v22, %v1318_v1  ;;  %v13049_v54 = vld [vmem:[#allocation101_spill] sm:$0xff] }
 0x232   : > { %v6670_v9 = vpop.eup %6669  ;;  %v3384_v8 = vadd.f32 1.0, %v6668_v59  ;;  %6687 = vpow2.f32 %v5945_v45  ;;  %v2039_v55 = vadd.f32 %v1783_v47, %v1319_v27  ;;  %v13050_v59 = vld [vmem:[#allocation117_spill] sm:$0xff]  ;;  %v13052_v47 = vld [vmem:[#allocation102_spill] sm:$0xff]  ;;  %v13053_v45 = vld [vmem:[#allocation123_spill] sm:$0xff] }
 0x233   : > { %v6672_v53 = vpop.eup %6671  ;;  %v4240_v43 = vmul.f32 %v6670_v9, %v9674_v30  ;;  %v1152_v7 = vmul.f32 %v13050_v59, %v13049_v54  ;;  %v9811_v61 = vadd.f32 %v13051_v39, %v2038_v29  ;;  %v13054_v27 = vld [vmem:[#allocation127_spill] sm:$0xff] }
 0x234   : > { %v6674_v33 = vpop.eup %6673  ;;  %v4241_v2 = vmul.f32 %v6672_v53, %v9682_v12  ;;  %6689 = vrcp.f32 %v3384_v8  ;;  %v9814_v30 = vadd.f32 %v13051_v39, %v2039_v55  ;;  %v1153_v12 = vmul.f32 %v13050_v59, %v13052_v47  ;;  %v13067_v54 = vld [vmem:[#allocation7_spill] sm:$0xff] }
 0x235   : > { %v3385_v6 = vadd.f32 1.0, %v6674_v33  ;;  %6691 = vpow2.f32 %v5946_v36  ;;  %v1408_v8 = vadd.f32 %v1152_v7, %v688_v44  ;;  %v1872_v9 = vmul.f32 %v13054_v27, %v13053_v45  ;;  %v9826_v7 = vpop.permute.xlu1 %1661 }
 0x236   : > { %v6676_v1 = vpop.eup %6675  ;;  %v4582_v22 = vadd.f32 %v4241_v2, %v4240_v43  ;;  %v5915_v36 = vmul.f32 -1.442695, %v9811_v61  ;;  %v5916_v29 = vmul.f32 -1.442695, %v9814_v30  ;;  %v1409_v43 = vadd.f32 %v1153_v12, %v689_v0  ;;  %v13055_v2 = vld [vmem:[#allocation91_spill] sm:$0xff]  ;;  %13056 = vst [vmem:[#allocation141_spill] sm:$0xff] %v9826_v7 }
 0x237   : > { %v6678_v53 = vpop.eup %6677  ;;  %v4090_v49 = vmul.f32 %v6676_v1, %v9691_v17  ;;  %6693 = vrcp.f32 %v3385_v6  ;;  %v1873_v59 = vmul.f32 %v13054_v27, %v13055_v2  ;;  %v2128_v45 = vadd.f32 %v1872_v9, %v1408_v8  ;;  %v13060_v8 = vld [vmem:[#allocation47_spill] sm:$0xff]  ;;  %v13061_v9 = vld [vmem:[#allocation62_spill] sm:$0xff] }
 0x238   : > { %v6680_v33 = vpop.eup %6679  ;;  %4583 = vadd.xlane.f32.xlu0 %v4582_v22  ;;  %v4091_v55 = vmul.f32 %v6678_v53, %v9696_v35  ;;  %6695 = vpow2.f32 %v5915_v36  ;;  %v13057_v35 = vld [vmem:[#allocation41_spill] sm:$0xff]  ;;  %v13059_v36 = vld [vmem:[#allocation42_spill] sm:$0xff] }
 0x239   : > { %v6682_v44 = vpop.eup %6681  ;;  %v3354_v10 = vadd.f32 1.0, %v6680_v33  ;;  %6697 = vpow2.f32 %v5916_v29  ;;  %v2129_v1 = vadd.f32 %v1873_v59, %v1409_v43  ;;  %v9829_v47 = vadd.f32 %v13019_v25, %v2128_v45  ;;  %v13058_v22 = vld [vmem:[#allocation61_spill] sm:$0xff]  ;;  %v13062_v29 = vld [vmem:[#allocation48_spill] sm:$0xff] }
 0x23a   : > { %v4357_v17 = vadd.f32 %v4091_v55, %v4090_v49  ;;  %v3355_v6 = vadd.f32 1.0, %v6682_v44  ;;  %v658_v12 = vmul.f32 %v13058_v22, %v13057_v35  ;;  %v659_v49 = vmul.f32 %v13058_v22, %v13059_v36  ;;  %v13063_v55 = vld [vmem:[#allocation49_spill] sm:$0xff]  ;;  %v13064_v43 = vld [vmem:[#allocation124_spill] sm:$0xff] }
 0x23b   : > { %6699 = vrcp.f32 %v3354_v10  ;;  %v9832_v0 = vadd.f32 %v13019_v25, %v2129_v1  ;;  %v6005_v53 = vmul.f32 -1.442695, %v9829_v47  ;;  %v1122_v59 = vmul.f32 %v13061_v9, %v13060_v8  ;;  %v13066_v25 = vld [vmem:[#allocation50_spill] sm:$0xff]  ;;  %v13069_v22 = vld [vmem:[#allocation8_spill] sm:$0xff] }
 0x23c   : > { %4358 = vadd.xlane.f32.xlu1 %v4357_v17  ;;  %6701 = vrcp.f32 %v3355_v6  ;;  %v1123_v33 = vmul.f32 %v13061_v9, %v13062_v29  ;;  %v1842_v44 = vmul.f32 %v13064_v43, %v13063_v55  ;;  %v9846_v6 = vpop.permute.xlu1 %1665  ;;  %v1843_v27 = vmul.f32 %v13064_v43, %v13066_v25  ;;  %v13068_v55 = vld [vmem:[#allocation126_spill] sm:$0xff]  ;;  %v13071_v25 = vld [vmem:[#allocation71_spill] sm:$0xff] }
 0x23d   : > { %v6684_v10 = vpop.eup %6683  ;;  %v6006_v45 = vmul.f32 -1.442695, %v9832_v0  ;;  %13065 = vst [vmem:[#allocation93_spill] sm:$0xff] %v9846_v6  ;;  %6703 = vpow2.f32 %v6005_v53  ;;  %v1378_v7 = vadd.f32 %v1122_v59, %v658_v12  ;;  %v508_v50 = vmul.f32 %v13068_v55, %v13067_v54 }
 0x23e   : > { %v6686_v17 = vpop.eup %6685  ;;  %v4300_v1 = vmul.f32 %v6684_v10, %v9723_v21  ;;  %v1379_v35 = vadd.f32 %v1123_v33, %v659_v49  ;;  %v509_v6 = vmul.f32 %v13068_v55, %v13069_v22  ;;  %v13070_v10 = vld [vmem:[#allocation9_spill] sm:$0xff]  ;;  %v13072_v49 = vld [vmem:[#allocation92_spill] sm:$0xff] }
 0x23f   : > { %v6688_v8 = vpop.eup %6687  ;;  %v4301_v36 = vmul.f32 %v6686_v17, %v9726_v56  ;;  %6705 = vpow2.f32 %v6006_v45  ;;  %v2098_v9 = vadd.f32 %v1842_v44, %v1378_v7  ;;  %v972_v43 = vmul.f32 %v13071_v25, %v13070_v10  ;;  %v13073_v7 = vld [vmem:[#allocation10_spill] sm:$0xff]  ;;  %v13074_v17 = vld [vmem:[#allocation29_spill] sm:$0xff] }
 0x240   : > { %v3444_v29 = vadd.f32 1.0, %v6688_v8  ;;  %v2099_v59 = vadd.f32 %v1843_v27, %v1379_v35  ;;  %v973_v8 = vmul.f32 %v13071_v25, %v13073_v7  ;;  %v13075_v27 = vld [vmem:[#allocation30_spill] sm:$0xff]  ;;  %v9871_v35 = vpop.permute.xlu1 %2258 }
 0x241   : > { %v6690_v2 = vpop.eup %6689  ;;  %v4672_v53 = vadd.f32 %v4301_v36, %v4300_v1  ;;  %v9860_v45 = vadd.f32 %v13072_v49, %v2098_v9  ;;  %v1228_v36 = vadd.f32 %v972_v43, %v508_v50  ;;  %13076 = vst [vmem:[#allocation77_spill] sm:$0xff] %v9871_v35 }
 0x242   : > { %v6692_v21 = vpop.eup %6691  ;;  %v4152_v12 = vmul.f32 %v6690_v2, %v9739_v52  ;;  %6707 = vrcp.f32 %v3444_v29  ;;  %v9865_v44 = vadd.f32 %v13072_v49, %v2099_v59  ;;  %v1692_v52 = vmul.f32 %v9778_v60, %v13074_v17 }
 0x243   : > { %v3445_v56 = vadd.f32 1.0, %v6692_v21  ;;  %4673 = vadd.xlane.f32.xlu0 %v4672_v53  ;;  %v1693_v2 = vmul.f32 %v9778_v60, %v13075_v27  ;;  %v5975_v29 = vmul.f32 -1.442695, %v9860_v45  ;;  %v1229_v1 = vadd.f32 %v973_v8, %v509_v6 }
 0x244   : > { %v6694_v33 = vpop.eup %6693  ;;  %v5976_v53 = vmul.f32 -1.442695, %v9865_v44  ;;  %v1948_v59 = vadd.f32 %v1692_v52, %v1228_v36 }
 0x245   : > { %v4153_v9 = vmul.f32 %v6694_v33, %v9750_v58  ;;  %6709 = vrcp.f32 %v3445_v56  ;;  %v6696_v21 = vpop.eup %6695  ;;  %v1949_v17 = vadd.f32 %v1693_v2, %v1229_v1  ;;  %v13078_v2 = vld [vmem:[#allocation44_spill] sm:$0xff] }
 0x246   : > { %v6698_v7 = vpop.eup %6697  ;;  %v3414_v43 = vadd.f32 1.0, %v6696_v21  ;;  %6711 = vpow2.f32 %v5975_v29  ;;  %v9877_v27 = vadd.f32 %v9871_v35, %v1948_v59 }
 0x247   : > { %v4450_v50 = vadd.f32 %v4153_v9, %v4152_v12  ;;  %v3415_v22 = vadd.f32 1.0, %v6698_v7  ;;  %6713 = vpow2.f32 %v5976_v53  ;;  %v9881_v6 = vadd.f32 %v9871_v35, %v1949_v17  ;;  %v13077_v7 = vld [vmem:[#allocation43_spill] sm:$0xff] }
 0x248   : > { %v6700_v10 = vpop.eup %6699  ;;  %6715 = vrcp.f32 %v3414_v43  ;;  %v5825_v12 = vmul.f32 -1.442695, %v9877_v27  ;;  %v718_v36 = vmul.f32 %v13077_v7, %v12970_v40  ;;  %v719_v52 = vmul.f32 %v13077_v7, %v9065_v26  ;;  %v13080_v43 = vld [vmem:[#allocation17_spill] sm:$0xff] }
 0x249   : > { %v6702_v58 = vpop.eup %6701  ;;  %4451 = vadd.xlane.f32.xlu1 %v4450_v50  ;;  %v4122_v56 = vmul.f32 %v6700_v10, %v9758_v63  ;;  %6717 = vrcp.f32 %v3415_v22  ;;  %v5826_v33 = vmul.f32 -1.442695, %v9881_v6  ;;  %v1182_v63 = vmul.f32 %v13078_v2, %v9075_v24  ;;  %v13079_v22 = vld [vmem:[#allocation57_spill] sm:$0xff] }
 0x24a   : > { %v4123_v8 = vmul.f32 %v6702_v58, %v9766_v51  ;;  %v6704_v10 = vpop.eup %6703  ;;  %6719 = vpow2.f32 %v5825_v12  ;;  %v1183_v51 = vmul.f32 %v13078_v2, %v9080_v48  ;;  %v1902_v17 = vmul.f32 %v13079_v22, %v13025_v32 }
 0x24b   : > { %v3504_v1 = vadd.f32 1.0, %v6704_v10  ;;  %6721 = vpow2.f32 %v5826_v33  ;;  %v1438_v21 = vadd.f32 %v1182_v63, %v718_v36  ;;  %v1903_v53 = vmul.f32 %v13079_v22, %v13027_v23  ;;  %v13081_v10 = vld [vmem:[#allocation148_spill] sm:$0xff] }
 0x24c   : > { %v4405_v9 = vadd.f32 %v4123_v8, %v4122_v56  ;;  %v6706_v29 = vpop.eup %6705  ;;  %v1439_v50 = vadd.f32 %v1183_v51, %v719_v52  ;;  %v570_v58 = vmul.f32 %v13014_v18, %v13080_v43  ;;  %v571_v56 = vmul.f32 %v13014_v18, %v12923_v41  ;;  %v13093_v18 = vld [vmem:[#allocation39_spill] sm:$0xff] }
 0x24d   : > { %v3505_v59 = vadd.f32 1.0, %v6706_v29  ;;  %6723 = vrcp.f32 %v3504_v1  ;;  %v2158_v8 = vadd.f32 %v1902_v17, %v1438_v21  ;;  %v1034_v12 = vmul.f32 %v13017_v42, %v12975_v14 }
 0x24e   : > { %4406 = vadd.xlane.f32.xlu0 %v4405_v9  ;;  %v1035_v33 = vmul.f32 %v13017_v42, %v12976_v11  ;;  %v2159_v36 = vadd.f32 %v1903_v53, %v1439_v50  ;;  %v1754_v52 = vmul.f32 %v9659_v37, %v12977_v31  ;;  %v1755_v2 = vmul.f32 %v9659_v37, %v12978_v3 }
 0x24f   : > { %v6708_v7 = vpop.eup %6707  ;;  %6725 = vrcp.f32 %v3505_v59  ;;  %v9912_v9 = vadd.f32 %v13081_v10, %v2158_v8  ;;  %v1290_v51 = vadd.f32 %v1034_v12, %v570_v58 }
 0x250   : > { %v4212_v63 = vmul.f32 %v6708_v7, %v9781_v28  ;;  %v9915_v17 = vadd.f32 %v13081_v10, %v2159_v36  ;;  %v1291_v29 = vadd.f32 %v1035_v33, %v571_v56  ;;  %v1004_v10 = vmul.f32 %v13071_v25, %v12931_v16 }
 0x251   : > { %v6035_v21 = vmul.f32 -1.442695, %v9912_v9  ;;  %v2010_v53 = vadd.f32 %v1754_v52, %v1290_v51 }
 0x252   : > { %v6710_v22 = vpop.eup %6709  ;;  %v6036_v50 = vmul.f32 -1.442695, %v9915_v17  ;;  %v2011_v37 = vadd.f32 %v1755_v2, %v1291_v29 }
 0x253   : > { %v4213_v1 = vmul.f32 %v6710_v22, %v9788_v46  ;;  %v6712_v59 = vpop.eup %6711  ;;  %6727 = vpow2.f32 %v6035_v21  ;;  %v9921_v58 = vadd.f32 %v9684_v4, %v2010_v53  ;;  %v1724_v21 = vmul.f32 %v9778_v60, %v12885_v19 }
 0x254   : > { %v6714_v42 = vpop.eup %6713  ;;  %v3474_v7 = vadd.f32 1.0, %v6712_v59  ;;  %6729 = vpow2.f32 %v6036_v50  ;;  %v9924_v56 = vadd.f32 %v9684_v4, %v2011_v37  ;;  %v541_v37 = vmul.f32 %v13068_v55, %v12930_v57 }
 0x255   : > { %v4540_v28 = vadd.f32 %v4213_v1, %v4212_v63  ;;  %v6716_v8 = vpop.eup %6715  ;;  %v3475_v12 = vadd.f32 1.0, %v6714_v42  ;;  %v5887_v36 = vmul.f32 -1.442695, %v9921_v58  ;;  %v540_v63 = vmul.f32 %v13068_v55, %v12979_v15 }
 0x256   : > { %v6718_v46 = vpop.eup %6717  ;;  %v4182_v33 = vmul.f32 %v6716_v8, %v9811_v61  ;;  %6731 = vrcp.f32 %v3474_v7  ;;  %v5888_v2 = vmul.f32 -1.442695, %v9924_v56  ;;  %v1725_v53 = vmul.f32 %v9778_v60, %v12886_v34 }
 0x257   : > { %4541 = vadd.xlane.f32.xlu1 %v4540_v28  ;;  %v4183_v52 = vmul.f32 %v6718_v46, %v9814_v30  ;;  %6733 = vrcp.f32 %v3475_v12  ;;  %v6720_v42 = vpop.eup %6719  ;;  %v1005_v30 = vmul.f32 %v13071_v25, %v12932_v13  ;;  %v1260_v1 = vadd.f32 %v1004_v10, %v540_v63  ;;  %v13083_v63 = vld [vmem:[#allocation38_spill] sm:$0xff]  ;;  %v13085_v10 = vld [vmem:[#allocation73_spill] sm:$0xff] }
 0x258   : > { %6735 = vpow2.f32 %v5887_v36  ;;  %v6722_v61 = vpop.eup %6721  ;;  %v3324_v22 = vadd.f32 1.0, %v6720_v42  ;;  %v630_v28 = vmul.f32 %v13037_v62, %v12833_v38  ;;  %v631_v7 = vmul.f32 %v13037_v62, %v12835_v20 }
 0x259   : > { %v4495_v51 = vadd.f32 %v4183_v52, %v4182_v33  ;;  %6737 = vpow2.f32 %v5888_v2  ;;  %v3325_v29 = vadd.f32 1.0, %v6722_v61  ;;  %v1261_v50 = vadd.f32 %v1005_v30, %v541_v37  ;;  %v13082_v33 = vld [vmem:[#allocation68_spill] sm:$0xff]  ;;  %v13084_v37 = vld [vmem:[#allocation45_spill] sm:$0xff]  ;;  %v13086_v30 = vld [vmem:[#allocation46_spill] sm:$0xff] }
 0x25a   : > { %v6724_v59 = vpop.eup %6723  ;;  %6739 = vrcp.f32 %v3324_v22  ;;  %v1980_v46 = vadd.f32 %v1724_v21, %v1260_v1  ;;  %v1094_v36 = vmul.f32 %v13082_v33, %v12836_v5  ;;  %v1095_v42 = vmul.f32 %v13082_v33, %v13083_v63  ;;  %v13087_v33 = vld [vmem:[#allocation21_spill] sm:$0xff] }
 0x25b   : > { %4496 = vadd.xlane.f32.xlu0 %v4495_v51  ;;  %v4272_v12 = vmul.f32 %v6724_v59, %v9829_v47  ;;  %6741 = vrcp.f32 %v3325_v29  ;;  %v1981_v2 = vadd.f32 %v1725_v53, %v1261_v50  ;;  %v1814_v61 = vmul.f32 %v13085_v10, %v13084_v37 }
 0x25c   : > { %v6726_v8 = vpop.eup %6725  ;;  %v9955_v51 = vadd.f32 %v9871_v35, %v1980_v46  ;;  %v1350_v22 = vadd.f32 %v1094_v36, %v630_v28  ;;  %v1815_v47 = vmul.f32 %v13085_v10, %v13086_v30  ;;  %v1351_v21 = vadd.f32 %v1095_v42, %v631_v7  ;;  %v13088_v46 = vld [vmem:[#allocation120_spill] sm:$0xff] }
 0x25d   : > { %v4273_v52 = vmul.f32 %v6726_v8, %v9832_v0  ;;  %v9960_v1 = vadd.f32 %v9871_v35, %v1981_v2  ;;  %v600_v62 = vmul.f32 %v13088_v46, %v13087_v33  ;;  %v13094_v33 = vld [vmem:[#allocation134_spill] sm:$0xff]  ;;  %v13095_v30 = vld [vmem:[#allocation40_spill] sm:$0xff] }
 0x25e   : > { %v5857_v0 = vmul.f32 -1.442695, %v9955_v51  ;;  %v2070_v53 = vadd.f32 %v1814_v61, %v1350_v22  ;;  %v2071_v8 = vadd.f32 %v1815_v47, %v1351_v21  ;;  %v13090_v22 = vld [vmem:[#allocation25_spill] sm:$0xff]  ;;  %v13091_v47 = vld [vmem:[#allocation66_spill] sm:$0xff] }
 0x25f   : > { %v4630_v29 = vadd.f32 %v4273_v52, %v4272_v12  ;;  %v5858_v50 = vmul.f32 -1.442695, %v9960_v1  ;;  %v13089_v52 = vld [vmem:[#allocation22_spill] sm:$0xff] }
 0x260   : > { %v6728_v59 = vpop.eup %6727  ;;  %6743 = vpow2.f32 %v5857_v0  ;;  %v9967_v12 = vadd.f32 %v13051_v39, %v2070_v53  ;;  %v601_v7 = vmul.f32 %v13088_v46, %v13089_v52  ;;  %v9972_v61 = vadd.f32 %v13051_v39, %v2071_v8  ;;  %v13092_v53 = vld [vmem:[#allocation26_spill] sm:$0xff] }
 0x261   : > { %4631 = vadd.xlane.f32.xlu1 %v4630_v29  ;;  %v6730_v28 = vpop.eup %6729  ;;  %v3534_v36 = vadd.f32 1.0, %v6728_v59  ;;  %6745 = vpow2.f32 %v5858_v50  ;;  %v1064_v29 = vmul.f32 %v13091_v47, %v13090_v22  ;;  %v1065_v59 = vmul.f32 %v13091_v47, %v13092_v53 }
 0x262   : > { %v3535_v42 = vadd.f32 1.0, %v6730_v28  ;;  %v5947_v0 = vmul.f32 -1.442695, %v9967_v12  ;;  %v5948_v50 = vmul.f32 -1.442695, %v9972_v61  ;;  %v1785_v53 = vmul.f32 %v13094_v33, %v13095_v30  ;;  %v13104_v30 = vld [vmem:[#allocation124_spill] sm:$0xff] }
 0x263   : > { %v6732_v2 = vpop.eup %6731  ;;  %6747 = vrcp.f32 %v3534_v36  ;;  %v1320_v8 = vadd.f32 %v1064_v29, %v600_v62  ;;  %v1321_v22 = vadd.f32 %v1065_v59, %v601_v7  ;;  %v13098_v62 = vld [vmem:[#allocation52_spill] sm:$0xff] }
 0x264   : > { %v6734_v21 = vpop.eup %6733  ;;  %v4242_v10 = vmul.f32 %v6732_v2, %v9860_v45  ;;  %6749 = vrcp.f32 %v3535_v42  ;;  %v1784_v45 = vmul.f32 %v13094_v33, %v13093_v18  ;;  %v13096_v42 = vld [vmem:[#allocation51_spill] sm:$0xff] }
 0x265   : > { %v6736_v4 = vpop.eup %6735  ;;  %v4243_v52 = vmul.f32 %v6734_v21, %v9865_v44  ;;  %6751 = vpow2.f32 %v5947_v0  ;;  %v13097_v21 = vld [vmem:[#allocation61_spill] sm:$0xff]  ;;  %v13100_v0 = vld [vmem:[#allocation62_spill] sm:$0xff] }
 0x266   : > { %v6738_v28 = vpop.eup %6737  ;;  %v3386_v39 = vadd.f32 1.0, %v6736_v4  ;;  %6753 = vpow2.f32 %v5948_v50  ;;  %v2040_v44 = vadd.f32 %v1784_v45, %v1320_v8  ;;  %v690_v63 = vmul.f32 %v13097_v21, %v13096_v42  ;;  %v13102_v8 = vld [vmem:[#allocation102_spill] sm:$0xff]  ;;  %v13103_v42 = vld [vmem:[#allocation123_spill] sm:$0xff] }
 0x267   : > { %v4585_v36 = vadd.f32 %v4243_v52, %v4242_v10  ;;  %v3387_v2 = vadd.f32 1.0, %v6738_v28  ;;  %v6740_v37 = vpop.eup %6739  ;;  %v691_v4 = vmul.f32 %v13097_v21, %v13098_v62  ;;  %v2041_v10 = vadd.f32 %v1785_v53, %v1321_v22  ;;  %v13099_v52 = vld [vmem:[#allocation101_spill] sm:$0xff]  ;;  %v13101_v28 = vld [vmem:[#allocation135_spill] sm:$0xff] }
 0x268   : > { %6755 = vrcp.f32 %v3386_v39  ;;  %v6742_v29 = vpop.eup %6741  ;;  %v4092_v7 = vmul.f32 %v6740_v37, %v9877_v27  ;;  %v1154_v59 = vmul.f32 %v13100_v0, %v13099_v52  ;;  %v9995_v39 = vadd.f32 %v13101_v28, %v2040_v44  ;;  %v13105_v37 = vld [vmem:[#allocation91_spill] sm:$0xff] }
 0x269   : > { %4586 = vadd.xlane.f32.xlu0 %v4585_v36  ;;  %6757 = vrcp.f32 %v3387_v2  ;;  %v4093_v50 = vmul.f32 %v6742_v29, %v9881_v6  ;;  %v1155_v45 = vmul.f32 %v13100_v0, %v13102_v8  ;;  %v1874_v21 = vmul.f32 %v13104_v30, %v13103_v42 }
 0x26a   : > { %v10002_v36 = vadd.f32 %v13101_v28, %v2041_v10  ;;  %v1410_v27 = vadd.f32 %v1154_v59, %v690_v63  ;;  %v1875_v22 = vmul.f32 %v13104_v30, %v13105_v37  ;;  %v5917_v2 = vmul.f32 -1.442695, %v9995_v39  ;;  %v13106_v10 = vld [vmem:[#allocation41_spill] sm:$0xff]  ;;  %v13107_v63 = vld [vmem:[#allocation72_spill] sm:$0xff]  ;;  %v13115_v28 = vld [vmem:[#allocation50_spill] sm:$0xff] }
 0x26b   : > { %v4360_v53 = vadd.f32 %v4093_v50, %v4092_v7  ;;  %v1411_v6 = vadd.f32 %v1155_v45, %v691_v4  ;;  %v660_v59 = vmul.f32 %v13107_v63, %v13106_v10  ;;  %v13109_v4 = vld [vmem:[#allocation42_spill] sm:$0xff] }
 0x26c   : > { %v5918_v44 = vmul.f32 -1.442695, %v10002_v36  ;;  %v2130_v29 = vadd.f32 %v1874_v21, %v1410_v27  ;;  %6759 = vpow2.f32 %v5917_v2  ;;  %v661_v50 = vmul.f32 %v13107_v63, %v13109_v4  ;;  %v13113_v63 = vld [vmem:[#allocation49_spill] sm:$0xff] }
 0x26d   : > { %4361 = vadd.xlane.f32.xlu1 %v4360_v53  ;;  %v2131_v0 = vadd.f32 %v1875_v22, %v1411_v6  ;;  %v6744_v8 = vpop.eup %6743  ;;  %v13110_v22 = vld [vmem:[#allocation47_spill] sm:$0xff]  ;;  %v13111_v53 = vld [vmem:[#allocation64_spill] sm:$0xff] }
 0x26e   : > { %6761 = vpow2.f32 %v5918_v44  ;;  %v10009_v42 = vadd.f32 %v13072_v49, %v2130_v29  ;;  %v6746_v52 = vpop.eup %6745  ;;  %v3356_v30 = vadd.f32 1.0, %v6744_v8  ;;  %v1124_v2 = vmul.f32 %v13111_v53, %v13110_v22  ;;  %v13112_v6 = vld [vmem:[#allocation48_spill] sm:$0xff] }
 0x26f   : > { %v10014_v7 = vadd.f32 %v13072_v49, %v2131_v0  ;;  %v3357_v45 = vadd.f32 1.0, %v6746_v52  ;;  %v1125_v44 = vmul.f32 %v13111_v53, %v13112_v6  ;;  %v13114_v22 = vld [vmem:[#allocation76_spill] sm:$0xff] }
 0x270   : > { %v6748_v21 = vpop.eup %6747  ;;  %v6007_v27 = vmul.f32 -1.442695, %v10009_v42  ;;  %6763 = vrcp.f32 %v3356_v30  ;;  %v1380_v4 = vadd.f32 %v1124_v2, %v660_v59  ;;  %v1844_v18 = vmul.f32 %v13114_v22, %v13113_v63  ;;  %v13117_v2 = vld [vmem:[#allocation8_spill] sm:$0xff] }
 0x271   : > { %13108 = vst [vmem:[#allocation94_spill] sm:$0xff] %v10014_v7  ;;  %v6750_v29 = vpop.eup %6749  ;;  %v4302_v10 = vmul.f32 %v6748_v21, %v9912_v9  ;;  %v6008_v0 = vmul.f32 -1.442695, %v10014_v7  ;;  %6765 = vrcp.f32 %v3357_v45  ;;  %v1381_v52 = vadd.f32 %v1125_v44, %v661_v50  ;;  %v13116_v21 = vld [vmem:[#allocation85_spill] sm:$0xff] }
 0x272   : > { %v6752_v8 = vpop.eup %6751  ;;  %v4303_v49 = vmul.f32 %v6750_v29, %v9915_v17  ;;  %6767 = vpow2.f32 %v6007_v27  ;;  %v1845_v6 = vmul.f32 %v13114_v22, %v13115_v28  ;;  %v510_v7 = vmul.f32 %v13116_v21, %v13067_v54  ;;  %v13118_v29 = vld [vmem:[#allocation9_spill] sm:$0xff]  ;;  %v10052_v54 = vpop.permute.xlu0 %2263 }
 0x273   : > { %v6754_v37 = vpop.eup %6753  ;;  %v3446_v62 = vadd.f32 1.0, %v6752_v8  ;;  %6769 = vpow2.f32 %v6008_v0  ;;  %v2100_v50 = vadd.f32 %v1844_v18, %v1380_v4  ;;  %v511_v44 = vmul.f32 %v13116_v21, %v13117_v2  ;;  %v13123_v4 = vld [vmem:[#allocation144_spill] sm:$0xff]  ;;  %13125 = vst [vmem:[#allocation95_spill] sm:$0xff] %v10052_v54 }
 0x274   : > { %v4675_v9 = vadd.f32 %v4303_v49, %v4302_v10  ;;  %v3447_v30 = vadd.f32 1.0, %v6754_v37  ;;  %v2101_v45 = vadd.f32 %v1845_v6, %v1381_v52  ;;  %v13119_v49 = vld [vmem:[#allocation86_spill] sm:$0xff]  ;;  %v13120_v10 = vld [vmem:[#allocation147_spill] sm:$0xff] }
 0x275   : > { %v6756_v53 = vpop.eup %6755  ;;  %6771 = vrcp.f32 %v3446_v62  ;;  %v974_v37 = vmul.f32 %v13119_v49, %v13118_v29  ;;  %v10039_v0 = vadd.f32 %v13120_v10, %v2100_v50  ;;  %v13122_v62 = vld [vmem:[#allocation29_spill] sm:$0xff]  ;;  %v13124_v52 = vld [vmem:[#allocation30_spill] sm:$0xff] }
 0x276   : > { %v6758_v17 = vpop.eup %6757  ;;  %v4154_v59 = vmul.f32 %v6756_v53, %v9921_v58  ;;  %4676 = vadd.xlane.f32.xlu0 %v4675_v9  ;;  %6773 = vrcp.f32 %v3447_v30  ;;  %v10042_v8 = vadd.f32 %v13120_v10, %v2101_v45  ;;  %v13121_v58 = vld [vmem:[#allocation10_spill] sm:$0xff]  ;;  %v1694_v53 = vmul.f32 %v13123_v4, %v13122_v62 }
 0x277   : > { %v4155_v27 = vmul.f32 %v6758_v17, %v9924_v56  ;;  %v975_v18 = vmul.f32 %v13119_v49, %v13121_v58  ;;  %v1230_v6 = vadd.f32 %v974_v37, %v510_v7  ;;  %v1695_v9 = vmul.f32 %v13123_v4, %v13124_v52 }
 0x278   : > { %v5977_v30 = vmul.f32 -1.442695, %v10039_v0  ;;  %v5978_v17 = vmul.f32 -1.442695, %v10042_v8 }
 0x279   : > { %v4453_v56 = vadd.f32 %v4155_v27, %v4154_v59  ;;  %v1231_v50 = vadd.f32 %v975_v18, %v511_v44  ;;  %v6760_v29 = vpop.eup %6759  ;;  %v1950_v45 = vadd.f32 %v1694_v53, %v1230_v6  ;;  %v13126_v59 = vld [vmem:[#allocation118_spill] sm:$0xff]  ;;  %v13127_v53 = vld [vmem:[#allocation117_spill] sm:$0xff] }
 0x27a   : > { %v3416_v58 = vadd.f32 1.0, %v6760_v29  ;;  %6775 = vpow2.f32 %v5977_v30  ;;  %v720_v7 = vmul.f32 %v13126_v59, %v12970_v40  ;;  %v721_v44 = vmul.f32 %v13126_v59, %v9065_v26 }
 0x27b   : > { %4454 = vadd.xlane.f32.xlu1 %v4453_v56  ;;  %v6762_v2 = vpop.eup %6761  ;;  %v1951_v28 = vadd.f32 %v1695_v9, %v1231_v50  ;;  %6777 = vpow2.f32 %v5978_v17  ;;  %v10057_v37 = vadd.f32 %v10052_v54, %v1950_v45  ;;  %v1184_v29 = vmul.f32 %v13127_v53, %v9075_v24  ;;  %v13128_v9 = vld [vmem:[#allocation127_spill] sm:$0xff] }
 0x27c   : > { %v3417_v27 = vadd.f32 1.0, %v6762_v2  ;;  %6779 = vrcp.f32 %v3416_v58  ;;  %v1185_v2 = vmul.f32 %v13127_v53, %v9080_v48  ;;  %v1904_v30 = vmul.f32 %v13128_v9, %v13025_v32 }
 0x27d   : > { %v10062_v18 = vadd.f32 %v10052_v54, %v1951_v28  ;;  %v6764_v56 = vpop.eup %6763  ;;  %v5827_v6 = vmul.f32 -1.442695, %v10057_v37  ;;  %v1440_v28 = vadd.f32 %v1184_v29, %v720_v7  ;;  %v1905_v45 = vmul.f32 %v13128_v9, %v13027_v23 }
 0x27e   : > { %6781 = vrcp.f32 %v3417_v27  ;;  %v6766_v17 = vpop.eup %6765  ;;  %v4124_v50 = vmul.f32 %v6764_v56, %v9955_v51  ;;  %v1441_v24 = vadd.f32 %v1185_v2, %v721_v44  ;;  %v572_v53 = vmul.f32 %v13068_v55, %v13080_v43 }
 0x27f   : > { %v5828_v58 = vmul.f32 -1.442695, %v10062_v18  ;;  %v6768_v59 = vpop.eup %6767  ;;  %v4125_v27 = vmul.f32 %v6766_v17, %v9960_v1  ;;  %6783 = vpow2.f32 %v5827_v6  ;;  %v2160_v32 = vadd.f32 %v1904_v30, %v1440_v28  ;;  %v13129_v6 = vld [vmem:[#allocation122_spill] sm:$0xff] }
 0x280   : > { %v6770_v48 = vpop.eup %6769  ;;  %v3506_v26 = vadd.f32 1.0, %v6768_v59  ;;  %v573_v51 = vmul.f32 %v13068_v55, %v12923_v41  ;;  %v2161_v40 = vadd.f32 %v1905_v45, %v1441_v24  ;;  %v1036_v9 = vmul.f32 %v13071_v25, %v12975_v14 }
 0x281   : > { %6785 = vpow2.f32 %v5828_v58  ;;  %v4408_v7 = vadd.f32 %v4125_v27, %v4124_v50  ;;  %v3507_v29 = vadd.f32 1.0, %v6770_v48  ;;  %v10084_v2 = vadd.f32 %v13129_v6, %v2160_v32 }
 0x282   : > { %v6772_v56 = vpop.eup %6771  ;;  %6787 = vrcp.f32 %v3506_v26  ;;  %v1037_v30 = vmul.f32 %v13071_v25, %v12976_v11  ;;  %v10090_v48 = vadd.f32 %v13129_v6, %v2161_v40  ;;  %v1292_v24 = vadd.f32 %v1036_v9, %v572_v53 }
 0x283   : > { %v6774_v1 = vpop.eup %6773  ;;  %v4214_v44 = vmul.f32 %v6772_v56, %v9967_v12  ;;  %4409 = vadd.xlane.f32.xlu0 %v4408_v7  ;;  %6789 = vrcp.f32 %v3507_v29  ;;  %v6037_v50 = vmul.f32 -1.442695, %v10084_v2  ;;  %v1756_v26 = vmul.f32 %v9778_v60, %v12977_v31 }
 0x284   : > { %v4215_v17 = vmul.f32 %v6774_v1, %v9972_v61  ;;  %v1293_v58 = vadd.f32 %v1037_v30, %v573_v51  ;;  %v1757_v32 = vmul.f32 %v9778_v60, %v12978_v3  ;;  %v6038_v28 = vmul.f32 -1.442695, %v10090_v48 }
 0x285   : > { %6791 = vpow2.f32 %v6037_v50  ;;  %v2012_v45 = vadd.f32 %v1756_v26, %v1292_v24  ;;  %v542_v40 = vmul.f32 %v13116_v21, %v12979_v15  ;;  %v543_v27 = vmul.f32 %v13116_v21, %v12930_v57 }
 0x286   : > { %v4543_v12 = vadd.f32 %v4215_v17, %v4214_v44  ;;  %v2013_v61 = vadd.f32 %v1757_v32, %v1293_v58  ;;  %6793 = vpow2.f32 %v6038_v28  ;;  %v1006_v29 = vmul.f32 %v13119_v49, %v12931_v16 }
 0x287   : > { %v6776_v59 = vpop.eup %6775  ;;  %v10103_v56 = vadd.f32 %v9871_v35, %v2012_v45  ;;  %v1007_v44 = vmul.f32 %v13119_v49, %v12932_v13  ;;  %v1726_v6 = vmul.f32 %v13123_v4, %v12885_v19  ;;  %v1727_v28 = vmul.f32 %v13123_v4, %v12886_v34 }
 0x288   : > { %4544 = vadd.xlane.f32.xlu1 %v4543_v12  ;;  %v6778_v53 = vpop.eup %6777  ;;  %v3476_v51 = vadd.f32 1.0, %v6776_v59  ;;  %v10106_v7 = vadd.f32 %v9871_v35, %v2013_v61  ;;  %v1262_v26 = vadd.f32 %v1006_v29, %v542_v40  ;;  %v632_v45 = vmul.f32 %v13088_v46, %v12833_v38 }
 0x289   : > { %v6780_v9 = vpop.eup %6779  ;;  %v3477_v1 = vadd.f32 1.0, %v6778_v53  ;;  %v5889_v24 = vmul.f32 -1.442695, %v10103_v56  ;;  %v1263_v32 = vadd.f32 %v1007_v44, %v543_v27  ;;  %v1096_v40 = vmul.f32 %v13091_v47, %v12836_v5  ;;  %v13130_v27 = vld [vmem:[#allocation38_spill] sm:$0xff] }
 0x28a   : > { %v4184_v17 = vmul.f32 %v6780_v9, %v9995_v39  ;;  %6795 = vrcp.f32 %v3476_v51  ;;  %v5890_v50 = vmul.f32 -1.442695, %v10106_v7  ;;  %v633_v39 = vmul.f32 %v13088_v46, %v12835_v20 }
 0x28b   : > { %v6782_v30 = vpop.eup %6781  ;;  %6797 = vrcp.f32 %v3477_v1  ;;  %v1982_v51 = vadd.f32 %v1726_v6, %v1262_v26  ;;  %v1983_v9 = vadd.f32 %v1727_v28, %v1263_v32  ;;  %v1097_v29 = vmul.f32 %v13091_v47, %v13130_v27 }
 0x28c   : > { %v4185_v58 = vmul.f32 %v6782_v30, %v10002_v36  ;;  %v6784_v12 = vpop.eup %6783  ;;  %6799 = vpow2.f32 %v5889_v24  ;;  %v13131_v30 = vld [vmem:[#allocation45_spill] sm:$0xff]  ;;  %v13132_v24 = vld [vmem:[#allocation46_spill] sm:$0xff]  ;;  %v1352_v32 = vadd.f32 %v1096_v40, %v632_v45 }
 0x28d   : > { %v3326_v53 = vadd.f32 1.0, %v6784_v12  ;;  %6801 = vpow2.f32 %v5890_v50  ;;  %v10129_v44 = vadd.f32 %v10052_v54, %v1982_v51  ;;  %v1817_v6 = vmul.f32 %v13094_v33, %v13132_v24  ;;  %v13133_v12 = vld [vmem:[#allocation94_spill] sm:$0xff] }
 0x28e   : > { %v6786_v61 = vpop.eup %6785  ;;  %v4498_v59 = vadd.f32 %v4185_v58, %v4184_v17  ;;  %v1816_v17 = vmul.f32 %v13094_v33, %v13131_v30  ;;  %v10137_v26 = vadd.f32 %v10052_v54, %v1983_v9  ;;  %v10145_v9 = vpop.permute.xlu1 %2268 }
 0x28f   : > { %v3327_v36 = vadd.f32 1.0, %v6786_v61  ;;  %v6788_v1 = vpop.eup %6787  ;;  %6803 = vrcp.f32 %v3326_v53  ;;  %v5859_v61 = vmul.f32 -1.442695, %v10129_v44  ;;  %13135 = vst [vmem:[#allocation96_spill] sm:$0xff] %v10145_v9 }
 0x290   : > { %4499 = vadd.xlane.f32.xlu0 %v4498_v59  ;;  %v6790_v50 = vpop.eup %6789  ;;  %v4274_v58 = vmul.f32 %v6788_v1, %v10009_v42  ;;  %v1353_v59 = vadd.f32 %v1097_v29, %v633_v39  ;;  %v5860_v53 = vmul.f32 -1.442695, %v10137_v26  ;;  %v2072_v51 = vadd.f32 %v1816_v17, %v1352_v32  ;;  %v13134_v42 = vld [vmem:[#allocation135_spill] sm:$0xff]  ;;  %v13136_v29 = vld [vmem:[#allocation21_spill] sm:$0xff] }
 0x291   : > { %6805 = vrcp.f32 %v3327_v36  ;;  %v4275_v28 = vmul.f32 %v6790_v50, %v13133_v12  ;;  %v13137_v1 = vld [vmem:[#allocation79_spill] sm:$0xff]  ;;  %v13139_v32 = vld [vmem:[#allocation25_spill] sm:$0xff]  ;;  %v13140_v12 = vld [vmem:[#allocation80_spill] sm:$0xff] }
 0x292   : > { %v6792_v47 = vpop.eup %6791  ;;  %6807 = vpow2.f32 %v5859_v61  ;;  %v2073_v33 = vadd.f32 %v1817_v6, %v1353_v59  ;;  %v10143_v36 = vadd.f32 %v13134_v42, %v2072_v51  ;;  %v602_v17 = vmul.f32 %v13137_v1, %v13136_v29  ;;  %v13138_v6 = vld [vmem:[#allocation22_spill] sm:$0xff]  ;;  %v13142_v61 = vld [vmem:[#allocation39_spill] sm:$0xff]  ;;  %v13145_v29 = vld [vmem:[#allocation40_spill] sm:$0xff] }
 0x293   : > { %v4633_v46 = vadd.f32 %v4275_v28, %v4274_v58  ;;  %v6794_v35 = vpop.eup %6793  ;;  %v3536_v60 = vadd.f32 1.0, %v6792_v47  ;;  %6809 = vpow2.f32 %v5860_v53  ;;  %v603_v47 = vmul.f32 %v13137_v1, %v13138_v6  ;;  %v13143_v59 = vld [vmem:[#allocation138_spill] sm:$0xff] }
 0x294   : > { %v3537_v45 = vadd.f32 1.0, %v6794_v35  ;;  %v10148_v40 = vadd.f32 %v13134_v42, %v2073_v33  ;;  %v5949_v39 = vmul.f32 -1.442695, %v10143_v36  ;;  %v1786_v53 = vmul.f32 %v13143_v59, %v13142_v61  ;;  %v10163_v42 = vpop.xlane.xlu1 %4325 }
 0x295   : > { %4634 = vadd.xlane.f32.xlu1 %v4633_v46  ;;  %6811 = vrcp.f32 %v3536_v60  ;;  %v1066_v46 = vmul.f32 %v13140_v12, %v13139_v32  ;;  %v13141_v60 = vld [vmem:[#allocation26_spill] sm:$0xff]  ;;  %13144 = vst [vmem:[#allocation99_spill] sm:$0xff] %v10163_v42 }
 0x296   : > { %6813 = vrcp.f32 %v3537_v45  ;;  %v5950_v58 = vmul.f32 -1.442695, %v10148_v40  ;;  %v1067_v28 = vmul.f32 %v13140_v12, %v13141_v60  ;;  %v10170_v60 = vpop.permute.xlu0 %2273  ;;  %v13149_v12 = vld [vmem:[#allocation52_spill] sm:$0xff] }
 0x297   : > { %v6796_v50 = vpop.eup %6795  ;;  %6815 = vpow2.f32 %v5949_v39  ;;  %v1322_v25 = vadd.f32 %v1066_v46, %v602_v17  ;;  %v13146_v39 = vld [vmem:[#allocation51_spill] sm:$0xff]  ;;  %13148 = vst [vmem:[#allocation78_spill] sm:$0xff] %v10170_v60  ;;  %v13151_v46 = vld [vmem:[#allocation64_spill] sm:$0xff] }
 0x298   : > { %v6798_v35 = vpop.eup %6797  ;;  %v4244_v33 = vmul.f32 %v6796_v50, %v10039_v0  ;;  %6817 = vpow2.f32 %v5950_v58  ;;  %v1323_v32 = vadd.f32 %v1067_v28, %v603_v47  ;;  %v1787_v0 = vmul.f32 %v13143_v59, %v13145_v29  ;;  %v13147_v50 = vld [vmem:[#allocation72_spill] sm:$0xff]  ;;  %v13150_v58 = vld [vmem:[#allocation101_spill] sm:$0xff]  ;;  %v10178_v29 = vpop.xlane.xlu1 %4376 }
 0x299   : > { %v6800_v51 = vpop.eup %6799  ;;  %v4245_v45 = vmul.f32 %v6798_v35, %v10042_v8  ;;  %v692_v24 = vmul.f32 %v13147_v50, %v13146_v39  ;;  %v2042_v27 = vadd.f32 %v1786_v53, %v1322_v25  ;;  %v693_v42 = vmul.f32 %v13147_v50, %v13149_v12  ;;  %v13152_v35 = vld [vmem:[#allocation102_spill] sm:$0xff]  ;;  %13153 = vst [vmem:[#allocation100_spill] sm:$0xff] %v10178_v29  ;;  %v13154_v25 = vld [vmem:[#allocation139_spill] sm:$0xff]  ;;  %v13170_v12 = vld [vmem:[#allocation8_spill] sm:$0xff] }
 0x29a   : > { %v6802_v6 = vpop.eup %6801  ;;  %v3388_v55 = vadd.f32 1.0, %v6800_v51  ;;  %v2043_v17 = vadd.f32 %v1787_v0, %v1323_v32  ;;  %v1156_v47 = vmul.f32 %v13151_v46, %v13150_v58  ;;  %v1157_v28 = vmul.f32 %v13151_v46, %v13152_v35  ;;  %v13155_v53 = vld [vmem:[#allocation123_spill] sm:$0xff]  ;;  %v10190_v46 = vpop.xlane.xlu0 %4328 }
 0x29b   : > { %v4588_v30 = vadd.f32 %v4245_v45, %v4244_v33  ;;  %v3389_v61 = vadd.f32 1.0, %v6802_v6  ;;  %v10182_v6 = vadd.f32 %v13154_v25, %v2042_v27  ;;  %13156 = vst [vmem:[#allocation145_spill] sm:$0xff] %v10190_v46  ;;  %v13157_v50 = vld [vmem:[#allocation91_spill] sm:$0xff] }
 0x29c   : > { %v6804_v8 = vpop.eup %6803  ;;  %6819 = vrcp.f32 %v3388_v55  ;;  %v1876_v55 = vmul.f32 %v13114_v22, %v13155_v53  ;;  %v10188_v45 = vadd.f32 %v13154_v25, %v2043_v17  ;;  %v1412_v0 = vadd.f32 %v1156_v47, %v692_v24 }
 0x29d   : > { %4589 = vadd.xlane.f32.xlu0 %v4588_v30  ;;  %v4094_v33 = vmul.f32 %v6804_v8, %v10057_v37  ;;  %6821 = vrcp.f32 %v3389_v61  ;;  %v5919_v29 = vmul.f32 -1.442695, %v10182_v6  ;;  %v1413_v30 = vadd.f32 %v1157_v28, %v693_v42  ;;  %v10199_v42 = vpop.xlane.xlu1 %4379 }
 0x29e   : > { %v6806_v51 = vpop.eup %6805  ;;  %v1877_v37 = vmul.f32 %v13114_v22, %v13157_v50  ;;  %v5920_v8 = vmul.f32 -1.442695, %v10188_v45  ;;  %v2132_v60 = vadd.f32 %v1876_v55, %v1412_v0  ;;  %13158 = vst [vmem:[#allocation81_spill] sm:$0xff] %v10199_v42  ;;  %v13161_v0 = vld [vmem:[#allocation42_spill] sm:$0xff]  ;;  %v13165_v42 = vld [vmem:[#allocation48_spill] sm:$0xff]  ;;  %v13168_v50 = vld [vmem:[#allocation7_spill] sm:$0xff] }
 0x29f   : > { %v4095_v32 = vmul.f32 %v6806_v51, %v10062_v18  ;;  %v6808_v61 = vpop.eup %6807  ;;  %6823 = vpow2.f32 %v5919_v29  ;;  %v13159_v51 = vld [vmem:[#allocation41_spill] sm:$0xff]  ;;  %v13167_v22 = vld [vmem:[#allocation50_spill] sm:$0xff] }
 0x2a0   : > { %v6810_v53 = vpop.eup %6809  ;;  %v3358_v35 = vadd.f32 1.0, %v6808_v61  ;;  %v2133_v18 = vadd.f32 %v1877_v37, %v1413_v30  ;;  %6825 = vpow2.f32 %v5920_v8  ;;  %v10197_v24 = vadd.f32 %v13120_v10, %v2132_v60  ;;  %v10210_v37 = vpop.xlane.xlu0 %4373  ;;  %v13164_v8 = vld [vmem:[#allocation68_spill] sm:$0xff] }
 0x2a1   : > { %v4363_v27 = vadd.f32 %v4095_v32, %v4094_v33  ;;  %v3359_v17 = vadd.f32 1.0, %v6810_v53  ;;  %v13160_v33 = vld [vmem:[#allocation67_spill] sm:$0xff]  ;;  %13162 = vst [vmem:[#allocation11_spill] sm:$0xff] %v10210_v37  ;;  %v1127_v46 = vmul.f32 %v13164_v8, %v13165_v42 }
 0x2a2   : > { %v6812_v47 = vpop.eup %6811  ;;  %6827 = vrcp.f32 %v3358_v35  ;;  %v10202_v28 = vadd.f32 %v13120_v10, %v2133_v18  ;;  %v662_v55 = vmul.f32 %v13160_v33, %v13159_v51  ;;  %v6009_v53 = vmul.f32 -1.442695, %v10197_v24 }
 0x2a3   : > { %4364 = vadd.xlane.f32.xlu1 %v4363_v27  ;;  %v6814_v32 = vpop.eup %6813  ;;  %v4304_v29 = vmul.f32 %v6812_v47, %v10084_v2  ;;  %6829 = vrcp.f32 %v3359_v17  ;;  %v663_v60 = vmul.f32 %v13160_v33, %v13161_v0  ;;  %v13163_v27 = vld [vmem:[#allocation47_spill] sm:$0xff]  ;;  %v13166_v47 = vld [vmem:[#allocation73_spill] sm:$0xff] }
 0x2a4   : > { %v6816_v30 = vpop.eup %6815  ;;  %v4305_v35 = vmul.f32 %v6814_v32, %v10090_v48  ;;  %v6010_v61 = vmul.f32 -1.442695, %v10202_v28  ;;  %v1126_v18 = vmul.f32 %v13164_v8, %v13163_v27  ;;  %6831 = vpow2.f32 %v6009_v53  ;;  %v13169_v27 = vld [vmem:[#allocation132_spill] sm:$0xff]  ;;  %v10226_v53 = vpop.xlane.xlu1 %4424  ;;  %v13172_v8 = vld [vmem:[#allocation9_spill] sm:$0xff] }
 0x2a5   : > { %v6818_v2 = vpop.eup %6817  ;;  %v3448_v17 = vadd.f32 1.0, %v6816_v30  ;;  %v1846_v10 = vmul.f32 %v13166_v47, %v13113_v63  ;;  %v1847_v0 = vmul.f32 %v13166_v47, %v13167_v22  ;;  %v1383_v32 = vadd.f32 %v1127_v46, %v663_v60  ;;  %13171 = vst [vmem:[#allocation12_spill] sm:$0xff] %v10226_v53  ;;  %v13173_v22 = vld [vmem:[#allocation119_spill] sm:$0xff]  ;;  %v10237_v53 = vpop.xlane.xlu0 %4331 }
 0x2a6   : > { %v4678_v37 = vadd.f32 %v4305_v35, %v4304_v29  ;;  %v3449_v51 = vadd.f32 1.0, %v6818_v2  ;;  %6833 = vpow2.f32 %v6010_v61  ;;  %v1382_v48 = vadd.f32 %v1126_v18, %v662_v55  ;;  %v13174_v35 = vld [vmem:[#allocation10_spill] sm:$0xff]  ;;  %v13175_v18 = vld [vmem:[#allocation141_spill] sm:$0xff]  ;;  %13176 = vst [vmem:[#allocation82_spill] sm:$0xff] %v10237_v53 }
 0x2a7   : > { %6835 = vrcp.f32 %v3448_v17  ;;  %v512_v58 = vmul.f32 %v13169_v27, %v13168_v50  ;;  %v513_v42 = vmul.f32 %v13169_v27, %v13170_v12  ;;  %v976_v29 = vmul.f32 %v13173_v22, %v13172_v8 }
 0x2a8   : > { %4679 = vadd.xlane.f32.xlu0 %v4678_v37  ;;  %6837 = vrcp.f32 %v3449_v51  ;;  %v2102_v63 = vadd.f32 %v1846_v10, %v1382_v48  ;;  %v977_v55 = vmul.f32 %v13173_v22, %v13174_v35  ;;  %v2103_v60 = vadd.f32 %v1847_v0, %v1383_v32  ;;  %v13177_v51 = vld [vmem:[#allocation133_spill] sm:$0xff]  ;;  %v10248_v53 = vpop.xlane.xlu1 %4382 }
 0x2a9   : > { %v6820_v30 = vpop.eup %6819  ;;  %v1696_v2 = vmul.f32 %v13175_v18, %v13122_v62  ;;  %v1697_v17 = vmul.f32 %v13175_v18, %v13124_v52  ;;  %v1232_v48 = vadd.f32 %v976_v29, %v512_v58  ;;  %13178 = vst [vmem:[#allocation149_spill] sm:$0xff] %v10248_v53  ;;  %v13186_v53 = vld [vmem:[#allocation75_spill] sm:$0xff] }
 0x2aa   : > { %v6822_v61 = vpop.eup %6821  ;;  %v4156_v46 = vmul.f32 %v6820_v30, %v10103_v56  ;;  %v10241_v37 = vadd.f32 %v13177_v51, %v2102_v63  ;;  %v1233_v8 = vadd.f32 %v977_v55, %v513_v42  ;;  %v10244_v35 = vadd.f32 %v13177_v51, %v2103_v60  ;;  %v13179_v55 = vld [vmem:[#allocation129_spill] sm:$0xff] }
 0x2ab   : > { %v4157_v10 = vmul.f32 %v6822_v61, %v10106_v7  ;;  %v1952_v32 = vadd.f32 %v1696_v2, %v1232_v48 }
 0x2ac   : > { %v5979_v0 = vmul.f32 -1.442695, %v10241_v37  ;;  %v1953_v30 = vadd.f32 %v1697_v17, %v1233_v8  ;;  %v6824_v62 = vpop.eup %6823  ;;  %v5980_v52 = vmul.f32 -1.442695, %v10244_v35  ;;  %v13180_v8 = vld [vmem:[#allocation61_spill] sm:$0xff]  ;;  %v10260_v17 = vpop.xlane.xlu0 %4421 }
 0x2ad   : > { %v4456_v56 = vadd.f32 %v4157_v10, %v4156_v46  ;;  %v6826_v12 = vpop.eup %6825  ;;  %v3418_v7 = vadd.f32 1.0, %v6824_v62  ;;  %v10251_v63 = vadd.f32 %v10145_v9, %v1952_v32  ;;  %v722_v61 = vmul.f32 %v13180_v8, %v13179_v55  ;;  %v13181_v46 = vld [vmem:[#allocation130_spill] sm:$0xff]  ;;  %13182 = vst [vmem:[#allocation150_spill] sm:$0xff] %v10260_v17  ;;  %v13187_v17 = vld [vmem:[#allocation124_spill] sm:$0xff]  ;;  %v10276_v55 = vpop.xlane.xlu1 %4469 }
 0x2ae   : > { %6839 = vpow2.f32 %v5979_v0  ;;  %v10254_v58 = vadd.f32 %v10145_v9, %v1953_v30  ;;  %v3419_v29 = vadd.f32 1.0, %v6826_v12  ;;  %v723_v60 = vmul.f32 %v13180_v8, %v13181_v46  ;;  %v13184_v12 = vld [vmem:[#allocation62_spill] sm:$0xff]  ;;  %13188 = vst [vmem:[#allocation87_spill] sm:$0xff] %v10276_v55 }
 0x2af   : > { %4457 = vadd.xlane.f32.xlu1 %v4456_v56  ;;  %v6828_v42 = vpop.eup %6827  ;;  %6841 = vpow2.f32 %v5980_v52  ;;  %v5829_v10 = vmul.f32 -1.442695, %v10251_v63  ;;  %v13183_v52 = vld [vmem:[#allocation69_spill] sm:$0xff]  ;;  %v13185_v32 = vld [vmem:[#allocation70_spill] sm:$0xff]  ;;  %v1906_v46 = vmul.f32 %v13187_v17, %v13186_v53  ;;  %v1038_v53 = vmul.f32 %v13119_v49, %v12975_v14 }
 0x2b0   : > { %v6830_v2 = vpop.eup %6829  ;;  %v4126_v62 = vmul.f32 %v6828_v42, %v10129_v44  ;;  %6843 = vrcp.f32 %v3418_v7  ;;  %v5830_v48 = vmul.f32 -1.442695, %v10254_v58  ;;  %v1186_v0 = vmul.f32 %v13184_v12, %v13183_v52 }
 0x2b1   : > { %v4127_v56 = vmul.f32 %v6830_v2, %v10137_v26  ;;  %6845 = vrcp.f32 %v3419_v29  ;;  %v1187_v30 = vmul.f32 %v13184_v12, %v13185_v32  ;;  %v6832_v8 = vpop.eup %6831  ;;  %v1907_v44 = vmul.f32 %v13187_v17, %v13027_v23 }
 0x2b2   : > { %6847 = vpow2.f32 %v5829_v10  ;;  %v574_v7 = vmul.f32 %v13116_v21, %v13080_v43  ;;  %v3508_v29 = vadd.f32 1.0, %v6832_v8  ;;  %v1442_v2 = vadd.f32 %v1186_v0, %v722_v61 }
 0x2b3   : > { %v6834_v42 = vpop.eup %6833  ;;  %v4411_v26 = vadd.f32 %v4127_v56, %v4126_v62  ;;  %6849 = vpow2.f32 %v5830_v48  ;;  %v1443_v32 = vadd.f32 %v1187_v30, %v723_v60  ;;  %v575_v10 = vmul.f32 %v13116_v21, %v12923_v41  ;;  %v10285_v48 = vpop.xlane.xlu0 %4334  ;;  %v13190_v30 = vld [vmem:[#allocation92_spill] sm:$0xff] }
 0x2b4   : > { %v6836_v52 = vpop.eup %6835  ;;  %v3509_v12 = vadd.f32 1.0, %v6834_v42  ;;  %6851 = vrcp.f32 %v3508_v29  ;;  %v2162_v62 = vadd.f32 %v1906_v46, %v1442_v2  ;;  %v1039_v61 = vmul.f32 %v13119_v49, %v12976_v11  ;;  %13189 = vst [vmem:[#allocation116_spill] sm:$0xff] %v10285_v48 }
 0x2b5   : > { %v6838_v17 = vpop.eup %6837  ;;  %4412 = vadd.xlane.f32.xlu0 %v4411_v26  ;;  %v4216_v43 = vmul.f32 %v6836_v52, %v10143_v36  ;;  %v2163_v60 = vadd.f32 %v1907_v44, %v1443_v32  ;;  %v1294_v0 = vadd.f32 %v1038_v53, %v574_v7  ;;  %v1758_v26 = vmul.f32 %v13123_v4, %v12977_v31  ;;  %v10301_v32 = vpop.xlane.xlu1 %4337 }
 0x2b6   : > { %v4217_v56 = vmul.f32 %v6838_v17, %v10148_v40  ;;  %6853 = vrcp.f32 %v3509_v12  ;;  %v10289_v8 = vadd.f32 %v13190_v30, %v2162_v62  ;;  %v1295_v42 = vadd.f32 %v1039_v61, %v575_v10  ;;  %13191 = vst [vmem:[#allocation88_spill] sm:$0xff] %v10301_v32 }
 0x2b7   : > { %v1759_v36 = vmul.f32 %v13123_v4, %v12978_v3  ;;  %v10296_v52 = vadd.f32 %v13190_v30, %v2163_v60  ;;  %v2014_v40 = vadd.f32 %v1758_v26, %v1294_v0  ;;  %v544_v53 = vmul.f32 %v13169_v27, %v12979_v15  ;;  %v10314_v61 = vpop.xlane.xlu0 %4427 }
 0x2b8   : > { %v4546_v46 = vadd.f32 %v4217_v56, %v4216_v43  ;;  %v6039_v29 = vmul.f32 -1.442695, %v10289_v8  ;;  %v545_v7 = vmul.f32 %v13169_v27, %v12930_v57  ;;  %v1008_v17 = vmul.f32 %v13173_v22, %v12931_v16  ;;  %13192 = vst [vmem:[#allocation83_spill] sm:$0xff] %v10314_v61  ;;  %v13195_v61 = vld [vmem:[#allocation80_spill] sm:$0xff] }
 0x2b9   : > { %v2015_v2 = vadd.f32 %v1759_v36, %v1295_v42  ;;  %v6040_v44 = vmul.f32 -1.442695, %v10296_v52  ;;  %v10307_v43 = vadd.f32 %v10052_v54, %v2014_v40  ;;  %v1009_v60 = vmul.f32 %v13173_v22, %v12932_v13 }
 0x2ba   : > { %4547 = vadd.xlane.f32.xlu1 %v4546_v46  ;;  %6855 = vpow2.f32 %v6039_v29  ;;  %v1264_v36 = vadd.f32 %v1008_v17, %v544_v53  ;;  %v634_v55 = vmul.f32 %v13137_v1, %v12833_v38  ;;  %v10328_v53 = vpop.xlane.xlu1 %4430 }
 0x2bb   : > { %v6840_v12 = vpop.eup %6839  ;;  %v10310_v10 = vadd.f32 %v10052_v54, %v2015_v2  ;;  %6857 = vpow2.f32 %v6040_v44  ;;  %v5891_v42 = vmul.f32 -1.442695, %v10307_v43  ;;  %v1265_v40 = vadd.f32 %v1009_v60, %v545_v7  ;;  %13193 = vst [vmem:[#allocation140_spill] sm:$0xff] %v10328_v53  ;;  %v13208_v54 = vld [vmem:[#allocation142_spill] sm:$0xff] }
 0x2bc   : > { %v6842_v62 = vpop.eup %6841  ;;  %v3478_v56 = vadd.f32 1.0, %v6840_v12  ;;  %v1728_v2 = vmul.f32 %v13175_v18, %v12885_v19  ;;  %v635_v7 = vmul.f32 %v13137_v1, %v12835_v20  ;;  %v1098_v53 = vmul.f32 %v13195_v61, %v12836_v5  ;;  %v13207_v1 = vld [vmem:[#allocation39_spill] sm:$0xff] }
 0x2bd   : > { %v6844_v0 = vpop.eup %6843  ;;  %v3479_v30 = vadd.f32 1.0, %v6842_v62  ;;  %v5892_v26 = vmul.f32 -1.442695, %v10310_v10  ;;  %v1729_v62 = vmul.f32 %v13175_v18, %v12886_v34 }
 0x2be   : > { %v6846_v46 = vpop.eup %6845  ;;  %v4186_v29 = vmul.f32 %v6844_v0, %v10182_v6  ;;  %6859 = vrcp.f32 %v3478_v56  ;;  %v1984_v6 = vadd.f32 %v1728_v2, %v1264_v36  ;;  %v10352_v48 = vpop.xlane.xlu1 %4517 }
 0x2bf   : > { %v6848_v12 = vpop.eup %6847  ;;  %v4187_v44 = vmul.f32 %v6846_v46, %v10188_v45  ;;  %6861 = vrcp.f32 %v3479_v30  ;;  %v1985_v45 = vadd.f32 %v1729_v62, %v1265_v40  ;;  %v10332_v30 = vpop.xlane.xlu0 %4472  ;;  %v1354_v62 = vadd.f32 %v1098_v53, %v634_v55  ;;  %13199 = vst [vmem:[#allocation103_spill] sm:$0xff] %v10352_v48  ;;  %v13201_v55 = vld [vmem:[#allocation21_spill] sm:$0xff]  ;;  %v13202_v53 = vld [vmem:[#allocation126_spill] sm:$0xff] }
 0x2c0   : > { %v6850_v32 = vpop.eup %6849  ;;  %v3328_v17 = vadd.f32 1.0, %v6848_v12  ;;  %6863 = vpow2.f32 %v5891_v42  ;;  %13194 = vst [vmem:[#allocation84_spill] sm:$0xff] %v10332_v30  ;;  %v10335_v46 = vadd.f32 %v10145_v9, %v1984_v6  ;;  %v13196_v12 = vld [vmem:[#allocation38_spill] sm:$0xff] }
 0x2c1   : > { %v4501_v56 = vadd.f32 %v4187_v44, %v4186_v29  ;;  %v3329_v60 = vadd.f32 1.0, %v6850_v32  ;;  %6865 = vpow2.f32 %v5892_v26  ;;  %v6852_v0 = vpop.eup %6851  ;;  %v1099_v42 = vmul.f32 %v13195_v61, %v13196_v12  ;;  %v13197_v26 = vld [vmem:[#allocation45_spill] sm:$0xff]  ;;  %v13198_v30 = vld [vmem:[#allocation46_spill] sm:$0xff] }
 0x2c2   : > { %6867 = vrcp.f32 %v3328_v17  ;;  %v4276_v29 = vmul.f32 %v6852_v0, %v10197_v24  ;;  %v10343_v32 = vadd.f32 %v10145_v9, %v1985_v45  ;;  %v1818_v40 = vmul.f32 %v13143_v59, %v13197_v26 }
 0x2c3   : > { %v6854_v36 = vpop.eup %6853  ;;  %4502 = vadd.xlane.f32.xlu0 %v4501_v56  ;;  %6869 = vrcp.f32 %v3329_v60  ;;  %v5861_v44 = vmul.f32 -1.442695, %v10335_v46  ;;  %v1355_v6 = vadd.f32 %v1099_v42, %v635_v7  ;;  %v1819_v56 = vmul.f32 %v13143_v59, %v13198_v30  ;;  %v10354_v61 = vpop.xlane.xlu0 %4385  ;;  %v13203_v42 = vld [vmem:[#allocation22_spill] sm:$0xff] }
 0x2c4   : > { %v4277_v2 = vmul.f32 %v6854_v36, %v10202_v28  ;;  %v5862_v17 = vmul.f32 -1.442695, %v10343_v32  ;;  %v2074_v60 = vadd.f32 %v1818_v40, %v1354_v62  ;;  %13200 = vst [vmem:[#allocation104_spill] sm:$0xff] %v10354_v61  ;;  %v604_v7 = vmul.f32 %v13202_v53, %v13201_v55  ;;  %v13204_v40 = vld [vmem:[#allocation25_spill] sm:$0xff] }
 0x2c5   : > { %6871 = vpow2.f32 %v5861_v44  ;;  %v2075_v45 = vadd.f32 %v1819_v56, %v1355_v6  ;;  %v605_v36 = vmul.f32 %v13202_v53, %v13203_v42  ;;  %v13206_v6 = vld [vmem:[#allocation26_spill] sm:$0xff] }
 0x2c6   : > { %v4636_v24 = vadd.f32 %v4277_v2, %v4276_v29  ;;  %6873 = vpow2.f32 %v5862_v17  ;;  %v10357_v28 = vadd.f32 %v13154_v25, %v2074_v60  ;;  %v13205_v2 = vld [vmem:[#allocation71_spill] sm:$0xff] }
 0x2c7   : > { %v6856_v0 = vpop.eup %6855  ;;  %v10364_v29 = vadd.f32 %v13154_v25, %v2075_v45  ;;  %v1068_v44 = vmul.f32 %v13205_v2, %v13204_v40  ;;  %v1069_v56 = vmul.f32 %v13205_v2, %v13206_v6  ;;  %v10374_v45 = vpop.xlane.xlu1 %4340  ;;  %v13210_v6 = vld [vmem:[#allocation40_spill] sm:$0xff] }
 0x2c8   : > { %4637 = vadd.xlane.f32.xlu1 %v4636_v24  ;;  %v6858_v59 = vpop.eup %6857  ;;  %v3538_v48 = vadd.f32 1.0, %v6856_v0  ;;  %v5951_v17 = vmul.f32 -1.442695, %v10357_v28  ;;  %v1788_v0 = vmul.f32 %v13208_v54, %v13207_v1  ;;  %13209 = vst [vmem:[#allocation125_spill] sm:$0xff] %v10374_v45  ;;  %v694_v45 = vmul.f32 %v13160_v33, %v13146_v39  ;;  %v13212_v1 = vld [vmem:[#allocation52_spill] sm:$0xff] }
 0x2c9   : > { %v3539_v62 = vadd.f32 1.0, %v6858_v59  ;;  %v5952_v60 = vmul.f32 -1.442695, %v10364_v29  ;;  %v1324_v61 = vadd.f32 %v1068_v44, %v604_v7  ;;  %v1325_v59 = vadd.f32 %v1069_v56, %v605_v36  ;;  %v10380_v7 = vpop.xlane.xlu0 %4475 }
 0x2ca   : > { %6875 = vrcp.f32 %v3538_v48  ;;  %v1789_v48 = vmul.f32 %v13208_v54, %v13210_v6  ;;  %13211 = vst [vmem:[#allocation56_spill] sm:$0xff] %v10380_v7  ;;  %v13216_v7 = vld [vmem:[#allocation102_spill] sm:$0xff] }
 0x2cb   : > { %v6860_v24 = vpop.eup %6859  ;;  %6877 = vrcp.f32 %v3539_v62  ;;  %v2044_v42 = vadd.f32 %v1788_v0, %v1324_v61  ;;  %v13214_v0 = vld [vmem:[#allocation101_spill] sm:$0xff]  ;;  %v13235_v6 = vld [vmem:[#allocation98_spill] sm:$0xff] }
 0x2cc   : > { %v6862_v4 = vpop.eup %6861  ;;  %v4246_v25 = vmul.f32 %v6860_v24, %v10241_v37  ;;  %6879 = vpow2.f32 %v5951_v17  ;;  %v695_v37 = vmul.f32 %v13160_v33, %v13212_v1  ;;  %v13232_v1 = vld [vmem:[#allocation97_spill] sm:$0xff] }
 0x2cd   : > { %v6864_v49 = vpop.eup %6863  ;;  %v4247_v40 = vmul.f32 %v6862_v4, %v10244_v35  ;;  %6881 = vpow2.f32 %v5952_v60  ;;  %v2045_v4 = vadd.f32 %v1789_v48, %v1325_v59  ;;  %v13213_v35 = vld [vmem:[#allocation77_spill] sm:$0xff]  ;;  %v13218_v59 = vld [vmem:[#allocation123_spill] sm:$0xff] }
 0x2ce   : > { %v6866_v21 = vpop.eup %6865  ;;  %v3390_v44 = vadd.f32 1.0, %v6864_v49  ;;  %v10387_v17 = vadd.f32 %v13213_v35, %v2044_v42  ;;  %v13215_v49 = vld [vmem:[#allocation68_spill] sm:$0xff]  ;;  %v10399_v42 = vpop.xlane.xlu1 %4433  ;;  %v1878_v48 = vmul.f32 %v13166_v47, %v13218_v59 }
 0x2cf   : > { %v6868_v36 = vpop.eup %6867  ;;  %v4591_v62 = vadd.f32 %v4247_v40, %v4246_v25  ;;  %v3391_v56 = vadd.f32 1.0, %v6866_v21  ;;  %v1158_v60 = vmul.f32 %v13215_v49, %v13214_v0  ;;  %v1159_v39 = vmul.f32 %v13215_v49, %v13216_v7  ;;  %13217 = vst [vmem:[#allocation109_spill] sm:$0xff] %v10399_v42 }
 0x2d0   : > { %v6870_v24 = vpop.eup %6869  ;;  %v4096_v61 = vmul.f32 %v6868_v36, %v10251_v63  ;;  %6883 = vrcp.f32 %v3390_v44  ;;  %v10396_v21 = vadd.f32 %v13213_v35, %v2045_v4  ;;  %v5921_v25 = vmul.f32 -1.442695, %v10387_v17  ;;  %v13219_v44 = vld [vmem:[#allocation91_spill] sm:$0xff]  ;;  %v10406_v4 = vpop.xlane.xlu0 %4520 }
 0x2d1   : > { %4592 = vadd.xlane.f32.xlu0 %v4591_v62  ;;  %v4097_v33 = vmul.f32 %v6870_v24, %v10254_v58  ;;  %6885 = vrcp.f32 %v3391_v56  ;;  %v1414_v40 = vadd.f32 %v1158_v60, %v694_v45  ;;  %v1415_v63 = vadd.f32 %v1159_v39, %v695_v37  ;;  %13220 = vst [vmem:[#allocation55_spill] sm:$0xff] %v10406_v4  ;;  %v13221_v39 = vld [vmem:[#allocation41_spill] sm:$0xff]  ;;  %v13222_v37 = vld [vmem:[#allocation120_spill] sm:$0xff] }
 0x2d2   : > { %v1879_v36 = vmul.f32 %v13166_v47, %v13219_v44  ;;  %v6872_v49 = vpop.eup %6871  ;;  %6887 = vpow2.f32 %v5921_v25  ;;  %v5922_v58 = vmul.f32 -1.442695, %v10396_v21  ;;  %v664_v60 = vmul.f32 %v13222_v37, %v13221_v39  ;;  %v13228_v4 = vld [vmem:[#allocation49_spill] sm:$0xff] }
 0x2d3   : > { %v4366_v62 = vadd.f32 %v4097_v33, %v4096_v61  ;;  %v6874_v56 = vpop.eup %6873  ;;  %v3360_v24 = vadd.f32 1.0, %v6872_v49  ;;  %v2134_v7 = vadd.f32 %v1878_v48, %v1414_v40  ;;  %v13223_v61 = vld [vmem:[#allocation42_spill] sm:$0xff]  ;;  %v13224_v49 = vld [vmem:[#allocation47_spill] sm:$0xff] }
 0x2d4   : > { %v2135_v0 = vadd.f32 %v1879_v36, %v1415_v63  ;;  %v3361_v45 = vadd.f32 1.0, %v6874_v56  ;;  %6889 = vpow2.f32 %v5922_v58  ;;  %v665_v25 = vmul.f32 %v13222_v37, %v13223_v61  ;;  %v13225_v40 = vld [vmem:[#allocation66_spill] sm:$0xff]  ;;  %v10420_v36 = vpop.xlane.xlu1 %4523  ;;  %v13227_v56 = vld [vmem:[#allocation48_spill] sm:$0xff]  ;;  %v10431_v44 = vpop.xlane.xlu0 %4388 }
 0x2d5   : > { %4367 = vadd.xlane.f32.xlu1 %v4366_v62  ;;  %6891 = vrcp.f32 %v3360_v24  ;;  %v10411_v42 = vadd.f32 %v13177_v51, %v2134_v7  ;;  %v1128_v63 = vmul.f32 %v13225_v40, %v13224_v49  ;;  %13226 = vst [vmem:[#allocation110_spill] sm:$0xff] %v10420_v36  ;;  %v1129_v7 = vmul.f32 %v13225_v40, %v13227_v56  ;;  %v13230_v61 = vld [vmem:[#allocation50_spill] sm:$0xff] }
 0x2d6   : > { %v10414_v33 = vadd.f32 %v13177_v51, %v2135_v0  ;;  %6893 = vrcp.f32 %v3361_v45  ;;  %v13229_v51 = vld [vmem:[#allocation134_spill] sm:$0xff]  ;;  %13231 = vst [vmem:[#allocation111_spill] sm:$0xff] %v10431_v44  ;;  %v514_v56 = vmul.f32 %v13232_v1, %v13168_v50 }
 0x2d7   : > { %v6876_v48 = vpop.eup %6875  ;;  %v6011_v62 = vmul.f32 -1.442695, %v10411_v42  ;;  %v1384_v45 = vadd.f32 %v1128_v63, %v664_v60  ;;  %v1848_v47 = vmul.f32 %v13229_v51, %v13228_v4  ;;  %v1849_v49 = vmul.f32 %v13229_v51, %v13230_v61  ;;  %v13233_v60 = vld [vmem:[#allocation8_spill] sm:$0xff]  ;;  %v13234_v51 = vld [vmem:[#allocation9_spill] sm:$0xff] }
 0x2d8   : > { %v6012_v58 = vmul.f32 -1.442695, %v10414_v33  ;;  %v6878_v24 = vpop.eup %6877  ;;  %v4306_v0 = vmul.f32 %v6876_v48, %v10289_v8  ;;  %v1385_v59 = vadd.f32 %v1129_v7, %v665_v25  ;;  %v515_v63 = vmul.f32 %v13232_v1, %v13233_v60  ;;  %v10457_v60 = vpop.xlane.xlu0 %4478 }
 0x2d9   : > { %v6880_v39 = vpop.eup %6879  ;;  %v4307_v36 = vmul.f32 %v6878_v24, %v10296_v52  ;;  %6895 = vpow2.f32 %v6011_v62  ;;  %v2104_v8 = vadd.f32 %v1848_v47, %v1384_v45  ;;  %v978_v44 = vmul.f32 %v13235_v6, %v13234_v51  ;;  %v13236_v52 = vld [vmem:[#allocation135_spill] sm:$0xff]  ;;  %v13237_v62 = vld [vmem:[#allocation10_spill] sm:$0xff]  ;;  %13242 = vst [vmem:[#allocation105_spill] sm:$0xff] %v10457_v60 }
 0x2da   : > { %v6882_v40 = vpop.eup %6881  ;;  %v3450_v37 = vadd.f32 1.0, %v6880_v39  ;;  %6897 = vpow2.f32 %v6012_v58  ;;  %v2105_v61 = vadd.f32 %v1849_v49, %v1385_v59  ;;  %v979_v50 = vmul.f32 %v13235_v6, %v13237_v62  ;;  %v13238_v39 = vld [vmem:[#allocation29_spill] sm:$0xff] }
 0x2db   : > { %v4681_v48 = vadd.f32 %v4307_v36, %v4306_v0  ;;  %v3451_v4 = vadd.f32 1.0, %v6882_v40  ;;  %v10441_v25 = vadd.f32 %v13236_v52, %v2104_v8  ;;  %v13239_v58 = vld [vmem:[#allocation93_spill] sm:$0xff]  ;;  %v10448_v40 = vpop.xlane.xlu1 %4568  ;;  %v1234_v59 = vadd.f32 %v978_v44, %v514_v56  ;;  %v13241_v0 = vld [vmem:[#allocation30_spill] sm:$0xff] }
 0x2dc   : > { %6899 = vrcp.f32 %v3450_v37  ;;  %v1698_v47 = vmul.f32 %v13239_v58, %v13238_v39  ;;  %13240 = vst [vmem:[#allocation112_spill] sm:$0xff] %v10448_v40  ;;  %v10451_v51 = vadd.f32 %v13236_v52, %v2105_v61  ;;  %v1235_v24 = vadd.f32 %v979_v50, %v515_v63  ;;  %v13243_v44 = vld [vmem:[#allocation78_spill] sm:$0xff] }
 0x2dd   : > { %v6884_v55 = vpop.eup %6883  ;;  %4682 = vadd.xlane.f32.xlu0 %v4681_v48  ;;  %6901 = vrcp.f32 %v3451_v4  ;;  %v5981_v49 = vmul.f32 -1.442695, %v10441_v25  ;;  %v1699_v45 = vmul.f32 %v13239_v58, %v13241_v0 }
 0x2de   : > { %v6886_v7 = vpop.eup %6885  ;;  %v4158_v36 = vmul.f32 %v6884_v55, %v10307_v43  ;;  %v5982_v43 = vmul.f32 -1.442695, %v10451_v51  ;;  %v1954_v55 = vadd.f32 %v1698_v47, %v1234_v59  ;;  %v13245_v59 = vld [vmem:[#allocation129_spill] sm:$0xff] }
 0x2df   : > { %v4159_v37 = vmul.f32 %v6886_v7, %v10310_v10  ;;  %v6888_v8 = vpop.eup %6887  ;;  %6903 = vpow2.f32 %v5981_v49  ;;  %v1955_v61 = vadd.f32 %v1699_v45, %v1235_v24  ;;  %v10467_v47 = vpop.xlane.xlu1 %4391  ;;  %v13247_v45 = vld [vmem:[#allocation130_spill] sm:$0xff] }
 0x2e0   : > { %v3420_v4 = vadd.f32 1.0, %v6888_v8  ;;  %6905 = vpow2.f32 %v5982_v43  ;;  %v10461_v10 = vadd.f32 %v13243_v44, %v1954_v55  ;;  %13244 = vst [vmem:[#allocation106_spill] sm:$0xff] %v10467_v47  ;;  %v10476_v43 = vpop.xlane.xlu0 %4565  ;;  %v13249_v55 = vld [vmem:[#allocation69_spill] sm:$0xff] }
 0x2e1   : > { %v4459_v48 = vadd.f32 %v4159_v37, %v4158_v36  ;;  %v6890_v62 = vpop.eup %6889  ;;  %v10464_v50 = vadd.f32 %v13243_v44, %v1955_v61  ;;  %v13246_v37 = vld [vmem:[#allocation72_spill] sm:$0xff]  ;;  %13248 = vst [vmem:[#allocation89_spill] sm:$0xff] %v10476_v43 }
 0x2e2   : > { %v6892_v56 = vpop.eup %6891  ;;  %v3421_v63 = vadd.f32 1.0, %v6890_v62  ;;  %6907 = vrcp.f32 %v3420_v4  ;;  %v5831_v36 = vmul.f32 -1.442695, %v10461_v10  ;;  %v724_v49 = vmul.f32 %v13246_v37, %v13245_v59  ;;  %v13251_v4 = vld [vmem:[#allocation70_spill] sm:$0xff]  ;;  %v13252_v62 = vld [vmem:[#allocation75_spill] sm:$0xff] }
 0x2e3   : > { %4460 = vadd.xlane.f32.xlu1 %v4459_v48  ;;  %v6894_v39 = vpop.eup %6893  ;;  %v4128_v7 = vmul.f32 %v6892_v56, %v10335_v46  ;;  %v5832_v0 = vmul.f32 -1.442695, %v10464_v50  ;;  %v725_v8 = vmul.f32 %v13246_v37, %v13247_v45  ;;  %v13250_v46 = vld [vmem:[#allocation64_spill] sm:$0xff] }
 0x2e4   : > { %v4129_v24 = vmul.f32 %v6894_v39, %v10343_v32  ;;  %6909 = vrcp.f32 %v3421_v63  ;;  %v1188_v48 = vmul.f32 %v13250_v46, %v13249_v55  ;;  %v1189_v61 = vmul.f32 %v13250_v46, %v13251_v4  ;;  %v13253_v56 = vld [vmem:[#allocation76_spill] sm:$0xff]  ;;  %v13254_v39 = vld [vmem:[#allocation17_spill] sm:$0xff] }
 0x2e5   : > { %6911 = vpow2.f32 %v5831_v36  ;;  %v1908_v60 = vmul.f32 %v13253_v56, %v13252_v62  ;;  %v1909_v63 = vmul.f32 %v13253_v56, %v13027_v23  ;;  %v576_v37 = vmul.f32 %v13169_v27, %v13254_v39  ;;  %v10496_v56 = vpop.xlane.xlu1 %4481  ;;  %v13257_v23 = vld [vmem:[#allocation147_spill] sm:$0xff] }
 0x2e6   : > { %v6896_v47 = vpop.eup %6895  ;;  %v4414_v32 = vadd.f32 %v4129_v24, %v4128_v7  ;;  %6913 = vpow2.f32 %v5832_v0  ;;  %v1444_v43 = vadd.f32 %v1188_v48, %v724_v49  ;;  %v1445_v45 = vadd.f32 %v1189_v61, %v725_v8  ;;  %13255 = vst [vmem:[#allocation90_spill] sm:$0xff] %v10496_v56 }
 0x2e7   : > { %v6898_v40 = vpop.eup %6897  ;;  %v3510_v36 = vadd.f32 1.0, %v6896_v47  ;;  %v577_v55 = vmul.f32 %v13169_v27, %v12923_v41  ;;  %v1040_v62 = vmul.f32 %v13173_v22, %v12975_v14  ;;  %v1041_v7 = vmul.f32 %v13173_v22, %v12976_v11  ;;  %v10502_v27 = vpop.xlane.xlu0 %4343 }
 0x2e8   : > { %4415 = vadd.xlane.f32.xlu0 %v4414_v32  ;;  %v3511_v46 = vadd.f32 1.0, %v6898_v40  ;;  %v1760_v24 = vmul.f32 %v13175_v18, %v12977_v31  ;;  %v2164_v47 = vadd.f32 %v1908_v60, %v1444_v43  ;;  %v2165_v49 = vadd.f32 %v1909_v63, %v1445_v45  ;;  %13256 = vst [vmem:[#allocation121_spill] sm:$0xff] %v10502_v27 }
 0x2e9   : > { %v6900_v0 = vpop.eup %6899  ;;  %6915 = vrcp.f32 %v3510_v36  ;;  %v1761_v8 = vmul.f32 %v13175_v18, %v12978_v3  ;;  %v1296_v61 = vadd.f32 %v1040_v62, %v576_v37  ;;  %v1297_v32 = vadd.f32 %v1041_v7, %v577_v55  ;;  %v10518_v7 = vpop.xlane.xlu1 %4571 }
 0x2ea   : > { %v6902_v48 = vpop.eup %6901  ;;  %v4218_v40 = vmul.f32 %v6900_v0, %v10357_v28  ;;  %6917 = vrcp.f32 %v3511_v46  ;;  %v10505_v4 = vadd.f32 %v13257_v23, %v2164_v47  ;;  %v10508_v36 = vadd.f32 %v13257_v23, %v2165_v49  ;;  %13258 = vst [vmem:[#allocation128_spill] sm:$0xff] %v10518_v7 }
 0x2eb   : > { %v4219_v22 = vmul.f32 %v6902_v48, %v10364_v29  ;;  %v2016_v60 = vadd.f32 %v1760_v24, %v1296_v61  ;;  %v2017_v45 = vadd.f32 %v1761_v8, %v1297_v32  ;;  %v547_v24 = vmul.f32 %v13232_v1, %v12930_v57  ;;  %v10527_v48 = vpop.xlane.xlu0 %4436 }
 0x2ec   : > { %v6904_v43 = vpop.eup %6903  ;;  %v6041_v56 = vmul.f32 -1.442695, %v10505_v4  ;;  %v6042_v55 = vmul.f32 -1.442695, %v10508_v36  ;;  %13259 = vst [vmem:[#allocation63_spill] sm:$0xff] %v10527_v48  ;;  %v1730_v57 = vmul.f32 %v13239_v58, %v12885_v19  ;;  %v1731_v61 = vmul.f32 %v13239_v58, %v12886_v34 }
 0x2ed   : > { %v4549_v63 = vadd.f32 %v4219_v22, %v4218_v40  ;;  %v6906_v28 = vpop.eup %6905  ;;  %v3480_v46 = vadd.f32 1.0, %v6904_v43  ;;  %v10513_v29 = vadd.f32 %v10145_v9, %v2016_v60  ;;  %v10516_v62 = vadd.f32 %v10145_v9, %v2017_v45 }
 0x2ee   : > { %v3481_v23 = vadd.f32 1.0, %v6906_v28  ;;  %6919 = vpow2.f32 %v6041_v56  ;;  %v546_v22 = vmul.f32 %v13232_v1, %v12979_v15  ;;  %v1010_v56 = vmul.f32 %v13235_v6, %v12931_v16 }
 0x2ef   : > { %v6908_v37 = vpop.eup %6907  ;;  %4550 = vadd.xlane.f32.xlu1 %v4549_v63  ;;  %6921 = vrcp.f32 %v3480_v46  ;;  %v5893_v47 = vmul.f32 -1.442695, %v10513_v29  ;;  %v5894_v49 = vmul.f32 -1.442695, %v10516_v62  ;;  %v1011_v15 = vmul.f32 %v13235_v6, %v12932_v13 }
 0x2f0   : > { %v4188_v0 = vmul.f32 %v6908_v37, %v10387_v17  ;;  %6923 = vrcp.f32 %v3481_v23  ;;  %v636_v32 = vmul.f32 %v13202_v53, %v12833_v38  ;;  %v1266_v16 = vadd.f32 %v1010_v56, %v546_v22 }
 0x2f1   : > { %v6910_v8 = vpop.eup %6909  ;;  %6925 = vpow2.f32 %v6042_v55  ;;  %v1267_v43 = vadd.f32 %v1011_v15, %v547_v24  ;;  %v637_v19 = vmul.f32 %v13202_v53, %v12835_v20  ;;  %v1100_v34 = vmul.f32 %v13205_v2, %v12836_v5 }
 0x2f2   : > { %v6912_v40 = vpop.eup %6911  ;;  %v4189_v17 = vmul.f32 %v6910_v8, %v10396_v21  ;;  %6927 = vpow2.f32 %v5893_v47  ;;  %v10542_v21 = vpop.xlane.xlu1 %4616  ;;  %v1986_v28 = vadd.f32 %v1730_v57, %v1266_v16  ;;  %v1101_v37 = vmul.f32 %v13205_v2, %v13196_v12 }
 0x2f3   : > { %v6914_v60 = vpop.eup %6913  ;;  %v3330_v45 = vadd.f32 1.0, %v6912_v40  ;;  %6929 = vpow2.f32 %v5894_v49  ;;  %13260 = vst [vmem:[#allocation143_spill] sm:$0xff] %v10542_v21  ;;  %v1987_v46 = vadd.f32 %v1731_v61, %v1267_v43  ;;  %v1820_v23 = vmul.f32 %v13208_v54, %v13197_v26  ;;  %v10553_v47 = vpop.xlane.xlu0 %4526  ;;  %v13263_v43 = vld [vmem:[#allocation21_spill] sm:$0xff] }
 0x2f4   : > { %v4504_v63 = vadd.f32 %v4189_v17, %v4188_v0  ;;  %v3331_v13 = vadd.f32 1.0, %v6914_v60  ;;  %v1821_v22 = vmul.f32 %v13208_v54, %v13198_v30  ;;  %13261 = vst [vmem:[#allocation3_spill] sm:$0xff] %v10553_v47  ;;  %v10556_v49 = vadd.f32 %v13243_v44, %v1986_v28 }
 0x2f5   : > { %6931 = vrcp.f32 %v3330_v45  ;;  %v10559_v8 = vadd.f32 %v13243_v44, %v1987_v46  ;;  %v1356_v56 = vadd.f32 %v1100_v34, %v636_v32  ;;  %v1357_v57 = vadd.f32 %v1101_v37, %v637_v19  ;;  %v13265_v19 = vld [vmem:[#allocation22_spill] sm:$0xff] }
 0x2f6   : > { %v6916_v55 = vpop.eup %6915  ;;  %4505 = vadd.xlane.f32.xlu0 %v4504_v63  ;;  %6933 = vrcp.f32 %v3331_v13  ;;  %v5863_v40 = vmul.f32 -1.442695, %v10556_v49  ;;  %v10567_v16 = vpop.xlane.xlu1 %4394  ;;  %v13264_v63 = vld [vmem:[#allocation85_spill] sm:$0xff] }
 0x2f7   : > { %v6918_v24 = vpop.eup %6917  ;;  %v4278_v0 = vmul.f32 %v6916_v55, %v10411_v42  ;;  %v5864_v17 = vmul.f32 -1.442695, %v10559_v8  ;;  %v2076_v61 = vadd.f32 %v1820_v23, %v1356_v56  ;;  %v2077_v45 = vadd.f32 %v1821_v22, %v1357_v57  ;;  %13262 = vst [vmem:[#allocation4_spill] sm:$0xff] %v10567_v16  ;;  %v10577_v37 = vpop.xlane.xlu0 %4613  ;;  %v13267_v23 = vld [vmem:[#allocation25_spill] sm:$0xff]  ;;  %v13268_v22 = vld [vmem:[#allocation86_spill] sm:$0xff] }
 0x2f8   : > { %v4279_v15 = vmul.f32 %v6918_v24, %v10414_v33  ;;  %6935 = vpow2.f32 %v5863_v40  ;;  %v606_v13 = vmul.f32 %v13264_v63, %v13263_v43  ;;  %v607_v28 = vmul.f32 %v13264_v63, %v13265_v19  ;;  %13266 = vst [vmem:[#allocation5_spill] sm:$0xff] %v10577_v37  ;;  %v13269_v57 = vld [vmem:[#allocation26_spill] sm:$0xff] }
 0x2f9   : > { %v10565_v42 = vadd.f32 %v13213_v35, %v2076_v61  ;;  %6937 = vpow2.f32 %v5864_v17  ;;  %v10572_v33 = vadd.f32 %v13213_v35, %v2077_v45  ;;  %v1070_v24 = vmul.f32 %v13268_v22, %v13267_v23  ;;  %v13270_v17 = vld [vmem:[#allocation39_spill] sm:$0xff]  ;;  %v13271_v61 = vld [vmem:[#allocation144_spill] sm:$0xff] }
 0x2fa   : > { %v4639_v60 = vadd.f32 %v4279_v15, %v4278_v0  ;;  %v1071_v40 = vmul.f32 %v13268_v22, %v13269_v57  ;;  %v10593_v53 = vpop.xlane.xlu1 %4484 }
 0x2fb   : > { %v6920_v32 = vpop.eup %6919  ;;  %v5953_v55 = vmul.f32 -1.442695, %v10565_v42  ;;  %v5954_v15 = vmul.f32 -1.442695, %v10572_v33  ;;  %v1326_v47 = vadd.f32 %v1070_v24, %v606_v13  ;;  %13274 = vst [vmem:[#allocation6_spill] sm:$0xff] %v10593_v53  ;;  %v13276_v13 = vld [vmem:[#allocation120_spill] sm:$0xff] }
 0x2fc   : > { %4640 = vadd.xlane.f32.xlu1 %v4639_v60  ;;  %v6922_v46 = vpop.eup %6921  ;;  %v3540_v34 = vadd.f32 1.0, %v6920_v32  ;;  %v1790_v60 = vmul.f32 %v13271_v61, %v13270_v17  ;;  %v13272_v32 = vlaneseq }
 0x2fd   : > { %v6924_v0 = vpop.eup %6923  ;;  %v4248_v56 = vmul.f32 %v6922_v46, %v10441_v25  ;;  %v1327_v25 = vadd.f32 %v1071_v40, %v607_v28  ;;  %v13273_v46 = vld [vmem:[#allocation40_spill] sm:$0xff] }
 0x2fe   : > { %v6926_v45 = vpop.eup %6925  ;;  %v10588_v21 = vand.u32 127, %v13272_v32  ;;  %v4249_v37 = vmul.f32 %v6924_v0, %v10451_v51  ;;  %6939 = vrcp.f32 %v3540_v34  ;;  %v1791_v48 = vmul.f32 %v13271_v61, %v13273_v46  ;;  %v13275_v34 = vld [vmem:[#allocation51_spill] sm:$0xff] }
 0x2ff   : > { %v6928_v16 = vpop.eup %6927  ;;  %v3541_v7 = vadd.f32 1.0, %v6926_v45  ;;  %6941 = vpow2.f32 %v5953_v55  ;;  %v2046_v2 = vadd.f32 %v1790_v60, %v1326_v47  ;;  %v696_v24 = vmul.f32 %v13276_v13, %v13275_v34  ;;  %v13277_v55 = vld [vmem:[#allocation95_spill] sm:$0xff]  ;;  %v13284_v60 = vld [vmem:[#allocation134_spill] sm:$0xff] }
 0x300   : > { %v6930_v27 = vpop.eup %6929  ;;  %v4594_v35 = vadd.f32 %v4249_v37, %v4248_v56  ;;  %v3392_v54 = vadd.f32 1.0, %v6928_v16  ;;  %6943 = vpow2.f32 %v5954_v15  ;;  %v2047_v51 = vadd.f32 %v1791_v48, %v1327_v25  ;;  %v13278_v16 = vld [vmem:[#allocation52_spill] sm:$0xff]  ;;  %v10603_v37 = vpop.xlane.xlu0 %4346  ;;  %v13280_v48 = vld [vmem:[#allocation101_spill] sm:$0xff]  ;;  %v13281_v56 = vld [vmem:[#allocation66_spill] sm:$0xff] }
 0x301   : > { %6945 = vrcp.f32 %v3541_v7  ;;  %v3393_v9 = vadd.f32 1.0, %v6930_v27  ;;  %v10599_v40 = vadd.f32 %v13277_v55, %v2046_v2  ;;  %v697_v47 = vmul.f32 %v13276_v13, %v13278_v16  ;;  %13279 = vst [vmem:[#allocation24_spill] sm:$0xff] %v10603_v37  ;;  %v13283_v15 = vld [vmem:[#allocation123_spill] sm:$0xff] }
 0x302   : > { %v6932_v32 = vpop.eup %6931  ;;  %4595 = vadd.xlane.f32.xlu0 %v4594_v35  ;;  %6947 = vrcp.f32 %v3392_v54  ;;  %v10607_v27 = vadd.f32 %v13277_v55, %v2047_v51  ;;  %v1160_v35 = vmul.f32 %v13281_v56, %v13280_v48  ;;  %v13282_v54 = vld [vmem:[#allocation102_spill] sm:$0xff]  ;;  %v1880_v45 = vmul.f32 %v13284_v60, %v13283_v15  ;;  %v13285_v25 = vld [vmem:[#allocation91_spill] sm:$0xff]  ;;  %v10621_v48 = vpop.xlane.xlu1 %4574 }
 0x303   : > { %v6934_v0 = vpop.eup %6933  ;;  %v4098_v28 = vmul.f32 %v6932_v32, %v10461_v10  ;;  %6949 = vrcp.f32 %v3393_v9  ;;  %v5923_v10 = vmul.f32 -1.442695, %v10599_v40  ;;  %v1161_v2 = vmul.f32 %v13281_v56, %v13282_v54  ;;  %v13287_v37 = vld [vmem:[#allocation79_spill] sm:$0xff]  ;;  %13288 = vst [vmem:[#allocation113_spill] sm:$0xff] %v10621_v48  ;;  %v13289_v54 = vld [vmem:[#allocation42_spill] sm:$0xff] }
 0x304   : > { %v4099_v7 = vmul.f32 %v6934_v0, %v10464_v50  ;;  %v1881_v32 = vmul.f32 %v13284_v60, %v13285_v25  ;;  %v5924_v9 = vmul.f32 -1.442695, %v10607_v27  ;;  %v1416_v50 = vadd.f32 %v1160_v35, %v696_v24  ;;  %v13286_v0 = vld [vmem:[#allocation41_spill] sm:$0xff]  ;;  %v13290_v60 = vld [vmem:[#allocation2_spill] sm:$0xff]  ;;  %v13293_v35 = vld [vmem:[#allocation80_spill] sm:$0xff] }
 0x305   : > { %6951 = vpow2.f32 %v5923_v10  ;;  %v1417_v51 = vadd.f32 %v1161_v2, %v697_v47  ;;  %v666_v13 = vmul.f32 %v13287_v37, %v13286_v0  ;;  %v6936_v16 = vpop.eup %6935  ;;  %v667_v15 = vmul.f32 %v13287_v37, %v13289_v54  ;;  %v13292_v47 = vld [vmem:[#allocation47_spill] sm:$0xff]  ;;  %v10631_v2 = vpop.xlane.xlu0 %4439 }
 0x306   : > { %v4369_v53 = vadd.f32 %v4099_v7, %v4098_v28  ;;  %6953 = vpow2.f32 %v5924_v9  ;;  %v2136_v56 = vadd.f32 %v1880_v45, %v1416_v50  ;;  %v6938_v34 = vpop.eup %6937  ;;  %v10627_v28 = vsub.s32 %v10588_v21, %v13290_v60  ;;  %13294 = vst [vmem:[#allocation107_spill] sm:$0xff] %v10631_v2  ;;  %v13295_v48 = vld [vmem:[#allocation99_spill] sm:$0xff]  ;;  %v13296_v9 = vld [vmem:[#allocation48_spill] sm:$0xff] }
 0x307   : > { %v3362_v24 = vadd.f32 1.0, %v6936_v16  ;;  %v2137_v7 = vadd.f32 %v1881_v32, %v1417_v51  ;;  %v1130_v10 = vmul.f32 %v13293_v35, %v13292_v47  ;;  %v10634_v0 = vmul.f32 0.00390625, %v13295_v48  ;;  %v13298_v47 = vld [vmem:[#allocation49_spill] sm:$0xff] }
 0x308   : > { %4370 = vadd.xlane.f32.xlu1 %v4369_v53  ;;  %13291 = vst [vmem:[#allocation53_spill] sm:$0xff] %v10627_v28  ;;  %v3363_v53 = vadd.f32 1.0, %v6938_v34  ;;  %v10637_v45 = vadd.f32 %v13236_v52, %v2136_v56  ;;  %v1131_v50 = vmul.f32 %v13293_v35, %v13296_v9  ;;  %v4994_v54 = vadd.s32 4294967288, %v10588_v21  ;;  %v13299_v34 = vld [vmem:[#allocation138_spill] sm:$0xff] }
 0x309   : > { %6955 = vrcp.f32 %v3362_v24  ;;  %v10643_v16 = vadd.f32 %v13236_v52, %v2137_v7  ;;  %v1386_v32 = vadd.f32 %v1130_v10, %v666_v13  ;;  %v1850_v25 = vmul.f32 %v13299_v34, %v13298_v47  ;;  %v13300_v35 = vld [vmem:[#allocation50_spill] sm:$0xff]  ;;  %v10654_v13 = vpop.xlane.xlu1 %4661 }
 0x30a   : > { %6957 = vrcp.f32 %v3363_v53  ;;  %v6013_v2 = vmul.f32 -1.442695, %v10637_v45  ;;  %v1387_v48 = vadd.f32 %v1131_v50, %v667_v15  ;;  %v1851_v24 = vmul.f32 %v13299_v34, %v13300_v35  ;;  %13301 = vst [vmem:[#allocation60_spill] sm:$0xff] %v10654_v13  ;;  %v10660_v35 = vpop.xlane.xlu0 %4529  ;;  %v13303_v13 = vld [vmem:[#allocation139_spill] sm:$0xff] }
 0x30b   : > { %13297 = vst [vmem:[#allocation108_spill] sm:$0xff] %v10643_v16  ;;  %v6940_v51 = vpop.eup %6939  ;;  %v6014_v9 = vmul.f32 -1.442695, %v10643_v16  ;;  %v578_v7 = vmul.f32 %v13232_v1, %v13254_v39  ;;  %v2106_v15 = vadd.f32 %v1850_v25, %v1386_v32  ;;  %v579_v50 = vmul.f32 %v13232_v1, %v12923_v41  ;;  %13302 = vst [vmem:[#allocation31_spill] sm:$0xff] %v10660_v35 }
 0x30c   : > { %v6942_v56 = vpop.eup %6941  ;;  %v4308_v37 = vmul.f32 %v6940_v51, %v10505_v4  ;;  %6959 = vpow2.f32 %v6013_v2  ;;  %v2107_v4 = vadd.f32 %v1851_v24, %v1387_v48  ;;  %v1042_v51 = vmul.f32 %v13235_v6, %v12975_v14  ;;  %v13304_v2 = vld [vmem:[#allocation145_spill] sm:$0xff] }
 0x30d   : > { %v6944_v10 = vpop.eup %6943  ;;  %v3452_v53 = vadd.f32 1.0, %v6942_v56  ;;  %6961 = vpow2.f32 %v6014_v9  ;;  %v10664_v56 = vadd.f32 %v13303_v13, %v2106_v15  ;;  %v1043_v25 = vmul.f32 %v13235_v6, %v12976_v11 }
 0x30e   : > { %v6946_v52 = vpop.eup %6945  ;;  %v3453_v47 = vadd.f32 1.0, %v6944_v10  ;;  %v10669_v32 = vmul.f32 0.00390625, %v13304_v2  ;;  %v10673_v14 = vadd.f32 %v13303_v13, %v2107_v4  ;;  %v1298_v24 = vadd.f32 %v1042_v51, %v578_v7 }
 0x30f   : > { %v6948_v16 = vpop.eup %6947  ;;  %v4309_v39 = vmul.f32 %v6946_v52, %v10508_v36  ;;  %6963 = vrcp.f32 %v3452_v53  ;;  %v5983_v36 = vmul.f32 -1.442695, %v10664_v56  ;;  %v1299_v53 = vadd.f32 %v1043_v25, %v579_v50 }
 0x310   : > { %v6950_v41 = vpop.eup %6949  ;;  %v4160_v9 = vmul.f32 %v6948_v16, %v10513_v29  ;;  %6965 = vrcp.f32 %v3453_v47  ;;  %v5984_v10 = vmul.f32 -1.442695, %v10673_v14  ;;  %v1762_v11 = vmul.f32 %v13239_v58, %v12977_v31  ;;  %v10682_v29 = vpop.xlane.xlu1 %4349 }
 0x311   : > { %v4684_v48 = vadd.f32 %v4309_v39, %v4308_v37  ;;  %v4161_v52 = vmul.f32 %v6950_v41, %v10516_v62  ;;  %v1763_v15 = vmul.f32 %v13239_v58, %v12978_v3  ;;  %13305 = vst [vmem:[#allocation32_spill] sm:$0xff] %v10682_v29  ;;  %v10685_v16 = vsub.s32 %v4994_v54, %v13290_v60  ;;  %v13307_v37 = vld [vmem:[#allocation67_spill] sm:$0xff]  ;;  %v10689_v39 = vpop.xlane.xlu0 %4619  ;;  %v13309_v54 = vld [vmem:[#allocation130_spill] sm:$0xff] }
 0x312   : > { %v6952_v47 = vpop.eup %6951  ;;  %6967 = vpow2.f32 %v5983_v36  ;;  %v726_v7 = vmul.f32 %v13307_v37, %v13245_v59  ;;  %v2018_v51 = vadd.f32 %v1762_v11, %v1298_v24  ;;  %13308 = vst [vmem:[#allocation131_spill] sm:$0xff] %v10689_v39  ;;  %v727_v41 = vmul.f32 %v13307_v37, %v13309_v54  ;;  %v13315_v39 = vld [vmem:[#allocation75_spill] sm:$0xff] }
 0x313   : > { %13306 = vst [vmem:[#allocation23_spill] sm:$0xff] %v10685_v16  ;;  %4685 = vadd.xlane.f32.xlu0 %v4684_v48  ;;  %v4462_v62 = vadd.f32 %v4161_v52, %v4160_v9  ;;  %v6954_v4 = vpop.eup %6953  ;;  %v3422_v50 = vadd.f32 1.0, %v6952_v47  ;;  %6969 = vpow2.f32 %v5984_v10  ;;  %v2019_v31 = vadd.f32 %v1763_v15, %v1299_v53  ;;  %v13310_v48 = vld [vmem:[#allocation69_spill] sm:$0xff]  ;;  %v13311_v52 = vld [vmem:[#allocation68_spill] sm:$0xff]  ;;  %v13313_v15 = vld [vmem:[#allocation70_spill] sm:$0xff] }
 0x314   : > { %v3423_v25 = vadd.f32 1.0, %v6954_v4  ;;  %v10696_v2 = vadd.f32 %v13243_v44, %v2018_v51  ;;  %v1190_v36 = vmul.f32 %v13311_v52, %v13310_v48  ;;  %v13312_v53 = vld [vmem:[#allocation100_spill] sm:$0xff]  ;;  %v1191_v47 = vmul.f32 %v13311_v52, %v13313_v15 }
 0x315   : > { %4463 = vadd.xlane.f32.xlu1 %v4462_v62  ;;  %6971 = vrcp.f32 %v3422_v50  ;;  %v10699_v9 = vadd.f32 %v13243_v44, %v2019_v31  ;;  %v10706_v11 = vmul.f32 0.00390625, %v13312_v53  ;;  %v10713_v31 = vpop.xlane.xlu1 %4442  ;;  %v13316_v53 = vld [vmem:[#allocation73_spill] sm:$0xff] }
 0x316   : > { %v6956_v24 = vpop.eup %6955  ;;  %6973 = vrcp.f32 %v3423_v25  ;;  %v5895_v4 = vmul.f32 -1.442695, %v10696_v2  ;;  %v1446_v51 = vadd.f32 %v1190_v36, %v726_v7  ;;  %13314 = vst [vmem:[#allocation18_spill] sm:$0xff] %v10713_v31  ;;  %v1447_v10 = vadd.f32 %v1191_v47, %v727_v41  ;;  %v13317_v25 = vld [vmem:[#allocation146_spill] sm:$0xff]  ;;  %v10726_v36 = vpop.xlane.xlu0 %4664 }
 0x317   : > { %v6958_v62 = vpop.eup %6957  ;;  %v4130_v37 = vmul.f32 %v6956_v24, %v10556_v49  ;;  %v5896_v50 = vmul.f32 -1.442695, %v10699_v9  ;;  %v1910_v35 = vmul.f32 %v13316_v53, %v13315_v39  ;;  %v1911_v29 = vmul.f32 %v13316_v53, %v13317_v25  ;;  %13318 = vst [vmem:[#allocation58_spill] sm:$0xff] %v10726_v36  ;;  %v13331_v36 = vld [vmem:[#allocation101_spill] sm:$0xff] }
 0x318   : > { %v4131_v3 = vmul.f32 %v6958_v62, %v10559_v8  ;;  %6975 = vpow2.f32 %v5895_v4  ;;  %v638_v49 = vmul.f32 %v13264_v63, %v12833_v38  ;;  %v639_v24 = vmul.f32 %v13264_v63, %v12835_v20 }
 0x319   : > { %v6960_v52 = vpop.eup %6959  ;;  %v1102_v7 = vmul.f32 %v13268_v22, %v12836_v5  ;;  %6977 = vpow2.f32 %v5896_v50  ;;  %v2166_v62 = vadd.f32 %v1910_v35, %v1446_v51  ;;  %v2167_v25 = vadd.f32 %v1911_v29, %v1447_v10  ;;  %v13319_v5 = vld [vmem:[#allocation133_spill] sm:$0xff]  ;;  %v10743_v50 = vpop.xlane.xlu1 %4532 }
 0x31a   : > { %v6962_v8 = vpop.eup %6961  ;;  %v4417_v41 = vadd.f32 %v4131_v3, %v4130_v37  ;;  %v3512_v47 = vadd.f32 1.0, %v6960_v52  ;;  %v1103_v4 = vmul.f32 %v13268_v22, %v13196_v12  ;;  %v1822_v3 = vmul.f32 %v13271_v61, %v13197_v26  ;;  %v13320_v37 = vld [vmem:[#allocation11_spill] sm:$0xff]  ;;  %13321 = vst [vmem:[#allocation14_spill] sm:$0xff] %v10743_v50  ;;  %v13333_v12 = vld [vmem:[#allocation102_spill] sm:$0xff] }
 0x31b   : > { %v3513_v53 = vadd.f32 1.0, %v6962_v8  ;;  %v1358_v38 = vadd.f32 %v1102_v7, %v638_v49  ;;  %v10732_v63 = vadd.f32 %v13319_v5, %v2166_v62  ;;  %v10737_v35 = vmul.f32 0.00390625, %v13320_v37 }
 0x31c   : > { %v6964_v31 = vpop.eup %6963  ;;  %4418 = vadd.xlane.f32.xlu0 %v4417_v41  ;;  %6979 = vrcp.f32 %v3512_v47  ;;  %v10741_v10 = vadd.f32 %v13319_v5, %v2167_v25  ;;  %v1359_v51 = vadd.f32 %v1103_v4, %v639_v24  ;;  %v5001_v8 = vadd.s32 4294967280, %v10588_v21  ;;  %v10752_v5 = vpop.xlane.xlu0 %4397 }
 0x31d   : > { %v6966_v39 = vpop.eup %6965  ;;  %v4220_v20 = vmul.f32 %v6964_v31, %v10565_v42  ;;  %6981 = vrcp.f32 %v3513_v53  ;;  %v6043_v42 = vmul.f32 -1.442695, %v10732_v63  ;;  %v1823_v31 = vmul.f32 %v13271_v61, %v13198_v30  ;;  %13322 = vst [vmem:[#allocation15_spill] sm:$0xff] %v10752_v5  ;;  %v13332_v30 = vld [vmem:[#allocation80_spill] sm:$0xff] }
 0x31e   : > { %v4221_v29 = vmul.f32 %v6966_v39, %v10572_v33  ;;  %v2078_v52 = vadd.f32 %v1822_v3, %v1358_v38  ;;  %v6044_v39 = vmul.f32 -1.442695, %v10741_v10  ;;  %v5102_v38 = vrot.slane %v10737_v35, %v10627_v28 }
 0x31f   : > { %v6968_v49 = vpop.eup %6967  ;;  %6983 = vpow2.f32 %v6043_v42  ;;  %v2079_v47 = vadd.f32 %v1823_v31, %v1359_v51  ;;  %v10768_v51 = vsub.s32 %v5001_v8, %v13290_v60  ;;  %v13325_v31 = vld [vmem:[#allocation119_spill] sm:$0xff]  ;;  %v1792_v8 = vmul.f32 %v13175_v18, %v13270_v17 }
 0x320   : > { %v4552_v33 = vadd.f32 %v4221_v29, %v4220_v20  ;;  %v6970_v25 = vpop.eup %6969  ;;  %v3482_v41 = vadd.f32 1.0, %v6968_v49  ;;  %v10755_v24 = vadd.f32 %v13277_v55, %v2078_v52  ;;  %6985 = vpow2.f32 %v6044_v39  ;;  %v13323_v20 = vld [vmem:[#allocation132_spill] sm:$0xff]  ;;  %v10773_v49 = vpop.xlane.xlu1 %4622 }
 0x321   : > { %v3483_v62 = vadd.f32 1.0, %v6970_v25  ;;  %v608_v53 = vmul.f32 %v13323_v20, %v13263_v43  ;;  %v10762_v3 = vadd.f32 %v13277_v55, %v2079_v47  ;;  %v609_v29 = vmul.f32 %v13323_v20, %v13265_v19  ;;  %13324 = vst [vmem:[#allocation16_spill] sm:$0xff] %v10768_v51  ;;  %13326 = vst [vmem:[#allocation33_spill] sm:$0xff] %v10773_v49  ;;  %v13327_v47 = vld [vmem:[#allocation51_spill] sm:$0xff]  ;;  %v10785_v7 = vpop.xlane.xlu0 %4487 }
 0x322   : > { %4553 = vadd.xlane.f32.xlu1 %v4552_v33  ;;  %v6972_v4 = vpop.eup %6971  ;;  %6987 = vrcp.f32 %v3482_v41  ;;  %v5955_v37 = vmul.f32 -1.442695, %v10755_v24  ;;  %v1072_v52 = vmul.f32 %v13325_v31, %v13267_v23  ;;  %v1073_v25 = vmul.f32 %v13325_v31, %v13269_v57  ;;  %13329 = vst [vmem:[#allocation34_spill] sm:$0xff] %v10785_v7  ;;  %v13334_v7 = vld [vmem:[#allocation123_spill] sm:$0xff] }
 0x323   : > { %v6974_v42 = vpop.eup %6973  ;;  %v4190_v35 = vmul.f32 %v6972_v4, %v10599_v40  ;;  %6989 = vrcp.f32 %v3483_v62  ;;  %v5956_v39 = vmul.f32 -1.442695, %v10762_v3  ;;  %v1793_v40 = vmul.f32 %v13175_v18, %v13273_v46  ;;  %v13328_v62 = vld [vmem:[#allocation79_spill] sm:$0xff] }
 0x324   : > { %v4191_v33 = vmul.f32 %v6974_v42, %v10607_v27  ;;  %6991 = vpow2.f32 %v5955_v37  ;;  %v1328_v41 = vadd.f32 %v1072_v52, %v608_v53  ;;  %v698_v4 = vmul.f32 %v13328_v62, %v13327_v47  ;;  %v13330_v42 = vld [vmem:[#allocation52_spill] sm:$0xff] }
 0x325   : > { %v6976_v49 = vpop.eup %6975  ;;  %6993 = vpow2.f32 %v5956_v39  ;;  %v1329_v37 = vadd.f32 %v1073_v25, %v609_v29  ;;  %v699_v50 = vmul.f32 %v13328_v62, %v13330_v42  ;;  %v1162_v26 = vmul.f32 %v13332_v30, %v13331_v36  ;;  %v13336_v25 = vld [vmem:[#allocation96_spill] sm:$0xff]  ;;  %v10800_v36 = vpop.xlane.xlu1 %4352 }
 0x326   : > { %v4507_v27 = vadd.f32 %v4191_v33, %v4190_v35  ;;  %v6978_v5 = vpop.eup %6977  ;;  %v3394_v53 = vadd.f32 1.0, %v6976_v49  ;;  %v2048_v52 = vadd.f32 %v1792_v8, %v1328_v41  ;;  %v1163_v18 = vmul.f32 %v13332_v30, %v13333_v12  ;;  %v13335_v33 = vld [vmem:[#allocation91_spill] sm:$0xff]  ;;  %13337 = vst [vmem:[#allocation54_spill] sm:$0xff] %v10800_v36  ;;  %v13338_v12 = vld [vmem:[#allocation81_spill] sm:$0xff] }
 0x327   : > { %v3395_v47 = vadd.f32 1.0, %v6978_v5  ;;  %v2049_v31 = vadd.f32 %v1793_v40, %v1329_v37  ;;  %v1882_v35 = vmul.f32 %v13299_v34, %v13334_v7  ;;  %v1883_v29 = vmul.f32 %v13299_v34, %v13335_v33  ;;  %v13339_v37 = vld [vmem:[#allocation108_spill] sm:$0xff]  ;;  %v13353_v36 = vld [vmem:[#allocation47_spill] sm:$0xff]  ;;  %v13357_v34 = vld [vmem:[#allocation49_spill] sm:$0xff] }
 0x328   : > { %4508 = vadd.xlane.f32.xlu0 %v4507_v27  ;;  %6995 = vrcp.f32 %v3394_v53  ;;  %v10798_v49 = vadd.f32 %v13336_v25, %v2048_v52  ;;  %v1418_v41 = vadd.f32 %v1162_v26, %v698_v4  ;;  %v1419_v8 = vadd.f32 %v1163_v18, %v699_v50  ;;  %v10811_v26 = vpop.xlane.xlu0 %4577 }
 0x329   : > { %v6980_v39 = vpop.eup %6979  ;;  %v10803_v27 = vmul.f32 0.00390625, %v13338_v12  ;;  %6997 = vrcp.f32 %v3395_v47  ;;  %v10807_v40 = vadd.f32 %v13336_v25, %v2049_v31  ;;  %13340 = vst [vmem:[#allocation59_spill] sm:$0xff] %v10811_v26  ;;  %v13341_v18 = vrot.slane %v10634_v0, %v10627_v28  ;;  %v13354_v26 = vld [vmem:[#allocation71_spill] sm:$0xff]  ;;  %v13358_v25 = vld [vmem:[#allocation142_spill] sm:$0xff] }
 0x32a   : > { %v6982_v42 = vpop.eup %6981  ;;  %v4280_v5 = vmul.f32 %v6980_v39, %v10637_v45  ;;  %v5925_v53 = vmul.f32 -1.442695, %v10798_v49  ;;  %v2138_v52 = vadd.f32 %v1882_v35, %v1418_v41  ;;  %v2139_v7 = vadd.f32 %v1883_v29, %v1419_v8  ;;  %v13346_v39 = vld [vmem:[#allocation82_spill] sm:$0xff]  ;;  %v13347_v8 = vld [vmem:[#allocation12_spill] sm:$0xff] }
 0x32b   : > { %v4281_v33 = vmul.f32 %v6982_v42, %v13339_v37  ;;  %v13342_v12 = vrot.slane %v10669_v32, %v10685_v16  ;;  %v13343_v50 = vrot.slane %v10706_v11, %v10685_v16  ;;  %v5926_v47 = vmul.f32 -1.442695, %v10807_v40 }
 0x32c   : > { %v6984_v4 = vpop.eup %6983  ;;  %6999 = vpow2.f32 %v5925_v53  ;;  %v10828_v35 = vadd.f32 %v13303_v13, %v2138_v52  ;;  %v10831_v0 = vadd.f32 %v13303_v13, %v2139_v7  ;;  %v5111_v29 = vrot.slane %v10803_v27, %v10768_v51  ;;  %v10843_v53 = vpop.xlane.xlu1 %4445 }
 0x32d   : > { %v10820_v45 = vsel %vm4999_vm0, %v13342_v12, %v13341_v18  ;;  %v5107_v31 = vsel %vm4999_vm0, %v13343_v50, %v5102_v38  ;;  %v4642_v42 = vadd.f32 %v4281_v33, %v4280_v5  ;;  %v6986_v32 = vpop.eup %6985  ;;  %v10836_v11 = vmul.f32 0.00390625, %v13346_v39  ;;  %13348 = vst [vmem:[#allocation35_spill] sm:$0xff] %v10843_v53  ;;  %v13349_v18 = vld [vmem:[#allocation41_spill] sm:$0xff]  ;;  %v13350_v12 = vld [vmem:[#allocation126_spill] sm:$0xff]  ;;  %v10856_v13 = vpop.xlane.xlu0 %4667 }
 0x32e   : > { %13344 = vst [vmem:[#allocation19_spill] sm:$0xff] %v10828_v35  ;;  %13345 = vst [vmem:[#allocation20_spill] sm:$0xff] %v10831_v0  ;;  %v3542_v38 = vadd.f32 1.0, %v6984_v4  ;;  %7001 = vpow2.f32 %v5926_v47  ;;  %v10839_v37 = vmul.f32 0.00390625, %v13347_v8  ;;  %v3543_v33 = vadd.f32 1.0, %v6986_v32  ;;  %v13351_v47 = vld [vmem:[#allocation42_spill] sm:$0xff] }
 0x32f   : > { %v6988_v41 = vpop.eup %6987  ;;  %4643 = vadd.xlane.f32.xlu1 %v4642_v42  ;;  %v6015_v5 = vmul.f32 -1.442695, %v10828_v35  ;;  %v6016_v7 = vmul.f32 -1.442695, %v10831_v0  ;;  %v668_v50 = vmul.f32 %v13350_v12, %v13349_v18  ;;  %v669_v4 = vmul.f32 %v13350_v12, %v13351_v47  ;;  %v13352_v8 = vld [vmem:[#allocation150_spill] sm:$0xff]  ;;  %13355 = vst [vmem:[#allocation36_spill] sm:$0xff] %v10856_v13 }
 0x330   : > { %v6990_v52 = vpop.eup %6989  ;;  %v4250_v27 = vmul.f32 %v6988_v41, %v10664_v56  ;;  %7003 = vrcp.f32 %v3542_v38  ;;  %v10851_v42 = vmul.f32 0.00390625, %v13352_v8  ;;  %v1132_v53 = vmul.f32 %v13354_v26, %v13353_v36  ;;  %v13356_v38 = vld [vmem:[#allocation48_spill] sm:$0xff]  ;;  %v13359_v35 = vld [vmem:[#allocation50_spill] sm:$0xff] }
 0x331   : > { %v6992_v39 = vpop.eup %6991  ;;  %v4251_v32 = vmul.f32 %v6990_v52, %v10673_v14  ;;  %7005 = vrcp.f32 %v3543_v33  ;;  %v1133_v41 = vmul.f32 %v13354_v26, %v13356_v38  ;;  %v1852_v12 = vmul.f32 %v13358_v25, %v13357_v34 }
 0x332   : > { %v3454_v56 = vadd.f32 1.0, %v6992_v39  ;;  %7007 = vpow2.f32 %v6015_v5  ;;  %v6994_v0 = vpop.eup %6993  ;;  %v5008_v8 = vadd.s32 4294967272, %v10588_v21  ;;  %v1388_v14 = vadd.f32 %v1132_v53, %v668_v50  ;;  %v13361_v50 = vld [vmem:[#allocation77_spill] sm:$0xff] }
 0x333   : > { %v4597_v30 = vadd.f32 %v4251_v32, %v4250_v27  ;;  %7009 = vpow2.f32 %v6016_v7  ;;  %v3455_v33 = vadd.f32 1.0, %v6994_v0  ;;  %v1389_v52 = vadd.f32 %v1133_v41, %v669_v4  ;;  %v10871_v27 = vpop.xlane.xlu1 %4535  ;;  %v10883_v32 = vpop.xlane.xlu0 %4400 }
 0x334   : > { %7011 = vrcp.f32 %v3454_v56  ;;  %v1853_v13 = vmul.f32 %v13358_v25, %v13359_v35  ;;  %v2108_v5 = vadd.f32 %v1852_v12, %v1388_v14  ;;  %v610_v39 = vmul.f32 %v13232_v1, %v13263_v43  ;;  %13360 = vst [vmem:[#allocation13_spill] sm:$0xff] %v10871_v27  ;;  %13362 = vst [vmem:[#allocation65_spill] sm:$0xff] %v10883_v32 }
 0x335   : > { %4598 = vadd.xlane.f32.xlu0 %v4597_v30  ;;  %v611_v26 = vmul.f32 %v13232_v1, %v13265_v19  ;;  %v1074_v62 = vmul.f32 %v13235_v6, %v13267_v23  ;;  %v6996_v7 = vpop.eup %6995  ;;  %7013 = vrcp.f32 %v3455_v33  ;;  %v1075_v53 = vmul.f32 %v13235_v6, %v13269_v57 }
 0x336   : > { %v2109_v0 = vadd.f32 %v1853_v13, %v1389_v52  ;;  %v1794_v30 = vmul.f32 %v13239_v58, %v13270_v17  ;;  %v6998_v12 = vpop.eup %6997  ;;  %v4162_v43 = vmul.f32 %v6996_v7, %v10696_v2  ;;  %v10879_v4 = vadd.f32 %v13361_v50, %v2108_v5 }
 0x337   : > { %v1330_v19 = vadd.f32 %v1074_v62, %v610_v39  ;;  %v1795_v23 = vmul.f32 %v13239_v58, %v13273_v46  ;;  %v10886_v13 = vsel %vm5006_vm1, %v5111_v29, %v5107_v31  ;;  %v4163_v57 = vmul.f32 %v6998_v12, %v10699_v9  ;;  %v10906_v7 = vpop.xlane.xlu1 %4625 }
 0x338   : > { %v10890_v56 = vadd.f32 %v13361_v50, %v2109_v0  ;;  %v1331_v17 = vadd.f32 %v1075_v53, %v611_v26  ;;  %v5985_v41 = vmul.f32 -1.442695, %v10879_v4  ;;  %v5181_v31 = vrot.slane %v10851_v42, %v10627_v28  ;;  %13364 = vst [vmem:[#allocation114_spill] sm:$0xff] %v10906_v7  ;;  %v13365_v53 = vld [vmem:[#allocation120_spill] sm:$0xff] }
 0x339   : > { %v2050_v46 = vadd.f32 %v1794_v30, %v1330_v19  ;;  %v7000_v14 = vpop.eup %6999  ;;  %v4465_v29 = vadd.f32 %v4163_v57, %v4162_v43  ;;  %v10901_v26 = vsub.s32 %v5008_v8, %v13290_v60  ;;  %v728_v30 = vmul.f32 %v13365_v53, %v13245_v59  ;;  %v13366_v43 = vld [vmem:[#allocation149_spill] sm:$0xff]  ;;  %v10919_v57 = vpop.xlane.xlu0 %4490 }
 0x33a   : > { %v5986_v9 = vmul.f32 -1.442695, %v10890_v56  ;;  %v2051_v33 = vadd.f32 %v1795_v23, %v1331_v17  ;;  %v3424_v5 = vadd.f32 1.0, %v7000_v14  ;;  %7015 = vpow2.f32 %v5985_v41  ;;  %13367 = vst [vmem:[#allocation74_spill] sm:$0xff] %v10919_v57  ;;  %v13368_v14 = vld [vmem:[#allocation66_spill] sm:$0xff] }
 0x33b   : > { %v7002_v52 = vpop.eup %7001  ;;  %13363 = vst [vmem:[#allocation115_spill] sm:$0xff] %v10901_v26  ;;  %v10904_v39 = vadd.f32 %v13243_v44, %v2050_v46  ;;  %4466 = vadd.xlane.f32.xlu1 %v4465_v29  ;;  %v10914_v8 = vmul.f32 0.00390625, %v13366_v43  ;;  %v729_v23 = vmul.f32 %v13365_v53, %v13309_v54  ;;  %v1192_v29 = vmul.f32 %v13368_v14, %v13310_v48  ;;  %v13370_v53 = vld [vmem:[#allocation134_spill] sm:$0xff] }
 0x33c   : > { %v3425_v0 = vadd.f32 1.0, %v7002_v52  ;;  %7017 = vpow2.f32 %v5986_v9  ;;  %v10909_v42 = vadd.f32 %v13243_v44, %v2051_v33  ;;  %v1193_v52 = vmul.f32 %v13368_v14, %v13313_v15  ;;  %v13392_v44 = vld [vmem:[#allocation141_spill] sm:$0xff] }
 0x33d   : > { %v7004_v12 = vpop.eup %7003  ;;  %7019 = vrcp.f32 %v3424_v5  ;;  %v5927_v19 = vmul.f32 -1.442695, %v10904_v39  ;;  %v13369_v5 = vld [vmem:[#allocation75_spill] sm:$0xff] }
 0x33e   : > { %v7006_v17 = vpop.eup %7005  ;;  %v4310_v41 = vmul.f32 %v7004_v12, %v10732_v63  ;;  %7021 = vrcp.f32 %v3425_v0  ;;  %v5928_v46 = vmul.f32 -1.442695, %v10909_v42  ;;  %v1912_v43 = vmul.f32 %v13370_v53, %v13369_v5  ;;  %v13371_v0 = vld [vmem:[#allocation146_spill] sm:$0xff] }
 0x33f   : > { %v7008_v9 = vpop.eup %7007  ;;  %v4311_v33 = vmul.f32 %v7006_v17, %v10741_v10  ;;  %7023 = vpow2.f32 %v5927_v19  ;;  %v1448_v63 = vadd.f32 %v1192_v29, %v728_v30  ;;  %v1913_v12 = vmul.f32 %v13370_v53, %v13371_v0  ;;  %v13372_v10 = vld [vmem:[#allocation85_spill] sm:$0xff]  ;;  %v10934_v17 = vpop.xlane.xlu1 %4355 }
 0x340   : > { %v7010_v62 = vpop.eup %7009  ;;  %v3514_v2 = vadd.f32 1.0, %v7008_v9  ;;  %7025 = vpow2.f32 %v5928_v46  ;;  %v1449_v32 = vadd.f32 %v1193_v52, %v729_v23  ;;  %v670_v19 = vmul.f32 %v13372_v10, %v13349_v18  ;;  %13373 = vst [vmem:[#allocation136_spill] sm:$0xff] %v10934_v17 }
 0x341   : > { %v7012_v7 = vpop.eup %7011  ;;  %v4687_v27 = vadd.f32 %v4311_v33, %v4310_v41  ;;  %v3515_v57 = vadd.f32 1.0, %v7010_v62  ;;  %v2168_v28 = vadd.f32 %v1912_v43, %v1448_v63  ;;  %v671_v46 = vmul.f32 %v13372_v10, %v13351_v47  ;;  %v10943_v41 = vpop.xlane.xlu0 %4580  ;;  %v13391_v10 = vld [vmem:[#allocation45_spill] sm:$0xff] }
 0x342   : > { %v4222_v14 = vmul.f32 %v7012_v7, %v10755_v24  ;;  %7027 = vrcp.f32 %v3514_v2  ;;  %v7014_v30 = vpop.eup %7013  ;;  %v2169_v29 = vadd.f32 %v1913_v12, %v1449_v32  ;;  %v1134_v62 = vmul.f32 %v13268_v22, %v13353_v36  ;;  %13374 = vst [vmem:[#allocation137_spill] sm:$0xff] %v10943_v41  ;;  %v13375_v24 = vld [vmem:[#allocation135_spill] sm:$0xff]  ;;  %v13379_v12 = vld [vmem:[#allocation116_spill] sm:$0xff] }
 0x343   : > { %4688 = vadd.xlane.f32.xlu0 %v4687_v27  ;;  %7029 = vrcp.f32 %v3515_v57  ;;  %v1135_v23 = vmul.f32 %v13268_v22, %v13356_v38  ;;  %v4223_v9 = vmul.f32 %v7014_v30, %v10762_v3  ;;  %v10947_v2 = vadd.f32 %v13375_v24, %v2168_v28 }
 0x344   : > { %v1854_v7 = vmul.f32 %v13271_v61, %v13357_v34  ;;  %v1855_v27 = vmul.f32 %v13271_v61, %v13359_v35  ;;  %v13376_v32 = vrot.slane %v10836_v11, %v10768_v51  ;;  %v10961_v33 = vadd.f32 %v13375_v24, %v2169_v29 }
 0x345   : > { %v1390_v3 = vadd.f32 %v1134_v62, %v670_v19  ;;  %v1391_v52 = vadd.f32 %v1135_v23, %v671_v46  ;;  %v13378_v28 = vrot.slane %v10839_v37, %v10685_v16  ;;  %v4555_v63 = vadd.f32 %v4223_v9, %v4222_v14  ;;  %v10976_v46 = vpop.xlane.xlu1 %4448  ;;  %v13381_v37 = vld [vmem:[#allocation83_spill] sm:$0xff]  ;;  %v13383_v9 = vld [vmem:[#allocation28_spill] sm:$0xff] }
 0x346   : > { %v10958_v57 = vsel %vm5006_vm1, %v13376_v32, %v10820_v45  ;;  %13377 = vst [vmem:[#allocation43_spill] sm:$0xff] %v10961_v33  ;;  %v6045_v11 = vmul.f32 -1.442695, %v10947_v2  ;;  %v10973_v45 = vmul.f32 0.00390625, %v13379_v12  ;;  %v6046_v30 = vmul.f32 -1.442695, %v10961_v33 }
 0x347   : > { %v10967_v53 = vsel %vm4999_vm0, %v13378_v28, %v5181_v31  ;;  %v2110_v29 = vadd.f32 %v1854_v7, %v1390_v3  ;;  %v2111_v19 = vadd.f32 %v1855_v27, %v1391_v52  ;;  %13380 = vst [vmem:[#allocation44_spill] sm:$0xff] %v10976_v46  ;;  %v7016_v62 = vpop.eup %7015  ;;  %v10979_v23 = vmul.f32 0.00390625, %v13381_v37  ;;  %4556 = vadd.xlane.f32.xlu1 %v4555_v63  ;;  %v13382_v31 = vld [vmem:[#allocation27_spill] sm:$0xff]  ;;  %v10991_v3 = vpop.xlane.xlu0 %4670  ;;  %v13387_v12 = vld [vmem:[#allocation37_spill] sm:$0xff]  ;;  %v13389_v46 = vld [vmem:[#allocation38_spill] sm:$0xff] }
 0x348   : > { %7031 = vpow2.f32 %v6045_v11  ;;  %v640_v14 = vmul.f32 %v13323_v20, %v13382_v31  ;;  %v641_v24 = vmul.f32 %v13323_v20, %v13383_v9  ;;  %v3484_v28 = vadd.f32 1.0, %v7016_v62  ;;  %13386 = vst [vmem:[#allocation118_spill] sm:$0xff] %v10991_v3  ;;  %v13388_v37 = vld [vmem:[#allocation119_spill] sm:$0xff] }
 0x349   : > { %v7018_v32 = vpop.eup %7017  ;;  %7033 = vpow2.f32 %v6046_v30  ;;  %v10986_v7 = vadd.f32 %v13277_v55, %v2110_v29  ;;  %v10989_v27 = vadd.f32 %v13277_v55, %v2111_v19  ;;  %v5015_v63 = vadd.s32 4294967264, %v10588_v21  ;;  %v11001_v41 = vpop.xlane.xlu1 %4538 }
 0x34a   : > { %v7020_v52 = vpop.eup %7019  ;;  %v3485_v11 = vadd.f32 1.0, %v7018_v32  ;;  %v1104_v43 = vmul.f32 %v13388_v37, %v13387_v12  ;;  %v1105_v17 = vmul.f32 %v13388_v37, %v13389_v46  ;;  %7035 = vrcp.f32 %v3484_v28  ;;  %13390 = vst [vmem:[#allocation117_spill] sm:$0xff] %v11001_v41  ;;  %v13394_v41 = vld [vmem:[#allocation79_spill] sm:$0xff] }
 0x34b   : > { %13384 = vst [vmem:[#allocation57_spill] sm:$0xff] %v10986_v7  ;;  %13385 = vst [vmem:[#allocation148_spill] sm:$0xff] %v10989_v27  ;;  %v7022_v62 = vpop.eup %7021  ;;  %v4192_v30 = vmul.f32 %v7020_v52, %v10798_v49  ;;  %v5987_v29 = vmul.f32 -1.442695, %v10986_v7  ;;  %v5988_v19 = vmul.f32 -1.442695, %v10989_v27  ;;  %v1824_v58 = vmul.f32 %v13392_v44, %v13391_v10 }
 0x34c   : > { %v7024_v3 = vpop.eup %7023  ;;  %v4193_v16 = vmul.f32 %v7022_v62, %v10807_v40  ;;  %7037 = vrcp.f32 %v3485_v11  ;;  %v1360_v32 = vadd.f32 %v1104_v43, %v640_v14  ;;  %v1361_v55 = vadd.f32 %v1105_v17, %v641_v24  ;;  %v13393_v49 = vld [vmem:[#allocation46_spill] sm:$0xff]  ;;  %v11012_v14 = vpop.xlane.xlu0 %4403  ;;  %v13397_v11 = vld [vmem:[#allocation19_spill] sm:$0xff] }
 0x34d   : > { %v7026_v61 = vpop.eup %7025  ;;  %v3426_v22 = vadd.f32 1.0, %v7024_v3  ;;  %7039 = vpow2.f32 %v5987_v29  ;;  %v1825_v28 = vmul.f32 %v13392_v44, %v13393_v49  ;;  %v730_v27 = vmul.f32 %v13394_v41, %v13245_v59  ;;  %13395 = vst [vmem:[#allocation127_spill] sm:$0xff] %v11012_v14  ;;  %v11014_v24 = vpop.xlane.xlu1 %4628 }
 0x34e   : > { %v4510_v52 = vadd.f32 %v4193_v16, %v4192_v30  ;;  %v3427_v7 = vadd.f32 1.0, %v7026_v61  ;;  %7041 = vpow2.f32 %v5988_v19  ;;  %v2080_v40 = vadd.f32 %v1824_v58, %v1360_v32  ;;  %13396 = vst [vmem:[#allocation122_spill] sm:$0xff] %v11014_v24  ;;  %v13398_v61 = vld [vmem:[#allocation80_spill] sm:$0xff]  ;;  %v13403_v19 = vld [vmem:[#allocation138_spill] sm:$0xff] }
 0x34f   : > { %v7028_v33 = vpop.eup %7027  ;;  %7043 = vrcp.f32 %v3426_v22  ;;  %v2081_v43 = vadd.f32 %v1825_v28, %v1361_v55  ;;  %v731_v17 = vmul.f32 %v13394_v41, %v13309_v54  ;;  %v1194_v62 = vmul.f32 %v13398_v61, %v13310_v48  ;;  %v13399_v58 = vld [vmem:[#allocation20_spill] sm:$0xff] }
 0x350   : > { %v7030_v3 = vpop.eup %7029  ;;  %4511 = vadd.xlane.f32.xlu0 %v4510_v52  ;;  %v4282_v16 = vmul.f32 %v7028_v33, %v13397_v11  ;;  %7045 = vrcp.f32 %v3427_v7  ;;  %v1195_v22 = vmul.f32 %v13398_v61, %v13313_v15  ;;  %v13400_v30 = vld [vmem:[#allocation96_spill] sm:$0xff]  ;;  %v1914_v32 = vmul.f32 %v13403_v19, %v13369_v5 }
 0x351   : > { %v4283_v55 = vmul.f32 %v7030_v3, %v13399_v58  ;;  %v11023_v29 = vadd.f32 %v13400_v30, %v2080_v40  ;;  %v11026_v41 = vadd.f32 %v13400_v30, %v2081_v43  ;;  %v11031_v33 = vsub.s32 %v5015_v63, %v13290_v60  ;;  %v13405_v11 = vld [vmem:[#allocation88_spill] sm:$0xff]  ;;  %v11040_v58 = vpop.xlane.xlu1 %4358 }
 0x352   : > { %v1450_v7 = vadd.f32 %v1194_v62, %v730_v27  ;;  %v1451_v28 = vadd.f32 %v1195_v22, %v731_v17  ;;  %v1915_v52 = vmul.f32 %v13403_v19, %v13371_v0  ;;  %v11036_v61 = vmul.f32 0.00390625, %v13405_v11  ;;  %13406 = vst [vmem:[#allocation62_spill] sm:$0xff] %v11040_v58  ;;  %v13407_v27 = vld [vmem:[#allocation51_spill] sm:$0xff]  ;;  %v13408_v17 = vld [vmem:[#allocation126_spill] sm:$0xff]  ;;  %v13410_v11 = vld [vmem:[#allocation101_spill] sm:$0xff] }
 0x353   : > { %13401 = vst [vmem:[#allocation94_spill] sm:$0xff] %v11023_v29  ;;  %13402 = vst [vmem:[#allocation7_spill] sm:$0xff] %v11026_v41  ;;  %v4645_v3 = vadd.f32 %v4283_v55, %v4282_v16  ;;  %v5957_v40 = vmul.f32 -1.442695, %v11023_v29  ;;  %v5958_v43 = vmul.f32 -1.442695, %v11026_v41  ;;  %v700_v62 = vmul.f32 %v13408_v17, %v13407_v27  ;;  %v11052_v29 = vpop.xlane.xlu0 %4493 }
 0x354   : > { %13404 = vst [vmem:[#allocation61_spill] sm:$0xff] %v11031_v33  ;;  %v2170_v63 = vadd.f32 %v1914_v32, %v1450_v7  ;;  %v2171_v14 = vadd.f32 %v1915_v52, %v1451_v28  ;;  %v13409_v16 = vld [vmem:[#allocation52_spill] sm:$0xff]  ;;  %v13411_v58 = vld [vmem:[#allocation71_spill] sm:$0xff]  ;;  %13412 = vst [vmem:[#allocation124_spill] sm:$0xff] %v11052_v29 }
 0x355   : > { %v7032_v22 = vpop.eup %7031  ;;  %4646 = vadd.xlane.f32.xlu1 %v4645_v3  ;;  %7047 = vpow2.f32 %v5957_v40  ;;  %v701_v55 = vmul.f32 %v13408_v17, %v13409_v16  ;;  %v1164_v41 = vmul.f32 %v13411_v58, %v13410_v11  ;;  %v13413_v28 = vld [vmem:[#allocation139_spill] sm:$0xff]  ;;  %v5019_v3 = vrot.slane %v11036_v61, %v11031_v33  ;;  %v13416_v40 = vld [vmem:[#allocation140_spill] sm:$0xff]  ;;  %v13417_v11 = vld [vmem:[#allocation102_spill] sm:$0xff]  ;;  %v11072_v33 = vpop.xlane.xlu1 %4451 }
 0x356   : > { %v7034_v32 = vpop.eup %7033  ;;  %v3544_v7 = vadd.f32 1.0, %v7032_v22  ;;  %7049 = vpow2.f32 %v5958_v43  ;;  %v11055_v52 = vadd.f32 %v13413_v28, %v2170_v63  ;;  %v11058_v24 = vadd.f32 %v13413_v28, %v2171_v14  ;;  %v13418_v61 = vld [vmem:[#allocation123_spill] sm:$0xff]  ;;  %13419 = vst [vmem:[#allocation8_spill] sm:$0xff] %v11072_v33 }
 0x357   : > { %v11063_v19 = vmul.f32 0.00390625, %v13416_v40  ;;  %v3545_v16 = vadd.f32 1.0, %v7034_v32  ;;  %v1165_v29 = vmul.f32 %v13411_v58, %v13417_v11  ;;  %v7036_v27 = vpop.eup %7035  ;;  %v1420_v22 = vadd.f32 %v1164_v41, %v700_v62 }
 0x358   : > { %13414 = vst [vmem:[#allocation92_spill] sm:$0xff] %v11055_v52  ;;  %13415 = vst [vmem:[#allocation97_spill] sm:$0xff] %v11058_v24  ;;  %7051 = vrcp.f32 %v3544_v7  ;;  %v6047_v43 = vmul.f32 -1.442695, %v11055_v52  ;;  %v6048_v63 = vmul.f32 -1.442695, %v11058_v24  ;;  %v4252_v28 = vmul.f32 %v7036_v27, %v10879_v4  ;;  %v11081_v27 = vpop.xlane.xlu0 %4583 }
 0x359   : > { %v7038_v14 = vpop.eup %7037  ;;  %7053 = vrcp.f32 %v3545_v16  ;;  %v1421_v0 = vadd.f32 %v1165_v29, %v701_v55  ;;  %v1884_v40 = vmul.f32 %v13358_v25, %v13418_v61  ;;  %v13420_v7 = vld [vmem:[#allocation91_spill] sm:$0xff]  ;;  %v672_v41 = vmul.f32 %v13323_v20, %v13349_v18  ;;  %13421 = vst [vmem:[#allocation9_spill] sm:$0xff] %v11081_v27 }
 0x35a   : > { %v7040_v32 = vpop.eup %7039  ;;  %v4253_v11 = vmul.f32 %v7038_v14, %v10890_v56  ;;  %7055 = vpow2.f32 %v6047_v43  ;;  %v1885_v52 = vmul.f32 %v13358_v25, %v13420_v7  ;;  %v673_v29 = vmul.f32 %v13323_v20, %v13351_v47  ;;  %v13454_v27 = vld [vmem:[#allocation91_spill] sm:$0xff] }
 0x35b   : > { %v7042_v62 = vpop.eup %7041  ;;  %v3486_v24 = vadd.f32 1.0, %v7040_v32  ;;  %7057 = vpow2.f32 %v6048_v63  ;;  %v2140_v4 = vadd.f32 %v1884_v40, %v1420_v22  ;;  %v1136_v43 = vmul.f32 %v13388_v37, %v13353_v36  ;;  %v11100_v40 = vpop.xlane.xlu1 %4541 }
 0x35c   : > { %v7044_v16 = vpop.eup %7043  ;;  %v4600_v55 = vadd.f32 %v4253_v11, %v4252_v28  ;;  %v3487_v33 = vadd.f32 1.0, %v7042_v62  ;;  %v2141_v56 = vadd.f32 %v1885_v52, %v1421_v0  ;;  %v1137_v63 = vmul.f32 %v13388_v37, %v13356_v38  ;;  %13422 = vst [vmem:[#allocation98_spill] sm:$0xff] %v11100_v40  ;;  %v13450_v40 = vld [vmem:[#allocation102_spill] sm:$0xff] }
 0x35d   : > { %v7046_v14 = vpop.eup %7045  ;;  %v4194_v7 = vmul.f32 %v7044_v16, %v10904_v39  ;;  %7059 = vrcp.f32 %v3486_v24  ;;  %v11087_v32 = vadd.f32 %v13361_v50, %v2140_v4  ;;  %v1392_v0 = vadd.f32 %v1136_v43, %v672_v41  ;;  %v11117_v43 = vpop.xlane.xlu0 %4673 }
 0x35e   : > { %4601 = vadd.xlane.f32.xlu0 %v4600_v55  ;;  %v4195_v22 = vmul.f32 %v7046_v14, %v10909_v42  ;;  %7061 = vrcp.f32 %v3487_v33  ;;  %v11093_v11 = vadd.f32 %v13361_v50, %v2141_v56  ;;  %v1393_v28 = vadd.f32 %v1137_v63, %v673_v29  ;;  %13425 = vst [vmem:[#allocation10_spill] sm:$0xff] %v11117_v43 }
 0x35f   : > { %v6017_v52 = vmul.f32 -1.442695, %v11087_v32  ;;  %v1856_v39 = vmul.f32 %v13392_v44, %v13357_v34  ;;  %v1857_v24 = vmul.f32 %v13392_v44, %v13359_v35  ;;  %v13423_v42 = vrot.slane %v10914_v8, %v10901_v26 }
 0x360   : > { %v5195_v41 = vrot.slane %v11063_v19, %v10901_v26  ;;  %v4513_v62 = vadd.f32 %v4195_v22, %v4194_v7  ;;  %v6018_v4 = vmul.f32 -1.442695, %v11093_v11  ;;  %v13424_v29 = vrot.slane %v10973_v45, %v10901_v26 }
 0x361   : > { %v11107_v33 = vsel %vm5013_vm2, %v13423_v42, %v10886_v13  ;;  %7063 = vpow2.f32 %v6017_v52  ;;  %v2112_v55 = vadd.f32 %v1856_v39, %v1392_v0  ;;  %v2113_v56 = vadd.f32 %v1857_v24, %v1393_v28 }
 0x362   : > { %v5014_v16 = vsel %vm5013_vm2, %v13424_v29, %v10958_v57  ;;  %v7048_v8 = vpop.eup %7047  ;;  %v13426_v13 = vrot.slane %v10979_v23, %v10768_v51  ;;  %v5022_v14 = vadd.s32 4294967256, %v10588_v21  ;;  %4514 = vadd.xlane.f32.xlu1 %v4513_v62  ;;  %7065 = vpow2.f32 %v6018_v4 }
 0x363   : > { %v11125_v7 = vsel %vm5020_vm3, %v5019_v3, %v5014_v16  ;;  %v7050_v57 = vpop.eup %7049  ;;  %v3456_v45 = vadd.f32 1.0, %v7048_v8  ;;  %v11129_v63 = vadd.f32 %v13400_v30, %v2112_v55  ;;  %v11132_v22 = vadd.f32 %v13400_v30, %v2113_v56  ;;  %v13427_v3 = vld [vmem:[#allocation104_spill] sm:$0xff]  ;;  %v13429_v55 = vld [vmem:[#allocation43_spill] sm:$0xff] }
 0x364   : > { %v5191_v19 = vsel %vm5006_vm1, %v13426_v13, %v10967_v53  ;;  %v642_v23 = vmul.f32 %v13232_v1, %v13382_v31  ;;  %v11140_v0 = vmul.f32 0.00390625, %v13427_v3  ;;  %v3457_v52 = vadd.f32 1.0, %v7050_v57  ;;  %v11148_v31 = vpop.xlane.xlu1 %4631  ;;  %v13430_v13 = vld [vmem:[#allocation93_spill] sm:$0xff] }
 0x365   : > { %v11137_v53 = vsel %vm5013_vm2, %v5195_v41, %v5191_v19  ;;  %v643_v28 = vmul.f32 %v13232_v1, %v13383_v9  ;;  %v7052_v39 = vpop.eup %7051  ;;  %7067 = vrcp.f32 %v3456_v45  ;;  %v5989_v24 = vmul.f32 -1.442695, %v11129_v63  ;;  %13428 = vst [vmem:[#allocation29_spill] sm:$0xff] %v11148_v31  ;;  %v11159_v19 = vpop.xlane.xlu0 %4406 }
 0x366   : > { %v5990_v42 = vmul.f32 -1.442695, %v11132_v22  ;;  %v1106_v62 = vmul.f32 %v13235_v6, %v13387_v12  ;;  %v7054_v41 = vpop.eup %7053  ;;  %v11151_v4 = vsub.s32 %v5022_v14, %v13290_v60  ;;  %v4312_v29 = vmul.f32 %v7052_v39, %v10947_v2  ;;  %13431 = vst [vmem:[#allocation30_spill] sm:$0xff] %v11159_v19  ;;  %v13453_v19 = vld [vmem:[#allocation144_spill] sm:$0xff] }
 0x367   : > { %7069 = vrcp.f32 %v3457_v52  ;;  %v1107_v9 = vmul.f32 %v13235_v6, %v13389_v46  ;;  %v7056_v16 = vpop.eup %7055  ;;  %v4313_v56 = vmul.f32 %v7054_v41, %v13429_v55  ;;  %v1826_v12 = vmul.f32 %v13430_v13, %v13391_v10  ;;  %v13435_v55 = vld [vmem:[#allocation148_spill] sm:$0xff] }
 0x368   : > { %7071 = vpow2.f32 %v5989_v24  ;;  %v1362_v8 = vadd.f32 %v1106_v62, %v642_v23  ;;  %v7058_v57 = vpop.eup %7057  ;;  %v3546_v45 = vadd.f32 1.0, %v7056_v16  ;;  %v1827_v2 = vmul.f32 %v13430_v13, %v13393_v49  ;;  %v13433_v49 = vld [vmem:[#allocation78_spill] sm:$0xff]  ;;  %v11175_v16 = vpop.xlane.xlu1 %4361 }
 0x369   : > { %7073 = vpow2.f32 %v5990_v42  ;;  %v1363_v14 = vadd.f32 %v1107_v9, %v643_v28  ;;  %v4690_v3 = vadd.f32 %v4313_v56, %v4312_v29  ;;  %v3547_v52 = vadd.f32 1.0, %v7058_v57  ;;  %v13432_v28 = vld [vmem:[#allocation57_spill] sm:$0xff]  ;;  %13434 = vst [vmem:[#allocation129_spill] sm:$0xff] %v11175_v16 }
 0x36a   : > { %v2082_v46 = vadd.f32 %v1826_v12, %v1362_v8  ;;  %v732_v39 = vmul.f32 %v13408_v17, %v13245_v59  ;;  %v7060_v24 = vpop.eup %7059  ;;  %7075 = vrcp.f32 %v3546_v45  ;;  %v733_v10 = vmul.f32 %v13408_v17, %v13309_v54  ;;  %v13436_v57 = vld [vmem:[#allocation125_spill] sm:$0xff] }
 0x36b   : > { %v2083_v23 = vadd.f32 %v1827_v2, %v1363_v14  ;;  %v1196_v62 = vmul.f32 %v13411_v58, %v13310_v48  ;;  %v7062_v42 = vpop.eup %7061  ;;  %4691 = vadd.xlane.f32.xlu0 %v4690_v3  ;;  %v4254_v41 = vmul.f32 %v7060_v24, %v13432_v28  ;;  %7077 = vrcp.f32 %v3547_v52  ;;  %v13437_v3 = vld [vmem:[#allocation146_spill] sm:$0xff]  ;;  %v11189_v52 = vpop.xlane.xlu0 %4496  ;;  %v13439_v24 = vld [vmem:[#allocation109_spill] sm:$0xff] }
 0x36c   : > { %v11171_v29 = vadd.f32 %v13433_v49, %v2082_v46  ;;  %v1197_v9 = vmul.f32 %v13411_v58, %v13313_v15  ;;  %v4255_v56 = vmul.f32 %v7062_v42, %v13435_v55  ;;  %v1916_v12 = vmul.f32 %v13358_v25, %v13369_v5  ;;  %13438 = vst [vmem:[#allocation72_spill] sm:$0xff] %v11189_v52  ;;  %v13440_v55 = vld [vmem:[#allocation61_spill] sm:$0xff] }
 0x36d   : > { %v11179_v17 = vadd.f32 %v13433_v49, %v2083_v23  ;;  %v1452_v8 = vadd.f32 %v1196_v62, %v732_v39  ;;  %v11184_v45 = vmul.f32 0.00390625, %v13436_v57  ;;  %v1917_v58 = vmul.f32 %v13358_v25, %v13437_v3 }
 0x36e   : > { %v5959_v14 = vmul.f32 -1.442695, %v11171_v29  ;;  %v1453_v2 = vadd.f32 %v1197_v9, %v733_v10  ;;  %v7064_v46 = vpop.eup %7063  ;;  %v11192_v42 = vmul.f32 0.00390625, %v13439_v24  ;;  %v4603_v23 = vadd.f32 %v4255_v56, %v4254_v41  ;;  %v13446_v24 = vld [vmem:[#allocation52_spill] sm:$0xff] }
 0x36f   : > { %v5960_v39 = vmul.f32 -1.442695, %v11179_v17  ;;  %v2172_v62 = vadd.f32 %v1916_v12, %v1452_v8  ;;  %v7066_v28 = vpop.eup %7065  ;;  %v5121_v57 = vrot.slane %v11140_v0, %v13440_v55  ;;  %v3516_v31 = vadd.f32 1.0, %v7064_v46  ;;  %v13443_v8 = vld [vmem:[#allocation51_spill] sm:$0xff]  ;;  %v13444_v12 = vld [vmem:[#allocation85_spill] sm:$0xff]  ;;  %v11207_v46 = vpop.xlane.xlu1 %4454 }
 0x370   : > { %7079 = vpow2.f32 %v5959_v14  ;;  %v2173_v10 = vadd.f32 %v1917_v58, %v1453_v2  ;;  %4604 = vadd.xlane.f32.xlu1 %v4603_v23  ;;  %v3517_v25 = vadd.f32 1.0, %v7066_v28  ;;  %v5026_v41 = vrot.slane %v11184_v45, %v11151_v4  ;;  %13445 = vst [vmem:[#allocation17_spill] sm:$0xff] %v11207_v46  ;;  %v13449_v28 = vld [vmem:[#allocation86_spill] sm:$0xff]  ;;  %v11220_v46 = vpop.xlane.xlu0 %4586 }
 0x371   : > { %7081 = vpow2.f32 %v5960_v39  ;;  %v11198_v9 = vadd.f32 %v13361_v50, %v2172_v62  ;;  %v702_v0 = vmul.f32 %v13444_v12, %v13443_v8  ;;  %v5200_v2 = vrot.slane %v11192_v42, %v13440_v55  ;;  %v13448_v62 = vld [vmem:[#allocation101_spill] sm:$0xff]  ;;  %13451 = vst [vmem:[#allocation147_spill] sm:$0xff] %v11220_v46 }
 0x372   : > { %7083 = vrcp.f32 %v3516_v31  ;;  %v11203_v56 = vadd.f32 %v13361_v50, %v2173_v10  ;;  %v7068_v14 = vpop.eup %7067  ;;  %v703_v23 = vmul.f32 %v13444_v12, %v13446_v24  ;;  %v13447_v31 = vld [vmem:[#allocation94_spill] sm:$0xff]  ;;  %v1166_v10 = vmul.f32 %v13449_v28, %v13448_v62 }
 0x373   : > { %13441 = vst [vmem:[#allocation64_spill] sm:$0xff] %v11198_v9  ;;  %7085 = vrcp.f32 %v3517_v25  ;;  %v6049_v58 = vmul.f32 -1.442695, %v11198_v9  ;;  %v4224_v39 = vmul.f32 %v7068_v14, %v13447_v31  ;;  %v1167_v52 = vmul.f32 %v13449_v28, %v13450_v40  ;;  %v13452_v25 = vld [vmem:[#allocation7_spill] sm:$0xff]  ;;  %v11233_v5 = vpop.xlane.xlu1 %4544 }
 0x374   : > { %13442 = vst [vmem:[#allocation76_spill] sm:$0xff] %v11203_v56  ;;  %v7070_v45 = vpop.eup %7069  ;;  %v6050_v50 = vmul.f32 -1.442695, %v11203_v56  ;;  %v1886_v43 = vmul.f32 %v13453_v19, %v13418_v61  ;;  %v1887_v14 = vmul.f32 %v13453_v19, %v13454_v27  ;;  %v1422_v26 = vadd.f32 %v1166_v10, %v702_v0  ;;  %13455 = vst [vmem:[#allocation21_spill] sm:$0xff] %v11233_v5  ;;  %v13468_v5 = vld [vmem:[#allocation146_spill] sm:$0xff] }
 0x375   : > { %v7072_v42 = vpop.eup %7071  ;;  %v4225_v16 = vmul.f32 %v7070_v45, %v13452_v25  ;;  %7087 = vpow2.f32 %v6049_v58  ;;  %v1423_v51 = vadd.f32 %v1167_v52, %v703_v23  ;;  %v704_v46 = vmul.f32 %v13323_v20, %v13443_v8  ;;  %v13456_v52 = vld [vmem:[#allocation92_spill] sm:$0xff] }
 0x376   : > { %v7074_v31 = vpop.eup %7073  ;;  %v3488_v55 = vadd.f32 1.0, %v7072_v42  ;;  %7089 = vpow2.f32 %v6050_v50  ;;  %v705_v45 = vmul.f32 %v13323_v20, %v13446_v24  ;;  %v2142_v25 = vadd.f32 %v1886_v43, %v1422_v26  ;;  %v13458_v26 = vld [vmem:[#allocation95_spill] sm:$0xff]  ;;  %v11247_v42 = vpop.xlane.xlu0 %4676 }
 0x377   : > { %v4558_v56 = vadd.f32 %v4225_v16, %v4224_v39  ;;  %v3489_v9 = vadd.f32 1.0, %v7074_v31  ;;  %v7076_v58 = vpop.eup %7075  ;;  %v2143_v3 = vadd.f32 %v1887_v14, %v1423_v51  ;;  %v1168_v19 = vmul.f32 %v13388_v37, %v13448_v62  ;;  %v13457_v39 = vld [vmem:[#allocation97_spill] sm:$0xff] }
 0x378   : > { %7091 = vrcp.f32 %v3488_v55  ;;  %v7078_v50 = vpop.eup %7077  ;;  %v4314_v16 = vmul.f32 %v7076_v58, %v13456_v52  ;;  %v1169_v0 = vmul.f32 %v13388_v37, %v13450_v40  ;;  %v1888_v23 = vmul.f32 %v13392_v44, %v13418_v61 }
 0x379   : > { %4559 = vadd.xlane.f32.xlu0 %v4558_v56  ;;  %7093 = vrcp.f32 %v3489_v9  ;;  %v4315_v55 = vmul.f32 %v7078_v50, %v13457_v39  ;;  %v11242_v51 = vadd.f32 %v13458_v26, %v2142_v25  ;;  %v11245_v43 = vadd.f32 %v13458_v26, %v2143_v3  ;;  %v11275_v39 = vpop.xlane.xlu1 %4634 }
 0x37a   : > { %v1424_v10 = vadd.f32 %v1168_v19, %v704_v46  ;;  %v11251_v9 = vsel %vm5020_vm3, %v5121_v57, %v11107_v33  ;;  %v11255_v56 = vsel %vm5027_vm4, %v5026_v41, %v11125_v7  ;;  %v1425_v14 = vadd.f32 %v1169_v0, %v705_v45  ;;  %v13459_v33 = vld [vmem:[#allocation111_spill] sm:$0xff]  ;;  %v13460_v7 = vld [vmem:[#allocation89_spill] sm:$0xff]  ;;  %13461 = vst [vmem:[#allocation22_spill] sm:$0xff] %v11275_v39 }
 0x37b   : > { %v1889_v31 = vmul.f32 %v13392_v44, %v13454_v27  ;;  %v4693_v58 = vadd.f32 %v4315_v55, %v4314_v16  ;;  %v6019_v25 = vmul.f32 -1.442695, %v11242_v51  ;;  %v6020_v3 = vmul.f32 -1.442695, %v11245_v43 }
 0x37c   : > { %v2144_v19 = vadd.f32 %v1888_v23, %v1424_v10  ;;  %v11263_v50 = vsel %vm5020_vm3, %v5200_v2, %v11137_v53  ;;  %v11266_v57 = vmul.f32 0.00390625, %v13459_v33  ;;  %v11269_v41 = vmul.f32 0.00390625, %v13460_v7 }
 0x37d   : > { %v7080_v46 = vpop.eup %7079  ;;  %v2145_v45 = vadd.f32 %v1889_v31, %v1425_v14  ;;  %v5029_v16 = vadd.s32 4294967248, %v10588_v21  ;;  %4694 = vadd.xlane.f32.xlu1 %v4693_v58  ;;  %7095 = vpow2.f32 %v6019_v25  ;;  %v674_v10 = vmul.f32 %v13232_v1, %v13349_v18 }
 0x37e   : > { %v7082_v52 = vpop.eup %7081  ;;  %v3458_v0 = vadd.f32 1.0, %v7080_v46  ;;  %v11273_v23 = vadd.f32 %v13400_v30, %v2144_v19  ;;  %7097 = vpow2.f32 %v6020_v3  ;;  %v675_v25 = vmul.f32 %v13232_v1, %v13351_v47  ;;  %v11286_v19 = vpop.xlane.xlu0 %4409 }
 0x37f   : > { %v7084_v53 = vpop.eup %7083  ;;  %v3459_v2 = vadd.f32 1.0, %v7082_v52  ;;  %v11278_v55 = vadd.f32 %v13400_v30, %v2145_v45  ;;  %v1138_v33 = vmul.f32 %v13235_v6, %v13353_v36  ;;  %v1858_v7 = vmul.f32 %v13430_v13, %v13357_v34 }
 0x380   : > { %v7086_v14 = vpop.eup %7085  ;;  %v4284_v31 = vmul.f32 %v7084_v53, %v11087_v32  ;;  %7099 = vrcp.f32 %v3458_v0  ;;  %v6021_v58 = vmul.f32 -1.442695, %v11273_v23  ;;  %v1139_v32 = vmul.f32 %v13235_v6, %v13356_v38  ;;  %v11302_v38 = vpop.xlane.xlu1 %4364 }
 0x381   : > { %v4285_v46 = vmul.f32 %v7086_v14, %v11093_v11  ;;  %7101 = vrcp.f32 %v3459_v2  ;;  %v6022_v3 = vmul.f32 -1.442695, %v11278_v55  ;;  %v1859_v47 = vmul.f32 %v13430_v13, %v13359_v35 }
 0x382   : > { %v7088_v18 = vpop.eup %7087  ;;  %7103 = vpow2.f32 %v6021_v58  ;;  %v1394_v0 = vadd.f32 %v1138_v33, %v674_v10  ;;  %v1395_v2 = vadd.f32 %v1139_v32, %v675_v25  ;;  %v706_v36 = vmul.f32 %v13232_v1, %v13443_v8 }
 0x383   : > { %v7090_v45 = vpop.eup %7089  ;;  %v4648_v52 = vadd.f32 %v4285_v46, %v4284_v31  ;;  %v3548_v11 = vadd.f32 1.0, %v7088_v18  ;;  %7105 = vpow2.f32 %v6022_v3  ;;  %v707_v14 = vmul.f32 %v13232_v1, %v13446_v24  ;;  %v11311_v46 = vpop.xlane.xlu0 %4499 }
 0x384   : > { %v3549_v53 = vadd.f32 1.0, %v7090_v45  ;;  %v2114_v34 = vadd.f32 %v1858_v7, %v1394_v0  ;;  %v1170_v35 = vmul.f32 %v13235_v6, %v13448_v62  ;;  %v1171_v10 = vmul.f32 %v13235_v6, %v13450_v40  ;;  %v13462_v40 = vld [vmem:[#allocation112_spill] sm:$0xff] }
 0x385   : > { %v7092_v58 = vpop.eup %7091  ;;  %4649 = vadd.xlane.f32.xlu0 %v4648_v52  ;;  %7107 = vrcp.f32 %v3548_v11  ;;  %v2115_v8 = vadd.f32 %v1859_v47, %v1395_v2  ;;  %v1890_v24 = vmul.f32 %v13430_v13, %v13418_v61  ;;  %v11320_v32 = vmul.f32 0.00390625, %v13462_v40  ;;  %v13463_v47 = vld [vmem:[#allocation53_spill] sm:$0xff]  ;;  %v13467_v45 = vld [vmem:[#allocation144_spill] sm:$0xff] }
 0x386   : > { %v7094_v31 = vpop.eup %7093  ;;  %v4256_v25 = vmul.f32 %v7092_v58, %v11129_v63  ;;  %7109 = vrcp.f32 %v3549_v53  ;;  %v11317_v62 = vadd.f32 %v13433_v49, %v2114_v34  ;;  %v1426_v18 = vadd.f32 %v1170_v35, %v706_v36 }
 0x387   : > { %v4257_v33 = vmul.f32 %v7094_v31, %v11132_v22  ;;  %v11323_v63 = vadd.f32 %v13433_v49, %v2115_v8  ;;  %v1427_v7 = vadd.f32 %v1171_v10, %v707_v14  ;;  %v1891_v61 = vmul.f32 %v13430_v13, %v13454_v27  ;;  %v11336_v14 = vpop.xlane.xlu1 %4457  ;;  %v13464_v10 = vld [vmem:[#allocation106_spill] sm:$0xff] }
 0x388   : > { %v5991_v22 = vmul.f32 -1.442695, %v11317_v62  ;;  %v2146_v11 = vadd.f32 %v1890_v24, %v1426_v18  ;;  %v11331_v0 = vsub.s32 %v5029_v16, %v13290_v60  ;;  %v734_v36 = vmul.f32 %v13444_v12, %v13245_v59  ;;  %v11351_v24 = vpop.xlane.xlu0 %4589  ;;  %v13465_v18 = vld [vmem:[#allocation121_spill] sm:$0xff] }
 0x389   : > { %v4606_v52 = vadd.f32 %v4257_v33, %v4256_v25  ;;  %v5992_v53 = vmul.f32 -1.442695, %v11323_v63  ;;  %v2147_v2 = vadd.f32 %v1891_v61, %v1427_v7  ;;  %v735_v34 = vmul.f32 %v13444_v12, %v13309_v54 }
 0x38a   : > { %v7096_v58 = vpop.eup %7095  ;;  %7111 = vpow2.f32 %v5991_v22  ;;  %v11339_v27 = vadd.f32 %v13433_v49, %v2146_v11  ;;  %v1198_v16 = vmul.f32 %v13449_v28, %v13310_v48  ;;  %v11346_v31 = vmul.f32 0.00390625, %v13464_v10 }
 0x38b   : > { %4607 = vadd.xlane.f32.xlu1 %v4606_v52  ;;  %v7098_v35 = vpop.eup %7097  ;;  %v3518_v25 = vadd.f32 1.0, %v7096_v58  ;;  %7113 = vpow2.f32 %v5992_v53  ;;  %v11349_v8 = vadd.f32 %v13433_v49, %v2147_v2  ;;  %v11354_v40 = vmul.f32 0.00390625, %v13465_v18  ;;  %v13466_v18 = vld [vmem:[#allocation75_spill] sm:$0xff] }
 0x38c   : > { %v3519_v7 = vadd.f32 1.0, %v7098_v35  ;;  %v6023_v12 = vmul.f32 -1.442695, %v11339_v27  ;;  %v1199_v61 = vmul.f32 %v13449_v28, %v13313_v15  ;;  %v1454_v53 = vadd.f32 %v1198_v16, %v734_v36 }
 0x38d   : > { %v7100_v33 = vpop.eup %7099  ;;  %7115 = vrcp.f32 %v3518_v25  ;;  %v6024_v11 = vmul.f32 -1.442695, %v11349_v8  ;;  %v1918_v35 = vmul.f32 %v13467_v45, %v13466_v18  ;;  %v1919_v28 = vmul.f32 %v13467_v45, %v13468_v5  ;;  %v11368_v25 = vpop.xlane.xlu1 %4547 }
 0x38e   : > { %v7102_v52 = vpop.eup %7101  ;;  %v4226_v22 = vmul.f32 %v7100_v33, %v11171_v29  ;;  %7117 = vrcp.f32 %v3519_v7  ;;  %v1455_v10 = vadd.f32 %v1199_v61, %v735_v34  ;;  %v738_v29 = vmul.f32 %v13232_v1, %v13245_v59  ;;  %13469 = vst [vmem:[#allocation25_spill] sm:$0xff] %v11368_v25  ;;  %v11374_v61 = vpop.xlane.xlu0 %4679 }
 0x38f   : > { %v7104_v2 = vpop.eup %7103  ;;  %v4227_v58 = vmul.f32 %v7102_v52, %v11179_v17  ;;  %7119 = vpow2.f32 %v6023_v12  ;;  %v2174_v17 = vadd.f32 %v1918_v35, %v1454_v53  ;;  %v739_v7 = vmul.f32 %v13232_v1, %v13309_v54  ;;  %v13470_v52 = vld [vmem:[#allocation64_spill] sm:$0xff] }
 0x390   : > { %v7106_v3 = vpop.eup %7105  ;;  %v3520_v39 = vadd.f32 1.0, %v7104_v2  ;;  %7121 = vpow2.f32 %v6024_v11  ;;  %v2175_v34 = vadd.f32 %v1919_v28, %v1455_v10  ;;  %v1202_v12 = vmul.f32 %v13235_v6, %v13310_v48  ;;  %v13472_v10 = vld [vmem:[#allocation23_spill] sm:$0xff] }
 0x391   : > { %v4561_v36 = vadd.f32 %v4227_v58, %v4226_v22  ;;  %v3521_v16 = vadd.f32 1.0, %v7106_v3  ;;  %v11378_v3 = vadd.f32 %v13458_v26, %v2174_v17  ;;  %v13471_v22 = vld [vmem:[#allocation76_spill] sm:$0xff]  ;;  %v1922_v58 = vmul.f32 %v13430_v13, %v13466_v18 }
 0x392   : > { %v7108_v33 = vpop.eup %7107  ;;  %7123 = vrcp.f32 %v3520_v39  ;;  %v1203_v39 = vmul.f32 %v13235_v6, %v13313_v15  ;;  %v11384_v1 = vadd.f32 %v13458_v26, %v2175_v34  ;;  %v1458_v53 = vadd.f32 %v1202_v12, %v738_v29  ;;  %v11401_v34 = vpop.xlane.xlu1 %4637 }
 0x393   : > { %v7110_v45 = vpop.eup %7109  ;;  %4562 = vadd.xlane.f32.xlu0 %v4561_v36  ;;  %v4316_v2 = vmul.f32 %v7108_v33, %v13470_v52  ;;  %7125 = vrcp.f32 %v3521_v16  ;;  %v5422_v35 = vrot.slane %v11320_v32, %v13472_v10  ;;  %v6051_v28 = vmul.f32 -1.442695, %v11378_v3  ;;  %13474 = vst [vmem:[#allocation26_spill] sm:$0xff] %v11401_v34  ;;  %v13479_v34 = vld [vmem:[#allocation24_spill] sm:$0xff] }
 0x394   : > { %v4317_v11 = vmul.f32 %v7110_v45, %v13471_v22  ;;  %v1459_v36 = vadd.f32 %v1203_v39, %v739_v7  ;;  %v1923_v16 = vmul.f32 %v13430_v13, %v13468_v5  ;;  %v13473_v6 = vrot.slane %v11266_v57, %v11151_v4  ;;  %v13476_v13 = vld [vmem:[#allocation63_spill] sm:$0xff] }
 0x395   : > { %v6052_v17 = vmul.f32 -1.442695, %v11384_v1  ;;  %v2178_v33 = vadd.f32 %v1922_v58, %v1458_v53  ;;  %v13475_v32 = vrot.slane %v11269_v41, %v13463_v47  ;;  %v11410_v12 = vmul.f32 0.00390625, %v13476_v13  ;;  %v13477_v58 = vld [vmem:[#allocation128_spill] sm:$0xff] }
 0x396   : > { %v11398_v26 = vsel %vm5027_vm4, %v13473_v6, %v11251_v9  ;;  %v4696_v29 = vadd.f32 %v4317_v11, %v4316_v2  ;;  %7127 = vpow2.f32 %v6051_v28  ;;  %v2179_v57 = vadd.f32 %v1923_v16, %v1459_v36  ;;  %v11419_v2 = vpop.xlane.xlu0 %4412 }
 0x397   : > { %v11407_v7 = vsel %vm4999_vm0, %v5422_v35, %v13475_v32  ;;  %v7112_v9 = vpop.eup %7111  ;;  %v5131_v45 = vrot.slane %v11346_v31, %v11331_v0  ;;  %v5033_v52 = vrot.slane %v11354_v40, %v11331_v0  ;;  %7129 = vpow2.f32 %v6052_v17 }
 0x398   : > { %4697 = vadd.xlane.f32.xlu1 %v4696_v29  ;;  %v11417_v41 = vadd.f32 %v13433_v49, %v2178_v33  ;;  %v7114_v39 = vpop.eup %7113  ;;  %v5036_v22 = vadd.s32 4294967240, %v10588_v21  ;;  %v3490_v11 = vadd.f32 1.0, %v7112_v9  ;;  %v11423_v53 = vadd.f32 %v13433_v49, %v2179_v57 }
 0x399   : > { %v736_v31 = vmul.f32 %v13323_v20, %v13245_v59  ;;  %v11428_v35 = vmul.f32 0.00390625, %v13477_v58  ;;  %v3491_v40 = vadd.f32 1.0, %v7114_v39  ;;  %v737_v36 = vmul.f32 %v13323_v20, %v13309_v54  ;;  %v11443_v20 = vpop.xlane.xlu1 %4367  ;;  %v13478_v39 = vld [vmem:[#allocation4_spill] sm:$0xff] }
 0x39a   : > { %v6055_v28 = vmul.f32 -1.442695, %v11417_v41  ;;  %v7116_v16 = vpop.eup %7115  ;;  %v5205_v6 = vrot.slane %v11410_v12, %v11151_v4  ;;  %7131 = vrcp.f32 %v3490_v11  ;;  %v6056_v49 = vmul.f32 -1.442695, %v11423_v53 }
 0x39b   : > { %v1200_v29 = vmul.f32 %v13388_v37, %v13310_v48  ;;  %v7118_v59 = vpop.eup %7117  ;;  %v4286_v17 = vmul.f32 %v7116_v16, %v11242_v51  ;;  %7133 = vrcp.f32 %v3491_v40  ;;  %v1201_v33 = vmul.f32 %v13388_v37, %v13313_v15  ;;  %v11451_v37 = vpop.xlane.xlu0 %4502 }
 0x39c   : > { %v1920_v54 = vmul.f32 %v13392_v44, %v13466_v18  ;;  %v7120_v32 = vpop.eup %7119  ;;  %v11446_v13 = vsub.s32 %v5036_v22, %v13290_v60  ;;  %v4287_v12 = vmul.f32 %v7118_v59, %v11245_v43  ;;  %7135 = vpow2.f32 %v6055_v28 }
 0x39d   : > { %v1456_v48 = vadd.f32 %v1200_v29, %v736_v31  ;;  %v7122_v57 = vpop.eup %7121  ;;  %v3522_v9 = vadd.f32 1.0, %v7120_v32  ;;  %7137 = vpow2.f32 %v6056_v49  ;;  %v1457_v51 = vadd.f32 %v1201_v33, %v737_v36  ;;  %v13480_v49 = vld [vmem:[#allocation107_spill] sm:$0xff]  ;;  %v11469_v33 = vpop.xlane.xlu1 %4460 }
 0x39e   : > { %v1921_v15 = vmul.f32 %v13392_v44, %v13468_v5  ;;  %v4732_v11 = vmul.f32 0.00390625, %v13478_v39  ;;  %v4651_v58 = vadd.f32 %v4287_v12, %v4286_v17  ;;  %v3523_v40 = vadd.f32 1.0, %v7122_v57  ;;  %v13484_v39 = vld [vmem:[#allocation60_spill] sm:$0xff] }
 0x39f   : > { %v7124_v18 = vpop.eup %7123  ;;  %v2176_v22 = vadd.f32 %v1920_v54, %v1456_v48  ;;  %v4716_v43 = vmul.f32 0.00390625, %v13479_v34  ;;  %7139 = vrcp.f32 %v3522_v9  ;;  %v4747_v36 = vmul.f32 0.00390625, %v13480_v49  ;;  %v13481_v34 = vld [vmem:[#allocation113_spill] sm:$0xff]  ;;  %v13482_v54 = vld [vmem:[#allocation16_spill] sm:$0xff]  ;;  %v13487_v49 = vld [vmem:[#allocation18_spill] sm:$0xff] }
 0x3a0   : > { %v7126_v16 = vpop.eup %7125  ;;  %v4288_v31 = vmul.f32 %v7124_v18, %v11273_v23  ;;  %v2177_v28 = vadd.f32 %v1921_v15, %v1457_v51  ;;  %4652 = vadd.xlane.f32.xlu0 %v4651_v58  ;;  %7141 = vrcp.f32 %v3523_v40  ;;  %v5132_v29 = vsel %vm5034_vm5, %v5131_v45, %v11398_v26  ;;  %v11479_v45 = vpop.xlane.xlu0 %4592  ;;  %v13483_v15 = vld [vmem:[#allocation115_spill] sm:$0xff] }
 0x3a1   : > { %v4289_v44 = vmul.f32 %v7126_v16, %v11278_v55  ;;  %v11459_v5 = vadd.f32 %v13400_v30, %v2176_v22  ;;  %v5035_v59 = vsel %vm5034_vm5, %v5033_v52, %v11255_v56  ;;  %v4792_v17 = vmul.f32 0.00390625, %v13481_v34  ;;  %v13486_v22 = vld [vmem:[#allocation58_spill] sm:$0xff] }
 0x3a2   : > { %v11467_v23 = vadd.f32 %v13400_v30, %v2177_v28  ;;  %v5427_v55 = vrot.slane %v11428_v35, %v13482_v54  ;;  %v5043_v32 = vadd.s32 4294967232, %v10588_v21  ;;  %v5206_v26 = vsel %vm5027_vm4, %v5205_v6, %v11263_v50 }
 0x3a3   : > { %v4654_v12 = vadd.f32 %v4289_v44, %v4288_v31  ;;  %v6053_v48 = vmul.f32 -1.442695, %v11459_v5  ;;  %v7128_v57 = vpop.eup %7127  ;;  %v5136_v56 = vrot.slane %v4732_v11, %v11446_v13  ;;  %v5040_v9 = vrot.slane %v4716_v43, %v11446_v13  ;;  %v13485_v11 = vld [vmem:[#allocation32_spill] sm:$0xff]  ;;  %v11494_v44 = vpop.xlane.xlu1 %4550 }
 0x3a4   : > { %v6054_v30 = vmul.f32 -1.442695, %v11467_v23  ;;  %v7130_v52 = vpop.eup %7129  ;;  %v5210_v35 = vrot.slane %v4747_v36, %v11331_v0  ;;  %v3550_v51 = vadd.f32 1.0, %v7128_v57  ;;  %v5432_v18 = vrot.slane %v4792_v17, %v13483_v15  ;;  %13488 = vst [vmem:[#allocation39_spill] sm:$0xff] %v11494_v44 }
 0x3a5   : > { %4655 = vadd.xlane.f32.xlu1 %v4654_v12  ;;  %7143 = vpow2.f32 %v6053_v48  ;;  %v4821_v58 = vmul.f32 0.00390625, %v13484_v39  ;;  %v3551_v50 = vadd.f32 1.0, %v7130_v52  ;;  %v11486_v6 = vsub.s32 %v5043_v32, %v13290_v60  ;;  %v13489_v32 = vld [vmem:[#allocation15_spill] sm:$0xff] }
 0x3a6   : > { %7145 = vpow2.f32 %v6054_v30  ;;  %v4717_v40 = vmul.f32 0.00390625, %v13485_v11  ;;  %v4822_v16 = vmul.f32 0.00390625, %v13486_v22  ;;  %v5428_v31 = vsel %vm5006_vm1, %v5427_v55, %v11407_v7  ;;  %v13490_v11 = vld [vmem:[#allocation59_spill] sm:$0xff] }
 0x3a7   : > { %7147 = vrcp.f32 %v3550_v51  ;;  %v7132_v43 = vpop.eup %7131  ;;  %v5137_v28 = vsel %vm5041_vm6, %v5136_v56, %v5132_v29  ;;  %v4748_v36 = vmul.f32 0.00390625, %v13487_v49  ;;  %v5042_v17 = vsel %vm5041_vm6, %v5040_v9, %v5035_v59  ;;  %v11506_v56 = vpop.xlane.xlu0 %4682 }
 0x3a8   : > { %7149 = vrcp.f32 %v3551_v50  ;;  %v7134_v34 = vpop.eup %7133  ;;  %v4733_v12 = vmul.f32 0.00390625, %v13489_v32  ;;  %v5050_v48 = vadd.s32 4294967224, %v10588_v21  ;;  %v4258_v57 = vmul.f32 %v7132_v43, %v11317_v62  ;;  %v13494_v32 = vld [vmem:[#allocation35_spill] sm:$0xff] }
 0x3a9   : > { %v7136_v30 = vpop.eup %7135  ;;  %v5211_v52 = vsel %vm5034_vm5, %v5210_v35, %v5206_v26  ;;  %v11502_v7 = vsel %vm5013_vm2, %v5432_v18, %v5428_v31  ;;  %v5576_v29 = vrot.slane %v4821_v58, %v13463_v47  ;;  %v4259_v55 = vmul.f32 %v7134_v34, %v11323_v63  ;;  %v11520_v34 = vpop.xlane.xlu1 %4640 }
 0x3aa   : > { %v7138_v51 = vpop.eup %7137  ;;  %v5047_v59 = vrot.slane %v4717_v40, %v11486_v6  ;;  %v5580_v9 = vrot.slane %v4822_v16, %v13472_v10  ;;  %v3554_v39 = vadd.f32 1.0, %v7136_v30  ;;  %v5215_v62 = vrot.slane %v4748_v36, %v11446_v13  ;;  %v13491_v40 = vld [vmem:[#allocation54_spill] sm:$0xff]  ;;  %v13492_v16 = vld [vmem:[#allocation36_spill] sm:$0xff]  ;;  %13493 = vst [vmem:[#allocation40_spill] sm:$0xff] %v11520_v34 }
 0x3ab   : > { %v4609_v50 = vadd.f32 %v4259_v55, %v4258_v57  ;;  %v3555_v26 = vadd.f32 1.0, %v7138_v51  ;;  %v5057_v35 = vadd.s32 4294967216, %v10588_v21  ;;  %v5141_v58 = vrot.slane %v4733_v12, %v11486_v6  ;;  %v13495_v12 = vld [vmem:[#allocation65_spill] sm:$0xff] }
 0x3ac   : > { %v7140_v18 = vpop.eup %7139  ;;  %v4793_v63 = vmul.f32 0.00390625, %v13490_v11  ;;  %v11515_v22 = vsub.s32 %v5050_v48, %v13290_v60  ;;  %7151 = vrcp.f32 %v3554_v39  ;;  %v4718_v31 = vmul.f32 0.00390625, %v13491_v40  ;;  %v13496_v48 = vld [vmem:[#allocation137_spill] sm:$0xff] }
 0x3ad   : > { %v7142_v43 = vpop.eup %7141  ;;  %v4823_v49 = vmul.f32 0.00390625, %v13492_v16  ;;  %4610 = vadd.xlane.f32.xlu0 %v4609_v50  ;;  %v4290_v36 = vmul.f32 %v7140_v18, %v11339_v27  ;;  %7153 = vrcp.f32 %v3555_v26  ;;  %v4749_v57 = vmul.f32 0.00390625, %v13494_v32  ;;  %v13497_v50 = vld [vmem:[#allocation136_spill] sm:$0xff]  ;;  %v11532_v26 = vpop.xlane.xlu0 %4415 }
 0x3ae   : > { %v4734_v30 = vmul.f32 0.00390625, %v13495_v12  ;;  %v4291_v55 = vmul.f32 %v7142_v43, %v11349_v8  ;;  %v4794_v51 = vmul.f32 0.00390625, %v13496_v48  ;;  %v5049_v39 = vsel %vm5048_vm7, %v5047_v59, %v5042_v17  ;;  %v13498_v12 = vld [vmem:[#allocation118_spill] sm:$0xff]  ;;  %v13499_v48 = vld [vmem:[#allocation61_spill] sm:$0xff] }
 0x3af   : > { %v5581_v11 = vsel %vm4999_vm0, %v5580_v9, %v5576_v29  ;;  %v11529_v40 = vsub.s32 %v5057_v35, %v13290_v60  ;;  %v4719_v27 = vmul.f32 0.00390625, %v13497_v50  ;;  %v5216_v18 = vsel %vm5041_vm6, %v5215_v62, %v5211_v52  ;;  %v11545_v50 = vpop.xlane.xlu1 %4370 }
 0x3b0   : > { %v5142_v16 = vsel %vm5048_vm7, %v5141_v58, %v5137_v28  ;;  %v4657_v32 = vadd.f32 %v4291_v55, %v4290_v36  ;;  %v4824_v8 = vmul.f32 0.00390625, %v13498_v12  ;;  %v5437_v34 = vrot.slane %v4793_v63, %v13499_v48  ;;  %v13500_v63 = vld [vmem:[#allocation44_spill] sm:$0xff]  ;;  %v13502_v12 = vld [vmem:[#allocation9_spill] sm:$0xff] }
 0x3b1   : > { %v5054_v17 = vrot.slane %v4718_v31, %v11515_v22  ;;  %v5585_v29 = vrot.slane %v4823_v49, %v13482_v54  ;;  %v5220_v9 = vrot.slane %v4749_v57, %v11486_v6  ;;  %v5146_v35 = vrot.slane %v4734_v30, %v11515_v22  ;;  %v13501_v30 = vld [vmem:[#allocation127_spill] sm:$0xff] }
 0x3b2   : > { %v7144_v43 = vpop.eup %7143  ;;  %4658 = vadd.xlane.f32.xlu1 %v4657_v32  ;;  %v5442_v52 = vrot.slane %v4794_v51, %v11151_v4  ;;  %v5061_v58 = vrot.slane %v4719_v27, %v11529_v40  ;;  %v4750_v55 = vmul.f32 0.00390625, %v13500_v63  ;;  %v5590_v57 = vrot.slane %v4824_v8, %v13483_v15 }
 0x3b3   : > { %v7146_v59 = vpop.eup %7145  ;;  %v3552_v28 = vadd.f32 1.0, %v7144_v43  ;;  %v4735_v32 = vmul.f32 0.00390625, %v13501_v30  ;;  %v4795_v43 = vmul.f32 0.00390625, %v13502_v12  ;;  %v5064_v27 = vadd.s32 4294967208, %v10588_v21 }
 0x3b4   : > { %v7148_v62 = vpop.eup %7147  ;;  %v3553_v36 = vadd.f32 1.0, %v7146_v59  ;;  %v11553_v59 = vpop.xlane.xlu0 %4505  ;;  %v5438_v63 = vsel %vm5020_vm3, %v5437_v34, %v11502_v7  ;;  %v5056_v44 = vsel %vm5055_vm8, %v5054_v17, %v5049_v39  ;;  %v5221_v8 = vsel %vm5048_vm7, %v5220_v9, %v5216_v18  ;;  %v13504_v18 = vld [vmem:[#allocation62_spill] sm:$0xff]  ;;  %v13505_v17 = vld [vmem:[#allocation147_spill] sm:$0xff] }
 0x3b5   : > { %v7150_v31 = vpop.eup %7149  ;;  %v4318_v49 = vmul.f32 %v7148_v62, %v11378_v3  ;;  %7155 = vrcp.f32 %v3552_v28  ;;  %v5586_v3 = vsel %vm5006_vm1, %v5585_v29, %v5581_v11  ;;  %v5147_v28 = vsel %vm5055_vm8, %v5146_v35, %v5142_v16  ;;  %v11573_v9 = vpop.xlane.xlu1 %4463 }
 0x3b6   : > { %v4319_v51 = vmul.f32 %v7150_v31, %v11384_v1  ;;  %7157 = vrcp.f32 %v3553_v36  ;;  %v5225_v1 = vrot.slane %v4750_v55, %v11515_v22  ;;  %v13503_v36 = vld [vmem:[#allocation10_spill] sm:$0xff]  ;;  %v5443_v30 = vsel %vm5027_vm4, %v5442_v52, %v5438_v63  ;;  %v13506_v52 = vld [vmem:[#allocation8_spill] sm:$0xff] }
 0x3b7   : > { %v4825_v31 = vmul.f32 0.00390625, %v13503_v36  ;;  %v5063_v12 = vsel %vm12444_vm9, %v5061_v58, %v5056_v44  ;;  %v5591_v25 = vsel %vm5013_vm2, %v5590_v57, %v5586_v3  ;;  %v5151_v7 = vrot.slane %v4735_v32, %v11529_v40 }
 0x3b8   : > { %v4699_v62 = vadd.f32 %v4319_v51, %v4318_v49  ;;  %v5447_v39 = vrot.slane %v4795_v43, %v11331_v0  ;;  %v11569_v11 = vsub.s32 %v5064_v27, %v13290_v60  ;;  %v4720_v16 = vmul.f32 0.00390625, %v13504_v18  ;;  %v13507_v43 = vld [vmem:[#allocation30_spill] sm:$0xff]  ;;  %v11587_v63 = vpop.xlane.xlu0 %4595 }
 0x3b9   : > { %v7152_v34 = vpop.eup %7151  ;;  %v4796_v29 = vmul.f32 0.00390625, %v13505_v17  ;;  %v11577_v58 = vmul.f32 0.00390625, %v13506_v52  ;;  %v4826_v55 = vmul.f32 0.00390625, %v11247_v42  ;;  %v4797_v49 = vmul.f32 0.00390625, %v11351_v24  ;;  %v11604_v18 = vpop.xlane.xlu1 %4553  ;;  %v13509_v17 = vld [vmem:[#allocation17_spill] sm:$0xff] }
 0x3ba   : > { %4700 = vadd.xlane.f32.xlu0 %v4699_v62  ;;  %v7154_v35 = vpop.eup %7153  ;;  %v4322_v44 = vmul.f32 %v7152_v34, %v11417_v41  ;;  %v11583_v32 = vsel %vm5055_vm8, %v5225_v1, %v5221_v8  ;;  %v5595_v51 = vrot.slane %v4825_v31, %v13499_v48  ;;  %v4736_v27 = vmul.f32 0.00390625, %v13507_v43  ;;  %v13508_v34 = vld [vmem:[#allocation129_spill] sm:$0xff] }
 0x3bb   : > { %v4323_v57 = vmul.f32 %v7154_v35, %v11423_v53  ;;  %v5152_v41 = vsel %vm12444_vm9, %v5151_v7, %v5147_v28  ;;  %v5071_v3 = vadd.s32 4294967200, %v10588_v21  ;;  %v4827_v42 = vmul.f32 0.00390625, %v11374_v61 }
 0x3bc   : > { %v5448_v24 = vsel %vm5034_vm5, %v5447_v39, %v5443_v30  ;;  %v5068_v53 = vrot.slane %v4720_v16, %v11569_v11  ;;  %v5452_v8 = vrot.slane %v4796_v29, %v11446_v13  ;;  %v5230_v1 = vrot.slane %v11577_v58, %v11529_v40  ;;  %v4852_v58 = vld [vmem:[%s11963_s3 + $0x78] sm:$0xff] }
 0x3bd   : > { %v4705_v62 = vadd.f32 %v4323_v57, %v4322_v44  ;;  %v5600_v36 = vrot.slane %v4826_v55, %v11151_v4  ;;  %v5457_v31 = vrot.slane %v4797_v49, %v11486_v6  ;;  %v5078_v28 = vadd.s32 4294967192, %v10588_v21  ;;  %v11618_v57 = vpop.xlane.xlu0 %4685 }
 0x3be   : > { %v5596_v7 = vsel %vm5020_vm3, %v5595_v51, %v5591_v25  ;;  %v5156_v61 = vrot.slane %v4736_v27, %v11569_v11  ;;  %v4721_v30 = vmul.f32 0.00390625, %v13508_v34  ;;  %v4798_v39 = vmul.f32 0.00390625, %v11479_v45  ;;  %v11643_v34 = vpop.xlane.xlu1 %4643 }
 0x3bf   : > { %4706 = vadd.xlane.f32.xlu1 %v4705_v62  ;;  %v11607_v16 = vsub.s32 %v5071_v3, %v13290_v60  ;;  %v11610_v29 = vmul.f32 0.00390625, %v13509_v17  ;;  %v4737_v35 = vmul.f32 0.00390625, %v11286_v19  ;;  %v5605_v44 = vrot.slane %v4827_v42, %v11331_v0 }
 0x3c0   : > { %v5453_v25 = vsel %vm5041_vm6, %v5452_v8, %v5448_v24  ;;  %v5462_v55 = vrot.slane %v4798_v39, %v11515_v22  ;;  %v5085_v49 = vadd.s32 4294967184, %v10588_v21  ;;  %v4828_v45 = vmul.f32 0.00390625, %v11506_v56 }
 0x3c1   : > { %v5601_v27 = vsel %vm5027_vm4, %v5600_v36, %v5596_v7  ;;  %v5458_v19 = vsel %vm5048_vm7, %v5457_v31, %v5453_v25  ;;  %v11624_v3 = vsub.s32 %v5078_v28, %v13290_v60  ;;  %v4722_v62 = vmul.f32 0.00390625, %v11302_v38 }
 0x3c2   : > { %v7156_v52 = vpop.eup %7155  ;;  %v11629_v24 = vsel %vm5055_vm8, %v5462_v55, %v5458_v19  ;;  %v5610_v56 = vrot.slane %v4828_v45, %v11446_v13  ;;  %v5070_v8 = vsel %vm5069_vm10, %v5068_v53, %v5063_v12  ;;  %v4738_v36 = vmul.f32 0.00390625, %v11419_v2 }
 0x3c3   : > { %v7158_v51 = vpop.eup %7157  ;;  %v4320_v43 = vmul.f32 %v7156_v52, %v11459_v5  ;;  %v5606_v5 = vsel %vm5034_vm5, %v5605_v44, %v5601_v27  ;;  %v4723_v31 = vmul.f32 0.00390625, %v11443_v20  ;;  %v11637_v28 = vsub.s32 %v5085_v49, %v13290_v60 }
 0x3c4   : > { %v4321_v42 = vmul.f32 %v7158_v51, %v11467_v23  ;;  %v11640_v23 = vsel %vm5041_vm6, %v5610_v56, %v5606_v5  ;;  %v4739_v38 = vmul.f32 0.00390625, %v11532_v26  ;;  %v5157_v39 = vsel %vm5069_vm10, %v5156_v61, %v5152_v41  ;;  %v4419_v26 = vpop.xlane.xlu0 %4418  ;;  %v4467_v45 = vpop.xlane.xlu1 %4466 }
 0x3c5   : > { %v5075_v12 = vrot.slane %v4721_v30, %v11607_v16  ;;  %v5161_v2 = vrot.slane %v4737_v35, %v11607_v16  ;;  %v5235_v20 = vrot.slane %v11610_v29, %v11569_v11  ;;  %v5082_v53 = vrot.slane %v4722_v62, %v11624_v3 }
 0x3c6   : > { %v4702_v7 = vadd.f32 %v4321_v42, %v4320_v43  ;;  %v4753_v17 = vmul.f32 0.00390625, %v11336_v14  ;;  %v5092_v44 = vadd.s32 4294967176, %v10588_v21  ;;  %v5166_v52 = vrot.slane %v4738_v36, %v11624_v3 }
 0x3c7   : > { %v4754_v41 = vmul.f32 0.00390625, %v11469_v33  ;;  %v4724_v61 = vmul.f32 0.00390625, %v11545_v50  ;;  %v5089_v30 = vrot.slane %v4723_v31, %v11637_v28  ;;  %v5171_v35 = vrot.slane %v4739_v38, %v11637_v28 }
 0x3c8   : > { %4703 = vadd.xlane.f32.xlu0 %v4702_v7  ;;  %v11659_v29 = vsub.s32 %v5092_v44, %v13290_v60  ;;  %v4755_v25 = vmul.f32 0.00390625, %v11573_v9  ;;  %v5077_v14 = vsel %vm5076_vm11, %v5075_v12, %v5070_v8  ;;  %v5162_v21 = vsel %vm5076_vm11, %v5161_v2, %v5157_v39  ;;  %v4851_v39 = vld [vmem:[%s11963_s3 + $0x70] sm:$0xff]  ;;  %v11692_v12 = vpop.xlane.xlu0 %4508  ;;  %v4848_v44 = vld [vmem:[%s11963_s3 + $0x58] sm:$0xff] }
 0x3c9   : > { %v4740_v55 = vmul.f32 0.00390625, %v4419_v26  ;;  %v5084_v49 = vsel %vm5083_vm12, %v5082_v53, %v5077_v14  ;;  %v5240_v33 = vrot.slane %v4753_v17, %v11607_v16  ;;  %v5167_v51 = vsel %vm5083_vm12, %v5166_v52, %v5162_v21  ;;  %v4850_v53 = vld [vmem:[%s11963_s3 + $0x68] sm:$0xff]  ;;  %v4849_v17 = vld [vmem:[%s11963_s3 + $0x60] sm:$0xff]  ;;  %v4847_v52 = vld [vmem:[%s11963_s3 + $0x50] sm:$0xff] }
 0x3ca   : > { %v5096_v50 = vrot.slane %v4724_v61, %v11659_v29  ;;  %v5245_v60 = vrot.slane %v4754_v41, %v11624_v3  ;;  %v5231_v43 = vsel %vm12444_vm9, %v5230_v1, %v11583_v32  ;;  %v5091_v27 = vsel %vm5090_vm13, %v5089_v30, %v5084_v49  ;;  %v13510_v41 = vld [vmem:[#allocation84_spill] sm:$0xff]  ;;  %v13512_v14 = vld [vmem:[#allocation87_spill] sm:$0xff] }
 0x3cb   : > { %v5176_v9 = vrot.slane %v4740_v55, %v11659_v29  ;;  %v5172_v19 = vsel %vm5090_vm13, %v5171_v35, %v5167_v51  ;;  %v5250_v42 = vrot.slane %v4755_v25, %v11637_v28  ;;  %v5236_v62 = vsel %vm5069_vm10, %v5235_v20, %v5231_v43  ;;  %v13511_v30 = vld [vmem:[#allocation56_spill] sm:$0xff]  ;;  %v4846_v25 = vld [vmem:[%s11963_s3 + $0x48] sm:$0xff]  ;;  %v13513_v55 = vld [vmem:[#allocation105_spill] sm:$0xff] }
 0x3cc   : > { %v5098_v56 = vsel %vm5097_vm14, %v5096_v50, %v5091_v27  ;;  %v4756_v5 = vmul.f32 0.00390625, %v4467_v45  ;;  %v5241_v36 = vsel %vm5076_vm11, %v5240_v33, %v5236_v62  ;;  %vm5654_vm9 = vcmask 1042434   ;;  %v11710_v26 = vpop.xlane.xlu0 %4598  ;;  %v13514_v33 = vld [vmem:[#allocation90_spill] sm:$0xff] }
 0x3cd   : > { %v5177_v8 = vsel %vm5097_vm14, %v5176_v9, %v5172_v19  ;;  %v5246_v32 = vsel %vm5083_vm12, %v5245_v60, %v5241_v36  ;;  %v7171_v38 = vmov 0.0   ;;  %v4758_v61 = vmul.f32 0.00390625, %v13510_v41  ;;  %v4845_v45 = vld [vmem:[%s11963_s3 + $0x40] sm:$0xff] }
 0x3ce   : > { %v5653_v31 = vsel %vm5652_vm15, %v5177_v8, %v5098_v56  ;;  %v5255_v1 = vrot.slane %v4756_v5, %v11659_v29  ;;  %v5251_v7 = vsel %vm5090_vm13, %v5250_v42, %v5246_v32  ;;  %6078 = vmatprep.subr.mxu0 %v7171_v38  ;;  %vm7172_vm15 = vmmov 0   ;;  %v13515_v60 = vld [vmem:[#allocation6_spill] sm:$0xff]  ;;  %v4844_v56 = vld [vmem:[%s11963_s3 + $0x38] sm:$0xff]  ;;  %v13518_v32 = vld [vmem:[#allocation124_spill] sm:$0xff] }
 0x3cf   : > { %6079 = vmatpush3.msra.mxu0 %v4852_v58  ;;  %6110 = vmatprep.mubr.msk.f32.mxu0 %vm7172_vm15, %v7171_v38  ;;  %v4759_v35 = vmul.f32 0.00390625, %v13511_v30  ;;  %v4757_v21 = vmul.f32 0.00390625, %v13512_v14  ;;  %v4760_v49 = vmul.f32 0.00390625, %v13513_v55  ;;  %v4761_v50 = vmul.f32 0.00390625, %v13514_v33  ;;  %v13516_v19 = vld [vmem:[#allocation34_spill] sm:$0xff] }
 0x3d0   : > { %v5256_v2 = vsel %vm5097_vm14, %v5255_v1, %v5251_v7  ;;  %6080 = vmatprep.subr.mxu0 %v7171_v38  ;;  %v5264_v51 = vrot.slane %v4758_v61, %v13472_v10  ;;  %v4762_v9 = vmul.f32 0.00390625, %v13515_v60  ;;  %v11731_v43 = vpop.xlane.xlu0 %4688  ;;  %v4763_v42 = vmul.f32 0.00390625, %v13516_v19  ;;  %v11735_v62 = vpop.xlane.xlu1 %4556  ;;  %v13517_v36 = vld [vmem:[#allocation74_spill] sm:$0xff]  ;;  %v4843_v7 = vld [vmem:[%s11963_s3 + $0x30] sm:$0xff]  ;;  %v4842_v61 = vld [vmem:[%s11963_s3 + $0x28] sm:$0xff] }
 0x3d1   : > { %v11695_v20 = vsel %vm5654_vm9, %v5256_v2, %v5653_v31  ;;  %6081 = vmatpush3.msra.mxu0 %v4851_v39  ;;  %v5269_v27 = vrot.slane %v4759_v35, %v13482_v54  ;;  %v5260_v8 = vrot.slane %v4757_v21, %v13463_v47  ;;  %v5274_v5 = vrot.slane %v4760_v49, %v13483_v15  ;;  %v4841_v33 = vld [vmem:[%s11963_s3 + $0x20] sm:$0xff] }
 0x3d2   : > { %6082 = vmatprep.subr.mxu0 %v7171_v38  ;;  %v4764_v31 = vmul.f32 0.00390625, %v13517_v36  ;;  %v5279_v58 = vrot.slane %v4761_v50, %v13499_v48  ;;  %v4765_v1 = vmul.f32 0.00390625, %v13518_v32  ;;  %v5284_v2 = vrot.slane %v4762_v9, %v11151_v4  ;;  %v4840_v9 = vld [vmem:[%s11963_s3 + $0x18] sm:$0xff]  ;;  %v4838_v32 = vld [vmem:[%s11963_s3 + $0x8] sm:$0xff] }
 0x3d3   : > { %6083 = vmatpush3.msra.mxu0 %v4850_v53  ;;  %v5265_v39 = vsel %vm4999_vm0, %v5264_v51, %v5260_v8  ;;  %v13519_v53 = vld [vmem:[#allocation72_spill] sm:$0xff]  ;;  %v4767_v41 = vmul.f32 0.00390625, %v11311_v46  ;;  %v4769_v46 = vmul.f32 0.00390625, %v11553_v59  ;;  %vm13520_vm9 = vcmask 720512  }
 0x3d4   : > { %6084 = vmatprep.subr.mxu0 %v7171_v38  ;;  %v5294_v35 = vrot.slane %v4764_v31, %v11446_v13  ;;  %v5299_v55 = vrot.slane %v4765_v1, %v11486_v6  ;;  %vm5656_vm15 = vcmask 1043459  }
 0x3d5   : > { %6085 = vmatpush3.msra.mxu0 %v4849_v17  ;;  %v4766_v17 = vmul.f32 0.00390625, %v13519_v53  ;;  %v5309_v60 = vrot.slane %v4767_v41, %v11529_v40 }
 0x3d6   : > { %6086 = vmatprep.subr.mxu0 %v7171_v38 }
 0x3d7   : > { %6087 = vmatpush3.msra.mxu0 %v4848_v44  ;;  %v5270_v44 = vsel %vm5006_vm1, %v5269_v27, %v5265_v39 }
 0x3d8   : > { %6088 = vmatprep.subr.mxu0 %v7171_v38  ;;  %v5275_v30 = vsel %vm5013_vm2, %v5274_v5, %v5270_v44 }
 0x3d9   : > { %6089 = vmatpush3.msra.mxu0 %v4847_v52  ;;  %v5289_v52 = vrot.slane %v4763_v42, %v11331_v0  ;;  %v4512_v14 = vpop.xlane.xlu0 %4511  ;;  %v5280_v21 = vsel %vm5020_vm3, %v5279_v58, %v5275_v30 }
 0x3da   : > { %6090 = vmatprep.subr.mxu0 %v7171_v38  ;;  %v5285_v50 = vsel %vm5027_vm4, %v5284_v2, %v5280_v21  ;;  %v4771_v59 = vmul.f32 0.00390625, %v4512_v14  ;;  %v4837_v2 = vld [vmem:[%s11963_s3] sm:$0xff] }
 0x3db   : > { %6091 = vmatpush3.msra.mxu0 %v4846_v25  ;;  %v4768_v25 = vmul.f32 0.00390625, %v11451_v37  ;;  %v5304_v37 = vrot.slane %v4766_v17, %v11515_v22  ;;  %v5290_v51 = vsel %vm5034_vm5, %v5289_v52, %v5285_v50  ;;  %v13522_v14 = vld [vmem:[#allocation110_spill] sm:$0xff] }
 0x3dc   : > { %6092 = vmatprep.subr.mxu0 %v7171_v38  ;;  %v5295_v27 = vsel %vm5041_vm6, %v5294_v35, %v5290_v51  ;;  %v5329_v31 = vrot.slane %v4771_v59, %v11637_v28  ;;  %v13521_v35 = vld [vmem:[#allocation55_spill] sm:$0xff]  ;;  %v4775_v21 = vmul.f32 0.00390625, %v13522_v14  ;;  %v13526_v51 = vld [vmem:[#allocation14_spill] sm:$0xff]  ;;  %v13527_v59 = vld [vmem:[#allocation13_spill] sm:$0xff] }
 0x3dd   : > { %6093 = vmatpush3.msra.mxu0 %v4845_v45  ;;  %v4770_v45 = vmul.f32 0.00390625, %v11692_v12  ;;  %v5314_v19 = vrot.slane %v4768_v25, %v11569_v11  ;;  %v5300_v42 = vsel %vm5048_vm7, %v5299_v55, %v5295_v27  ;;  %v5319_v12 = vrot.slane %v4769_v46, %v11607_v16  ;;  %v13523_v55 = vld [vmem:[#allocation103_spill] sm:$0xff] }
 0x3de   : > { %6094 = vmatprep.subr.mxu0 %v7171_v38  ;;  %v11766_v49 = vpop.xlane.xlu1 %4646  ;;  %v5305_v8 = vsel %vm5055_vm8, %v5304_v37, %v5300_v42  ;;  %v4774_v25 = vmul.f32 0.00390625, %v13521_v35  ;;  %v4773_v46 = vmul.f32 0.00390625, %v13523_v55  ;;  %v13525_v37 = vld [vmem:[#allocation31_spill] sm:$0xff] }
 0x3df   : > { %6095 = vmatpush3.msra.mxu0 %v4844_v56  ;;  %v4839_v56 = vld [vmem:[%s11963_s3 + $0x10] sm:$0xff]  ;;  %v5324_v5 = vrot.slane %v4770_v45, %v11624_v3  ;;  %v5310_v36 = vsel %vm13520_vm9, %v5309_v60, %v5305_v8  ;;  %v4777_v45 = vmul.f32 0.00390625, %v13525_v37  ;;  %v4778_v60 = vmul.f32 0.00390625, %v13526_v51 }
 0x3e0   : > { %6096 = vmatprep.subr.mxu0 %v7171_v38  ;;  %v5315_v1 = vsel %vm5069_vm10, %v5314_v19, %v5310_v36  ;;  %v5339_v19 = vrot.slane %v4773_v46, %v13463_v47 }
 0x3e1   : > { %6097 = vmatpush3.msra.mxu0 %v4843_v7  ;;  %v5320_v39 = vsel %vm5076_vm11, %v5319_v12, %v5315_v1  ;;  %v13528_v12 = vld [vmem:[#allocation117_spill] sm:$0xff]  ;;  %v5358_v8 = vrot.slane %v4777_v45, %v13499_v48 }
 0x3e2   : > { %6098 = vmatprep.subr.mxu0 %v7171_v38  ;;  %v5325_v53 = vsel %vm5083_vm12, %v5324_v5, %v5320_v39  ;;  %v13529_v5 = vld [vmem:[#allocation98_spill] sm:$0xff] }
 0x3e3   : > { %6099 = vmatpush3.msra.mxu0 %v4842_v61  ;;  %v5330_v44 = vsel %vm5090_vm13, %v5329_v31, %v5325_v53  ;;  %v4781_v36 = vmul.f32 0.00390625, %v13529_v5 }
 0x3e4   : > { %6100 = vmatprep.subr.mxu0 %v7171_v38 }
 0x3e5   : > { %6101 = vmatpush3.msra.mxu0 %v4841_v33  ;;  %v13524_v33 = vld [vmem:[#allocation3_spill] sm:$0xff]  ;;  %v5378_v14 = vrot.slane %v4781_v36, %v11486_v6 }
 0x3e6   : > { %6102 = vmatprep.subr.mxu0 %v7171_v38  ;;  %v4776_v50 = vmul.f32 0.00390625, %v13524_v33 }
 0x3e7   : > { %6103 = vmatpush3.msra.mxu0 %v4840_v9  ;;  %v11809_v61 = vpop.xlane.xlu0 %4601  ;;  %v4779_v9 = vmul.f32 0.00390625, %v13527_v59 }
 0x3e8   : > { %6104 = vmatprep.subr.mxu0 %v7171_v38  ;;  %v5353_v42 = vrot.slane %v4776_v50, %v13483_v15  ;;  %v4786_v50 = vmul.f32 0.00390625, %v11735_v62 }
 0x3e9   : > { %6105 = vmatpush3.msra.mxu0 %v4839_v56  ;;  %v4780_v56 = vmul.f32 0.00390625, %v13528_v12  ;;  %v5368_v39 = vrot.slane %v4779_v9, %v11331_v0 }
 0x3ea   : > { %6106 = vmatprep.subr.mxu0 %v7171_v38  ;;  %v5403_v9 = vrot.slane %v4786_v50, %v11624_v3  ;;  %v13538_v50 = vld [vmem:[#allocation122_spill] sm:$0xff] }
 0x3eb   : > { %v4515_v58 = vpop.xlane.xlu1 %4514  ;;  %6107 = vmatpush3.msra.mxu0 %v4838_v32  ;;  %v13530_v32 = vld [vmem:[#allocation21_spill] sm:$0xff] }
 0x3ec   : > { %v4772_v7 = vmul.f32 0.00390625, %v4515_v58  ;;  %6108 = vmatprep.subr.mxu0 %v7171_v38  ;;  %v5343_v38 = vrot.slane %v4774_v25, %v13472_v10  ;;  %v5363_v58 = vrot.slane %v4778_v60, %v11151_v4  ;;  %v4782_v1 = vmul.f32 0.00390625, %v13530_v32 }
 0x3ed   : > { %6109 = vmatpush3.msra.mxu0 %v4837_v2  ;;  %v13531_v2 = vld [vmem:[#allocation25_spill] sm:$0xff] }
 0x3ee   : > { %v5334_v17 = vrot.slane %v4772_v7, %v11659_v29  ;;  %v5344_v31 = vsel %vm4999_vm0, %v5343_v38, %v5339_v19  ;;  %v4783_v53 = vmul.f32 0.00390625, %v13531_v2  ;;  %v5383_v33 = vrot.slane %v4782_v1, %v11515_v22  ;;  %v13534_v2 = vld [vmem:[#allocation131_spill] sm:$0xff] }
 0x3f0   : > { %v5335_v52 = vsel %vm5097_vm14, %v5334_v17, %v5330_v44  ;;  %v5373_v44 = vrot.slane %v4780_v56, %v11446_v13  ;;  %v5388_v45 = vrot.slane %v4783_v53, %v11529_v40  ;;  %v4807_v53 = vmul.f32 0.00390625, %v13534_v2 }
 0x3f1   : > { %v5657_v41 = vsel %vm5656_vm15, %v5335_v52, %v11695_v20  ;;  %v5348_v20 = vrot.slane %v4775_v21, %v13482_v54  ;;  %v13532_v52 = vld [vmem:[#allocation39_spill] sm:$0xff]  ;;  %v4785_v21 = vmul.f32 0.00390625, %v11604_v18  ;;  %vm5658_vm15 = vcmask 1044484  }
 0x3f2   : > { %v4784_v35 = vmul.f32 0.00390625, %v13532_v52  ;;  %v13536_v52 = vld [vmem:[#allocation33_spill] sm:$0xff] }
 0x3f3   : > { %v5349_v7 = vsel %vm5006_vm1, %v5348_v20, %v5344_v31  ;;  %v5398_v18 = vrot.slane %v4785_v21, %v11607_v16 }
 0x3f4   : > { %v11811_v30 = vpop.xlane.xlu0 %4691  ;;  %v5354_v17 = vsel %vm5013_vm2, %v5353_v42, %v5349_v7  ;;  %v5393_v60 = vrot.slane %v4784_v35, %v11569_v11  ;;  %v13533_v7 = vld [vmem:[#allocation5_spill] sm:$0xff]  ;;  %v4808_v35 = vmul.f32 0.00390625, %v13536_v52 }
 0x3f5   : > { %v5359_v25 = vsel %vm5020_vm3, %v5358_v8, %v5354_v17  ;;  %v13535_v17 = vld [vmem:[#allocation143_spill] sm:$0xff] }
 0x3f6   : > { %v5364_v46 = vsel %vm5027_vm4, %v5363_v58, %v5359_v25 }
 0x3f7   : > { %v5369_v37 = vsel %vm5034_vm5, %v5368_v39, %v5364_v46  ;;  %v4805_v39 = vmul.f32 0.00390625, %v13533_v7  ;;  %v4816_v7 = vmul.f32 0.00390625, %v11766_v49 }
 0x3f8   : > { %v5374_v51 = vsel %vm5041_vm6, %v5373_v44, %v5369_v37  ;;  %v4806_v44 = vmul.f32 0.00390625, %v13535_v17 }
 0x3f9   : > { %v5379_v20 = vsel %vm5048_vm7, %v5378_v14, %v5374_v51  ;;  %v13537_v14 = vld [vmem:[#allocation114_spill] sm:$0xff]  ;;  %v5497_v46 = vrot.slane %v4805_v39, %v13463_v47  ;;  %v4799_v47 = vmul.f32 0.00390625, %v11587_v63 }
 0x3fa   : > { %v5384_v59 = vsel %vm5055_vm8, %v5383_v33, %v5379_v20  ;;  %v4809_v21 = vmul.f32 0.00390625, %v13537_v14  ;;  %v5506_v33 = vrot.slane %v4807_v53, %v13482_v54  ;;  %v5501_v37 = vrot.slane %v4806_v44, %v13472_v10  ;;  %v13540_v20 = vld [vmem:[#allocation22_spill] sm:$0xff] }
 0x3fb   : > { %v5389_v19 = vsel %vm13520_vm9, %v5388_v45, %v5384_v59  ;;  %v5511_v45 = vrot.slane %v4808_v35, %v13483_v15  ;;  %v4800_v15 = vmul.f32 0.00390625, %v11710_v26  ;;  %v5467_v26 = vrot.slane %v4799_v47, %v11529_v40 }
 0x3fc   : > { %v5394_v12 = vsel %vm5069_vm10, %v5393_v60, %v5389_v19  ;;  %v5516_v60 = vrot.slane %v4809_v21, %v13499_v48  ;;  %v5502_v59 = vsel %vm4999_vm0, %v5501_v37, %v5497_v46  ;;  %vm13543_vm0 = vmmov %vm13520_vm9 }
 0x3fd   : > { %v5399_v8 = vsel %vm5076_vm11, %v5398_v18, %v5394_v12  ;;  %v4812_v18 = vmul.f32 0.00390625, %v13540_v20  ;;  %v5507_v54 = vsel %vm5006_vm1, %v5506_v33, %v5502_v59  ;;  %v13542_v12 = vld [vmem:[#allocation40_spill] sm:$0xff]  ;;  %v5472_v2 = vrot.slane %v4800_v15, %v11569_v11  ;;  %vm13544_vm1 = vmmov %vm13543_vm0 }
 0x3fe   : > { %v5404_v5 = vsel %vm5083_vm12, %v5403_v9, %v5399_v8  ;;  %v13541_v9 = vld [vmem:[#allocation26_spill] sm:$0xff]  ;;  %v4801_v8 = vmul.f32 0.00390625, %v11809_v61 }
 0x3ff   : > { %v4813_v19 = vmul.f32 0.00390625, %v13541_v9  ;;  %v5531_v63 = vrot.slane %v4812_v18, %v11446_v13 }
 0x402   : > { %v4560_v27 = vpop.xlane.xlu0 %4559 }
 0x403   : > { %v4787_v38 = vmul.f32 0.00390625, %v4560_v27  ;;  %v4605_v27 = vpop.xlane.xlu1 %4604 }
 0x405   : > { %v5408_v62 = vrot.slane %v4787_v38, %v11637_v28  ;;  %v13539_v38 = vld [vmem:[#allocation29_spill] sm:$0xff] }
 0x406   : > { %v4811_v51 = vmul.f32 0.00390625, %v13539_v38 }
 0x407   : > { %v5409_v31 = vsel %vm5090_vm13, %v5408_v62, %v5404_v5  ;;  %v11862_v1 = vpop.xlane.xlu1 %4694 }
 0x408   : > { %v5526_v48 = vrot.slane %v4811_v51, %v11331_v0 }
 0x40e   : > { %v11839_v55 = vpop.xlane.xlu0 %4649 }
 0x40f   : > { %v4817_v61 = vmul.f32 0.00390625, %v11839_v55  ;;  %v5551_v55 = vrot.slane %v4816_v7, %v11569_v11 }
 0x411   : > { %v5556_v33 = vrot.slane %v4817_v61, %v11607_v16 }
 0x414   : > { %v4608_v25 = vpop.xlane.xlu1 %4607 }
 0x415   : > { %v4803_v39 = vmul.f32 0.00390625, %v4608_v25  ;;  %v5468_v25 = vsel %vm13543_vm0, %v5467_v26, %v11629_v24 }
 0x416   : > { %v5473_v46 = vsel %vm5069_vm10, %v5472_v2, %v5468_v25 }
 0x417   : > { %v5487_v14 = vrot.slane %v4803_v39, %v11637_v28 }
 0x41c   : > { %v4563_v42 = vpop.xlane.xlu0 %4562 }
 0x41d   : > { %v4788_v56 = vmul.f32 0.00390625, %v4563_v42  ;;  %v5512_v42 = vsel %vm5013_vm2, %v5511_v45, %v5507_v54  ;;  %vm5660_vm2 = vcmask 1045509  }
 0x41f   : > { %v5413_v36 = vrot.slane %v4788_v56, %v11659_v29  ;;  %v4814_v56 = vmul.f32 0.00390625, %v13542_v12 }
 0x421   : > { %v5414_v58 = vsel %vm5097_vm14, %v5413_v36, %v5409_v31  ;;  %v11880_v62 = vpop.xlane.xlu1 %4697  ;;  %v5517_v36 = vsel %vm5020_vm3, %v5516_v60, %v5512_v42  ;;  %v4815_v31 = vmul.f32 0.00390625, %v11643_v34  ;;  %v5541_v13 = vrot.slane %v4814_v56, %v11515_v22 }
 0x422   : > { %v11860_v32 = vsel %vm5658_vm15, %v5414_v58, %v5657_v41  ;;  %v4810_v41 = vmul.f32 0.00390625, %v13538_v50  ;;  %v4802_v58 = vmul.f32 0.00390625, %v4605_v27  ;;  %v5477_v34 = vrot.slane %v4801_v8, %v11607_v16 }
 0x423   : > { %v5546_v52 = vrot.slane %v4815_v31, %v11529_v40  ;;  %vm5662_vm3 = vcmask 1046534   ;;  %v4829_v8 = vmul.f32 0.00390625, %v11618_v57  ;;  %v4832_v31 = vmul.f32 0.00390625, %v11862_v1 }
 0x424   : > { %v5521_v10 = vrot.slane %v4810_v41, %v11151_v4  ;;  %v5536_v4 = vrot.slane %v4813_v19, %v11486_v6  ;;  %v5482_v49 = vrot.slane %v4802_v58, %v11624_v3  ;;  %v5478_v45 = vsel %vm5076_vm11, %v5477_v34, %v5473_v46  ;;  %v6057_v34 = vld [vmem:[%s11964_s4] ss:$0 sm:$0xff] }
 0x425   : > { %v5615_v58 = vrot.slane %v4829_v8, %v11486_v6 }
 0x426   : > { %v5522_v0 = vsel %vm5027_vm4, %v5521_v10, %v5517_v36  ;;  %v5483_v24 = vsel %vm5083_vm12, %v5482_v49, %v5478_v45  ;;  %v4831_v36 = vmul.f32 0.00390625, %v11811_v30  ;;  %vm13545_vm4 = vmmov %vm13543_vm0 }
 0x427   : > { %v5527_v53 = vsel %vm5034_vm5, %v5526_v48, %v5522_v0  ;;  %v5488_v18 = vsel %vm5090_vm13, %v5487_v14, %v5483_v24  ;;  %v5630_v0 = vrot.slane %v4832_v31, %v11569_v11  ;;  %v5616_v57 = vsel %vm5048_vm7, %v5615_v58, %v11640_v23 }
 0x428   : > { %v5532_v44 = vsel %vm5041_vm6, %v5531_v63, %v5527_v53  ;;  %v5625_v7 = vrot.slane %v4831_v36, %v11529_v40  ;;  %vm5664_vm5 = vcmask 1047559   ;;  %vm5737_vm6 = vcmask 785408  }
 0x429   : > { %v4653_v5 = vpop.xlane.xlu0 %4652  ;;  %v5537_v35 = vsel %vm5048_vm7, %v5536_v4, %v5532_v44 }
 0x42a   : > { %v4818_v27 = vmul.f32 0.00390625, %v4653_v5  ;;  %v5542_v37 = vsel %vm5055_vm8, %v5541_v13, %v5537_v35  ;;  %v4830_v5 = vmul.f32 0.00390625, %v11731_v43 }
 0x42b   : > { %v5547_v51 = vsel %vm13544_vm1, %v5546_v52, %v5542_v37 }
 0x42c   : > { %v5561_v38 = vrot.slane %v4818_v27, %v11624_v3  ;;  %v5552_v20 = vsel %vm5069_vm10, %v5551_v55, %v5547_v51  ;;  %v5620_v4 = vrot.slane %v4830_v5, %v11515_v22 }
 0x42d   : > { %v5557_v59 = vsel %vm5076_vm11, %v5556_v33, %v5552_v20 }
 0x42e   : > { %v4656_v17 = vpop.xlane.xlu1 %4655  ;;  %v5562_v54 = vsel %vm5083_vm12, %v5561_v38, %v5557_v59  ;;  %v5621_v30 = vsel %vm5055_vm8, %v5620_v4, %v5616_v57 }
 0x42f   : > { %v4819_v50 = vmul.f32 0.00390625, %v4656_v17  ;;  %v5626_v22 = vsel %vm13545_vm4, %v5625_v7, %v5621_v30 }
 0x430   : > { %v5631_v40 = vsel %vm5069_vm10, %v5630_v0, %v5626_v22 }
 0x431   : > { %v5566_v9 = vrot.slane %v4819_v50, %v11637_v28 }
 0x433   : > { %v5567_v48 = vsel %vm5090_vm13, %v5566_v9, %v5562_v54 }
 0x436   : > { %v4611_v21 = vpop.xlane.xlu0 %4610 }
 0x437   : > { %v4804_v41 = vmul.f32 0.00390625, %v4611_v21 }
 0x439   : > { %v5492_v60 = vrot.slane %v4804_v41, %v11659_v29 }
 0x43b   : > { %v5493_v19 = vsel %vm5097_vm14, %v5492_v60, %v5488_v18  ;;  %v4659_v47 = vpop.xlane.xlu1 %4658 }
 0x43c   : > { %v4820_v10 = vmul.f32 0.00390625, %v4659_v47  ;;  %v5661_v15 = vsel %vm5660_vm2, %v5493_v19, %v11860_v32  ;;  %v4833_v32 = vmul.f32 0.00390625, %v11880_v62 }
 0x43e   : > { %v5571_v42 = vrot.slane %v4820_v10, %v11659_v29  ;;  %v5635_v43 = vrot.slane %v4833_v32, %v11607_v16 }
 0x440   : > { %v5572_v12 = vsel %vm5097_vm14, %v5571_v42, %v5567_v48  ;;  %v5636_v11 = vsel %vm5076_vm11, %v5635_v43, %v5631_v40 }
 0x441   : > { %v5663_v56 = vsel %vm5662_vm3, %v5572_v12, %v5661_v15 }
 0x443   : > { %v4701_v63 = vpop.xlane.xlu0 %4700 }
 0x444   : > { %v4834_v26 = vmul.f32 0.00390625, %v4701_v63 }
 0x446   : > { %v5640_v6 = vrot.slane %v4834_v26, %v11624_v3 }
 0x448   : > { %v4707_v39 = vpop.xlane.xlu1 %4706  ;;  %v5641_v23 = vsel %vm5083_vm12, %v5640_v6, %v5636_v11 }
 0x449   : > { %v4836_v1 = vmul.f32 0.00390625, %v4707_v39 }
 0x44b   : > { %v5650_v16 = vrot.slane %v4836_v1, %v11659_v29 }
 0x451   : > { %v4704_v62 = vpop.xlane.xlu0 %4703 }
 0x452   : > { %v4835_v2 = vmul.f32 0.00390625, %v4704_v62 }
 0x454   : > { %v5645_v61 = vrot.slane %v4835_v2, %v11637_v28 }
 0x456   : > { %v5646_v53 = vsel %vm5090_vm13, %v5645_v61, %v5641_v23 }
 0x457   : > { %v5651_v3 = vsel %vm5097_vm14, %v5650_v16, %v5646_v53 }
 0x458   : > { %v5665_v13 = vsel %vm5664_vm5, %v5651_v3, %v5663_v56 }
 0x459   : > { %6111 = vmatmul.mubr.f32.vlgmr.msra.gmra.mxu0 %v5665_v13 }
 0x519   : > { %v5733_v28 = vpop.f32.mrf.mxu0 }
 0x51a   : > { %v5734_v29 = vadd.f32 %v6057_v34, %v5733_v28 }
 0x51b   : > { %v6112_v27 = vpop.f32.mrf.mxu0 }
 0x51c   : > { %5738 = vst.msk [vmem:[%s227_s9] sm:$0xff] %vm5737_vm6, %v5734_v29 }
 0x51d PF: > { %s15_s18 = sadd.s32 1, %s7166_s18  }
 0x51e   : > { %p12_p5 = scmp.ge.s32.totalorder %s15_s18, 4  }
 0x520   :  { %14 = sbr.rel (!%p12_p5) target bundleno = 1 (0x1), region = 70 }

</bundles_post_ra>
